<compile_context>
chip_gen: v5e
topology: v5e:2x2
jax: 0.10.0
libtpu: 0.0.40
codegen_flags: <defaults>
</compile_context>

<pallas_src>
import functools
import math

import jax
import jax.numpy as jnp
from jax import lax
from jax.experimental import pallas as pl
from jax.experimental.pallas import tpu as pltpu

# ----------------------------- model hyper-parameters (small) -----------------------------
D_MODEL = 32
N_HEAD = 4
HEAD_DIM = D_MODEL // N_HEAD
DIM_FF = 64
N_ENC = 2
N_DEC = 2
LN_EPS = 1e-5
NEG_INF = -1e9  # stand-in for -inf in the masked softmax (matches torch behaviour here)


# -------------------------------- fused whole-model kernel --------------------------------
def _transformer_kernel(
    # activations
    src_ref, tgt_ref,
    # encoder params (stacked over layers)
    e_wqkv, e_wo, e_w1, e_b1, e_w2, e_b2, e_ln_g, e_ln_b,
    # decoder params (stacked over layers)
    d_sa_wqkv, d_sa_wo, d_ca_wq, d_ca_wkv, d_ca_wo,
    d_w1, d_b1, d_w2, d_b2, d_ln_g, d_ln_b,
    # output
    o_ref,
    *, batch, s_src, s_tgt,
):
    # Causal additive bias (generate_square_subsequent_mask) built in-kernel — no HBM
    # input, no extra DMA / double buffer / BlockSpec.
    row = lax.broadcasted_iota(jnp.int32, (s_tgt, s_tgt), 0)
    col = lax.broadcasted_iota(jnp.int32, (s_tgt, s_tgt), 1)
    causal = jnp.where(col > row, NEG_INF, 0.0).astype(jnp.float32)

    def attend(q, k, v, wo, mask_bias):
        # Per-head logits / PV matmuls (tiny), then ONE full-width output projection.
        # The 1/sqrt(head_dim) scale is already folded into the Q weights.
        heads = []
        for h in range(N_HEAD):
            lo = h * HEAD_DIM
            hi = lo + HEAD_DIM
            # q @ k^T without an explicit transpose (contract last dims of both).
            logits = lax.dot_general(
                q[:, lo:hi], k[:, lo:hi], (((1,), (1,)), ((), ())),
                preferred_element_type=jnp.float32)
            if mask_bias is not None:
                logits = logits + mask_bias
            logits = logits - jnp.max(logits, axis=-1, keepdims=True)
            p = jnp.exp(logits)
            p = p * (1.0 / jnp.sum(p, axis=-1, keepdims=True))   # exact reciprocal
            heads.append(jnp.dot(p, v[:, lo:hi], preferred_element_type=jnp.float32))
        attn = jnp.concatenate(heads, axis=-1)                    # [Sq, D]
        return jnp.dot(attn, wo, preferred_element_type=jnp.float32)

    def self_mha(x, wqkv, wo, mask_bias):
        qkv = jnp.dot(x, wqkv, preferred_element_type=jnp.float32)   # fused QKV: [S, 3D]
        return attend(qkv[:, :D_MODEL], qkv[:, D_MODEL:2 * D_MODEL],
                      qkv[:, 2 * D_MODEL:], wo, mask_bias)

    def cross_mha(x, mem, wq, wkv, wo):
        q = jnp.dot(x, wq, preferred_element_type=jnp.float32)
        kv = jnp.dot(mem, wkv, preferred_element_type=jnp.float32)   # fused KV: [Sk, 2D]
        return attend(q, kv[:, :D_MODEL], kv[:, D_MODEL:], wo, None)

    def add_ln(x, y, g, b):
        z = x + y
        mu = jnp.mean(z, axis=-1, keepdims=True)
        c = z - mu
        var = jnp.mean(c * c, axis=-1, keepdims=True)
        return c * lax.rsqrt(var + LN_EPS) * g + b

    def ffn(x, w1, b1, w2, b2):
        h = jnp.maximum(jnp.dot(x, w1, preferred_element_type=jnp.float32) + b1, 0.0)
        return jnp.dot(h, w2, preferred_element_type=jnp.float32) + b2

    # Single kernel invocation handles all batch elements: `batch` is a small static
    # constant, so this loop is unrolled and the row slices (multiples of 8) are free.
    for b in range(batch):
        # ------------------ encoder stack (dropouts = identity in eval) ---------------
        x = src_ref[b * s_src:(b + 1) * s_src, :]                 # [Ss, D]
        for i in range(N_ENC):
            g = e_ln_g[i]                                         # [2, D]
            bb = e_ln_b[i]
            x = add_ln(x, self_mha(x, e_wqkv[i], e_wo[i], None), g[0:1], bb[0:1])
            x = add_ln(x, ffn(x, e_w1[i], e_b1[i], e_w2[i], e_b2[i]), g[1:2], bb[1:2])
        memory = x

        # ------------------------------- decoder stack --------------------------------
        y = tgt_ref[b * s_tgt:(b + 1) * s_tgt, :]                 # [St, D]
        for i in range(N_DEC):
            g = d_ln_g[i]                                         # [3, D]
            bb = d_ln_b[i]
            y = add_ln(y, self_mha(y, d_sa_wqkv[i], d_sa_wo[i], causal), g[0:1], bb[0:1])
            y = add_ln(y, cross_mha(y, memory, d_ca_wq[i], d_ca_wkv[i], d_ca_wo[i]),
                       g[1:2], bb[1:2])
            y = add_ln(y, ffn(y, d_w1[i], d_b1[i], d_w2[i], d_b2[i]), g[2:3], bb[2:3])

        o_ref[b * s_tgt:(b + 1) * s_tgt, :] = y


_WEIGHT_ORDER = (
    "enc_wqkv", "enc_wo", "enc_w1", "enc_b1", "enc_w2", "enc_b2", "enc_ln_g", "enc_ln_b",
    "dec_sa_wqkv", "dec_sa_wo", "dec_ca_wq", "dec_ca_wkv", "dec_ca_wo",
    "dec_w1", "dec_b1", "dec_w2", "dec_b2", "dec_ln_g", "dec_ln_b",
)


@jax.jit
def transformer_forward(src, tgt, params):
    B, Ss, D = src.shape
    St = tgt.shape[1]

    # Fold the softmax scale 1/sqrt(head_dim) into the Q projection weights (done once,
    # wrapper-side, on weights — not activations).
    scale = 1.0 / math.sqrt(HEAD_DIM)
    p = dict(params)
    p["enc_wqkv"] = p["enc_wqkv"].at[:, :, :D_MODEL].multiply(scale)
    p["dec_sa_wqkv"] = p["dec_sa_wqkv"].at[:, :, :D_MODEL].multiply(scale)
    p["dec_ca_wq"] = p["dec_ca_wq"] * scale
    weights = [p[n] for n in _WEIGHT_ORDER]

    vmem = pl.BlockSpec(memory_space=pltpu.MemorySpace.VMEM)   # whole array resident in VMEM

    out2d = pl.pallas_call(
        functools.partial(_transformer_kernel, batch=B, s_src=Ss, s_tgt=St),
        out_shape=jax.ShapeDtypeStruct((B * St, D), jnp.float32),
        in_specs=[vmem] * (2 + len(weights)),
        out_specs=vmem,
    )(src.reshape(B * Ss, D), tgt.reshape(B * St, D), *weights)
    return out2d.reshape(B, St, D)


# ------------------------------------ parameter init --------------------------------------
def init_params(key):
    ks = iter(jax.random.split(key, 24))
    s = 1.0 / math.sqrt(D_MODEL)

    def rnd(shape, scale):
        return jax.random.normal(next(ks), shape, jnp.float32) * scale

    return {
        # encoder (stacked over N_ENC layers)
        "enc_wqkv": rnd((N_ENC, D_MODEL, 3 * D_MODEL), s),        # wq|wk|wv fused
        "enc_wo":   rnd((N_ENC, D_MODEL, D_MODEL), s),
        "enc_w1":   rnd((N_ENC, D_MODEL, DIM_FF), s),
        "enc_b1":   rnd((N_ENC, 1, DIM_FF), 0.1),
        "enc_w2":   rnd((N_ENC, DIM_FF, D_MODEL), 1.0 / math.sqrt(DIM_FF)),
        "enc_b2":   rnd((N_ENC, 1, D_MODEL), 0.1),
        "enc_ln_g": 1.0 + rnd((N_ENC, 2, D_MODEL), 0.1),
        "enc_ln_b": rnd((N_ENC, 2, D_MODEL), 0.1),
        # decoder (stacked over N_DEC layers)
        "dec_sa_wqkv": rnd((N_DEC, D_MODEL, 3 * D_MODEL), s),
        "dec_sa_wo":   rnd((N_DEC, D_MODEL, D_MODEL), s),
        "dec_ca_wq":   rnd((N_DEC, D_MODEL, D_MODEL), s),
        "dec_ca_wkv":  rnd((N_DEC, D_MODEL, 2 * D_MODEL), s),     # wk|wv fused
        "dec_ca_wo":   rnd((N_DEC, D_MODEL, D_MODEL), s),
        "dec_w1":      rnd((N_DEC, D_MODEL, DIM_FF), s),
        "dec_b1":      rnd((N_DEC, 1, DIM_FF), 0.1),
        "dec_w2":      rnd((N_DEC, DIM_FF, D_MODEL), 1.0 / math.sqrt(DIM_FF)),
        "dec_b2":      rnd((N_DEC, 1, D_MODEL), 0.1),
        "dec_ln_g":    1.0 + rnd((N_DEC, 3, D_MODEL), 0.1),
        "dec_ln_b":    rnd((N_DEC, 3, D_MODEL), 0.1),
    }


# --------------------------------- pure-JAX reference -------------------------------------
# All matmuls use Precision.HIGHEST so the reference computes true f32 (the Pallas kernel
# computes real f32 via Mosaic) — default TPU matmul precision (bf16 passes) would not be
# a fair comparison and was the source of the previous mismatch.
_HI = lax.Precision.HIGHEST


def _ref_mha(xq, xkv, wq, wk, wv, wo, bias):
    B, Sq, D = xq.shape
    Sk = xkv.shape[1]
    q = jnp.matmul(xq, wq, precision=_HI).reshape(B, Sq, N_HEAD, HEAD_DIM)
    k = jnp.matmul(xkv, wk, precision=_HI).reshape(B, Sk, N_HEAD, HEAD_DIM)
    v = jnp.matmul(xkv, wv, precision=_HI).reshape(B, Sk, N_HEAD, HEAD_DIM)
    logits = jnp.einsum("bqhd,bkhd->bhqk", q, k, precision=_HI) / math.sqrt(HEAD_DIM)
    if bias is not None:
        logits = logits + bias
    a = jax.nn.softmax(logits, axis=-1)
    o = jnp.einsum("bhqk,bkhd->bqhd", a, v, precision=_HI).reshape(B, Sq, D)
    return jnp.matmul(o, wo, precision=_HI)


def _ref_ln(z, g, b):
    mu = jnp.mean(z, axis=-1, keepdims=True)
    var = jnp.mean((z - mu) ** 2, axis=-1, keepdims=True)
    return (z - mu) * lax.rsqrt(var + LN_EPS) * g + b


def _ref_ffn(x, w1, b1, w2, b2):
    h = jnp.maximum(jnp.matmul(x, w1, precision=_HI) + b1, 0.0)
    return jnp.matmul(h, w2, precision=_HI) + b2


def reference_forward(src, tgt, p):
    D = D_MODEL
    St = tgt.shape[1]
    causal = jnp.where(jnp.triu(jnp.ones((St, St), dtype=bool), k=1), NEG_INF, 0.0)

    x = src
    for i in range(N_ENC):
        w = p["enc_wqkv"][i]
        attn = _ref_mha(x, x, w[:, :D], w[:, D:2 * D], w[:, 2 * D:], p["enc_wo"][i], None)
        x = _ref_ln(x + attn, p["enc_ln_g"][i, 0], p["enc_ln_b"][i, 0])
        ff = _ref_ffn(x, p["enc_w1"][i], p["enc_b1"][i], p["enc_w2"][i], p["enc_b2"][i])
        x = _ref_ln(x + ff, p["enc_ln_g"][i, 1], p["enc_ln_b"][i, 1])
    mem = x

    y = tgt
    for i in range(N_DEC):
        w = p["dec_sa_wqkv"][i]
        sa = _ref_mha(y, y, w[:, :D], w[:, D:2 * D], w[:, 2 * D:], p["dec_sa_wo"][i], causal)
        y = _ref_ln(y + sa, p["dec_ln_g"][i, 0], p["dec_ln_b"][i, 0])
        wkv = p["dec_ca_wkv"][i]
        ca = _ref_mha(y, mem, p["dec_ca_wq"][i], wkv[:, :D], wkv[:, D:], p["dec_ca_wo"][i], None)
        y = _ref_ln(y + ca, p["dec_ln_g"][i, 1], p["dec_ln_b"][i, 1])
        ff = _ref_ffn(y, p["dec_w1"][i], p["dec_b1"][i], p["dec_w2"][i], p["dec_b2"][i])
        y = _ref_ln(y + ff, p["dec_ln_g"][i, 2], p["dec_ln_b"][i, 2])
    return y


# --------------------------------------- main ---------------------------------------------
if __name__ == "__main__":
    key = jax.random.PRNGKey(0)
    k_params, k_src, k_tgt = jax.random.split(key, 3)

    B, S_SRC, S_TGT = 2, 8, 8
    params = init_params(k_params)
    src = jax.random.normal(k_src, (B, S_SRC, D_MODEL), jnp.float32)
    tgt = jax.random.normal(k_tgt, (B, S_TGT, D_MODEL), jnp.float32)

    out = jax.block_until_ready(transformer_forward(src, tgt, params))
    ref = jax.block_until_ready(reference_forward(src, tgt, params))

    assert out.shape == (B, S_TGT, D_MODEL)
    assert bool(jnp.allclose(out, ref, atol=2e-3, rtol=2e-3)), \
        "Pallas output mismatch vs reference"

    print("KERNEL_OK")
</pallas_src>

<mosaic_0001>
module attributes {stable_mosaic.version = 11 : i64} {
  func.func @_transformer_kernel(%arg0: memref<16x32xf32, #tpu.memory_space<vmem>>, %arg1: memref<16x32xf32, #tpu.memory_space<vmem>>, %arg2: memref<2x32x96xf32, #tpu.memory_space<vmem>>, %arg3: memref<2x32x32xf32, #tpu.memory_space<vmem>>, %arg4: memref<2x32x64xf32, #tpu.memory_space<vmem>>, %arg5: memref<2x1x64xf32, #tpu.memory_space<vmem>>, %arg6: memref<2x64x32xf32, #tpu.memory_space<vmem>>, %arg7: memref<2x1x32xf32, #tpu.memory_space<vmem>>, %arg8: memref<2x2x32xf32, #tpu.memory_space<vmem>>, %arg9: memref<2x2x32xf32, #tpu.memory_space<vmem>>, %arg10: memref<2x32x96xf32, #tpu.memory_space<vmem>>, %arg11: memref<2x32x32xf32, #tpu.memory_space<vmem>>, %arg12: memref<2x32x32xf32, #tpu.memory_space<vmem>>, %arg13: memref<2x32x64xf32, #tpu.memory_space<vmem>>, %arg14: memref<2x32x32xf32, #tpu.memory_space<vmem>>, %arg15: memref<2x32x64xf32, #tpu.memory_space<vmem>>, %arg16: memref<2x1x64xf32, #tpu.memory_space<vmem>>, %arg17: memref<2x64x32xf32, #tpu.memory_space<vmem>>, %arg18: memref<2x1x32xf32, #tpu.memory_space<vmem>>, %arg19: memref<2x3x32xf32, #tpu.memory_space<vmem>>, %arg20: memref<2x3x32xf32, #tpu.memory_space<vmem>>, %arg21: memref<16x32xf32, #tpu.memory_space<vmem>>) attributes {dimension_semantics = [], scalar_prefetch = 0 : i64, scratch_operands = 0 : i64, tpu.core_type = #tpu.core_type<tc>} {
    %0 = tpu.iota {dimensions = array<i32: 0>} : vector<8x8xi32>
    %1 = tpu.iota {dimensions = array<i32: 1>} : vector<8x8xi32>
    %2 = arith.cmpi sgt, %1, %0 : vector<8x8xi32>
    %cst = arith.constant -1.000000e+09 : f32
    %cst_0 = arith.constant 0.000000e+00 : f32
    %3 = vector.broadcast %cst : f32 to vector<8x8xf32>
    %4 = vector.broadcast %cst_0 : f32 to vector<8x8xf32>
    %5 = arith.select %2, %3, %4 : vector<8x8xi1>, vector<8x8xf32>
    %c0 = arith.constant 0 : index
    %c0_1 = arith.constant 0 : index
    %6 = vector.load %arg0[%c0, %c0_1] : memref<16x32xf32, #tpu.memory_space<vmem>>, vector<8x32xf32>
    %c0_2 = arith.constant 0 : index
    %c0_3 = arith.constant 0 : index
    %c0_4 = arith.constant 0 : index
    %7 = vector.load %arg8[%c0_2, %c0_3, %c0_4] : memref<2x2x32xf32, #tpu.memory_space<vmem>>, vector<1x2x32xf32>
    %8 = vector.shape_cast %7 : vector<1x2x32xf32> to vector<2x32xf32>
    %c0_5 = arith.constant 0 : index
    %c0_6 = arith.constant 0 : index
    %c0_7 = arith.constant 0 : index
    %9 = vector.load %arg9[%c0_5, %c0_6, %c0_7] : memref<2x2x32xf32, #tpu.memory_space<vmem>>, vector<1x2x32xf32>
    %10 = vector.shape_cast %9 : vector<1x2x32xf32> to vector<2x32xf32>
    %c0_8 = arith.constant 0 : index
    %c0_9 = arith.constant 0 : index
    %c0_10 = arith.constant 0 : index
    %11 = vector.load %arg2[%c0_8, %c0_9, %c0_10] : memref<2x32x96xf32, #tpu.memory_space<vmem>>, vector<1x32x96xf32>
    %12 = vector.shape_cast %11 : vector<1x32x96xf32> to vector<32x96xf32>
    %c0_11 = arith.constant 0 : index
    %c0_12 = arith.constant 0 : index
    %c0_13 = arith.constant 0 : index
    %13 = vector.load %arg3[%c0_11, %c0_12, %c0_13] : memref<2x32x32xf32, #tpu.memory_space<vmem>>, vector<1x32x32xf32>
    %14 = vector.shape_cast %13 : vector<1x32x32xf32> to vector<32x32xf32>
    %cst_14 = arith.constant dense<0.000000e+00> : vector<8x96xf32>
    %15 = tpu.matmul %6, %12, %cst_14 {dimension_numbers = #tpu.dot_dimension_numbers<[1], [0], [0], [1], [0, 0, 1, 1], [], []>} : vector<8x32xf32>, vector<32x96xf32>, vector<8x96xf32> -> vector<8x96xf32>
    %16 = vector.extract_strided_slice %15 {offsets = [0, 0], sizes = [8, 32], strides = [1, 1]} : vector<8x96xf32> to vector<8x32xf32>
    %17 = vector.extract_strided_slice %15 {offsets = [0, 32], sizes = [8, 32], strides = [1, 1]} : vector<8x96xf32> to vector<8x32xf32>
    %18 = vector.extract_strided_slice %15 {offsets = [0, 64], sizes = [8, 32], strides = [1, 1]} : vector<8x96xf32> to vector<8x32xf32>
    %19 = vector.extract_strided_slice %16 {offsets = [0, 0], sizes = [8, 8], strides = [1, 1]} : vector<8x32xf32> to vector<8x8xf32>
    %20 = vector.extract_strided_slice %17 {offsets = [0, 0], sizes = [8, 8], strides = [1, 1]} : vector<8x32xf32> to vector<8x8xf32>
    %cst_15 = arith.constant dense<0.000000e+00> : vector<8x8xf32>
    %21 = tpu.matmul %19, %20, %cst_15 {dimension_numbers = #tpu.dot_dimension_numbers<[1], [1], [0], [0], [0, 0, 1, 0], [], []>} : vector<8x8xf32>, vector<8x8xf32>, vector<8x8xf32> -> vector<8x8xf32>
    %cst_16 = arith.constant dense<0xFF800000> : vector<8xf32>
    %22 = vector.multi_reduction <maximumf>, %21, %cst_16 [1] : vector<8x8xf32> to vector<8xf32>
    %23 = vector.shape_cast %22 : vector<8xf32> to vector<8x1xf32>
    %24 = vector.broadcast %23 : vector<8x1xf32> to vector<8x8xf32>
    %25 = arith.subf %21, %24 : vector<8x8xf32>
    %26 = math.exp %25 : vector<8x8xf32>
    %cst_17 = arith.constant dense<0.000000e+00> : vector<8xf32>
    %27 = vector.multi_reduction <add>, %26, %cst_17 [1] : vector<8x8xf32> to vector<8xf32>
    %28 = vector.shape_cast %27 : vector<8xf32> to vector<8x1xf32>
    %cst_18 = arith.constant 1.000000e+00 : f32
    %29 = vector.broadcast %cst_18 : f32 to vector<8x1xf32>
    %30 = arith.divf %29, %28 : vector<8x1xf32>
    %31 = vector.broadcast %30 : vector<8x1xf32> to vector<8x8xf32>
    %32 = arith.mulf %26, %31 : vector<8x8xf32>
    %33 = vector.extract_strided_slice %18 {offsets = [0, 0], sizes = [8, 8], strides = [1, 1]} : vector<8x32xf32> to vector<8x8xf32>
    %cst_19 = arith.constant dense<0.000000e+00> : vector<8x8xf32>
    %34 = tpu.matmul %32, %33, %cst_19 {dimension_numbers = #tpu.dot_dimension_numbers<[1], [0], [0], [1], [0, 0, 1, 1], [], []>} : vector<8x8xf32>, vector<8x8xf32>, vector<8x8xf32> -> vector<8x8xf32>
    %35 = vector.extract_strided_slice %16 {offsets = [0, 8], sizes = [8, 8], strides = [1, 1]} : vector<8x32xf32> to vector<8x8xf32>
    %36 = vector.extract_strided_slice %17 {offsets = [0, 8], sizes = [8, 8], strides = [1, 1]} : vector<8x32xf32> to vector<8x8xf32>
    %cst_20 = arith.constant dense<0.000000e+00> : vector<8x8xf32>
    %37 = tpu.matmul %35, %36, %cst_20 {dimension_numbers = #tpu.dot_dimension_numbers<[1], [1], [0], [0], [0, 0, 1, 0], [], []>} : vector<8x8xf32>, vector<8x8xf32>, vector<8x8xf32> -> vector<8x8xf32>
    %cst_21 = arith.constant dense<0xFF800000> : vector<8xf32>
    %38 = vector.multi_reduction <maximumf>, %37, %cst_21 [1] : vector<8x8xf32> to vector<8xf32>
    %39 = vector.shape_cast %38 : vector<8xf32> to vector<8x1xf32>
    %40 = vector.broadcast %39 : vector<8x1xf32> to vector<8x8xf32>
    %41 = arith.subf %37, %40 : vector<8x8xf32>
    %42 = math.exp %41 : vector<8x8xf32>
    %cst_22 = arith.constant dense<0.000000e+00> : vector<8xf32>
    %43 = vector.multi_reduction <add>, %42, %cst_22 [1] : vector<8x8xf32> to vector<8xf32>
    %44 = vector.shape_cast %43 : vector<8xf32> to vector<8x1xf32>
    %cst_23 = arith.constant 1.000000e+00 : f32
    %45 = vector.broadcast %cst_23 : f32 to vector<8x1xf32>
    %46 = arith.divf %45, %44 : vector<8x1xf32>
    %47 = vector.broadcast %46 : vector<8x1xf32> to vector<8x8xf32>
    %48 = arith.mulf %42, %47 : vector<8x8xf32>
    %49 = vector.extract_strided_slice %18 {offsets = [0, 8], sizes = [8, 8], strides = [1, 1]} : vector<8x32xf32> to vector<8x8xf32>
    %cst_24 = arith.constant dense<0.000000e+00> : vector<8x8xf32>
    %50 = tpu.matmul %48, %49, %cst_24 {dimension_numbers = #tpu.dot_dimension_numbers<[1], [0], [0], [1], [0, 0, 1, 1], [], []>} : vector<8x8xf32>, vector<8x8xf32>, vector<8x8xf32> -> vector<8x8xf32>
    %51 = vector.extract_strided_slice %16 {offsets = [0, 16], sizes = [8, 8], strides = [1, 1]} : vector<8x32xf32> to vector<8x8xf32>
    %52 = vector.extract_strided_slice %17 {offsets = [0, 16], sizes = [8, 8], strides = [1, 1]} : vector<8x32xf32> to vector<8x8xf32>
    %cst_25 = arith.constant dense<0.000000e+00> : vector<8x8xf32>
    %53 = tpu.matmul %51, %52, %cst_25 {dimension_numbers = #tpu.dot_dimension_numbers<[1], [1], [0], [0], [0, 0, 1, 0], [], []>} : vector<8x8xf32>, vector<8x8xf32>, vector<8x8xf32> -> vector<8x8xf32>
    %cst_26 = arith.constant dense<0xFF800000> : vector<8xf32>
    %54 = vector.multi_reduction <maximumf>, %53, %cst_26 [1] : vector<8x8xf32> to vector<8xf32>
    %55 = vector.shape_cast %54 : vector<8xf32> to vector<8x1xf32>
    %56 = vector.broadcast %55 : vector<8x1xf32> to vector<8x8xf32>
    %57 = arith.subf %53, %56 : vector<8x8xf32>
    %58 = math.exp %57 : vector<8x8xf32>
    %cst_27 = arith.constant dense<0.000000e+00> : vector<8xf32>
    %59 = vector.multi_reduction <add>, %58, %cst_27 [1] : vector<8x8xf32> to vector<8xf32>
    %60 = vector.shape_cast %59 : vector<8xf32> to vector<8x1xf32>
    %cst_28 = arith.constant 1.000000e+00 : f32
    %61 = vector.broadcast %cst_28 : f32 to vector<8x1xf32>
    %62 = arith.divf %61, %60 : vector<8x1xf32>
    %63 = vector.broadcast %62 : vector<8x1xf32> to vector<8x8xf32>
    %64 = arith.mulf %58, %63 : vector<8x8xf32>
    %65 = vector.extract_strided_slice %18 {offsets = [0, 16], sizes = [8, 8], strides = [1, 1]} : vector<8x32xf32> to vector<8x8xf32>
    %cst_29 = arith.constant dense<0.000000e+00> : vector<8x8xf32>
    %66 = tpu.matmul %64, %65, %cst_29 {dimension_numbers = #tpu.dot_dimension_numbers<[1], [0], [0], [1], [0, 0, 1, 1], [], []>} : vector<8x8xf32>, vector<8x8xf32>, vector<8x8xf32> -> vector<8x8xf32>
    %67 = vector.extract_strided_slice %16 {offsets = [0, 24], sizes = [8, 8], strides = [1, 1]} : vector<8x32xf32> to vector<8x8xf32>
    %68 = vector.extract_strided_slice %17 {offsets = [0, 24], sizes = [8, 8], strides = [1, 1]} : vector<8x32xf32> to vector<8x8xf32>
    %cst_30 = arith.constant dense<0.000000e+00> : vector<8x8xf32>
    %69 = tpu.matmul %67, %68, %cst_30 {dimension_numbers = #tpu.dot_dimension_numbers<[1], [1], [0], [0], [0, 0, 1, 0], [], []>} : vector<8x8xf32>, vector<8x8xf32>, vector<8x8xf32> -> vector<8x8xf32>
    %cst_31 = arith.constant dense<0xFF800000> : vector<8xf32>
    %70 = vector.multi_reduction <maximumf>, %69, %cst_31 [1] : vector<8x8xf32> to vector<8xf32>
    %71 = vector.shape_cast %70 : vector<8xf32> to vector<8x1xf32>
    %72 = vector.broadcast %71 : vector<8x1xf32> to vector<8x8xf32>
    %73 = arith.subf %69, %72 : vector<8x8xf32>
    %74 = math.exp %73 : vector<8x8xf32>
    %cst_32 = arith.constant dense<0.000000e+00> : vector<8xf32>
    %75 = vector.multi_reduction <add>, %74, %cst_32 [1] : vector<8x8xf32> to vector<8xf32>
    %76 = vector.shape_cast %75 : vector<8xf32> to vector<8x1xf32>
    %cst_33 = arith.constant 1.000000e+00 : f32
    %77 = vector.broadcast %cst_33 : f32 to vector<8x1xf32>
    %78 = arith.divf %77, %76 : vector<8x1xf32>
    %79 = vector.broadcast %78 : vector<8x1xf32> to vector<8x8xf32>
    %80 = arith.mulf %74, %79 : vector<8x8xf32>
    %81 = vector.extract_strided_slice %18 {offsets = [0, 24], sizes = [8, 8], strides = [1, 1]} : vector<8x32xf32> to vector<8x8xf32>
    %cst_34 = arith.constant dense<0.000000e+00> : vector<8x8xf32>
    %82 = tpu.matmul %80, %81, %cst_34 {dimension_numbers = #tpu.dot_dimension_numbers<[1], [0], [0], [1], [0, 0, 1, 1], [], []>} : vector<8x8xf32>, vector<8x8xf32>, vector<8x8xf32> -> vector<8x8xf32>
    %83 = tpu.concatenate %34, %50, %66, %82 in 1 : vector<8x8xf32>, vector<8x8xf32>, vector<8x8xf32>, vector<8x8xf32> -> vector<8x32xf32>
    %cst_35 = arith.constant dense<0.000000e+00> : vector<8x32xf32>
    %84 = tpu.matmul %83, %14, %cst_35 {dimension_numbers = #tpu.dot_dimension_numbers<[1], [0], [0], [1], [0, 0, 1, 1], [], []>} : vector<8x32xf32>, vector<32x32xf32>, vector<8x32xf32> -> vector<8x32xf32>
    %85 = vector.extract_strided_slice %8 {offsets = [0, 0], sizes = [1, 32], strides = [1, 1]} : vector<2x32xf32> to vector<1x32xf32>
    %86 = vector.extract_strided_slice %10 {offsets = [0, 0], sizes = [1, 32], strides = [1, 1]} : vector<2x32xf32> to vector<1x32xf32>
    %87 = arith.addf %6, %84 : vector<8x32xf32>
    %cst_36 = arith.constant dense<0.000000e+00> : vector<8xf32>
    %88 = vector.multi_reduction <add>, %87, %cst_36 [1] : vector<8x32xf32> to vector<8xf32>
    %89 = vector.shape_cast %88 : vector<8xf32> to vector<8x1xf32>
    %cst_37 = arith.constant 3.200000e+01 : f32
    %90 = vector.broadcast %cst_37 : f32 to vector<8x1xf32>
    %91 = arith.divf %89, %90 : vector<8x1xf32>
    %92 = vector.broadcast %91 : vector<8x1xf32> to vector<8x32xf32>
    %93 = arith.subf %87, %92 : vector<8x32xf32>
    %94 = arith.mulf %93, %93 : vector<8x32xf32>
    %cst_38 = arith.constant dense<0.000000e+00> : vector<8xf32>
    %95 = vector.multi_reduction <add>, %94, %cst_38 [1] : vector<8x32xf32> to vector<8xf32>
    %96 = vector.shape_cast %95 : vector<8xf32> to vector<8x1xf32>
    %cst_39 = arith.constant 3.200000e+01 : f32
    %97 = vector.broadcast %cst_39 : f32 to vector<8x1xf32>
    %98 = arith.divf %96, %97 : vector<8x1xf32>
    %cst_40 = arith.constant 9.99999974E-6 : f32
    %99 = vector.broadcast %cst_40 : f32 to vector<8x1xf32>
    %100 = arith.addf %98, %99 : vector<8x1xf32>
    %101 = math.rsqrt %100 : vector<8x1xf32>
    %102 = vector.broadcast %101 : vector<8x1xf32> to vector<8x32xf32>
    %103 = arith.mulf %93, %102 : vector<8x32xf32>
    %104 = vector.broadcast %85 : vector<1x32xf32> to vector<8x32xf32>
    %105 = arith.mulf %103, %104 : vector<8x32xf32>
    %106 = vector.broadcast %86 : vector<1x32xf32> to vector<8x32xf32>
    %107 = arith.addf %105, %106 : vector<8x32xf32>
    %c0_41 = arith.constant 0 : index
    %c0_42 = arith.constant 0 : index
    %c0_43 = arith.constant 0 : index
    %108 = vector.load %arg4[%c0_41, %c0_42, %c0_43] : memref<2x32x64xf32, #tpu.memory_space<vmem>>, vector<1x32x64xf32>
    %109 = vector.shape_cast %108 : vector<1x32x64xf32> to vector<32x64xf32>
    %c0_44 = arith.constant 0 : index
    %c0_45 = arith.constant 0 : index
    %c0_46 = arith.constant 0 : index
    %110 = vector.load %arg5[%c0_44, %c0_45, %c0_46] : memref<2x1x64xf32, #tpu.memory_space<vmem>>, vector<1x1x64xf32>
    %111 = vector.shape_cast %110 : vector<1x1x64xf32> to vector<1x64xf32>
    %c0_47 = arith.constant 0 : index
    %c0_48 = arith.constant 0 : index
    %c0_49 = arith.constant 0 : index
    %112 = vector.load %arg6[%c0_47, %c0_48, %c0_49] : memref<2x64x32xf32, #tpu.memory_space<vmem>>, vector<1x64x32xf32>
    %113 = vector.shape_cast %112 : vector<1x64x32xf32> to vector<64x32xf32>
    %c0_50 = arith.constant 0 : index
    %c0_51 = arith.constant 0 : index
    %c0_52 = arith.constant 0 : index
    %114 = vector.load %arg7[%c0_50, %c0_51, %c0_52] : memref<2x1x32xf32, #tpu.memory_space<vmem>>, vector<1x1x32xf32>
    %115 = vector.shape_cast %114 : vector<1x1x32xf32> to vector<1x32xf32>
    %cst_53 = arith.constant dense<0.000000e+00> : vector<8x64xf32>
    %116 = tpu.matmul %107, %109, %cst_53 {dimension_numbers = #tpu.dot_dimension_numbers<[1], [0], [0], [1], [0, 0, 1, 1], [], []>} : vector<8x32xf32>, vector<32x64xf32>, vector<8x64xf32> -> vector<8x64xf32>
    %117 = vector.broadcast %111 : vector<1x64xf32> to vector<8x64xf32>
    %118 = arith.addf %116, %117 : vector<8x64xf32>
    %cst_54 = arith.constant 0.000000e+00 : f32
    %119 = vector.broadcast %cst_54 : f32 to vector<8x64xf32>
    %120 = arith.maximumf %118, %119 : vector<8x64xf32>
    %cst_55 = arith.constant dense<0.000000e+00> : vector<8x32xf32>
    %121 = tpu.matmul %120, %113, %cst_55 {dimension_numbers = #tpu.dot_dimension_numbers<[1], [0], [0], [1], [0, 0, 1, 1], [], []>} : vector<8x64xf32>, vector<64x32xf32>, vector<8x32xf32> -> vector<8x32xf32>
    %122 = vector.broadcast %115 : vector<1x32xf32> to vector<8x32xf32>
    %123 = arith.addf %121, %122 : vector<8x32xf32>
    %124 = vector.extract_strided_slice %8 {offsets = [1, 0], sizes = [1, 32], strides = [1, 1]} : vector<2x32xf32> to vector<1x32xf32>
    %125 = vector.extract_strided_slice %10 {offsets = [1, 0], sizes = [1, 32], strides = [1, 1]} : vector<2x32xf32> to vector<1x32xf32>
    %126 = arith.addf %107, %123 : vector<8x32xf32>
    %cst_56 = arith.constant dense<0.000000e+00> : vector<8xf32>
    %127 = vector.multi_reduction <add>, %126, %cst_56 [1] : vector<8x32xf32> to vector<8xf32>
    %128 = vector.shape_cast %127 : vector<8xf32> to vector<8x1xf32>
    %cst_57 = arith.constant 3.200000e+01 : f32
    %129 = vector.broadcast %cst_57 : f32 to vector<8x1xf32>
    %130 = arith.divf %128, %129 : vector<8x1xf32>
    %131 = vector.broadcast %130 : vector<8x1xf32> to vector<8x32xf32>
    %132 = arith.subf %126, %131 : vector<8x32xf32>
    %133 = arith.mulf %132, %132 : vector<8x32xf32>
    %cst_58 = arith.constant dense<0.000000e+00> : vector<8xf32>
    %134 = vector.multi_reduction <add>, %133, %cst_58 [1] : vector<8x32xf32> to vector<8xf32>
    %135 = vector.shape_cast %134 : vector<8xf32> to vector<8x1xf32>
    %cst_59 = arith.constant 3.200000e+01 : f32
    %136 = vector.broadcast %cst_59 : f32 to vector<8x1xf32>
    %137 = arith.divf %135, %136 : vector<8x1xf32>
    %cst_60 = arith.constant 9.99999974E-6 : f32
    %138 = vector.broadcast %cst_60 : f32 to vector<8x1xf32>
    %139 = arith.addf %137, %138 : vector<8x1xf32>
    %140 = math.rsqrt %139 : vector<8x1xf32>
    %141 = vector.broadcast %140 : vector<8x1xf32> to vector<8x32xf32>
    %142 = arith.mulf %132, %141 : vector<8x32xf32>
    %143 = vector.broadcast %124 : vector<1x32xf32> to vector<8x32xf32>
    %144 = arith.mulf %142, %143 : vector<8x32xf32>
    %145 = vector.broadcast %125 : vector<1x32xf32> to vector<8x32xf32>
    %146 = arith.addf %144, %145 : vector<8x32xf32>
    %c1 = arith.constant 1 : index
    %c0_61 = arith.constant 0 : index
    %c0_62 = arith.constant 0 : index
    %147 = vector.load %arg8[%c1, %c0_61, %c0_62] : memref<2x2x32xf32, #tpu.memory_space<vmem>>, vector<1x2x32xf32>
    %148 = vector.shape_cast %147 : vector<1x2x32xf32> to vector<2x32xf32>
    %c1_63 = arith.constant 1 : index
    %c0_64 = arith.constant 0 : index
    %c0_65 = arith.constant 0 : index
    %149 = vector.load %arg9[%c1_63, %c0_64, %c0_65] : memref<2x2x32xf32, #tpu.memory_space<vmem>>, vector<1x2x32xf32>
    %150 = vector.shape_cast %149 : vector<1x2x32xf32> to vector<2x32xf32>
    %c1_66 = arith.constant 1 : index
    %c0_67 = arith.constant 0 : index
    %c0_68 = arith.constant 0 : index
    %151 = vector.load %arg2[%c1_66, %c0_67, %c0_68] : memref<2x32x96xf32, #tpu.memory_space<vmem>>, vector<1x32x96xf32>
    %152 = vector.shape_cast %151 : vector<1x32x96xf32> to vector<32x96xf32>
    %c1_69 = arith.constant 1 : index
    %c0_70 = arith.constant 0 : index
    %c0_71 = arith.constant 0 : index
    %153 = vector.load %arg3[%c1_69, %c0_70, %c0_71] : memref<2x32x32xf32, #tpu.memory_space<vmem>>, vector<1x32x32xf32>
    %154 = vector.shape_cast %153 : vector<1x32x32xf32> to vector<32x32xf32>
    %cst_72 = arith.constant dense<0.000000e+00> : vector<8x96xf32>
    %155 = tpu.matmul %146, %152, %cst_72 {dimension_numbers = #tpu.dot_dimension_numbers<[1], [0], [0], [1], [0, 0, 1, 1], [], []>} : vector<8x32xf32>, vector<32x96xf32>, vector<8x96xf32> -> vector<8x96xf32>
    %156 = vector.extract_strided_slice %155 {offsets = [0, 0], sizes = [8, 32], strides = [1, 1]} : vector<8x96xf32> to vector<8x32xf32>
    %157 = vector.extract_strided_slice %155 {offsets = [0, 32], sizes = [8, 32], strides = [1, 1]} : vector<8x96xf32> to vector<8x32xf32>
    %158 = vector.extract_strided_slice %155 {offsets = [0, 64], sizes = [8, 32], strides = [1, 1]} : vector<8x96xf32> to vector<8x32xf32>
    %159 = vector.extract_strided_slice %156 {offsets = [0, 0], sizes = [8, 8], strides = [1, 1]} : vector<8x32xf32> to vector<8x8xf32>
    %160 = vector.extract_strided_slice %157 {offsets = [0, 0], sizes = [8, 8], strides = [1, 1]} : vector<8x32xf32> to vector<8x8xf32>
    %cst_73 = arith.constant dense<0.000000e+00> : vector<8x8xf32>
    %161 = tpu.matmul %159, %160, %cst_73 {dimension_numbers = #tpu.dot_dimension_numbers<[1], [1], [0], [0], [0, 0, 1, 0], [], []>} : vector<8x8xf32>, vector<8x8xf32>, vector<8x8xf32> -> vector<8x8xf32>
    %cst_74 = arith.constant dense<0xFF800000> : vector<8xf32>
    %162 = vector.multi_reduction <maximumf>, %161, %cst_74 [1] : vector<8x8xf32> to vector<8xf32>
    %163 = vector.shape_cast %162 : vector<8xf32> to vector<8x1xf32>
    %164 = vector.broadcast %163 : vector<8x1xf32> to vector<8x8xf32>
    %165 = arith.subf %161, %164 : vector<8x8xf32>
    %166 = math.exp %165 : vector<8x8xf32>
    %cst_75 = arith.constant dense<0.000000e+00> : vector<8xf32>
    %167 = vector.multi_reduction <add>, %166, %cst_75 [1] : vector<8x8xf32> to vector<8xf32>
    %168 = vector.shape_cast %167 : vector<8xf32> to vector<8x1xf32>
    %cst_76 = arith.constant 1.000000e+00 : f32
    %169 = vector.broadcast %cst_76 : f32 to vector<8x1xf32>
    %170 = arith.divf %169, %168 : vector<8x1xf32>
    %171 = vector.broadcast %170 : vector<8x1xf32> to vector<8x8xf32>
    %172 = arith.mulf %166, %171 : vector<8x8xf32>
    %173 = vector.extract_strided_slice %158 {offsets = [0, 0], sizes = [8, 8], strides = [1, 1]} : vector<8x32xf32> to vector<8x8xf32>
    %cst_77 = arith.constant dense<0.000000e+00> : vector<8x8xf32>
    %174 = tpu.matmul %172, %173, %cst_77 {dimension_numbers = #tpu.dot_dimension_numbers<[1], [0], [0], [1], [0, 0, 1, 1], [], []>} : vector<8x8xf32>, vector<8x8xf32>, vector<8x8xf32> -> vector<8x8xf32>
    %175 = vector.extract_strided_slice %156 {offsets = [0, 8], sizes = [8, 8], strides = [1, 1]} : vector<8x32xf32> to vector<8x8xf32>
    %176 = vector.extract_strided_slice %157 {offsets = [0, 8], sizes = [8, 8], strides = [1, 1]} : vector<8x32xf32> to vector<8x8xf32>
    %cst_78 = arith.constant dense<0.000000e+00> : vector<8x8xf32>
    %177 = tpu.matmul %175, %176, %cst_78 {dimension_numbers = #tpu.dot_dimension_numbers<[1], [1], [0], [0], [0, 0, 1, 0], [], []>} : vector<8x8xf32>, vector<8x8xf32>, vector<8x8xf32> -> vector<8x8xf32>
    %cst_79 = arith.constant dense<0xFF800000> : vector<8xf32>
    %178 = vector.multi_reduction <maximumf>, %177, %cst_79 [1] : vector<8x8xf32> to vector<8xf32>
    %179 = vector.shape_cast %178 : vector<8xf32> to vector<8x1xf32>
    %180 = vector.broadcast %179 : vector<8x1xf32> to vector<8x8xf32>
    %181 = arith.subf %177, %180 : vector<8x8xf32>
    %182 = math.exp %181 : vector<8x8xf32>
    %cst_80 = arith.constant dense<0.000000e+00> : vector<8xf32>
    %183 = vector.multi_reduction <add>, %182, %cst_80 [1] : vector<8x8xf32> to vector<8xf32>
    %184 = vector.shape_cast %183 : vector<8xf32> to vector<8x1xf32>
    %cst_81 = arith.constant 1.000000e+00 : f32
    %185 = vector.broadcast %cst_81 : f32 to vector<8x1xf32>
    %186 = arith.divf %185, %184 : vector<8x1xf32>
    %187 = vector.broadcast %186 : vector<8x1xf32> to vector<8x8xf32>
    %188 = arith.mulf %182, %187 : vector<8x8xf32>
    %189 = vector.extract_strided_slice %158 {offsets = [0, 8], sizes = [8, 8], strides = [1, 1]} : vector<8x32xf32> to vector<8x8xf32>
    %cst_82 = arith.constant dense<0.000000e+00> : vector<8x8xf32>
    %190 = tpu.matmul %188, %189, %cst_82 {dimension_numbers = #tpu.dot_dimension_numbers<[1], [0], [0], [1], [0, 0, 1, 1], [], []>} : vector<8x8xf32>, vector<8x8xf32>, vector<8x8xf32> -> vector<8x8xf32>
    %191 = vector.extract_strided_slice %156 {offsets = [0, 16], sizes = [8, 8], strides = [1, 1]} : vector<8x32xf32> to vector<8x8xf32>
    %192 = vector.extract_strided_slice %157 {offsets = [0, 16], sizes = [8, 8], strides = [1, 1]} : vector<8x32xf32> to vector<8x8xf32>
    %cst_83 = arith.constant dense<0.000000e+00> : vector<8x8xf32>
    %193 = tpu.matmul %191, %192, %cst_83 {dimension_numbers = #tpu.dot_dimension_numbers<[1], [1], [0], [0], [0, 0, 1, 0], [], []>} : vector<8x8xf32>, vector<8x8xf32>, vector<8x8xf32> -> vector<8x8xf32>
    %cst_84 = arith.constant dense<0xFF800000> : vector<8xf32>
    %194 = vector.multi_reduction <maximumf>, %193, %cst_84 [1] : vector<8x8xf32> to vector<8xf32>
    %195 = vector.shape_cast %194 : vector<8xf32> to vector<8x1xf32>
    %196 = vector.broadcast %195 : vector<8x1xf32> to vector<8x8xf32>
    %197 = arith.subf %193, %196 : vector<8x8xf32>
    %198 = math.exp %197 : vector<8x8xf32>
    %cst_85 = arith.constant dense<0.000000e+00> : vector<8xf32>
    %199 = vector.multi_reduction <add>, %198, %cst_85 [1] : vector<8x8xf32> to vector<8xf32>
    %200 = vector.shape_cast %199 : vector<8xf32> to vector<8x1xf32>
    %cst_86 = arith.constant 1.000000e+00 : f32
    %201 = vector.broadcast %cst_86 : f32 to vector<8x1xf32>
    %202 = arith.divf %201, %200 : vector<8x1xf32>
    %203 = vector.broadcast %202 : vector<8x1xf32> to vector<8x8xf32>
    %204 = arith.mulf %198, %203 : vector<8x8xf32>
    %205 = vector.extract_strided_slice %158 {offsets = [0, 16], sizes = [8, 8], strides = [1, 1]} : vector<8x32xf32> to vector<8x8xf32>
    %cst_87 = arith.constant dense<0.000000e+00> : vector<8x8xf32>
    %206 = tpu.matmul %204, %205, %cst_87 {dimension_numbers = #tpu.dot_dimension_numbers<[1], [0], [0], [1], [0, 0, 1, 1], [], []>} : vector<8x8xf32>, vector<8x8xf32>, vector<8x8xf32> -> vector<8x8xf32>
    %207 = vector.extract_strided_slice %156 {offsets = [0, 24], sizes = [8, 8], strides = [1, 1]} : vector<8x32xf32> to vector<8x8xf32>
    %208 = vector.extract_strided_slice %157 {offsets = [0, 24], sizes = [8, 8], strides = [1, 1]} : vector<8x32xf32> to vector<8x8xf32>
    %cst_88 = arith.constant dense<0.000000e+00> : vector<8x8xf32>
    %209 = tpu.matmul %207, %208, %cst_88 {dimension_numbers = #tpu.dot_dimension_numbers<[1], [1], [0], [0], [0, 0, 1, 0], [], []>} : vector<8x8xf32>, vector<8x8xf32>, vector<8x8xf32> -> vector<8x8xf32>
    %cst_89 = arith.constant dense<0xFF800000> : vector<8xf32>
    %210 = vector.multi_reduction <maximumf>, %209, %cst_89 [1] : vector<8x8xf32> to vector<8xf32>
    %211 = vector.shape_cast %210 : vector<8xf32> to vector<8x1xf32>
    %212 = vector.broadcast %211 : vector<8x1xf32> to vector<8x8xf32>
    %213 = arith.subf %209, %212 : vector<8x8xf32>
    %214 = math.exp %213 : vector<8x8xf32>
    %cst_90 = arith.constant dense<0.000000e+00> : vector<8xf32>
    %215 = vector.multi_reduction <add>, %214, %cst_90 [1] : vector<8x8xf32> to vector<8xf32>
    %216 = vector.shape_cast %215 : vector<8xf32> to vector<8x1xf32>
    %cst_91 = arith.constant 1.000000e+00 : f32
    %217 = vector.broadcast %cst_91 : f32 to vector<8x1xf32>
    %218 = arith.divf %217, %216 : vector<8x1xf32>
    %219 = vector.broadcast %218 : vector<8x1xf32> to vector<8x8xf32>
    %220 = arith.mulf %214, %219 : vector<8x8xf32>
    %221 = vector.extract_strided_slice %158 {offsets = [0, 24], sizes = [8, 8], strides = [1, 1]} : vector<8x32xf32> to vector<8x8xf32>
    %cst_92 = arith.constant dense<0.000000e+00> : vector<8x8xf32>
    %222 = tpu.matmul %220, %221, %cst_92 {dimension_numbers = #tpu.dot_dimension_numbers<[1], [0], [0], [1], [0, 0, 1, 1], [], []>} : vector<8x8xf32>, vector<8x8xf32>, vector<8x8xf32> -> vector<8x8xf32>
    %223 = tpu.concatenate %174, %190, %206, %222 in 1 : vector<8x8xf32>, vector<8x8xf32>, vector<8x8xf32>, vector<8x8xf32> -> vector<8x32xf32>
    %cst_93 = arith.constant dense<0.000000e+00> : vector<8x32xf32>
    %224 = tpu.matmul %223, %154, %cst_93 {dimension_numbers = #tpu.dot_dimension_numbers<[1], [0], [0], [1], [0, 0, 1, 1], [], []>} : vector<8x32xf32>, vector<32x32xf32>, vector<8x32xf32> -> vector<8x32xf32>
    %225 = vector.extract_strided_slice %148 {offsets = [0, 0], sizes = [1, 32], strides = [1, 1]} : vector<2x32xf32> to vector<1x32xf32>
    %226 = vector.extract_strided_slice %150 {offsets = [0, 0], sizes = [1, 32], strides = [1, 1]} : vector<2x32xf32> to vector<1x32xf32>
    %227 = arith.addf %146, %224 : vector<8x32xf32>
    %cst_94 = arith.constant dense<0.000000e+00> : vector<8xf32>
    %228 = vector.multi_reduction <add>, %227, %cst_94 [1] : vector<8x32xf32> to vector<8xf32>
    %229 = vector.shape_cast %228 : vector<8xf32> to vector<8x1xf32>
    %cst_95 = arith.constant 3.200000e+01 : f32
    %230 = vector.broadcast %cst_95 : f32 to vector<8x1xf32>
    %231 = arith.divf %229, %230 : vector<8x1xf32>
    %232 = vector.broadcast %231 : vector<8x1xf32> to vector<8x32xf32>
    %233 = arith.subf %227, %232 : vector<8x32xf32>
    %234 = arith.mulf %233, %233 : vector<8x32xf32>
    %cst_96 = arith.constant dense<0.000000e+00> : vector<8xf32>
    %235 = vector.multi_reduction <add>, %234, %cst_96 [1] : vector<8x32xf32> to vector<8xf32>
    %236 = vector.shape_cast %235 : vector<8xf32> to vector<8x1xf32>
    %cst_97 = arith.constant 3.200000e+01 : f32
    %237 = vector.broadcast %cst_97 : f32 to vector<8x1xf32>
    %238 = arith.divf %236, %237 : vector<8x1xf32>
    %cst_98 = arith.constant 9.99999974E-6 : f32
    %239 = vector.broadcast %cst_98 : f32 to vector<8x1xf32>
    %240 = arith.addf %238, %239 : vector<8x1xf32>
    %241 = math.rsqrt %240 : vector<8x1xf32>
    %242 = vector.broadcast %241 : vector<8x1xf32> to vector<8x32xf32>
    %243 = arith.mulf %233, %242 : vector<8x32xf32>
    %244 = vector.broadcast %225 : vector<1x32xf32> to vector<8x32xf32>
    %245 = arith.mulf %243, %244 : vector<8x32xf32>
    %246 = vector.broadcast %226 : vector<1x32xf32> to vector<8x32xf32>
    %247 = arith.addf %245, %246 : vector<8x32xf32>
    %c1_99 = arith.constant 1 : index
    %c0_100 = arith.constant 0 : index
    %c0_101 = arith.constant 0 : index
    %248 = vector.load %arg4[%c1_99, %c0_100, %c0_101] : memref<2x32x64xf32, #tpu.memory_space<vmem>>, vector<1x32x64xf32>
    %249 = vector.shape_cast %248 : vector<1x32x64xf32> to vector<32x64xf32>
    %c1_102 = arith.constant 1 : index
    %c0_103 = arith.constant 0 : index
    %c0_104 = arith.constant 0 : index
    %250 = vector.load %arg5[%c1_102, %c0_103, %c0_104] : memref<2x1x64xf32, #tpu.memory_space<vmem>>, vector<1x1x64xf32>
    %251 = vector.shape_cast %250 : vector<1x1x64xf32> to vector<1x64xf32>
    %c1_105 = arith.constant 1 : index
    %c0_106 = arith.constant 0 : index
    %c0_107 = arith.constant 0 : index
    %252 = vector.load %arg6[%c1_105, %c0_106, %c0_107] : memref<2x64x32xf32, #tpu.memory_space<vmem>>, vector<1x64x32xf32>
    %253 = vector.shape_cast %252 : vector<1x64x32xf32> to vector<64x32xf32>
    %c1_108 = arith.constant 1 : index
    %c0_109 = arith.constant 0 : index
    %c0_110 = arith.constant 0 : index
    %254 = vector.load %arg7[%c1_108, %c0_109, %c0_110] : memref<2x1x32xf32, #tpu.memory_space<vmem>>, vector<1x1x32xf32>
    %255 = vector.shape_cast %254 : vector<1x1x32xf32> to vector<1x32xf32>
    %cst_111 = arith.constant dense<0.000000e+00> : vector<8x64xf32>
    %256 = tpu.matmul %247, %249, %cst_111 {dimension_numbers = #tpu.dot_dimension_numbers<[1], [0], [0], [1], [0, 0, 1, 1], [], []>} : vector<8x32xf32>, vector<32x64xf32>, vector<8x64xf32> -> vector<8x64xf32>
    %257 = vector.broadcast %251 : vector<1x64xf32> to vector<8x64xf32>
    %258 = arith.addf %256, %257 : vector<8x64xf32>
    %cst_112 = arith.constant 0.000000e+00 : f32
    %259 = vector.broadcast %cst_112 : f32 to vector<8x64xf32>
    %260 = arith.maximumf %258, %259 : vector<8x64xf32>
    %cst_113 = arith.constant dense<0.000000e+00> : vector<8x32xf32>
    %261 = tpu.matmul %260, %253, %cst_113 {dimension_numbers = #tpu.dot_dimension_numbers<[1], [0], [0], [1], [0, 0, 1, 1], [], []>} : vector<8x64xf32>, vector<64x32xf32>, vector<8x32xf32> -> vector<8x32xf32>
    %262 = vector.broadcast %255 : vector<1x32xf32> to vector<8x32xf32>
    %263 = arith.addf %261, %262 : vector<8x32xf32>
    %264 = vector.extract_strided_slice %148 {offsets = [1, 0], sizes = [1, 32], strides = [1, 1]} : vector<2x32xf32> to vector<1x32xf32>
    %265 = vector.extract_strided_slice %150 {offsets = [1, 0], sizes = [1, 32], strides = [1, 1]} : vector<2x32xf32> to vector<1x32xf32>
    %266 = arith.addf %247, %263 : vector<8x32xf32>
    %cst_114 = arith.constant dense<0.000000e+00> : vector<8xf32>
    %267 = vector.multi_reduction <add>, %266, %cst_114 [1] : vector<8x32xf32> to vector<8xf32>
    %268 = vector.shape_cast %267 : vector<8xf32> to vector<8x1xf32>
    %cst_115 = arith.constant 3.200000e+01 : f32
    %269 = vector.broadcast %cst_115 : f32 to vector<8x1xf32>
    %270 = arith.divf %268, %269 : vector<8x1xf32>
    %271 = vector.broadcast %270 : vector<8x1xf32> to vector<8x32xf32>
    %272 = arith.subf %266, %271 : vector<8x32xf32>
    %273 = arith.mulf %272, %272 : vector<8x32xf32>
    %cst_116 = arith.constant dense<0.000000e+00> : vector<8xf32>
    %274 = vector.multi_reduction <add>, %273, %cst_116 [1] : vector<8x32xf32> to vector<8xf32>
    %275 = vector.shape_cast %274 : vector<8xf32> to vector<8x1xf32>
    %cst_117 = arith.constant 3.200000e+01 : f32
    %276 = vector.broadcast %cst_117 : f32 to vector<8x1xf32>
    %277 = arith.divf %275, %276 : vector<8x1xf32>
    %cst_118 = arith.constant 9.99999974E-6 : f32
    %278 = vector.broadcast %cst_118 : f32 to vector<8x1xf32>
    %279 = arith.addf %277, %278 : vector<8x1xf32>
    %280 = math.rsqrt %279 : vector<8x1xf32>
    %281 = vector.broadcast %280 : vector<8x1xf32> to vector<8x32xf32>
    %282 = arith.mulf %272, %281 : vector<8x32xf32>
    %283 = vector.broadcast %264 : vector<1x32xf32> to vector<8x32xf32>
    %284 = arith.mulf %282, %283 : vector<8x32xf32>
    %285 = vector.broadcast %265 : vector<1x32xf32> to vector<8x32xf32>
    %286 = arith.addf %284, %285 : vector<8x32xf32>
    %c0_119 = arith.constant 0 : index
    %c0_120 = arith.constant 0 : index
    %287 = vector.load %arg1[%c0_119, %c0_120] : memref<16x32xf32, #tpu.memory_space<vmem>>, vector<8x32xf32>
    %c0_121 = arith.constant 0 : index
    %c0_122 = arith.constant 0 : index
    %c0_123 = arith.constant 0 : index
    %288 = vector.load %arg19[%c0_121, %c0_122, %c0_123] : memref<2x3x32xf32, #tpu.memory_space<vmem>>, vector<1x3x32xf32>
    %289 = vector.shape_cast %288 : vector<1x3x32xf32> to vector<3x32xf32>
    %c0_124 = arith.constant 0 : index
    %c0_125 = arith.constant 0 : index
    %c0_126 = arith.constant 0 : index
    %290 = vector.load %arg20[%c0_124, %c0_125, %c0_126] : memref<2x3x32xf32, #tpu.memory_space<vmem>>, vector<1x3x32xf32>
    %291 = vector.shape_cast %290 : vector<1x3x32xf32> to vector<3x32xf32>
    %c0_127 = arith.constant 0 : index
    %c0_128 = arith.constant 0 : index
    %c0_129 = arith.constant 0 : index
    %292 = vector.load %arg10[%c0_127, %c0_128, %c0_129] : memref<2x32x96xf32, #tpu.memory_space<vmem>>, vector<1x32x96xf32>
    %293 = vector.shape_cast %292 : vector<1x32x96xf32> to vector<32x96xf32>
    %c0_130 = arith.constant 0 : index
    %c0_131 = arith.constant 0 : index
    %c0_132 = arith.constant 0 : index
    %294 = vector.load %arg11[%c0_130, %c0_131, %c0_132] : memref<2x32x32xf32, #tpu.memory_space<vmem>>, vector<1x32x32xf32>
    %295 = vector.shape_cast %294 : vector<1x32x32xf32> to vector<32x32xf32>
    %cst_133 = arith.constant dense<0.000000e+00> : vector<8x96xf32>
    %296 = tpu.matmul %287, %293, %cst_133 {dimension_numbers = #tpu.dot_dimension_numbers<[1], [0], [0], [1], [0, 0, 1, 1], [], []>} : vector<8x32xf32>, vector<32x96xf32>, vector<8x96xf32> -> vector<8x96xf32>
    %297 = vector.extract_strided_slice %296 {offsets = [0, 0], sizes = [8, 32], strides = [1, 1]} : vector<8x96xf32> to vector<8x32xf32>
    %298 = vector.extract_strided_slice %296 {offsets = [0, 32], sizes = [8, 32], strides = [1, 1]} : vector<8x96xf32> to vector<8x32xf32>
    %299 = vector.extract_strided_slice %296 {offsets = [0, 64], sizes = [8, 32], strides = [1, 1]} : vector<8x96xf32> to vector<8x32xf32>
    %300 = vector.extract_strided_slice %297 {offsets = [0, 0], sizes = [8, 8], strides = [1, 1]} : vector<8x32xf32> to vector<8x8xf32>
    %301 = vector.extract_strided_slice %298 {offsets = [0, 0], sizes = [8, 8], strides = [1, 1]} : vector<8x32xf32> to vector<8x8xf32>
    %cst_134 = arith.constant dense<0.000000e+00> : vector<8x8xf32>
    %302 = tpu.matmul %300, %301, %cst_134 {dimension_numbers = #tpu.dot_dimension_numbers<[1], [1], [0], [0], [0, 0, 1, 0], [], []>} : vector<8x8xf32>, vector<8x8xf32>, vector<8x8xf32> -> vector<8x8xf32>
    %303 = arith.addf %302, %5 : vector<8x8xf32>
    %cst_135 = arith.constant dense<0xFF800000> : vector<8xf32>
    %304 = vector.multi_reduction <maximumf>, %303, %cst_135 [1] : vector<8x8xf32> to vector<8xf32>
    %305 = vector.shape_cast %304 : vector<8xf32> to vector<8x1xf32>
    %306 = vector.broadcast %305 : vector<8x1xf32> to vector<8x8xf32>
    %307 = arith.subf %303, %306 : vector<8x8xf32>
    %308 = math.exp %307 : vector<8x8xf32>
    %cst_136 = arith.constant dense<0.000000e+00> : vector<8xf32>
    %309 = vector.multi_reduction <add>, %308, %cst_136 [1] : vector<8x8xf32> to vector<8xf32>
    %310 = vector.shape_cast %309 : vector<8xf32> to vector<8x1xf32>
    %cst_137 = arith.constant 1.000000e+00 : f32
    %311 = vector.broadcast %cst_137 : f32 to vector<8x1xf32>
    %312 = arith.divf %311, %310 : vector<8x1xf32>
    %313 = vector.broadcast %312 : vector<8x1xf32> to vector<8x8xf32>
    %314 = arith.mulf %308, %313 : vector<8x8xf32>
    %315 = vector.extract_strided_slice %299 {offsets = [0, 0], sizes = [8, 8], strides = [1, 1]} : vector<8x32xf32> to vector<8x8xf32>
    %cst_138 = arith.constant dense<0.000000e+00> : vector<8x8xf32>
    %316 = tpu.matmul %314, %315, %cst_138 {dimension_numbers = #tpu.dot_dimension_numbers<[1], [0], [0], [1], [0, 0, 1, 1], [], []>} : vector<8x8xf32>, vector<8x8xf32>, vector<8x8xf32> -> vector<8x8xf32>
    %317 = vector.extract_strided_slice %297 {offsets = [0, 8], sizes = [8, 8], strides = [1, 1]} : vector<8x32xf32> to vector<8x8xf32>
    %318 = vector.extract_strided_slice %298 {offsets = [0, 8], sizes = [8, 8], strides = [1, 1]} : vector<8x32xf32> to vector<8x8xf32>
    %cst_139 = arith.constant dense<0.000000e+00> : vector<8x8xf32>
    %319 = tpu.matmul %317, %318, %cst_139 {dimension_numbers = #tpu.dot_dimension_numbers<[1], [1], [0], [0], [0, 0, 1, 0], [], []>} : vector<8x8xf32>, vector<8x8xf32>, vector<8x8xf32> -> vector<8x8xf32>
    %320 = arith.addf %319, %5 : vector<8x8xf32>
    %cst_140 = arith.constant dense<0xFF800000> : vector<8xf32>
    %321 = vector.multi_reduction <maximumf>, %320, %cst_140 [1] : vector<8x8xf32> to vector<8xf32>
    %322 = vector.shape_cast %321 : vector<8xf32> to vector<8x1xf32>
    %323 = vector.broadcast %322 : vector<8x1xf32> to vector<8x8xf32>
    %324 = arith.subf %320, %323 : vector<8x8xf32>
    %325 = math.exp %324 : vector<8x8xf32>
    %cst_141 = arith.constant dense<0.000000e+00> : vector<8xf32>
    %326 = vector.multi_reduction <add>, %325, %cst_141 [1] : vector<8x8xf32> to vector<8xf32>
    %327 = vector.shape_cast %326 : vector<8xf32> to vector<8x1xf32>
    %cst_142 = arith.constant 1.000000e+00 : f32
    %328 = vector.broadcast %cst_142 : f32 to vector<8x1xf32>
    %329 = arith.divf %328, %327 : vector<8x1xf32>
    %330 = vector.broadcast %329 : vector<8x1xf32> to vector<8x8xf32>
    %331 = arith.mulf %325, %330 : vector<8x8xf32>
    %332 = vector.extract_strided_slice %299 {offsets = [0, 8], sizes = [8, 8], strides = [1, 1]} : vector<8x32xf32> to vector<8x8xf32>
    %cst_143 = arith.constant dense<0.000000e+00> : vector<8x8xf32>
    %333 = tpu.matmul %331, %332, %cst_143 {dimension_numbers = #tpu.dot_dimension_numbers<[1], [0], [0], [1], [0, 0, 1, 1], [], []>} : vector<8x8xf32>, vector<8x8xf32>, vector<8x8xf32> -> vector<8x8xf32>
    %334 = vector.extract_strided_slice %297 {offsets = [0, 16], sizes = [8, 8], strides = [1, 1]} : vector<8x32xf32> to vector<8x8xf32>
    %335 = vector.extract_strided_slice %298 {offsets = [0, 16], sizes = [8, 8], strides = [1, 1]} : vector<8x32xf32> to vector<8x8xf32>
    %cst_144 = arith.constant dense<0.000000e+00> : vector<8x8xf32>
    %336 = tpu.matmul %334, %335, %cst_144 {dimension_numbers = #tpu.dot_dimension_numbers<[1], [1], [0], [0], [0, 0, 1, 0], [], []>} : vector<8x8xf32>, vector<8x8xf32>, vector<8x8xf32> -> vector<8x8xf32>
    %337 = arith.addf %336, %5 : vector<8x8xf32>
    %cst_145 = arith.constant dense<0xFF800000> : vector<8xf32>
    %338 = vector.multi_reduction <maximumf>, %337, %cst_145 [1] : vector<8x8xf32> to vector<8xf32>
    %339 = vector.shape_cast %338 : vector<8xf32> to vector<8x1xf32>
    %340 = vector.broadcast %339 : vector<8x1xf32> to vector<8x8xf32>
    %341 = arith.subf %337, %340 : vector<8x8xf32>
    %342 = math.exp %341 : vector<8x8xf32>
    %cst_146 = arith.constant dense<0.000000e+00> : vector<8xf32>
    %343 = vector.multi_reduction <add>, %342, %cst_146 [1] : vector<8x8xf32> to vector<8xf32>
    %344 = vector.shape_cast %343 : vector<8xf32> to vector<8x1xf32>
    %cst_147 = arith.constant 1.000000e+00 : f32
    %345 = vector.broadcast %cst_147 : f32 to vector<8x1xf32>
    %346 = arith.divf %345, %344 : vector<8x1xf32>
    %347 = vector.broadcast %346 : vector<8x1xf32> to vector<8x8xf32>
    %348 = arith.mulf %342, %347 : vector<8x8xf32>
    %349 = vector.extract_strided_slice %299 {offsets = [0, 16], sizes = [8, 8], strides = [1, 1]} : vector<8x32xf32> to vector<8x8xf32>
    %cst_148 = arith.constant dense<0.000000e+00> : vector<8x8xf32>
    %350 = tpu.matmul %348, %349, %cst_148 {dimension_numbers = #tpu.dot_dimension_numbers<[1], [0], [0], [1], [0, 0, 1, 1], [], []>} : vector<8x8xf32>, vector<8x8xf32>, vector<8x8xf32> -> vector<8x8xf32>
    %351 = vector.extract_strided_slice %297 {offsets = [0, 24], sizes = [8, 8], strides = [1, 1]} : vector<8x32xf32> to vector<8x8xf32>
    %352 = vector.extract_strided_slice %298 {offsets = [0, 24], sizes = [8, 8], strides = [1, 1]} : vector<8x32xf32> to vector<8x8xf32>
    %cst_149 = arith.constant dense<0.000000e+00> : vector<8x8xf32>
    %353 = tpu.matmul %351, %352, %cst_149 {dimension_numbers = #tpu.dot_dimension_numbers<[1], [1], [0], [0], [0, 0, 1, 0], [], []>} : vector<8x8xf32>, vector<8x8xf32>, vector<8x8xf32> -> vector<8x8xf32>
    %354 = arith.addf %353, %5 : vector<8x8xf32>
    %cst_150 = arith.constant dense<0xFF800000> : vector<8xf32>
    %355 = vector.multi_reduction <maximumf>, %354, %cst_150 [1] : vector<8x8xf32> to vector<8xf32>
    %356 = vector.shape_cast %355 : vector<8xf32> to vector<8x1xf32>
    %357 = vector.broadcast %356 : vector<8x1xf32> to vector<8x8xf32>
    %358 = arith.subf %354, %357 : vector<8x8xf32>
    %359 = math.exp %358 : vector<8x8xf32>
    %cst_151 = arith.constant dense<0.000000e+00> : vector<8xf32>
    %360 = vector.multi_reduction <add>, %359, %cst_151 [1] : vector<8x8xf32> to vector<8xf32>
    %361 = vector.shape_cast %360 : vector<8xf32> to vector<8x1xf32>
    %cst_152 = arith.constant 1.000000e+00 : f32
    %362 = vector.broadcast %cst_152 : f32 to vector<8x1xf32>
    %363 = arith.divf %362, %361 : vector<8x1xf32>
    %364 = vector.broadcast %363 : vector<8x1xf32> to vector<8x8xf32>
    %365 = arith.mulf %359, %364 : vector<8x8xf32>
    %366 = vector.extract_strided_slice %299 {offsets = [0, 24], sizes = [8, 8], strides = [1, 1]} : vector<8x32xf32> to vector<8x8xf32>
    %cst_153 = arith.constant dense<0.000000e+00> : vector<8x8xf32>
    %367 = tpu.matmul %365, %366, %cst_153 {dimension_numbers = #tpu.dot_dimension_numbers<[1], [0], [0], [1], [0, 0, 1, 1], [], []>} : vector<8x8xf32>, vector<8x8xf32>, vector<8x8xf32> -> vector<8x8xf32>
    %368 = tpu.concatenate %316, %333, %350, %367 in 1 : vector<8x8xf32>, vector<8x8xf32>, vector<8x8xf32>, vector<8x8xf32> -> vector<8x32xf32>
    %cst_154 = arith.constant dense<0.000000e+00> : vector<8x32xf32>
    %369 = tpu.matmul %368, %295, %cst_154 {dimension_numbers = #tpu.dot_dimension_numbers<[1], [0], [0], [1], [0, 0, 1, 1], [], []>} : vector<8x32xf32>, vector<32x32xf32>, vector<8x32xf32> -> vector<8x32xf32>
    %370 = vector.extract_strided_slice %289 {offsets = [0, 0], sizes = [1, 32], strides = [1, 1]} : vector<3x32xf32> to vector<1x32xf32>
    %371 = vector.extract_strided_slice %291 {offsets = [0, 0], sizes = [1, 32], strides = [1, 1]} : vector<3x32xf32> to vector<1x32xf32>
    %372 = arith.addf %287, %369 : vector<8x32xf32>
    %cst_155 = arith.constant dense<0.000000e+00> : vector<8xf32>
    %373 = vector.multi_reduction <add>, %372, %cst_155 [1] : vector<8x32xf32> to vector<8xf32>
    %374 = vector.shape_cast %373 : vector<8xf32> to vector<8x1xf32>
    %cst_156 = arith.constant 3.200000e+01 : f32
    %375 = vector.broadcast %cst_156 : f32 to vector<8x1xf32>
    %376 = arith.divf %374, %375 : vector<8x1xf32>
    %377 = vector.broadcast %376 : vector<8x1xf32> to vector<8x32xf32>
    %378 = arith.subf %372, %377 : vector<8x32xf32>
    %379 = arith.mulf %378, %378 : vector<8x32xf32>
    %cst_157 = arith.constant dense<0.000000e+00> : vector<8xf32>
    %380 = vector.multi_reduction <add>, %379, %cst_157 [1] : vector<8x32xf32> to vector<8xf32>
    %381 = vector.shape_cast %380 : vector<8xf32> to vector<8x1xf32>
    %cst_158 = arith.constant 3.200000e+01 : f32
    %382 = vector.broadcast %cst_158 : f32 to vector<8x1xf32>
    %383 = arith.divf %381, %382 : vector<8x1xf32>
    %cst_159 = arith.constant 9.99999974E-6 : f32
    %384 = vector.broadcast %cst_159 : f32 to vector<8x1xf32>
    %385 = arith.addf %383, %384 : vector<8x1xf32>
    %386 = math.rsqrt %385 : vector<8x1xf32>
    %387 = vector.broadcast %386 : vector<8x1xf32> to vector<8x32xf32>
    %388 = arith.mulf %378, %387 : vector<8x32xf32>
    %389 = vector.broadcast %370 : vector<1x32xf32> to vector<8x32xf32>
    %390 = arith.mulf %388, %389 : vector<8x32xf32>
    %391 = vector.broadcast %371 : vector<1x32xf32> to vector<8x32xf32>
    %392 = arith.addf %390, %391 : vector<8x32xf32>
    %c0_160 = arith.constant 0 : index
    %c0_161 = arith.constant 0 : index
    %c0_162 = arith.constant 0 : index
    %393 = vector.load %arg12[%c0_160, %c0_161, %c0_162] : memref<2x32x32xf32, #tpu.memory_space<vmem>>, vector<1x32x32xf32>
    %394 = vector.shape_cast %393 : vector<1x32x32xf32> to vector<32x32xf32>
    %c0_163 = arith.constant 0 : index
    %c0_164 = arith.constant 0 : index
    %c0_165 = arith.constant 0 : index
    %395 = vector.load %arg13[%c0_163, %c0_164, %c0_165] : memref<2x32x64xf32, #tpu.memory_space<vmem>>, vector<1x32x64xf32>
    %396 = vector.shape_cast %395 : vector<1x32x64xf32> to vector<32x64xf32>
    %c0_166 = arith.constant 0 : index
    %c0_167 = arith.constant 0 : index
    %c0_168 = arith.constant 0 : index
    %397 = vector.load %arg14[%c0_166, %c0_167, %c0_168] : memref<2x32x32xf32, #tpu.memory_space<vmem>>, vector<1x32x32xf32>
    %398 = vector.shape_cast %397 : vector<1x32x32xf32> to vector<32x32xf32>
    %cst_169 = arith.constant dense<0.000000e+00> : vector<8x32xf32>
    %399 = tpu.matmul %392, %394, %cst_169 {dimension_numbers = #tpu.dot_dimension_numbers<[1], [0], [0], [1], [0, 0, 1, 1], [], []>} : vector<8x32xf32>, vector<32x32xf32>, vector<8x32xf32> -> vector<8x32xf32>
    %cst_170 = arith.constant dense<0.000000e+00> : vector<8x64xf32>
    %400 = tpu.matmul %286, %396, %cst_170 {dimension_numbers = #tpu.dot_dimension_numbers<[1], [0], [0], [1], [0, 0, 1, 1], [], []>} : vector<8x32xf32>, vector<32x64xf32>, vector<8x64xf32> -> vector<8x64xf32>
    %401 = vector.extract_strided_slice %400 {offsets = [0, 0], sizes = [8, 32], strides = [1, 1]} : vector<8x64xf32> to vector<8x32xf32>
    %402 = vector.extract_strided_slice %400 {offsets = [0, 32], sizes = [8, 32], strides = [1, 1]} : vector<8x64xf32> to vector<8x32xf32>
    %403 = vector.extract_strided_slice %399 {offsets = [0, 0], sizes = [8, 8], strides = [1, 1]} : vector<8x32xf32> to vector<8x8xf32>
    %404 = vector.extract_strided_slice %401 {offsets = [0, 0], sizes = [8, 8], strides = [1, 1]} : vector<8x32xf32> to vector<8x8xf32>
    %cst_171 = arith.constant dense<0.000000e+00> : vector<8x8xf32>
    %405 = tpu.matmul %403, %404, %cst_171 {dimension_numbers = #tpu.dot_dimension_numbers<[1], [1], [0], [0], [0, 0, 1, 0], [], []>} : vector<8x8xf32>, vector<8x8xf32>, vector<8x8xf32> -> vector<8x8xf32>
    %cst_172 = arith.constant dense<0xFF800000> : vector<8xf32>
    %406 = vector.multi_reduction <maximumf>, %405, %cst_172 [1] : vector<8x8xf32> to vector<8xf32>
    %407 = vector.shape_cast %406 : vector<8xf32> to vector<8x1xf32>
    %408 = vector.broadcast %407 : vector<8x1xf32> to vector<8x8xf32>
    %409 = arith.subf %405, %408 : vector<8x8xf32>
    %410 = math.exp %409 : vector<8x8xf32>
    %cst_173 = arith.constant dense<0.000000e+00> : vector<8xf32>
    %411 = vector.multi_reduction <add>, %410, %cst_173 [1] : vector<8x8xf32> to vector<8xf32>
    %412 = vector.shape_cast %411 : vector<8xf32> to vector<8x1xf32>
    %cst_174 = arith.constant 1.000000e+00 : f32
    %413 = vector.broadcast %cst_174 : f32 to vector<8x1xf32>
    %414 = arith.divf %413, %412 : vector<8x1xf32>
    %415 = vector.broadcast %414 : vector<8x1xf32> to vector<8x8xf32>
    %416 = arith.mulf %410, %415 : vector<8x8xf32>
    %417 = vector.extract_strided_slice %402 {offsets = [0, 0], sizes = [8, 8], strides = [1, 1]} : vector<8x32xf32> to vector<8x8xf32>
    %cst_175 = arith.constant dense<0.000000e+00> : vector<8x8xf32>
    %418 = tpu.matmul %416, %417, %cst_175 {dimension_numbers = #tpu.dot_dimension_numbers<[1], [0], [0], [1], [0, 0, 1, 1], [], []>} : vector<8x8xf32>, vector<8x8xf32>, vector<8x8xf32> -> vector<8x8xf32>
    %419 = vector.extract_strided_slice %399 {offsets = [0, 8], sizes = [8, 8], strides = [1, 1]} : vector<8x32xf32> to vector<8x8xf32>
    %420 = vector.extract_strided_slice %401 {offsets = [0, 8], sizes = [8, 8], strides = [1, 1]} : vector<8x32xf32> to vector<8x8xf32>
    %cst_176 = arith.constant dense<0.000000e+00> : vector<8x8xf32>
    %421 = tpu.matmul %419, %420, %cst_176 {dimension_numbers = #tpu.dot_dimension_numbers<[1], [1], [0], [0], [0, 0, 1, 0], [], []>} : vector<8x8xf32>, vector<8x8xf32>, vector<8x8xf32> -> vector<8x8xf32>
    %cst_177 = arith.constant dense<0xFF800000> : vector<8xf32>
    %422 = vector.multi_reduction <maximumf>, %421, %cst_177 [1] : vector<8x8xf32> to vector<8xf32>
    %423 = vector.shape_cast %422 : vector<8xf32> to vector<8x1xf32>
    %424 = vector.broadcast %423 : vector<8x1xf32> to vector<8x8xf32>
    %425 = arith.subf %421, %424 : vector<8x8xf32>
    %426 = math.exp %425 : vector<8x8xf32>
    %cst_178 = arith.constant dense<0.000000e+00> : vector<8xf32>
    %427 = vector.multi_reduction <add>, %426, %cst_178 [1] : vector<8x8xf32> to vector<8xf32>
    %428 = vector.shape_cast %427 : vector<8xf32> to vector<8x1xf32>
    %cst_179 = arith.constant 1.000000e+00 : f32
    %429 = vector.broadcast %cst_179 : f32 to vector<8x1xf32>
    %430 = arith.divf %429, %428 : vector<8x1xf32>
    %431 = vector.broadcast %430 : vector<8x1xf32> to vector<8x8xf32>
    %432 = arith.mulf %426, %431 : vector<8x8xf32>
    %433 = vector.extract_strided_slice %402 {offsets = [0, 8], sizes = [8, 8], strides = [1, 1]} : vector<8x32xf32> to vector<8x8xf32>
    %cst_180 = arith.constant dense<0.000000e+00> : vector<8x8xf32>
    %434 = tpu.matmul %432, %433, %cst_180 {dimension_numbers = #tpu.dot_dimension_numbers<[1], [0], [0], [1], [0, 0, 1, 1], [], []>} : vector<8x8xf32>, vector<8x8xf32>, vector<8x8xf32> -> vector<8x8xf32>
    %435 = vector.extract_strided_slice %399 {offsets = [0, 16], sizes = [8, 8], strides = [1, 1]} : vector<8x32xf32> to vector<8x8xf32>
    %436 = vector.extract_strided_slice %401 {offsets = [0, 16], sizes = [8, 8], strides = [1, 1]} : vector<8x32xf32> to vector<8x8xf32>
    %cst_181 = arith.constant dense<0.000000e+00> : vector<8x8xf32>
    %437 = tpu.matmul %435, %436, %cst_181 {dimension_numbers = #tpu.dot_dimension_numbers<[1], [1], [0], [0], [0, 0, 1, 0], [], []>} : vector<8x8xf32>, vector<8x8xf32>, vector<8x8xf32> -> vector<8x8xf32>
    %cst_182 = arith.constant dense<0xFF800000> : vector<8xf32>
    %438 = vector.multi_reduction <maximumf>, %437, %cst_182 [1] : vector<8x8xf32> to vector<8xf32>
    %439 = vector.shape_cast %438 : vector<8xf32> to vector<8x1xf32>
    %440 = vector.broadcast %439 : vector<8x1xf32> to vector<8x8xf32>
    %441 = arith.subf %437, %440 : vector<8x8xf32>
    %442 = math.exp %441 : vector<8x8xf32>
    %cst_183 = arith.constant dense<0.000000e+00> : vector<8xf32>
    %443 = vector.multi_reduction <add>, %442, %cst_183 [1] : vector<8x8xf32> to vector<8xf32>
    %444 = vector.shape_cast %443 : vector<8xf32> to vector<8x1xf32>
    %cst_184 = arith.constant 1.000000e+00 : f32
    %445 = vector.broadcast %cst_184 : f32 to vector<8x1xf32>
    %446 = arith.divf %445, %444 : vector<8x1xf32>
    %447 = vector.broadcast %446 : vector<8x1xf32> to vector<8x8xf32>
    %448 = arith.mulf %442, %447 : vector<8x8xf32>
    %449 = vector.extract_strided_slice %402 {offsets = [0, 16], sizes = [8, 8], strides = [1, 1]} : vector<8x32xf32> to vector<8x8xf32>
    %cst_185 = arith.constant dense<0.000000e+00> : vector<8x8xf32>
    %450 = tpu.matmul %448, %449, %cst_185 {dimension_numbers = #tpu.dot_dimension_numbers<[1], [0], [0], [1], [0, 0, 1, 1], [], []>} : vector<8x8xf32>, vector<8x8xf32>, vector<8x8xf32> -> vector<8x8xf32>
    %451 = vector.extract_strided_slice %399 {offsets = [0, 24], sizes = [8, 8], strides = [1, 1]} : vector<8x32xf32> to vector<8x8xf32>
    %452 = vector.extract_strided_slice %401 {offsets = [0, 24], sizes = [8, 8], strides = [1, 1]} : vector<8x32xf32> to vector<8x8xf32>
    %cst_186 = arith.constant dense<0.000000e+00> : vector<8x8xf32>
    %453 = tpu.matmul %451, %452, %cst_186 {dimension_numbers = #tpu.dot_dimension_numbers<[1], [1], [0], [0], [0, 0, 1, 0], [], []>} : vector<8x8xf32>, vector<8x8xf32>, vector<8x8xf32> -> vector<8x8xf32>
    %cst_187 = arith.constant dense<0xFF800000> : vector<8xf32>
    %454 = vector.multi_reduction <maximumf>, %453, %cst_187 [1] : vector<8x8xf32> to vector<8xf32>
    %455 = vector.shape_cast %454 : vector<8xf32> to vector<8x1xf32>
    %456 = vector.broadcast %455 : vector<8x1xf32> to vector<8x8xf32>
    %457 = arith.subf %453, %456 : vector<8x8xf32>
    %458 = math.exp %457 : vector<8x8xf32>
    %cst_188 = arith.constant dense<0.000000e+00> : vector<8xf32>
    %459 = vector.multi_reduction <add>, %458, %cst_188 [1] : vector<8x8xf32> to vector<8xf32>
    %460 = vector.shape_cast %459 : vector<8xf32> to vector<8x1xf32>
    %cst_189 = arith.constant 1.000000e+00 : f32
    %461 = vector.broadcast %cst_189 : f32 to vector<8x1xf32>
    %462 = arith.divf %461, %460 : vector<8x1xf32>
    %463 = vector.broadcast %462 : vector<8x1xf32> to vector<8x8xf32>
    %464 = arith.mulf %458, %463 : vector<8x8xf32>
    %465 = vector.extract_strided_slice %402 {offsets = [0, 24], sizes = [8, 8], strides = [1, 1]} : vector<8x32xf32> to vector<8x8xf32>
    %cst_190 = arith.constant dense<0.000000e+00> : vector<8x8xf32>
    %466 = tpu.matmul %464, %465, %cst_190 {dimension_numbers = #tpu.dot_dimension_numbers<[1], [0], [0], [1], [0, 0, 1, 1], [], []>} : vector<8x8xf32>, vector<8x8xf32>, vector<8x8xf32> -> vector<8x8xf32>
    %467 = tpu.concatenate %418, %434, %450, %466 in 1 : vector<8x8xf32>, vector<8x8xf32>, vector<8x8xf32>, vector<8x8xf32> -> vector<8x32xf32>
    %cst_191 = arith.constant dense<0.000000e+00> : vector<8x32xf32>
    %468 = tpu.matmul %467, %398, %cst_191 {dimension_numbers = #tpu.dot_dimension_numbers<[1], [0], [0], [1], [0, 0, 1, 1], [], []>} : vector<8x32xf32>, vector<32x32xf32>, vector<8x32xf32> -> vector<8x32xf32>
    %469 = vector.extract_strided_slice %289 {offsets = [1, 0], sizes = [1, 32], strides = [1, 1]} : vector<3x32xf32> to vector<1x32xf32>
    %470 = vector.extract_strided_slice %291 {offsets = [1, 0], sizes = [1, 32], strides = [1, 1]} : vector<3x32xf32> to vector<1x32xf32>
    %471 = arith.addf %392, %468 : vector<8x32xf32>
    %cst_192 = arith.constant dense<0.000000e+00> : vector<8xf32>
    %472 = vector.multi_reduction <add>, %471, %cst_192 [1] : vector<8x32xf32> to vector<8xf32>
    %473 = vector.shape_cast %472 : vector<8xf32> to vector<8x1xf32>
    %cst_193 = arith.constant 3.200000e+01 : f32
    %474 = vector.broadcast %cst_193 : f32 to vector<8x1xf32>
    %475 = arith.divf %473, %474 : vector<8x1xf32>
    %476 = vector.broadcast %475 : vector<8x1xf32> to vector<8x32xf32>
    %477 = arith.subf %471, %476 : vector<8x32xf32>
    %478 = arith.mulf %477, %477 : vector<8x32xf32>
    %cst_194 = arith.constant dense<0.000000e+00> : vector<8xf32>
    %479 = vector.multi_reduction <add>, %478, %cst_194 [1] : vector<8x32xf32> to vector<8xf32>
    %480 = vector.shape_cast %479 : vector<8xf32> to vector<8x1xf32>
    %cst_195 = arith.constant 3.200000e+01 : f32
    %481 = vector.broadcast %cst_195 : f32 to vector<8x1xf32>
    %482 = arith.divf %480, %481 : vector<8x1xf32>
    %cst_196 = arith.constant 9.99999974E-6 : f32
    %483 = vector.broadcast %cst_196 : f32 to vector<8x1xf32>
    %484 = arith.addf %482, %483 : vector<8x1xf32>
    %485 = math.rsqrt %484 : vector<8x1xf32>
    %486 = vector.broadcast %485 : vector<8x1xf32> to vector<8x32xf32>
    %487 = arith.mulf %477, %486 : vector<8x32xf32>
    %488 = vector.broadcast %469 : vector<1x32xf32> to vector<8x32xf32>
    %489 = arith.mulf %487, %488 : vector<8x32xf32>
    %490 = vector.broadcast %470 : vector<1x32xf32> to vector<8x32xf32>
    %491 = arith.addf %489, %490 : vector<8x32xf32>
    %c0_197 = arith.constant 0 : index
    %c0_198 = arith.constant 0 : index
    %c0_199 = arith.constant 0 : index
    %492 = vector.load %arg15[%c0_197, %c0_198, %c0_199] : memref<2x32x64xf32, #tpu.memory_space<vmem>>, vector<1x32x64xf32>
    %493 = vector.shape_cast %492 : vector<1x32x64xf32> to vector<32x64xf32>
    %c0_200 = arith.constant 0 : index
    %c0_201 = arith.constant 0 : index
    %c0_202 = arith.constant 0 : index
    %494 = vector.load %arg16[%c0_200, %c0_201, %c0_202] : memref<2x1x64xf32, #tpu.memory_space<vmem>>, vector<1x1x64xf32>
    %495 = vector.shape_cast %494 : vector<1x1x64xf32> to vector<1x64xf32>
    %c0_203 = arith.constant 0 : index
    %c0_204 = arith.constant 0 : index
    %c0_205 = arith.constant 0 : index
    %496 = vector.load %arg17[%c0_203, %c0_204, %c0_205] : memref<2x64x32xf32, #tpu.memory_space<vmem>>, vector<1x64x32xf32>
    %497 = vector.shape_cast %496 : vector<1x64x32xf32> to vector<64x32xf32>
    %c0_206 = arith.constant 0 : index
    %c0_207 = arith.constant 0 : index
    %c0_208 = arith.constant 0 : index
    %498 = vector.load %arg18[%c0_206, %c0_207, %c0_208] : memref<2x1x32xf32, #tpu.memory_space<vmem>>, vector<1x1x32xf32>
    %499 = vector.shape_cast %498 : vector<1x1x32xf32> to vector<1x32xf32>
    %cst_209 = arith.constant dense<0.000000e+00> : vector<8x64xf32>
    %500 = tpu.matmul %491, %493, %cst_209 {dimension_numbers = #tpu.dot_dimension_numbers<[1], [0], [0], [1], [0, 0, 1, 1], [], []>} : vector<8x32xf32>, vector<32x64xf32>, vector<8x64xf32> -> vector<8x64xf32>
    %501 = vector.broadcast %495 : vector<1x64xf32> to vector<8x64xf32>
    %502 = arith.addf %500, %501 : vector<8x64xf32>
    %cst_210 = arith.constant 0.000000e+00 : f32
    %503 = vector.broadcast %cst_210 : f32 to vector<8x64xf32>
    %504 = arith.maximumf %502, %503 : vector<8x64xf32>
    %cst_211 = arith.constant dense<0.000000e+00> : vector<8x32xf32>
    %505 = tpu.matmul %504, %497, %cst_211 {dimension_numbers = #tpu.dot_dimension_numbers<[1], [0], [0], [1], [0, 0, 1, 1], [], []>} : vector<8x64xf32>, vector<64x32xf32>, vector<8x32xf32> -> vector<8x32xf32>
    %506 = vector.broadcast %499 : vector<1x32xf32> to vector<8x32xf32>
    %507 = arith.addf %505, %506 : vector<8x32xf32>
    %508 = vector.extract_strided_slice %289 {offsets = [2, 0], sizes = [1, 32], strides = [1, 1]} : vector<3x32xf32> to vector<1x32xf32>
    %509 = vector.extract_strided_slice %291 {offsets = [2, 0], sizes = [1, 32], strides = [1, 1]} : vector<3x32xf32> to vector<1x32xf32>
    %510 = arith.addf %491, %507 : vector<8x32xf32>
    %cst_212 = arith.constant dense<0.000000e+00> : vector<8xf32>
    %511 = vector.multi_reduction <add>, %510, %cst_212 [1] : vector<8x32xf32> to vector<8xf32>
    %512 = vector.shape_cast %511 : vector<8xf32> to vector<8x1xf32>
    %cst_213 = arith.constant 3.200000e+01 : f32
    %513 = vector.broadcast %cst_213 : f32 to vector<8x1xf32>
    %514 = arith.divf %512, %513 : vector<8x1xf32>
    %515 = vector.broadcast %514 : vector<8x1xf32> to vector<8x32xf32>
    %516 = arith.subf %510, %515 : vector<8x32xf32>
    %517 = arith.mulf %516, %516 : vector<8x32xf32>
    %cst_214 = arith.constant dense<0.000000e+00> : vector<8xf32>
    %518 = vector.multi_reduction <add>, %517, %cst_214 [1] : vector<8x32xf32> to vector<8xf32>
    %519 = vector.shape_cast %518 : vector<8xf32> to vector<8x1xf32>
    %cst_215 = arith.constant 3.200000e+01 : f32
    %520 = vector.broadcast %cst_215 : f32 to vector<8x1xf32>
    %521 = arith.divf %519, %520 : vector<8x1xf32>
    %cst_216 = arith.constant 9.99999974E-6 : f32
    %522 = vector.broadcast %cst_216 : f32 to vector<8x1xf32>
    %523 = arith.addf %521, %522 : vector<8x1xf32>
    %524 = math.rsqrt %523 : vector<8x1xf32>
    %525 = vector.broadcast %524 : vector<8x1xf32> to vector<8x32xf32>
    %526 = arith.mulf %516, %525 : vector<8x32xf32>
    %527 = vector.broadcast %508 : vector<1x32xf32> to vector<8x32xf32>
    %528 = arith.mulf %526, %527 : vector<8x32xf32>
    %529 = vector.broadcast %509 : vector<1x32xf32> to vector<8x32xf32>
    %530 = arith.addf %528, %529 : vector<8x32xf32>
    %c1_217 = arith.constant 1 : index
    %c0_218 = arith.constant 0 : index
    %c0_219 = arith.constant 0 : index
    %531 = vector.load %arg19[%c1_217, %c0_218, %c0_219] : memref<2x3x32xf32, #tpu.memory_space<vmem>>, vector<1x3x32xf32>
    %532 = vector.shape_cast %531 : vector<1x3x32xf32> to vector<3x32xf32>
    %c1_220 = arith.constant 1 : index
    %c0_221 = arith.constant 0 : index
    %c0_222 = arith.constant 0 : index
    %533 = vector.load %arg20[%c1_220, %c0_221, %c0_222] : memref<2x3x32xf32, #tpu.memory_space<vmem>>, vector<1x3x32xf32>
    %534 = vector.shape_cast %533 : vector<1x3x32xf32> to vector<3x32xf32>
    %c1_223 = arith.constant 1 : index
    %c0_224 = arith.constant 0 : index
    %c0_225 = arith.constant 0 : index
    %535 = vector.load %arg10[%c1_223, %c0_224, %c0_225] : memref<2x32x96xf32, #tpu.memory_space<vmem>>, vector<1x32x96xf32>
    %536 = vector.shape_cast %535 : vector<1x32x96xf32> to vector<32x96xf32>
    %c1_226 = arith.constant 1 : index
    %c0_227 = arith.constant 0 : index
    %c0_228 = arith.constant 0 : index
    %537 = vector.load %arg11[%c1_226, %c0_227, %c0_228] : memref<2x32x32xf32, #tpu.memory_space<vmem>>, vector<1x32x32xf32>
    %538 = vector.shape_cast %537 : vector<1x32x32xf32> to vector<32x32xf32>
    %cst_229 = arith.constant dense<0.000000e+00> : vector<8x96xf32>
    %539 = tpu.matmul %530, %536, %cst_229 {dimension_numbers = #tpu.dot_dimension_numbers<[1], [0], [0], [1], [0, 0, 1, 1], [], []>} : vector<8x32xf32>, vector<32x96xf32>, vector<8x96xf32> -> vector<8x96xf32>
    %540 = vector.extract_strided_slice %539 {offsets = [0, 0], sizes = [8, 32], strides = [1, 1]} : vector<8x96xf32> to vector<8x32xf32>
    %541 = vector.extract_strided_slice %539 {offsets = [0, 32], sizes = [8, 32], strides = [1, 1]} : vector<8x96xf32> to vector<8x32xf32>
    %542 = vector.extract_strided_slice %539 {offsets = [0, 64], sizes = [8, 32], strides = [1, 1]} : vector<8x96xf32> to vector<8x32xf32>
    %543 = vector.extract_strided_slice %540 {offsets = [0, 0], sizes = [8, 8], strides = [1, 1]} : vector<8x32xf32> to vector<8x8xf32>
    %544 = vector.extract_strided_slice %541 {offsets = [0, 0], sizes = [8, 8], strides = [1, 1]} : vector<8x32xf32> to vector<8x8xf32>
    %cst_230 = arith.constant dense<0.000000e+00> : vector<8x8xf32>
    %545 = tpu.matmul %543, %544, %cst_230 {dimension_numbers = #tpu.dot_dimension_numbers<[1], [1], [0], [0], [0, 0, 1, 0], [], []>} : vector<8x8xf32>, vector<8x8xf32>, vector<8x8xf32> -> vector<8x8xf32>
    %546 = arith.addf %545, %5 : vector<8x8xf32>
    %cst_231 = arith.constant dense<0xFF800000> : vector<8xf32>
    %547 = vector.multi_reduction <maximumf>, %546, %cst_231 [1] : vector<8x8xf32> to vector<8xf32>
    %548 = vector.shape_cast %547 : vector<8xf32> to vector<8x1xf32>
    %549 = vector.broadcast %548 : vector<8x1xf32> to vector<8x8xf32>
    %550 = arith.subf %546, %549 : vector<8x8xf32>
    %551 = math.exp %550 : vector<8x8xf32>
    %cst_232 = arith.constant dense<0.000000e+00> : vector<8xf32>
    %552 = vector.multi_reduction <add>, %551, %cst_232 [1] : vector<8x8xf32> to vector<8xf32>
    %553 = vector.shape_cast %552 : vector<8xf32> to vector<8x1xf32>
    %cst_233 = arith.constant 1.000000e+00 : f32
    %554 = vector.broadcast %cst_233 : f32 to vector<8x1xf32>
    %555 = arith.divf %554, %553 : vector<8x1xf32>
    %556 = vector.broadcast %555 : vector<8x1xf32> to vector<8x8xf32>
    %557 = arith.mulf %551, %556 : vector<8x8xf32>
    %558 = vector.extract_strided_slice %542 {offsets = [0, 0], sizes = [8, 8], strides = [1, 1]} : vector<8x32xf32> to vector<8x8xf32>
    %cst_234 = arith.constant dense<0.000000e+00> : vector<8x8xf32>
    %559 = tpu.matmul %557, %558, %cst_234 {dimension_numbers = #tpu.dot_dimension_numbers<[1], [0], [0], [1], [0, 0, 1, 1], [], []>} : vector<8x8xf32>, vector<8x8xf32>, vector<8x8xf32> -> vector<8x8xf32>
    %560 = vector.extract_strided_slice %540 {offsets = [0, 8], sizes = [8, 8], strides = [1, 1]} : vector<8x32xf32> to vector<8x8xf32>
    %561 = vector.extract_strided_slice %541 {offsets = [0, 8], sizes = [8, 8], strides = [1, 1]} : vector<8x32xf32> to vector<8x8xf32>
    %cst_235 = arith.constant dense<0.000000e+00> : vector<8x8xf32>
    %562 = tpu.matmul %560, %561, %cst_235 {dimension_numbers = #tpu.dot_dimension_numbers<[1], [1], [0], [0], [0, 0, 1, 0], [], []>} : vector<8x8xf32>, vector<8x8xf32>, vector<8x8xf32> -> vector<8x8xf32>
    %563 = arith.addf %562, %5 : vector<8x8xf32>
    %cst_236 = arith.constant dense<0xFF800000> : vector<8xf32>
    %564 = vector.multi_reduction <maximumf>, %563, %cst_236 [1] : vector<8x8xf32> to vector<8xf32>
    %565 = vector.shape_cast %564 : vector<8xf32> to vector<8x1xf32>
    %566 = vector.broadcast %565 : vector<8x1xf32> to vector<8x8xf32>
    %567 = arith.subf %563, %566 : vector<8x8xf32>
    %568 = math.exp %567 : vector<8x8xf32>
    %cst_237 = arith.constant dense<0.000000e+00> : vector<8xf32>
    %569 = vector.multi_reduction <add>, %568, %cst_237 [1] : vector<8x8xf32> to vector<8xf32>
    %570 = vector.shape_cast %569 : vector<8xf32> to vector<8x1xf32>
    %cst_238 = arith.constant 1.000000e+00 : f32
    %571 = vector.broadcast %cst_238 : f32 to vector<8x1xf32>
    %572 = arith.divf %571, %570 : vector<8x1xf32>
    %573 = vector.broadcast %572 : vector<8x1xf32> to vector<8x8xf32>
    %574 = arith.mulf %568, %573 : vector<8x8xf32>
    %575 = vector.extract_strided_slice %542 {offsets = [0, 8], sizes = [8, 8], strides = [1, 1]} : vector<8x32xf32> to vector<8x8xf32>
    %cst_239 = arith.constant dense<0.000000e+00> : vector<8x8xf32>
    %576 = tpu.matmul %574, %575, %cst_239 {dimension_numbers = #tpu.dot_dimension_numbers<[1], [0], [0], [1], [0, 0, 1, 1], [], []>} : vector<8x8xf32>, vector<8x8xf32>, vector<8x8xf32> -> vector<8x8xf32>
    %577 = vector.extract_strided_slice %540 {offsets = [0, 16], sizes = [8, 8], strides = [1, 1]} : vector<8x32xf32> to vector<8x8xf32>
    %578 = vector.extract_strided_slice %541 {offsets = [0, 16], sizes = [8, 8], strides = [1, 1]} : vector<8x32xf32> to vector<8x8xf32>
    %cst_240 = arith.constant dense<0.000000e+00> : vector<8x8xf32>
    %579 = tpu.matmul %577, %578, %cst_240 {dimension_numbers = #tpu.dot_dimension_numbers<[1], [1], [0], [0], [0, 0, 1, 0], [], []>} : vector<8x8xf32>, vector<8x8xf32>, vector<8x8xf32> -> vector<8x8xf32>
    %580 = arith.addf %579, %5 : vector<8x8xf32>
    %cst_241 = arith.constant dense<0xFF800000> : vector<8xf32>
    %581 = vector.multi_reduction <maximumf>, %580, %cst_241 [1] : vector<8x8xf32> to vector<8xf32>
    %582 = vector.shape_cast %581 : vector<8xf32> to vector<8x1xf32>
    %583 = vector.broadcast %582 : vector<8x1xf32> to vector<8x8xf32>
    %584 = arith.subf %580, %583 : vector<8x8xf32>
    %585 = math.exp %584 : vector<8x8xf32>
    %cst_242 = arith.constant dense<0.000000e+00> : vector<8xf32>
    %586 = vector.multi_reduction <add>, %585, %cst_242 [1] : vector<8x8xf32> to vector<8xf32>
    %587 = vector.shape_cast %586 : vector<8xf32> to vector<8x1xf32>
    %cst_243 = arith.constant 1.000000e+00 : f32
    %588 = vector.broadcast %cst_243 : f32 to vector<8x1xf32>
    %589 = arith.divf %588, %587 : vector<8x1xf32>
    %590 = vector.broadcast %589 : vector<8x1xf32> to vector<8x8xf32>
    %591 = arith.mulf %585, %590 : vector<8x8xf32>
    %592 = vector.extract_strided_slice %542 {offsets = [0, 16], sizes = [8, 8], strides = [1, 1]} : vector<8x32xf32> to vector<8x8xf32>
    %cst_244 = arith.constant dense<0.000000e+00> : vector<8x8xf32>
    %593 = tpu.matmul %591, %592, %cst_244 {dimension_numbers = #tpu.dot_dimension_numbers<[1], [0], [0], [1], [0, 0, 1, 1], [], []>} : vector<8x8xf32>, vector<8x8xf32>, vector<8x8xf32> -> vector<8x8xf32>
    %594 = vector.extract_strided_slice %540 {offsets = [0, 24], sizes = [8, 8], strides = [1, 1]} : vector<8x32xf32> to vector<8x8xf32>
    %595 = vector.extract_strided_slice %541 {offsets = [0, 24], sizes = [8, 8], strides = [1, 1]} : vector<8x32xf32> to vector<8x8xf32>
    %cst_245 = arith.constant dense<0.000000e+00> : vector<8x8xf32>
    %596 = tpu.matmul %594, %595, %cst_245 {dimension_numbers = #tpu.dot_dimension_numbers<[1], [1], [0], [0], [0, 0, 1, 0], [], []>} : vector<8x8xf32>, vector<8x8xf32>, vector<8x8xf32> -> vector<8x8xf32>
    %597 = arith.addf %596, %5 : vector<8x8xf32>
    %cst_246 = arith.constant dense<0xFF800000> : vector<8xf32>
    %598 = vector.multi_reduction <maximumf>, %597, %cst_246 [1] : vector<8x8xf32> to vector<8xf32>
    %599 = vector.shape_cast %598 : vector<8xf32> to vector<8x1xf32>
    %600 = vector.broadcast %599 : vector<8x1xf32> to vector<8x8xf32>
    %601 = arith.subf %597, %600 : vector<8x8xf32>
    %602 = math.exp %601 : vector<8x8xf32>
    %cst_247 = arith.constant dense<0.000000e+00> : vector<8xf32>
    %603 = vector.multi_reduction <add>, %602, %cst_247 [1] : vector<8x8xf32> to vector<8xf32>
    %604 = vector.shape_cast %603 : vector<8xf32> to vector<8x1xf32>
    %cst_248 = arith.constant 1.000000e+00 : f32
    %605 = vector.broadcast %cst_248 : f32 to vector<8x1xf32>
    %606 = arith.divf %605, %604 : vector<8x1xf32>
    %607 = vector.broadcast %606 : vector<8x1xf32> to vector<8x8xf32>
    %608 = arith.mulf %602, %607 : vector<8x8xf32>
    %609 = vector.extract_strided_slice %542 {offsets = [0, 24], sizes = [8, 8], strides = [1, 1]} : vector<8x32xf32> to vector<8x8xf32>
    %cst_249 = arith.constant dense<0.000000e+00> : vector<8x8xf32>
    %610 = tpu.matmul %608, %609, %cst_249 {dimension_numbers = #tpu.dot_dimension_numbers<[1], [0], [0], [1], [0, 0, 1, 1], [], []>} : vector<8x8xf32>, vector<8x8xf32>, vector<8x8xf32> -> vector<8x8xf32>
    %611 = tpu.concatenate %559, %576, %593, %610 in 1 : vector<8x8xf32>, vector<8x8xf32>, vector<8x8xf32>, vector<8x8xf32> -> vector<8x32xf32>
    %cst_250 = arith.constant dense<0.000000e+00> : vector<8x32xf32>
    %612 = tpu.matmul %611, %538, %cst_250 {dimension_numbers = #tpu.dot_dimension_numbers<[1], [0], [0], [1], [0, 0, 1, 1], [], []>} : vector<8x32xf32>, vector<32x32xf32>, vector<8x32xf32> -> vector<8x32xf32>
    %613 = vector.extract_strided_slice %532 {offsets = [0, 0], sizes = [1, 32], strides = [1, 1]} : vector<3x32xf32> to vector<1x32xf32>
    %614 = vector.extract_strided_slice %534 {offsets = [0, 0], sizes = [1, 32], strides = [1, 1]} : vector<3x32xf32> to vector<1x32xf32>
    %615 = arith.addf %530, %612 : vector<8x32xf32>
    %cst_251 = arith.constant dense<0.000000e+00> : vector<8xf32>
    %616 = vector.multi_reduction <add>, %615, %cst_251 [1] : vector<8x32xf32> to vector<8xf32>
    %617 = vector.shape_cast %616 : vector<8xf32> to vector<8x1xf32>
    %cst_252 = arith.constant 3.200000e+01 : f32
    %618 = vector.broadcast %cst_252 : f32 to vector<8x1xf32>
    %619 = arith.divf %617, %618 : vector<8x1xf32>
    %620 = vector.broadcast %619 : vector<8x1xf32> to vector<8x32xf32>
    %621 = arith.subf %615, %620 : vector<8x32xf32>
    %622 = arith.mulf %621, %621 : vector<8x32xf32>
    %cst_253 = arith.constant dense<0.000000e+00> : vector<8xf32>
    %623 = vector.multi_reduction <add>, %622, %cst_253 [1] : vector<8x32xf32> to vector<8xf32>
    %624 = vector.shape_cast %623 : vector<8xf32> to vector<8x1xf32>
    %cst_254 = arith.constant 3.200000e+01 : f32
    %625 = vector.broadcast %cst_254 : f32 to vector<8x1xf32>
    %626 = arith.divf %624, %625 : vector<8x1xf32>
    %cst_255 = arith.constant 9.99999974E-6 : f32
    %627 = vector.broadcast %cst_255 : f32 to vector<8x1xf32>
    %628 = arith.addf %626, %627 : vector<8x1xf32>
    %629 = math.rsqrt %628 : vector<8x1xf32>
    %630 = vector.broadcast %629 : vector<8x1xf32> to vector<8x32xf32>
    %631 = arith.mulf %621, %630 : vector<8x32xf32>
    %632 = vector.broadcast %613 : vector<1x32xf32> to vector<8x32xf32>
    %633 = arith.mulf %631, %632 : vector<8x32xf32>
    %634 = vector.broadcast %614 : vector<1x32xf32> to vector<8x32xf32>
    %635 = arith.addf %633, %634 : vector<8x32xf32>
    %c1_256 = arith.constant 1 : index
    %c0_257 = arith.constant 0 : index
    %c0_258 = arith.constant 0 : index
    %636 = vector.load %arg12[%c1_256, %c0_257, %c0_258] : memref<2x32x32xf32, #tpu.memory_space<vmem>>, vector<1x32x32xf32>
    %637 = vector.shape_cast %636 : vector<1x32x32xf32> to vector<32x32xf32>
    %c1_259 = arith.constant 1 : index
    %c0_260 = arith.constant 0 : index
    %c0_261 = arith.constant 0 : index
    %638 = vector.load %arg13[%c1_259, %c0_260, %c0_261] : memref<2x32x64xf32, #tpu.memory_space<vmem>>, vector<1x32x64xf32>
    %639 = vector.shape_cast %638 : vector<1x32x64xf32> to vector<32x64xf32>
    %c1_262 = arith.constant 1 : index
    %c0_263 = arith.constant 0 : index
    %c0_264 = arith.constant 0 : index
    %640 = vector.load %arg14[%c1_262, %c0_263, %c0_264] : memref<2x32x32xf32, #tpu.memory_space<vmem>>, vector<1x32x32xf32>
    %641 = vector.shape_cast %640 : vector<1x32x32xf32> to vector<32x32xf32>
    %cst_265 = arith.constant dense<0.000000e+00> : vector<8x32xf32>
    %642 = tpu.matmul %635, %637, %cst_265 {dimension_numbers = #tpu.dot_dimension_numbers<[1], [0], [0], [1], [0, 0, 1, 1], [], []>} : vector<8x32xf32>, vector<32x32xf32>, vector<8x32xf32> -> vector<8x32xf32>
    %cst_266 = arith.constant dense<0.000000e+00> : vector<8x64xf32>
    %643 = tpu.matmul %286, %639, %cst_266 {dimension_numbers = #tpu.dot_dimension_numbers<[1], [0], [0], [1], [0, 0, 1, 1], [], []>} : vector<8x32xf32>, vector<32x64xf32>, vector<8x64xf32> -> vector<8x64xf32>
    %644 = vector.extract_strided_slice %643 {offsets = [0, 0], sizes = [8, 32], strides = [1, 1]} : vector<8x64xf32> to vector<8x32xf32>
    %645 = vector.extract_strided_slice %643 {offsets = [0, 32], sizes = [8, 32], strides = [1, 1]} : vector<8x64xf32> to vector<8x32xf32>
    %646 = vector.extract_strided_slice %642 {offsets = [0, 0], sizes = [8, 8], strides = [1, 1]} : vector<8x32xf32> to vector<8x8xf32>
    %647 = vector.extract_strided_slice %644 {offsets = [0, 0], sizes = [8, 8], strides = [1, 1]} : vector<8x32xf32> to vector<8x8xf32>
    %cst_267 = arith.constant dense<0.000000e+00> : vector<8x8xf32>
    %648 = tpu.matmul %646, %647, %cst_267 {dimension_numbers = #tpu.dot_dimension_numbers<[1], [1], [0], [0], [0, 0, 1, 0], [], []>} : vector<8x8xf32>, vector<8x8xf32>, vector<8x8xf32> -> vector<8x8xf32>
    %cst_268 = arith.constant dense<0xFF800000> : vector<8xf32>
    %649 = vector.multi_reduction <maximumf>, %648, %cst_268 [1] : vector<8x8xf32> to vector<8xf32>
    %650 = vector.shape_cast %649 : vector<8xf32> to vector<8x1xf32>
    %651 = vector.broadcast %650 : vector<8x1xf32> to vector<8x8xf32>
    %652 = arith.subf %648, %651 : vector<8x8xf32>
    %653 = math.exp %652 : vector<8x8xf32>
    %cst_269 = arith.constant dense<0.000000e+00> : vector<8xf32>
    %654 = vector.multi_reduction <add>, %653, %cst_269 [1] : vector<8x8xf32> to vector<8xf32>
    %655 = vector.shape_cast %654 : vector<8xf32> to vector<8x1xf32>
    %cst_270 = arith.constant 1.000000e+00 : f32
    %656 = vector.broadcast %cst_270 : f32 to vector<8x1xf32>
    %657 = arith.divf %656, %655 : vector<8x1xf32>
    %658 = vector.broadcast %657 : vector<8x1xf32> to vector<8x8xf32>
    %659 = arith.mulf %653, %658 : vector<8x8xf32>
    %660 = vector.extract_strided_slice %645 {offsets = [0, 0], sizes = [8, 8], strides = [1, 1]} : vector<8x32xf32> to vector<8x8xf32>
    %cst_271 = arith.constant dense<0.000000e+00> : vector<8x8xf32>
    %661 = tpu.matmul %659, %660, %cst_271 {dimension_numbers = #tpu.dot_dimension_numbers<[1], [0], [0], [1], [0, 0, 1, 1], [], []>} : vector<8x8xf32>, vector<8x8xf32>, vector<8x8xf32> -> vector<8x8xf32>
    %662 = vector.extract_strided_slice %642 {offsets = [0, 8], sizes = [8, 8], strides = [1, 1]} : vector<8x32xf32> to vector<8x8xf32>
    %663 = vector.extract_strided_slice %644 {offsets = [0, 8], sizes = [8, 8], strides = [1, 1]} : vector<8x32xf32> to vector<8x8xf32>
    %cst_272 = arith.constant dense<0.000000e+00> : vector<8x8xf32>
    %664 = tpu.matmul %662, %663, %cst_272 {dimension_numbers = #tpu.dot_dimension_numbers<[1], [1], [0], [0], [0, 0, 1, 0], [], []>} : vector<8x8xf32>, vector<8x8xf32>, vector<8x8xf32> -> vector<8x8xf32>
    %cst_273 = arith.constant dense<0xFF800000> : vector<8xf32>
    %665 = vector.multi_reduction <maximumf>, %664, %cst_273 [1] : vector<8x8xf32> to vector<8xf32>
    %666 = vector.shape_cast %665 : vector<8xf32> to vector<8x1xf32>
    %667 = vector.broadcast %666 : vector<8x1xf32> to vector<8x8xf32>
    %668 = arith.subf %664, %667 : vector<8x8xf32>
    %669 = math.exp %668 : vector<8x8xf32>
    %cst_274 = arith.constant dense<0.000000e+00> : vector<8xf32>
    %670 = vector.multi_reduction <add>, %669, %cst_274 [1] : vector<8x8xf32> to vector<8xf32>
    %671 = vector.shape_cast %670 : vector<8xf32> to vector<8x1xf32>
    %cst_275 = arith.constant 1.000000e+00 : f32
    %672 = vector.broadcast %cst_275 : f32 to vector<8x1xf32>
    %673 = arith.divf %672, %671 : vector<8x1xf32>
    %674 = vector.broadcast %673 : vector<8x1xf32> to vector<8x8xf32>
    %675 = arith.mulf %669, %674 : vector<8x8xf32>
    %676 = vector.extract_strided_slice %645 {offsets = [0, 8], sizes = [8, 8], strides = [1, 1]} : vector<8x32xf32> to vector<8x8xf32>
    %cst_276 = arith.constant dense<0.000000e+00> : vector<8x8xf32>
    %677 = tpu.matmul %675, %676, %cst_276 {dimension_numbers = #tpu.dot_dimension_numbers<[1], [0], [0], [1], [0, 0, 1, 1], [], []>} : vector<8x8xf32>, vector<8x8xf32>, vector<8x8xf32> -> vector<8x8xf32>
    %678 = vector.extract_strided_slice %642 {offsets = [0, 16], sizes = [8, 8], strides = [1, 1]} : vector<8x32xf32> to vector<8x8xf32>
    %679 = vector.extract_strided_slice %644 {offsets = [0, 16], sizes = [8, 8], strides = [1, 1]} : vector<8x32xf32> to vector<8x8xf32>
    %cst_277 = arith.constant dense<0.000000e+00> : vector<8x8xf32>
    %680 = tpu.matmul %678, %679, %cst_277 {dimension_numbers = #tpu.dot_dimension_numbers<[1], [1], [0], [0], [0, 0, 1, 0], [], []>} : vector<8x8xf32>, vector<8x8xf32>, vector<8x8xf32> -> vector<8x8xf32>
    %cst_278 = arith.constant dense<0xFF800000> : vector<8xf32>
    %681 = vector.multi_reduction <maximumf>, %680, %cst_278 [1] : vector<8x8xf32> to vector<8xf32>
    %682 = vector.shape_cast %681 : vector<8xf32> to vector<8x1xf32>
    %683 = vector.broadcast %682 : vector<8x1xf32> to vector<8x8xf32>
    %684 = arith.subf %680, %683 : vector<8x8xf32>
    %685 = math.exp %684 : vector<8x8xf32>
    %cst_279 = arith.constant dense<0.000000e+00> : vector<8xf32>
    %686 = vector.multi_reduction <add>, %685, %cst_279 [1] : vector<8x8xf32> to vector<8xf32>
    %687 = vector.shape_cast %686 : vector<8xf32> to vector<8x1xf32>
    %cst_280 = arith.constant 1.000000e+00 : f32
    %688 = vector.broadcast %cst_280 : f32 to vector<8x1xf32>
    %689 = arith.divf %688, %687 : vector<8x1xf32>
    %690 = vector.broadcast %689 : vector<8x1xf32> to vector<8x8xf32>
    %691 = arith.mulf %685, %690 : vector<8x8xf32>
    %692 = vector.extract_strided_slice %645 {offsets = [0, 16], sizes = [8, 8], strides = [1, 1]} : vector<8x32xf32> to vector<8x8xf32>
    %cst_281 = arith.constant dense<0.000000e+00> : vector<8x8xf32>
    %693 = tpu.matmul %691, %692, %cst_281 {dimension_numbers = #tpu.dot_dimension_numbers<[1], [0], [0], [1], [0, 0, 1, 1], [], []>} : vector<8x8xf32>, vector<8x8xf32>, vector<8x8xf32> -> vector<8x8xf32>
    %694 = vector.extract_strided_slice %642 {offsets = [0, 24], sizes = [8, 8], strides = [1, 1]} : vector<8x32xf32> to vector<8x8xf32>
    %695 = vector.extract_strided_slice %644 {offsets = [0, 24], sizes = [8, 8], strides = [1, 1]} : vector<8x32xf32> to vector<8x8xf32>
    %cst_282 = arith.constant dense<0.000000e+00> : vector<8x8xf32>
    %696 = tpu.matmul %694, %695, %cst_282 {dimension_numbers = #tpu.dot_dimension_numbers<[1], [1], [0], [0], [0, 0, 1, 0], [], []>} : vector<8x8xf32>, vector<8x8xf32>, vector<8x8xf32> -> vector<8x8xf32>
    %cst_283 = arith.constant dense<0xFF800000> : vector<8xf32>
    %697 = vector.multi_reduction <maximumf>, %696, %cst_283 [1] : vector<8x8xf32> to vector<8xf32>
    %698 = vector.shape_cast %697 : vector<8xf32> to vector<8x1xf32>
    %699 = vector.broadcast %698 : vector<8x1xf32> to vector<8x8xf32>
    %700 = arith.subf %696, %699 : vector<8x8xf32>
    %701 = math.exp %700 : vector<8x8xf32>
    %cst_284 = arith.constant dense<0.000000e+00> : vector<8xf32>
    %702 = vector.multi_reduction <add>, %701, %cst_284 [1] : vector<8x8xf32> to vector<8xf32>
    %703 = vector.shape_cast %702 : vector<8xf32> to vector<8x1xf32>
    %cst_285 = arith.constant 1.000000e+00 : f32
    %704 = vector.broadcast %cst_285 : f32 to vector<8x1xf32>
    %705 = arith.divf %704, %703 : vector<8x1xf32>
    %706 = vector.broadcast %705 : vector<8x1xf32> to vector<8x8xf32>
    %707 = arith.mulf %701, %706 : vector<8x8xf32>
    %708 = vector.extract_strided_slice %645 {offsets = [0, 24], sizes = [8, 8], strides = [1, 1]} : vector<8x32xf32> to vector<8x8xf32>
    %cst_286 = arith.constant dense<0.000000e+00> : vector<8x8xf32>
    %709 = tpu.matmul %707, %708, %cst_286 {dimension_numbers = #tpu.dot_dimension_numbers<[1], [0], [0], [1], [0, 0, 1, 1], [], []>} : vector<8x8xf32>, vector<8x8xf32>, vector<8x8xf32> -> vector<8x8xf32>
    %710 = tpu.concatenate %661, %677, %693, %709 in 1 : vector<8x8xf32>, vector<8x8xf32>, vector<8x8xf32>, vector<8x8xf32> -> vector<8x32xf32>
    %cst_287 = arith.constant dense<0.000000e+00> : vector<8x32xf32>
    %711 = tpu.matmul %710, %641, %cst_287 {dimension_numbers = #tpu.dot_dimension_numbers<[1], [0], [0], [1], [0, 0, 1, 1], [], []>} : vector<8x32xf32>, vector<32x32xf32>, vector<8x32xf32> -> vector<8x32xf32>
    %712 = vector.extract_strided_slice %532 {offsets = [1, 0], sizes = [1, 32], strides = [1, 1]} : vector<3x32xf32> to vector<1x32xf32>
    %713 = vector.extract_strided_slice %534 {offsets = [1, 0], sizes = [1, 32], strides = [1, 1]} : vector<3x32xf32> to vector<1x32xf32>
    %714 = arith.addf %635, %711 : vector<8x32xf32>
    %cst_288 = arith.constant dense<0.000000e+00> : vector<8xf32>
    %715 = vector.multi_reduction <add>, %714, %cst_288 [1] : vector<8x32xf32> to vector<8xf32>
    %716 = vector.shape_cast %715 : vector<8xf32> to vector<8x1xf32>
    %cst_289 = arith.constant 3.200000e+01 : f32
    %717 = vector.broadcast %cst_289 : f32 to vector<8x1xf32>
    %718 = arith.divf %716, %717 : vector<8x1xf32>
    %719 = vector.broadcast %718 : vector<8x1xf32> to vector<8x32xf32>
    %720 = arith.subf %714, %719 : vector<8x32xf32>
    %721 = arith.mulf %720, %720 : vector<8x32xf32>
    %cst_290 = arith.constant dense<0.000000e+00> : vector<8xf32>
    %722 = vector.multi_reduction <add>, %721, %cst_290 [1] : vector<8x32xf32> to vector<8xf32>
    %723 = vector.shape_cast %722 : vector<8xf32> to vector<8x1xf32>
    %cst_291 = arith.constant 3.200000e+01 : f32
    %724 = vector.broadcast %cst_291 : f32 to vector<8x1xf32>
    %725 = arith.divf %723, %724 : vector<8x1xf32>
    %cst_292 = arith.constant 9.99999974E-6 : f32
    %726 = vector.broadcast %cst_292 : f32 to vector<8x1xf32>
    %727 = arith.addf %725, %726 : vector<8x1xf32>
    %728 = math.rsqrt %727 : vector<8x1xf32>
    %729 = vector.broadcast %728 : vector<8x1xf32> to vector<8x32xf32>
    %730 = arith.mulf %720, %729 : vector<8x32xf32>
    %731 = vector.broadcast %712 : vector<1x32xf32> to vector<8x32xf32>
    %732 = arith.mulf %730, %731 : vector<8x32xf32>
    %733 = vector.broadcast %713 : vector<1x32xf32> to vector<8x32xf32>
    %734 = arith.addf %732, %733 : vector<8x32xf32>
    %c1_293 = arith.constant 1 : index
    %c0_294 = arith.constant 0 : index
    %c0_295 = arith.constant 0 : index
    %735 = vector.load %arg15[%c1_293, %c0_294, %c0_295] : memref<2x32x64xf32, #tpu.memory_space<vmem>>, vector<1x32x64xf32>
    %736 = vector.shape_cast %735 : vector<1x32x64xf32> to vector<32x64xf32>
    %c1_296 = arith.constant 1 : index
    %c0_297 = arith.constant 0 : index
    %c0_298 = arith.constant 0 : index
    %737 = vector.load %arg16[%c1_296, %c0_297, %c0_298] : memref<2x1x64xf32, #tpu.memory_space<vmem>>, vector<1x1x64xf32>
    %738 = vector.shape_cast %737 : vector<1x1x64xf32> to vector<1x64xf32>
    %c1_299 = arith.constant 1 : index
    %c0_300 = arith.constant 0 : index
    %c0_301 = arith.constant 0 : index
    %739 = vector.load %arg17[%c1_299, %c0_300, %c0_301] : memref<2x64x32xf32, #tpu.memory_space<vmem>>, vector<1x64x32xf32>
    %740 = vector.shape_cast %739 : vector<1x64x32xf32> to vector<64x32xf32>
    %c1_302 = arith.constant 1 : index
    %c0_303 = arith.constant 0 : index
    %c0_304 = arith.constant 0 : index
    %741 = vector.load %arg18[%c1_302, %c0_303, %c0_304] : memref<2x1x32xf32, #tpu.memory_space<vmem>>, vector<1x1x32xf32>
    %742 = vector.shape_cast %741 : vector<1x1x32xf32> to vector<1x32xf32>
    %cst_305 = arith.constant dense<0.000000e+00> : vector<8x64xf32>
    %743 = tpu.matmul %734, %736, %cst_305 {dimension_numbers = #tpu.dot_dimension_numbers<[1], [0], [0], [1], [0, 0, 1, 1], [], []>} : vector<8x32xf32>, vector<32x64xf32>, vector<8x64xf32> -> vector<8x64xf32>
    %744 = vector.broadcast %738 : vector<1x64xf32> to vector<8x64xf32>
    %745 = arith.addf %743, %744 : vector<8x64xf32>
    %cst_306 = arith.constant 0.000000e+00 : f32
    %746 = vector.broadcast %cst_306 : f32 to vector<8x64xf32>
    %747 = arith.maximumf %745, %746 : vector<8x64xf32>
    %cst_307 = arith.constant dense<0.000000e+00> : vector<8x32xf32>
    %748 = tpu.matmul %747, %740, %cst_307 {dimension_numbers = #tpu.dot_dimension_numbers<[1], [0], [0], [1], [0, 0, 1, 1], [], []>} : vector<8x64xf32>, vector<64x32xf32>, vector<8x32xf32> -> vector<8x32xf32>
    %749 = vector.broadcast %742 : vector<1x32xf32> to vector<8x32xf32>
    %750 = arith.addf %748, %749 : vector<8x32xf32>
    %751 = vector.extract_strided_slice %532 {offsets = [2, 0], sizes = [1, 32], strides = [1, 1]} : vector<3x32xf32> to vector<1x32xf32>
    %752 = vector.extract_strided_slice %534 {offsets = [2, 0], sizes = [1, 32], strides = [1, 1]} : vector<3x32xf32> to vector<1x32xf32>
    %753 = arith.addf %734, %750 : vector<8x32xf32>
    %cst_308 = arith.constant dense<0.000000e+00> : vector<8xf32>
    %754 = vector.multi_reduction <add>, %753, %cst_308 [1] : vector<8x32xf32> to vector<8xf32>
    %755 = vector.shape_cast %754 : vector<8xf32> to vector<8x1xf32>
    %cst_309 = arith.constant 3.200000e+01 : f32
    %756 = vector.broadcast %cst_309 : f32 to vector<8x1xf32>
    %757 = arith.divf %755, %756 : vector<8x1xf32>
    %758 = vector.broadcast %757 : vector<8x1xf32> to vector<8x32xf32>
    %759 = arith.subf %753, %758 : vector<8x32xf32>
    %760 = arith.mulf %759, %759 : vector<8x32xf32>
    %cst_310 = arith.constant dense<0.000000e+00> : vector<8xf32>
    %761 = vector.multi_reduction <add>, %760, %cst_310 [1] : vector<8x32xf32> to vector<8xf32>
    %762 = vector.shape_cast %761 : vector<8xf32> to vector<8x1xf32>
    %cst_311 = arith.constant 3.200000e+01 : f32
    %763 = vector.broadcast %cst_311 : f32 to vector<8x1xf32>
    %764 = arith.divf %762, %763 : vector<8x1xf32>
    %cst_312 = arith.constant 9.99999974E-6 : f32
    %765 = vector.broadcast %cst_312 : f32 to vector<8x1xf32>
    %766 = arith.addf %764, %765 : vector<8x1xf32>
    %767 = math.rsqrt %766 : vector<8x1xf32>
    %768 = vector.broadcast %767 : vector<8x1xf32> to vector<8x32xf32>
    %769 = arith.mulf %759, %768 : vector<8x32xf32>
    %770 = vector.broadcast %751 : vector<1x32xf32> to vector<8x32xf32>
    %771 = arith.mulf %769, %770 : vector<8x32xf32>
    %772 = vector.broadcast %752 : vector<1x32xf32> to vector<8x32xf32>
    %773 = arith.addf %771, %772 : vector<8x32xf32>
    %c0_313 = arith.constant 0 : index
    %c0_314 = arith.constant 0 : index
    %774 = vector.load %arg21[%c0_313, %c0_314] : memref<16x32xf32, #tpu.memory_space<vmem>>, vector<8x32xf32>
    tpu.vector_store %arg21[%c0_313, %c0_314], %773 {strides = array<i32>} : memref<16x32xf32, #tpu.memory_space<vmem>>, vector<8x32xf32>,
    %c8 = arith.constant 8 : index
    %c0_315 = arith.constant 0 : index
    %775 = vector.load %arg0[%c8, %c0_315] : memref<16x32xf32, #tpu.memory_space<vmem>>, vector<8x32xf32>
    %c0_316 = arith.constant 0 : index
    %c0_317 = arith.constant 0 : index
    %c0_318 = arith.constant 0 : index
    %776 = vector.load %arg8[%c0_316, %c0_317, %c0_318] : memref<2x2x32xf32, #tpu.memory_space<vmem>>, vector<1x2x32xf32>
    %777 = vector.shape_cast %776 : vector<1x2x32xf32> to vector<2x32xf32>
    %c0_319 = arith.constant 0 : index
    %c0_320 = arith.constant 0 : index
    %c0_321 = arith.constant 0 : index
    %778 = vector.load %arg9[%c0_319, %c0_320, %c0_321] : memref<2x2x32xf32, #tpu.memory_space<vmem>>, vector<1x2x32xf32>
    %779 = vector.shape_cast %778 : vector<1x2x32xf32> to vector<2x32xf32>
    %c0_322 = arith.constant 0 : index
    %c0_323 = arith.constant 0 : index
    %c0_324 = arith.constant 0 : index
    %780 = vector.load %arg2[%c0_322, %c0_323, %c0_324] : memref<2x32x96xf32, #tpu.memory_space<vmem>>, vector<1x32x96xf32>
    %781 = vector.shape_cast %780 : vector<1x32x96xf32> to vector<32x96xf32>
    %c0_325 = arith.constant 0 : index
    %c0_326 = arith.constant 0 : index
    %c0_327 = arith.constant 0 : index
    %782 = vector.load %arg3[%c0_325, %c0_326, %c0_327] : memref<2x32x32xf32, #tpu.memory_space<vmem>>, vector<1x32x32xf32>
    %783 = vector.shape_cast %782 : vector<1x32x32xf32> to vector<32x32xf32>
    %cst_328 = arith.constant dense<0.000000e+00> : vector<8x96xf32>
    %784 = tpu.matmul %775, %781, %cst_328 {dimension_numbers = #tpu.dot_dimension_numbers<[1], [0], [0], [1], [0, 0, 1, 1], [], []>} : vector<8x32xf32>, vector<32x96xf32>, vector<8x96xf32> -> vector<8x96xf32>
    %785 = vector.extract_strided_slice %784 {offsets = [0, 0], sizes = [8, 32], strides = [1, 1]} : vector<8x96xf32> to vector<8x32xf32>
    %786 = vector.extract_strided_slice %784 {offsets = [0, 32], sizes = [8, 32], strides = [1, 1]} : vector<8x96xf32> to vector<8x32xf32>
    %787 = vector.extract_strided_slice %784 {offsets = [0, 64], sizes = [8, 32], strides = [1, 1]} : vector<8x96xf32> to vector<8x32xf32>
    %788 = vector.extract_strided_slice %785 {offsets = [0, 0], sizes = [8, 8], strides = [1, 1]} : vector<8x32xf32> to vector<8x8xf32>
    %789 = vector.extract_strided_slice %786 {offsets = [0, 0], sizes = [8, 8], strides = [1, 1]} : vector<8x32xf32> to vector<8x8xf32>
    %cst_329 = arith.constant dense<0.000000e+00> : vector<8x8xf32>
    %790 = tpu.matmul %788, %789, %cst_329 {dimension_numbers = #tpu.dot_dimension_numbers<[1], [1], [0], [0], [0, 0, 1, 0], [], []>} : vector<8x8xf32>, vector<8x8xf32>, vector<8x8xf32> -> vector<8x8xf32>
    %cst_330 = arith.constant dense<0xFF800000> : vector<8xf32>
    %791 = vector.multi_reduction <maximumf>, %790, %cst_330 [1] : vector<8x8xf32> to vector<8xf32>
    %792 = vector.shape_cast %791 : vector<8xf32> to vector<8x1xf32>
    %793 = vector.broadcast %792 : vector<8x1xf32> to vector<8x8xf32>
    %794 = arith.subf %790, %793 : vector<8x8xf32>
    %795 = math.exp %794 : vector<8x8xf32>
    %cst_331 = arith.constant dense<0.000000e+00> : vector<8xf32>
    %796 = vector.multi_reduction <add>, %795, %cst_331 [1] : vector<8x8xf32> to vector<8xf32>
    %797 = vector.shape_cast %796 : vector<8xf32> to vector<8x1xf32>
    %cst_332 = arith.constant 1.000000e+00 : f32
    %798 = vector.broadcast %cst_332 : f32 to vector<8x1xf32>
    %799 = arith.divf %798, %797 : vector<8x1xf32>
    %800 = vector.broadcast %799 : vector<8x1xf32> to vector<8x8xf32>
    %801 = arith.mulf %795, %800 : vector<8x8xf32>
    %802 = vector.extract_strided_slice %787 {offsets = [0, 0], sizes = [8, 8], strides = [1, 1]} : vector<8x32xf32> to vector<8x8xf32>
    %cst_333 = arith.constant dense<0.000000e+00> : vector<8x8xf32>
    %803 = tpu.matmul %801, %802, %cst_333 {dimension_numbers = #tpu.dot_dimension_numbers<[1], [0], [0], [1], [0, 0, 1, 1], [], []>} : vector<8x8xf32>, vector<8x8xf32>, vector<8x8xf32> -> vector<8x8xf32>
    %804 = vector.extract_strided_slice %785 {offsets = [0, 8], sizes = [8, 8], strides = [1, 1]} : vector<8x32xf32> to vector<8x8xf32>
    %805 = vector.extract_strided_slice %786 {offsets = [0, 8], sizes = [8, 8], strides = [1, 1]} : vector<8x32xf32> to vector<8x8xf32>
    %cst_334 = arith.constant dense<0.000000e+00> : vector<8x8xf32>
    %806 = tpu.matmul %804, %805, %cst_334 {dimension_numbers = #tpu.dot_dimension_numbers<[1], [1], [0], [0], [0, 0, 1, 0], [], []>} : vector<8x8xf32>, vector<8x8xf32>, vector<8x8xf32> -> vector<8x8xf32>
    %cst_335 = arith.constant dense<0xFF800000> : vector<8xf32>
    %807 = vector.multi_reduction <maximumf>, %806, %cst_335 [1] : vector<8x8xf32> to vector<8xf32>
    %808 = vector.shape_cast %807 : vector<8xf32> to vector<8x1xf32>
    %809 = vector.broadcast %808 : vector<8x1xf32> to vector<8x8xf32>
    %810 = arith.subf %806, %809 : vector<8x8xf32>
    %811 = math.exp %810 : vector<8x8xf32>
    %cst_336 = arith.constant dense<0.000000e+00> : vector<8xf32>
    %812 = vector.multi_reduction <add>, %811, %cst_336 [1] : vector<8x8xf32> to vector<8xf32>
    %813 = vector.shape_cast %812 : vector<8xf32> to vector<8x1xf32>
    %cst_337 = arith.constant 1.000000e+00 : f32
    %814 = vector.broadcast %cst_337 : f32 to vector<8x1xf32>
    %815 = arith.divf %814, %813 : vector<8x1xf32>
    %816 = vector.broadcast %815 : vector<8x1xf32> to vector<8x8xf32>
    %817 = arith.mulf %811, %816 : vector<8x8xf32>
    %818 = vector.extract_strided_slice %787 {offsets = [0, 8], sizes = [8, 8], strides = [1, 1]} : vector<8x32xf32> to vector<8x8xf32>
    %cst_338 = arith.constant dense<0.000000e+00> : vector<8x8xf32>
    %819 = tpu.matmul %817, %818, %cst_338 {dimension_numbers = #tpu.dot_dimension_numbers<[1], [0], [0], [1], [0, 0, 1, 1], [], []>} : vector<8x8xf32>, vector<8x8xf32>, vector<8x8xf32> -> vector<8x8xf32>
    %820 = vector.extract_strided_slice %785 {offsets = [0, 16], sizes = [8, 8], strides = [1, 1]} : vector<8x32xf32> to vector<8x8xf32>
    %821 = vector.extract_strided_slice %786 {offsets = [0, 16], sizes = [8, 8], strides = [1, 1]} : vector<8x32xf32> to vector<8x8xf32>
    %cst_339 = arith.constant dense<0.000000e+00> : vector<8x8xf32>
    %822 = tpu.matmul %820, %821, %cst_339 {dimension_numbers = #tpu.dot_dimension_numbers<[1], [1], [0], [0], [0, 0, 1, 0], [], []>} : vector<8x8xf32>, vector<8x8xf32>, vector<8x8xf32> -> vector<8x8xf32>
    %cst_340 = arith.constant dense<0xFF800000> : vector<8xf32>
    %823 = vector.multi_reduction <maximumf>, %822, %cst_340 [1] : vector<8x8xf32> to vector<8xf32>
    %824 = vector.shape_cast %823 : vector<8xf32> to vector<8x1xf32>
    %825 = vector.broadcast %824 : vector<8x1xf32> to vector<8x8xf32>
    %826 = arith.subf %822, %825 : vector<8x8xf32>
    %827 = math.exp %826 : vector<8x8xf32>
    %cst_341 = arith.constant dense<0.000000e+00> : vector<8xf32>
    %828 = vector.multi_reduction <add>, %827, %cst_341 [1] : vector<8x8xf32> to vector<8xf32>
    %829 = vector.shape_cast %828 : vector<8xf32> to vector<8x1xf32>
    %cst_342 = arith.constant 1.000000e+00 : f32
    %830 = vector.broadcast %cst_342 : f32 to vector<8x1xf32>
    %831 = arith.divf %830, %829 : vector<8x1xf32>
    %832 = vector.broadcast %831 : vector<8x1xf32> to vector<8x8xf32>
    %833 = arith.mulf %827, %832 : vector<8x8xf32>
    %834 = vector.extract_strided_slice %787 {offsets = [0, 16], sizes = [8, 8], strides = [1, 1]} : vector<8x32xf32> to vector<8x8xf32>
    %cst_343 = arith.constant dense<0.000000e+00> : vector<8x8xf32>
    %835 = tpu.matmul %833, %834, %cst_343 {dimension_numbers = #tpu.dot_dimension_numbers<[1], [0], [0], [1], [0, 0, 1, 1], [], []>} : vector<8x8xf32>, vector<8x8xf32>, vector<8x8xf32> -> vector<8x8xf32>
    %836 = vector.extract_strided_slice %785 {offsets = [0, 24], sizes = [8, 8], strides = [1, 1]} : vector<8x32xf32> to vector<8x8xf32>
    %837 = vector.extract_strided_slice %786 {offsets = [0, 24], sizes = [8, 8], strides = [1, 1]} : vector<8x32xf32> to vector<8x8xf32>
    %cst_344 = arith.constant dense<0.000000e+00> : vector<8x8xf32>
    %838 = tpu.matmul %836, %837, %cst_344 {dimension_numbers = #tpu.dot_dimension_numbers<[1], [1], [0], [0], [0, 0, 1, 0], [], []>} : vector<8x8xf32>, vector<8x8xf32>, vector<8x8xf32> -> vector<8x8xf32>
    %cst_345 = arith.constant dense<0xFF800000> : vector<8xf32>
    %839 = vector.multi_reduction <maximumf>, %838, %cst_345 [1] : vector<8x8xf32> to vector<8xf32>
    %840 = vector.shape_cast %839 : vector<8xf32> to vector<8x1xf32>
    %841 = vector.broadcast %840 : vector<8x1xf32> to vector<8x8xf32>
    %842 = arith.subf %838, %841 : vector<8x8xf32>
    %843 = math.exp %842 : vector<8x8xf32>
    %cst_346 = arith.constant dense<0.000000e+00> : vector<8xf32>
    %844 = vector.multi_reduction <add>, %843, %cst_346 [1] : vector<8x8xf32> to vector<8xf32>
    %845 = vector.shape_cast %844 : vector<8xf32> to vector<8x1xf32>
    %cst_347 = arith.constant 1.000000e+00 : f32
    %846 = vector.broadcast %cst_347 : f32 to vector<8x1xf32>
    %847 = arith.divf %846, %845 : vector<8x1xf32>
    %848 = vector.broadcast %847 : vector<8x1xf32> to vector<8x8xf32>
    %849 = arith.mulf %843, %848 : vector<8x8xf32>
    %850 = vector.extract_strided_slice %787 {offsets = [0, 24], sizes = [8, 8], strides = [1, 1]} : vector<8x32xf32> to vector<8x8xf32>
    %cst_348 = arith.constant dense<0.000000e+00> : vector<8x8xf32>
    %851 = tpu.matmul %849, %850, %cst_348 {dimension_numbers = #tpu.dot_dimension_numbers<[1], [0], [0], [1], [0, 0, 1, 1], [], []>} : vector<8x8xf32>, vector<8x8xf32>, vector<8x8xf32> -> vector<8x8xf32>
    %852 = tpu.concatenate %803, %819, %835, %851 in 1 : vector<8x8xf32>, vector<8x8xf32>, vector<8x8xf32>, vector<8x8xf32> -> vector<8x32xf32>
    %cst_349 = arith.constant dense<0.000000e+00> : vector<8x32xf32>
    %853 = tpu.matmul %852, %783, %cst_349 {dimension_numbers = #tpu.dot_dimension_numbers<[1], [0], [0], [1], [0, 0, 1, 1], [], []>} : vector<8x32xf32>, vector<32x32xf32>, vector<8x32xf32> -> vector<8x32xf32>
    %854 = vector.extract_strided_slice %777 {offsets = [0, 0], sizes = [1, 32], strides = [1, 1]} : vector<2x32xf32> to vector<1x32xf32>
    %855 = vector.extract_strided_slice %779 {offsets = [0, 0], sizes = [1, 32], strides = [1, 1]} : vector<2x32xf32> to vector<1x32xf32>
    %856 = arith.addf %775, %853 : vector<8x32xf32>
    %cst_350 = arith.constant dense<0.000000e+00> : vector<8xf32>
    %857 = vector.multi_reduction <add>, %856, %cst_350 [1] : vector<8x32xf32> to vector<8xf32>
    %858 = vector.shape_cast %857 : vector<8xf32> to vector<8x1xf32>
    %cst_351 = arith.constant 3.200000e+01 : f32
    %859 = vector.broadcast %cst_351 : f32 to vector<8x1xf32>
    %860 = arith.divf %858, %859 : vector<8x1xf32>
    %861 = vector.broadcast %860 : vector<8x1xf32> to vector<8x32xf32>
    %862 = arith.subf %856, %861 : vector<8x32xf32>
    %863 = arith.mulf %862, %862 : vector<8x32xf32>
    %cst_352 = arith.constant dense<0.000000e+00> : vector<8xf32>
    %864 = vector.multi_reduction <add>, %863, %cst_352 [1] : vector<8x32xf32> to vector<8xf32>
    %865 = vector.shape_cast %864 : vector<8xf32> to vector<8x1xf32>
    %cst_353 = arith.constant 3.200000e+01 : f32
    %866 = vector.broadcast %cst_353 : f32 to vector<8x1xf32>
    %867 = arith.divf %865, %866 : vector<8x1xf32>
    %cst_354 = arith.constant 9.99999974E-6 : f32
    %868 = vector.broadcast %cst_354 : f32 to vector<8x1xf32>
    %869 = arith.addf %867, %868 : vector<8x1xf32>
    %870 = math.rsqrt %869 : vector<8x1xf32>
    %871 = vector.broadcast %870 : vector<8x1xf32> to vector<8x32xf32>
    %872 = arith.mulf %862, %871 : vector<8x32xf32>
    %873 = vector.broadcast %854 : vector<1x32xf32> to vector<8x32xf32>
    %874 = arith.mulf %872, %873 : vector<8x32xf32>
    %875 = vector.broadcast %855 : vector<1x32xf32> to vector<8x32xf32>
    %876 = arith.addf %874, %875 : vector<8x32xf32>
    %c0_355 = arith.constant 0 : index
    %c0_356 = arith.constant 0 : index
    %c0_357 = arith.constant 0 : index
    %877 = vector.load %arg4[%c0_355, %c0_356, %c0_357] : memref<2x32x64xf32, #tpu.memory_space<vmem>>, vector<1x32x64xf32>
    %878 = vector.shape_cast %877 : vector<1x32x64xf32> to vector<32x64xf32>
    %c0_358 = arith.constant 0 : index
    %c0_359 = arith.constant 0 : index
    %c0_360 = arith.constant 0 : index
    %879 = vector.load %arg5[%c0_358, %c0_359, %c0_360] : memref<2x1x64xf32, #tpu.memory_space<vmem>>, vector<1x1x64xf32>
    %880 = vector.shape_cast %879 : vector<1x1x64xf32> to vector<1x64xf32>
    %c0_361 = arith.constant 0 : index
    %c0_362 = arith.constant 0 : index
    %c0_363 = arith.constant 0 : index
    %881 = vector.load %arg6[%c0_361, %c0_362, %c0_363] : memref<2x64x32xf32, #tpu.memory_space<vmem>>, vector<1x64x32xf32>
    %882 = vector.shape_cast %881 : vector<1x64x32xf32> to vector<64x32xf32>
    %c0_364 = arith.constant 0 : index
    %c0_365 = arith.constant 0 : index
    %c0_366 = arith.constant 0 : index
    %883 = vector.load %arg7[%c0_364, %c0_365, %c0_366] : memref<2x1x32xf32, #tpu.memory_space<vmem>>, vector<1x1x32xf32>
    %884 = vector.shape_cast %883 : vector<1x1x32xf32> to vector<1x32xf32>
    %cst_367 = arith.constant dense<0.000000e+00> : vector<8x64xf32>
    %885 = tpu.matmul %876, %878, %cst_367 {dimension_numbers = #tpu.dot_dimension_numbers<[1], [0], [0], [1], [0, 0, 1, 1], [], []>} : vector<8x32xf32>, vector<32x64xf32>, vector<8x64xf32> -> vector<8x64xf32>
    %886 = vector.broadcast %880 : vector<1x64xf32> to vector<8x64xf32>
    %887 = arith.addf %885, %886 : vector<8x64xf32>
    %cst_368 = arith.constant 0.000000e+00 : f32
    %888 = vector.broadcast %cst_368 : f32 to vector<8x64xf32>
    %889 = arith.maximumf %887, %888 : vector<8x64xf32>
    %cst_369 = arith.constant dense<0.000000e+00> : vector<8x32xf32>
    %890 = tpu.matmul %889, %882, %cst_369 {dimension_numbers = #tpu.dot_dimension_numbers<[1], [0], [0], [1], [0, 0, 1, 1], [], []>} : vector<8x64xf32>, vector<64x32xf32>, vector<8x32xf32> -> vector<8x32xf32>
    %891 = vector.broadcast %884 : vector<1x32xf32> to vector<8x32xf32>
    %892 = arith.addf %890, %891 : vector<8x32xf32>
    %893 = vector.extract_strided_slice %777 {offsets = [1, 0], sizes = [1, 32], strides = [1, 1]} : vector<2x32xf32> to vector<1x32xf32>
    %894 = vector.extract_strided_slice %779 {offsets = [1, 0], sizes = [1, 32], strides = [1, 1]} : vector<2x32xf32> to vector<1x32xf32>
    %895 = arith.addf %876, %892 : vector<8x32xf32>
    %cst_370 = arith.constant dense<0.000000e+00> : vector<8xf32>
    %896 = vector.multi_reduction <add>, %895, %cst_370 [1] : vector<8x32xf32> to vector<8xf32>
    %897 = vector.shape_cast %896 : vector<8xf32> to vector<8x1xf32>
    %cst_371 = arith.constant 3.200000e+01 : f32
    %898 = vector.broadcast %cst_371 : f32 to vector<8x1xf32>
    %899 = arith.divf %897, %898 : vector<8x1xf32>
    %900 = vector.broadcast %899 : vector<8x1xf32> to vector<8x32xf32>
    %901 = arith.subf %895, %900 : vector<8x32xf32>
    %902 = arith.mulf %901, %901 : vector<8x32xf32>
    %cst_372 = arith.constant dense<0.000000e+00> : vector<8xf32>
    %903 = vector.multi_reduction <add>, %902, %cst_372 [1] : vector<8x32xf32> to vector<8xf32>
    %904 = vector.shape_cast %903 : vector<8xf32> to vector<8x1xf32>
    %cst_373 = arith.constant 3.200000e+01 : f32
    %905 = vector.broadcast %cst_373 : f32 to vector<8x1xf32>
    %906 = arith.divf %904, %905 : vector<8x1xf32>
    %cst_374 = arith.constant 9.99999974E-6 : f32
    %907 = vector.broadcast %cst_374 : f32 to vector<8x1xf32>
    %908 = arith.addf %906, %907 : vector<8x1xf32>
    %909 = math.rsqrt %908 : vector<8x1xf32>
    %910 = vector.broadcast %909 : vector<8x1xf32> to vector<8x32xf32>
    %911 = arith.mulf %901, %910 : vector<8x32xf32>
    %912 = vector.broadcast %893 : vector<1x32xf32> to vector<8x32xf32>
    %913 = arith.mulf %911, %912 : vector<8x32xf32>
    %914 = vector.broadcast %894 : vector<1x32xf32> to vector<8x32xf32>
    %915 = arith.addf %913, %914 : vector<8x32xf32>
    %c1_375 = arith.constant 1 : index
    %c0_376 = arith.constant 0 : index
    %c0_377 = arith.constant 0 : index
    %916 = vector.load %arg8[%c1_375, %c0_376, %c0_377] : memref<2x2x32xf32, #tpu.memory_space<vmem>>, vector<1x2x32xf32>
    %917 = vector.shape_cast %916 : vector<1x2x32xf32> to vector<2x32xf32>
    %c1_378 = arith.constant 1 : index
    %c0_379 = arith.constant 0 : index
    %c0_380 = arith.constant 0 : index
    %918 = vector.load %arg9[%c1_378, %c0_379, %c0_380] : memref<2x2x32xf32, #tpu.memory_space<vmem>>, vector<1x2x32xf32>
    %919 = vector.shape_cast %918 : vector<1x2x32xf32> to vector<2x32xf32>
    %c1_381 = arith.constant 1 : index
    %c0_382 = arith.constant 0 : index
    %c0_383 = arith.constant 0 : index
    %920 = vector.load %arg2[%c1_381, %c0_382, %c0_383] : memref<2x32x96xf32, #tpu.memory_space<vmem>>, vector<1x32x96xf32>
    %921 = vector.shape_cast %920 : vector<1x32x96xf32> to vector<32x96xf32>
    %c1_384 = arith.constant 1 : index
    %c0_385 = arith.constant 0 : index
    %c0_386 = arith.constant 0 : index
    %922 = vector.load %arg3[%c1_384, %c0_385, %c0_386] : memref<2x32x32xf32, #tpu.memory_space<vmem>>, vector<1x32x32xf32>
    %923 = vector.shape_cast %922 : vector<1x32x32xf32> to vector<32x32xf32>
    %cst_387 = arith.constant dense<0.000000e+00> : vector<8x96xf32>
    %924 = tpu.matmul %915, %921, %cst_387 {dimension_numbers = #tpu.dot_dimension_numbers<[1], [0], [0], [1], [0, 0, 1, 1], [], []>} : vector<8x32xf32>, vector<32x96xf32>, vector<8x96xf32> -> vector<8x96xf32>
    %925 = vector.extract_strided_slice %924 {offsets = [0, 0], sizes = [8, 32], strides = [1, 1]} : vector<8x96xf32> to vector<8x32xf32>
    %926 = vector.extract_strided_slice %924 {offsets = [0, 32], sizes = [8, 32], strides = [1, 1]} : vector<8x96xf32> to vector<8x32xf32>
    %927 = vector.extract_strided_slice %924 {offsets = [0, 64], sizes = [8, 32], strides = [1, 1]} : vector<8x96xf32> to vector<8x32xf32>
    %928 = vector.extract_strided_slice %925 {offsets = [0, 0], sizes = [8, 8], strides = [1, 1]} : vector<8x32xf32> to vector<8x8xf32>
    %929 = vector.extract_strided_slice %926 {offsets = [0, 0], sizes = [8, 8], strides = [1, 1]} : vector<8x32xf32> to vector<8x8xf32>
    %cst_388 = arith.constant dense<0.000000e+00> : vector<8x8xf32>
    %930 = tpu.matmul %928, %929, %cst_388 {dimension_numbers = #tpu.dot_dimension_numbers<[1], [1], [0], [0], [0, 0, 1, 0], [], []>} : vector<8x8xf32>, vector<8x8xf32>, vector<8x8xf32> -> vector<8x8xf32>
    %cst_389 = arith.constant dense<0xFF800000> : vector<8xf32>
    %931 = vector.multi_reduction <maximumf>, %930, %cst_389 [1] : vector<8x8xf32> to vector<8xf32>
    %932 = vector.shape_cast %931 : vector<8xf32> to vector<8x1xf32>
    %933 = vector.broadcast %932 : vector<8x1xf32> to vector<8x8xf32>
    %934 = arith.subf %930, %933 : vector<8x8xf32>
    %935 = math.exp %934 : vector<8x8xf32>
    %cst_390 = arith.constant dense<0.000000e+00> : vector<8xf32>
    %936 = vector.multi_reduction <add>, %935, %cst_390 [1] : vector<8x8xf32> to vector<8xf32>
    %937 = vector.shape_cast %936 : vector<8xf32> to vector<8x1xf32>
    %cst_391 = arith.constant 1.000000e+00 : f32
    %938 = vector.broadcast %cst_391 : f32 to vector<8x1xf32>
    %939 = arith.divf %938, %937 : vector<8x1xf32>
    %940 = vector.broadcast %939 : vector<8x1xf32> to vector<8x8xf32>
    %941 = arith.mulf %935, %940 : vector<8x8xf32>
    %942 = vector.extract_strided_slice %927 {offsets = [0, 0], sizes = [8, 8], strides = [1, 1]} : vector<8x32xf32> to vector<8x8xf32>
    %cst_392 = arith.constant dense<0.000000e+00> : vector<8x8xf32>
    %943 = tpu.matmul %941, %942, %cst_392 {dimension_numbers = #tpu.dot_dimension_numbers<[1], [0], [0], [1], [0, 0, 1, 1], [], []>} : vector<8x8xf32>, vector<8x8xf32>, vector<8x8xf32> -> vector<8x8xf32>
    %944 = vector.extract_strided_slice %925 {offsets = [0, 8], sizes = [8, 8], strides = [1, 1]} : vector<8x32xf32> to vector<8x8xf32>
    %945 = vector.extract_strided_slice %926 {offsets = [0, 8], sizes = [8, 8], strides = [1, 1]} : vector<8x32xf32> to vector<8x8xf32>
    %cst_393 = arith.constant dense<0.000000e+00> : vector<8x8xf32>
    %946 = tpu.matmul %944, %945, %cst_393 {dimension_numbers = #tpu.dot_dimension_numbers<[1], [1], [0], [0], [0, 0, 1, 0], [], []>} : vector<8x8xf32>, vector<8x8xf32>, vector<8x8xf32> -> vector<8x8xf32>
    %cst_394 = arith.constant dense<0xFF800000> : vector<8xf32>
    %947 = vector.multi_reduction <maximumf>, %946, %cst_394 [1] : vector<8x8xf32> to vector<8xf32>
    %948 = vector.shape_cast %947 : vector<8xf32> to vector<8x1xf32>
    %949 = vector.broadcast %948 : vector<8x1xf32> to vector<8x8xf32>
    %950 = arith.subf %946, %949 : vector<8x8xf32>
    %951 = math.exp %950 : vector<8x8xf32>
    %cst_395 = arith.constant dense<0.000000e+00> : vector<8xf32>
    %952 = vector.multi_reduction <add>, %951, %cst_395 [1] : vector<8x8xf32> to vector<8xf32>
    %953 = vector.shape_cast %952 : vector<8xf32> to vector<8x1xf32>
    %cst_396 = arith.constant 1.000000e+00 : f32
    %954 = vector.broadcast %cst_396 : f32 to vector<8x1xf32>
    %955 = arith.divf %954, %953 : vector<8x1xf32>
    %956 = vector.broadcast %955 : vector<8x1xf32> to vector<8x8xf32>
    %957 = arith.mulf %951, %956 : vector<8x8xf32>
    %958 = vector.extract_strided_slice %927 {offsets = [0, 8], sizes = [8, 8], strides = [1, 1]} : vector<8x32xf32> to vector<8x8xf32>
    %cst_397 = arith.constant dense<0.000000e+00> : vector<8x8xf32>
    %959 = tpu.matmul %957, %958, %cst_397 {dimension_numbers = #tpu.dot_dimension_numbers<[1], [0], [0], [1], [0, 0, 1, 1], [], []>} : vector<8x8xf32>, vector<8x8xf32>, vector<8x8xf32> -> vector<8x8xf32>
    %960 = vector.extract_strided_slice %925 {offsets = [0, 16], sizes = [8, 8], strides = [1, 1]} : vector<8x32xf32> to vector<8x8xf32>
    %961 = vector.extract_strided_slice %926 {offsets = [0, 16], sizes = [8, 8], strides = [1, 1]} : vector<8x32xf32> to vector<8x8xf32>
    %cst_398 = arith.constant dense<0.000000e+00> : vector<8x8xf32>
    %962 = tpu.matmul %960, %961, %cst_398 {dimension_numbers = #tpu.dot_dimension_numbers<[1], [1], [0], [0], [0, 0, 1, 0], [], []>} : vector<8x8xf32>, vector<8x8xf32>, vector<8x8xf32> -> vector<8x8xf32>
    %cst_399 = arith.constant dense<0xFF800000> : vector<8xf32>
    %963 = vector.multi_reduction <maximumf>, %962, %cst_399 [1] : vector<8x8xf32> to vector<8xf32>
    %964 = vector.shape_cast %963 : vector<8xf32> to vector<8x1xf32>
    %965 = vector.broadcast %964 : vector<8x1xf32> to vector<8x8xf32>
    %966 = arith.subf %962, %965 : vector<8x8xf32>
    %967 = math.exp %966 : vector<8x8xf32>
    %cst_400 = arith.constant dense<0.000000e+00> : vector<8xf32>
    %968 = vector.multi_reduction <add>, %967, %cst_400 [1] : vector<8x8xf32> to vector<8xf32>
    %969 = vector.shape_cast %968 : vector<8xf32> to vector<8x1xf32>
    %cst_401 = arith.constant 1.000000e+00 : f32
    %970 = vector.broadcast %cst_401 : f32 to vector<8x1xf32>
    %971 = arith.divf %970, %969 : vector<8x1xf32>
    %972 = vector.broadcast %971 : vector<8x1xf32> to vector<8x8xf32>
    %973 = arith.mulf %967, %972 : vector<8x8xf32>
    %974 = vector.extract_strided_slice %927 {offsets = [0, 16], sizes = [8, 8], strides = [1, 1]} : vector<8x32xf32> to vector<8x8xf32>
    %cst_402 = arith.constant dense<0.000000e+00> : vector<8x8xf32>
    %975 = tpu.matmul %973, %974, %cst_402 {dimension_numbers = #tpu.dot_dimension_numbers<[1], [0], [0], [1], [0, 0, 1, 1], [], []>} : vector<8x8xf32>, vector<8x8xf32>, vector<8x8xf32> -> vector<8x8xf32>
    %976 = vector.extract_strided_slice %925 {offsets = [0, 24], sizes = [8, 8], strides = [1, 1]} : vector<8x32xf32> to vector<8x8xf32>
    %977 = vector.extract_strided_slice %926 {offsets = [0, 24], sizes = [8, 8], strides = [1, 1]} : vector<8x32xf32> to vector<8x8xf32>
    %cst_403 = arith.constant dense<0.000000e+00> : vector<8x8xf32>
    %978 = tpu.matmul %976, %977, %cst_403 {dimension_numbers = #tpu.dot_dimension_numbers<[1], [1], [0], [0], [0, 0, 1, 0], [], []>} : vector<8x8xf32>, vector<8x8xf32>, vector<8x8xf32> -> vector<8x8xf32>
    %cst_404 = arith.constant dense<0xFF800000> : vector<8xf32>
    %979 = vector.multi_reduction <maximumf>, %978, %cst_404 [1] : vector<8x8xf32> to vector<8xf32>
    %980 = vector.shape_cast %979 : vector<8xf32> to vector<8x1xf32>
    %981 = vector.broadcast %980 : vector<8x1xf32> to vector<8x8xf32>
    %982 = arith.subf %978, %981 : vector<8x8xf32>
    %983 = math.exp %982 : vector<8x8xf32>
    %cst_405 = arith.constant dense<0.000000e+00> : vector<8xf32>
    %984 = vector.multi_reduction <add>, %983, %cst_405 [1] : vector<8x8xf32> to vector<8xf32>
    %985 = vector.shape_cast %984 : vector<8xf32> to vector<8x1xf32>
    %cst_406 = arith.constant 1.000000e+00 : f32
    %986 = vector.broadcast %cst_406 : f32 to vector<8x1xf32>
    %987 = arith.divf %986, %985 : vector<8x1xf32>
    %988 = vector.broadcast %987 : vector<8x1xf32> to vector<8x8xf32>
    %989 = arith.mulf %983, %988 : vector<8x8xf32>
    %990 = vector.extract_strided_slice %927 {offsets = [0, 24], sizes = [8, 8], strides = [1, 1]} : vector<8x32xf32> to vector<8x8xf32>
    %cst_407 = arith.constant dense<0.000000e+00> : vector<8x8xf32>
    %991 = tpu.matmul %989, %990, %cst_407 {dimension_numbers = #tpu.dot_dimension_numbers<[1], [0], [0], [1], [0, 0, 1, 1], [], []>} : vector<8x8xf32>, vector<8x8xf32>, vector<8x8xf32> -> vector<8x8xf32>
    %992 = tpu.concatenate %943, %959, %975, %991 in 1 : vector<8x8xf32>, vector<8x8xf32>, vector<8x8xf32>, vector<8x8xf32> -> vector<8x32xf32>
    %cst_408 = arith.constant dense<0.000000e+00> : vector<8x32xf32>
    %993 = tpu.matmul %992, %923, %cst_408 {dimension_numbers = #tpu.dot_dimension_numbers<[1], [0], [0], [1], [0, 0, 1, 1], [], []>} : vector<8x32xf32>, vector<32x32xf32>, vector<8x32xf32> -> vector<8x32xf32>
    %994 = vector.extract_strided_slice %917 {offsets = [0, 0], sizes = [1, 32], strides = [1, 1]} : vector<2x32xf32> to vector<1x32xf32>
    %995 = vector.extract_strided_slice %919 {offsets = [0, 0], sizes = [1, 32], strides = [1, 1]} : vector<2x32xf32> to vector<1x32xf32>
    %996 = arith.addf %915, %993 : vector<8x32xf32>
    %cst_409 = arith.constant dense<0.000000e+00> : vector<8xf32>
    %997 = vector.multi_reduction <add>, %996, %cst_409 [1] : vector<8x32xf32> to vector<8xf32>
    %998 = vector.shape_cast %997 : vector<8xf32> to vector<8x1xf32>
    %cst_410 = arith.constant 3.200000e+01 : f32
    %999 = vector.broadcast %cst_410 : f32 to vector<8x1xf32>
    %1000 = arith.divf %998, %999 : vector<8x1xf32>
    %1001 = vector.broadcast %1000 : vector<8x1xf32> to vector<8x32xf32>
    %1002 = arith.subf %996, %1001 : vector<8x32xf32>
    %1003 = arith.mulf %1002, %1002 : vector<8x32xf32>
    %cst_411 = arith.constant dense<0.000000e+00> : vector<8xf32>
    %1004 = vector.multi_reduction <add>, %1003, %cst_411 [1] : vector<8x32xf32> to vector<8xf32>
    %1005 = vector.shape_cast %1004 : vector<8xf32> to vector<8x1xf32>
    %cst_412 = arith.constant 3.200000e+01 : f32
    %1006 = vector.broadcast %cst_412 : f32 to vector<8x1xf32>
    %1007 = arith.divf %1005, %1006 : vector<8x1xf32>
    %cst_413 = arith.constant 9.99999974E-6 : f32
    %1008 = vector.broadcast %cst_413 : f32 to vector<8x1xf32>
    %1009 = arith.addf %1007, %1008 : vector<8x1xf32>
    %1010 = math.rsqrt %1009 : vector<8x1xf32>
    %1011 = vector.broadcast %1010 : vector<8x1xf32> to vector<8x32xf32>
    %1012 = arith.mulf %1002, %1011 : vector<8x32xf32>
    %1013 = vector.broadcast %994 : vector<1x32xf32> to vector<8x32xf32>
    %1014 = arith.mulf %1012, %1013 : vector<8x32xf32>
    %1015 = vector.broadcast %995 : vector<1x32xf32> to vector<8x32xf32>
    %1016 = arith.addf %1014, %1015 : vector<8x32xf32>
    %c1_414 = arith.constant 1 : index
    %c0_415 = arith.constant 0 : index
    %c0_416 = arith.constant 0 : index
    %1017 = vector.load %arg4[%c1_414, %c0_415, %c0_416] : memref<2x32x64xf32, #tpu.memory_space<vmem>>, vector<1x32x64xf32>
    %1018 = vector.shape_cast %1017 : vector<1x32x64xf32> to vector<32x64xf32>
    %c1_417 = arith.constant 1 : index
    %c0_418 = arith.constant 0 : index
    %c0_419 = arith.constant 0 : index
    %1019 = vector.load %arg5[%c1_417, %c0_418, %c0_419] : memref<2x1x64xf32, #tpu.memory_space<vmem>>, vector<1x1x64xf32>
    %1020 = vector.shape_cast %1019 : vector<1x1x64xf32> to vector<1x64xf32>
    %c1_420 = arith.constant 1 : index
    %c0_421 = arith.constant 0 : index
    %c0_422 = arith.constant 0 : index
    %1021 = vector.load %arg6[%c1_420, %c0_421, %c0_422] : memref<2x64x32xf32, #tpu.memory_space<vmem>>, vector<1x64x32xf32>
    %1022 = vector.shape_cast %1021 : vector<1x64x32xf32> to vector<64x32xf32>
    %c1_423 = arith.constant 1 : index
    %c0_424 = arith.constant 0 : index
    %c0_425 = arith.constant 0 : index
    %1023 = vector.load %arg7[%c1_423, %c0_424, %c0_425] : memref<2x1x32xf32, #tpu.memory_space<vmem>>, vector<1x1x32xf32>
    %1024 = vector.shape_cast %1023 : vector<1x1x32xf32> to vector<1x32xf32>
    %cst_426 = arith.constant dense<0.000000e+00> : vector<8x64xf32>
    %1025 = tpu.matmul %1016, %1018, %cst_426 {dimension_numbers = #tpu.dot_dimension_numbers<[1], [0], [0], [1], [0, 0, 1, 1], [], []>} : vector<8x32xf32>, vector<32x64xf32>, vector<8x64xf32> -> vector<8x64xf32>
    %1026 = vector.broadcast %1020 : vector<1x64xf32> to vector<8x64xf32>
    %1027 = arith.addf %1025, %1026 : vector<8x64xf32>
    %cst_427 = arith.constant 0.000000e+00 : f32
    %1028 = vector.broadcast %cst_427 : f32 to vector<8x64xf32>
    %1029 = arith.maximumf %1027, %1028 : vector<8x64xf32>
    %cst_428 = arith.constant dense<0.000000e+00> : vector<8x32xf32>
    %1030 = tpu.matmul %1029, %1022, %cst_428 {dimension_numbers = #tpu.dot_dimension_numbers<[1], [0], [0], [1], [0, 0, 1, 1], [], []>} : vector<8x64xf32>, vector<64x32xf32>, vector<8x32xf32> -> vector<8x32xf32>
    %1031 = vector.broadcast %1024 : vector<1x32xf32> to vector<8x32xf32>
    %1032 = arith.addf %1030, %1031 : vector<8x32xf32>
    %1033 = vector.extract_strided_slice %917 {offsets = [1, 0], sizes = [1, 32], strides = [1, 1]} : vector<2x32xf32> to vector<1x32xf32>
    %1034 = vector.extract_strided_slice %919 {offsets = [1, 0], sizes = [1, 32], strides = [1, 1]} : vector<2x32xf32> to vector<1x32xf32>
    %1035 = arith.addf %1016, %1032 : vector<8x32xf32>
    %cst_429 = arith.constant dense<0.000000e+00> : vector<8xf32>
    %1036 = vector.multi_reduction <add>, %1035, %cst_429 [1] : vector<8x32xf32> to vector<8xf32>
    %1037 = vector.shape_cast %1036 : vector<8xf32> to vector<8x1xf32>
    %cst_430 = arith.constant 3.200000e+01 : f32
    %1038 = vector.broadcast %cst_430 : f32 to vector<8x1xf32>
    %1039 = arith.divf %1037, %1038 : vector<8x1xf32>
    %1040 = vector.broadcast %1039 : vector<8x1xf32> to vector<8x32xf32>
    %1041 = arith.subf %1035, %1040 : vector<8x32xf32>
    %1042 = arith.mulf %1041, %1041 : vector<8x32xf32>
    %cst_431 = arith.constant dense<0.000000e+00> : vector<8xf32>
    %1043 = vector.multi_reduction <add>, %1042, %cst_431 [1] : vector<8x32xf32> to vector<8xf32>
    %1044 = vector.shape_cast %1043 : vector<8xf32> to vector<8x1xf32>
    %cst_432 = arith.constant 3.200000e+01 : f32
    %1045 = vector.broadcast %cst_432 : f32 to vector<8x1xf32>
    %1046 = arith.divf %1044, %1045 : vector<8x1xf32>
    %cst_433 = arith.constant 9.99999974E-6 : f32
    %1047 = vector.broadcast %cst_433 : f32 to vector<8x1xf32>
    %1048 = arith.addf %1046, %1047 : vector<8x1xf32>
    %1049 = math.rsqrt %1048 : vector<8x1xf32>
    %1050 = vector.broadcast %1049 : vector<8x1xf32> to vector<8x32xf32>
    %1051 = arith.mulf %1041, %1050 : vector<8x32xf32>
    %1052 = vector.broadcast %1033 : vector<1x32xf32> to vector<8x32xf32>
    %1053 = arith.mulf %1051, %1052 : vector<8x32xf32>
    %1054 = vector.broadcast %1034 : vector<1x32xf32> to vector<8x32xf32>
    %1055 = arith.addf %1053, %1054 : vector<8x32xf32>
    %c8_434 = arith.constant 8 : index
    %c0_435 = arith.constant 0 : index
    %1056 = vector.load %arg1[%c8_434, %c0_435] : memref<16x32xf32, #tpu.memory_space<vmem>>, vector<8x32xf32>
    %c0_436 = arith.constant 0 : index
    %c0_437 = arith.constant 0 : index
    %c0_438 = arith.constant 0 : index
    %1057 = vector.load %arg19[%c0_436, %c0_437, %c0_438] : memref<2x3x32xf32, #tpu.memory_space<vmem>>, vector<1x3x32xf32>
    %1058 = vector.shape_cast %1057 : vector<1x3x32xf32> to vector<3x32xf32>
    %c0_439 = arith.constant 0 : index
    %c0_440 = arith.constant 0 : index
    %c0_441 = arith.constant 0 : index
    %1059 = vector.load %arg20[%c0_439, %c0_440, %c0_441] : memref<2x3x32xf32, #tpu.memory_space<vmem>>, vector<1x3x32xf32>
    %1060 = vector.shape_cast %1059 : vector<1x3x32xf32> to vector<3x32xf32>
    %c0_442 = arith.constant 0 : index
    %c0_443 = arith.constant 0 : index
    %c0_444 = arith.constant 0 : index
    %1061 = vector.load %arg10[%c0_442, %c0_443, %c0_444] : memref<2x32x96xf32, #tpu.memory_space<vmem>>, vector<1x32x96xf32>
    %1062 = vector.shape_cast %1061 : vector<1x32x96xf32> to vector<32x96xf32>
    %c0_445 = arith.constant 0 : index
    %c0_446 = arith.constant 0 : index
    %c0_447 = arith.constant 0 : index
    %1063 = vector.load %arg11[%c0_445, %c0_446, %c0_447] : memref<2x32x32xf32, #tpu.memory_space<vmem>>, vector<1x32x32xf32>
    %1064 = vector.shape_cast %1063 : vector<1x32x32xf32> to vector<32x32xf32>
    %cst_448 = arith.constant dense<0.000000e+00> : vector<8x96xf32>
    %1065 = tpu.matmul %1056, %1062, %cst_448 {dimension_numbers = #tpu.dot_dimension_numbers<[1], [0], [0], [1], [0, 0, 1, 1], [], []>} : vector<8x32xf32>, vector<32x96xf32>, vector<8x96xf32> -> vector<8x96xf32>
    %1066 = vector.extract_strided_slice %1065 {offsets = [0, 0], sizes = [8, 32], strides = [1, 1]} : vector<8x96xf32> to vector<8x32xf32>
    %1067 = vector.extract_strided_slice %1065 {offsets = [0, 32], sizes = [8, 32], strides = [1, 1]} : vector<8x96xf32> to vector<8x32xf32>
    %1068 = vector.extract_strided_slice %1065 {offsets = [0, 64], sizes = [8, 32], strides = [1, 1]} : vector<8x96xf32> to vector<8x32xf32>
    %1069 = vector.extract_strided_slice %1066 {offsets = [0, 0], sizes = [8, 8], strides = [1, 1]} : vector<8x32xf32> to vector<8x8xf32>
    %1070 = vector.extract_strided_slice %1067 {offsets = [0, 0], sizes = [8, 8], strides = [1, 1]} : vector<8x32xf32> to vector<8x8xf32>
    %cst_449 = arith.constant dense<0.000000e+00> : vector<8x8xf32>
    %1071 = tpu.matmul %1069, %1070, %cst_449 {dimension_numbers = #tpu.dot_dimension_numbers<[1], [1], [0], [0], [0, 0, 1, 0], [], []>} : vector<8x8xf32>, vector<8x8xf32>, vector<8x8xf32> -> vector<8x8xf32>
    %1072 = arith.addf %1071, %5 : vector<8x8xf32>
    %cst_450 = arith.constant dense<0xFF800000> : vector<8xf32>
    %1073 = vector.multi_reduction <maximumf>, %1072, %cst_450 [1] : vector<8x8xf32> to vector<8xf32>
    %1074 = vector.shape_cast %1073 : vector<8xf32> to vector<8x1xf32>
    %1075 = vector.broadcast %1074 : vector<8x1xf32> to vector<8x8xf32>
    %1076 = arith.subf %1072, %1075 : vector<8x8xf32>
    %1077 = math.exp %1076 : vector<8x8xf32>
    %cst_451 = arith.constant dense<0.000000e+00> : vector<8xf32>
    %1078 = vector.multi_reduction <add>, %1077, %cst_451 [1] : vector<8x8xf32> to vector<8xf32>
    %1079 = vector.shape_cast %1078 : vector<8xf32> to vector<8x1xf32>
    %cst_452 = arith.constant 1.000000e+00 : f32
    %1080 = vector.broadcast %cst_452 : f32 to vector<8x1xf32>
    %1081 = arith.divf %1080, %1079 : vector<8x1xf32>
    %1082 = vector.broadcast %1081 : vector<8x1xf32> to vector<8x8xf32>
    %1083 = arith.mulf %1077, %1082 : vector<8x8xf32>
    %1084 = vector.extract_strided_slice %1068 {offsets = [0, 0], sizes = [8, 8], strides = [1, 1]} : vector<8x32xf32> to vector<8x8xf32>
    %cst_453 = arith.constant dense<0.000000e+00> : vector<8x8xf32>
    %1085 = tpu.matmul %1083, %1084, %cst_453 {dimension_numbers = #tpu.dot_dimension_numbers<[1], [0], [0], [1], [0, 0, 1, 1], [], []>} : vector<8x8xf32>, vector<8x8xf32>, vector<8x8xf32> -> vector<8x8xf32>
    %1086 = vector.extract_strided_slice %1066 {offsets = [0, 8], sizes = [8, 8], strides = [1, 1]} : vector<8x32xf32> to vector<8x8xf32>
    %1087 = vector.extract_strided_slice %1067 {offsets = [0, 8], sizes = [8, 8], strides = [1, 1]} : vector<8x32xf32> to vector<8x8xf32>
    %cst_454 = arith.constant dense<0.000000e+00> : vector<8x8xf32>
    %1088 = tpu.matmul %1086, %1087, %cst_454 {dimension_numbers = #tpu.dot_dimension_numbers<[1], [1], [0], [0], [0, 0, 1, 0], [], []>} : vector<8x8xf32>, vector<8x8xf32>, vector<8x8xf32> -> vector<8x8xf32>
    %1089 = arith.addf %1088, %5 : vector<8x8xf32>
    %cst_455 = arith.constant dense<0xFF800000> : vector<8xf32>
    %1090 = vector.multi_reduction <maximumf>, %1089, %cst_455 [1] : vector<8x8xf32> to vector<8xf32>
    %1091 = vector.shape_cast %1090 : vector<8xf32> to vector<8x1xf32>
    %1092 = vector.broadcast %1091 : vector<8x1xf32> to vector<8x8xf32>
    %1093 = arith.subf %1089, %1092 : vector<8x8xf32>
    %1094 = math.exp %1093 : vector<8x8xf32>
    %cst_456 = arith.constant dense<0.000000e+00> : vector<8xf32>
    %1095 = vector.multi_reduction <add>, %1094, %cst_456 [1] : vector<8x8xf32> to vector<8xf32>
    %1096 = vector.shape_cast %1095 : vector<8xf32> to vector<8x1xf32>
    %cst_457 = arith.constant 1.000000e+00 : f32
    %1097 = vector.broadcast %cst_457 : f32 to vector<8x1xf32>
    %1098 = arith.divf %1097, %1096 : vector<8x1xf32>
    %1099 = vector.broadcast %1098 : vector<8x1xf32> to vector<8x8xf32>
    %1100 = arith.mulf %1094, %1099 : vector<8x8xf32>
    %1101 = vector.extract_strided_slice %1068 {offsets = [0, 8], sizes = [8, 8], strides = [1, 1]} : vector<8x32xf32> to vector<8x8xf32>
    %cst_458 = arith.constant dense<0.000000e+00> : vector<8x8xf32>
    %1102 = tpu.matmul %1100, %1101, %cst_458 {dimension_numbers = #tpu.dot_dimension_numbers<[1], [0], [0], [1], [0, 0, 1, 1], [], []>} : vector<8x8xf32>, vector<8x8xf32>, vector<8x8xf32> -> vector<8x8xf32>
    %1103 = vector.extract_strided_slice %1066 {offsets = [0, 16], sizes = [8, 8], strides = [1, 1]} : vector<8x32xf32> to vector<8x8xf32>
    %1104 = vector.extract_strided_slice %1067 {offsets = [0, 16], sizes = [8, 8], strides = [1, 1]} : vector<8x32xf32> to vector<8x8xf32>
    %cst_459 = arith.constant dense<0.000000e+00> : vector<8x8xf32>
    %1105 = tpu.matmul %1103, %1104, %cst_459 {dimension_numbers = #tpu.dot_dimension_numbers<[1], [1], [0], [0], [0, 0, 1, 0], [], []>} : vector<8x8xf32>, vector<8x8xf32>, vector<8x8xf32> -> vector<8x8xf32>
    %1106 = arith.addf %1105, %5 : vector<8x8xf32>
    %cst_460 = arith.constant dense<0xFF800000> : vector<8xf32>
    %1107 = vector.multi_reduction <maximumf>, %1106, %cst_460 [1] : vector<8x8xf32> to vector<8xf32>
    %1108 = vector.shape_cast %1107 : vector<8xf32> to vector<8x1xf32>
    %1109 = vector.broadcast %1108 : vector<8x1xf32> to vector<8x8xf32>
    %1110 = arith.subf %1106, %1109 : vector<8x8xf32>
    %1111 = math.exp %1110 : vector<8x8xf32>
    %cst_461 = arith.constant dense<0.000000e+00> : vector<8xf32>
    %1112 = vector.multi_reduction <add>, %1111, %cst_461 [1] : vector<8x8xf32> to vector<8xf32>
    %1113 = vector.shape_cast %1112 : vector<8xf32> to vector<8x1xf32>
    %cst_462 = arith.constant 1.000000e+00 : f32
    %1114 = vector.broadcast %cst_462 : f32 to vector<8x1xf32>
    %1115 = arith.divf %1114, %1113 : vector<8x1xf32>
    %1116 = vector.broadcast %1115 : vector<8x1xf32> to vector<8x8xf32>
    %1117 = arith.mulf %1111, %1116 : vector<8x8xf32>
    %1118 = vector.extract_strided_slice %1068 {offsets = [0, 16], sizes = [8, 8], strides = [1, 1]} : vector<8x32xf32> to vector<8x8xf32>
    %cst_463 = arith.constant dense<0.000000e+00> : vector<8x8xf32>
    %1119 = tpu.matmul %1117, %1118, %cst_463 {dimension_numbers = #tpu.dot_dimension_numbers<[1], [0], [0], [1], [0, 0, 1, 1], [], []>} : vector<8x8xf32>, vector<8x8xf32>, vector<8x8xf32> -> vector<8x8xf32>
    %1120 = vector.extract_strided_slice %1066 {offsets = [0, 24], sizes = [8, 8], strides = [1, 1]} : vector<8x32xf32> to vector<8x8xf32>
    %1121 = vector.extract_strided_slice %1067 {offsets = [0, 24], sizes = [8, 8], strides = [1, 1]} : vector<8x32xf32> to vector<8x8xf32>
    %cst_464 = arith.constant dense<0.000000e+00> : vector<8x8xf32>
    %1122 = tpu.matmul %1120, %1121, %cst_464 {dimension_numbers = #tpu.dot_dimension_numbers<[1], [1], [0], [0], [0, 0, 1, 0], [], []>} : vector<8x8xf32>, vector<8x8xf32>, vector<8x8xf32> -> vector<8x8xf32>
    %1123 = arith.addf %1122, %5 : vector<8x8xf32>
    %cst_465 = arith.constant dense<0xFF800000> : vector<8xf32>
    %1124 = vector.multi_reduction <maximumf>, %1123, %cst_465 [1] : vector<8x8xf32> to vector<8xf32>
    %1125 = vector.shape_cast %1124 : vector<8xf32> to vector<8x1xf32>
    %1126 = vector.broadcast %1125 : vector<8x1xf32> to vector<8x8xf32>
    %1127 = arith.subf %1123, %1126 : vector<8x8xf32>
    %1128 = math.exp %1127 : vector<8x8xf32>
    %cst_466 = arith.constant dense<0.000000e+00> : vector<8xf32>
    %1129 = vector.multi_reduction <add>, %1128, %cst_466 [1] : vector<8x8xf32> to vector<8xf32>
    %1130 = vector.shape_cast %1129 : vector<8xf32> to vector<8x1xf32>
    %cst_467 = arith.constant 1.000000e+00 : f32
    %1131 = vector.broadcast %cst_467 : f32 to vector<8x1xf32>
    %1132 = arith.divf %1131, %1130 : vector<8x1xf32>
    %1133 = vector.broadcast %1132 : vector<8x1xf32> to vector<8x8xf32>
    %1134 = arith.mulf %1128, %1133 : vector<8x8xf32>
    %1135 = vector.extract_strided_slice %1068 {offsets = [0, 24], sizes = [8, 8], strides = [1, 1]} : vector<8x32xf32> to vector<8x8xf32>
    %cst_468 = arith.constant dense<0.000000e+00> : vector<8x8xf32>
    %1136 = tpu.matmul %1134, %1135, %cst_468 {dimension_numbers = #tpu.dot_dimension_numbers<[1], [0], [0], [1], [0, 0, 1, 1], [], []>} : vector<8x8xf32>, vector<8x8xf32>, vector<8x8xf32> -> vector<8x8xf32>
    %1137 = tpu.concatenate %1085, %1102, %1119, %1136 in 1 : vector<8x8xf32>, vector<8x8xf32>, vector<8x8xf32>, vector<8x8xf32> -> vector<8x32xf32>
    %cst_469 = arith.constant dense<0.000000e+00> : vector<8x32xf32>
    %1138 = tpu.matmul %1137, %1064, %cst_469 {dimension_numbers = #tpu.dot_dimension_numbers<[1], [0], [0], [1], [0, 0, 1, 1], [], []>} : vector<8x32xf32>, vector<32x32xf32>, vector<8x32xf32> -> vector<8x32xf32>
    %1139 = vector.extract_strided_slice %1058 {offsets = [0, 0], sizes = [1, 32], strides = [1, 1]} : vector<3x32xf32> to vector<1x32xf32>
    %1140 = vector.extract_strided_slice %1060 {offsets = [0, 0], sizes = [1, 32], strides = [1, 1]} : vector<3x32xf32> to vector<1x32xf32>
    %1141 = arith.addf %1056, %1138 : vector<8x32xf32>
    %cst_470 = arith.constant dense<0.000000e+00> : vector<8xf32>
    %1142 = vector.multi_reduction <add>, %1141, %cst_470 [1] : vector<8x32xf32> to vector<8xf32>
    %1143 = vector.shape_cast %1142 : vector<8xf32> to vector<8x1xf32>
    %cst_471 = arith.constant 3.200000e+01 : f32
    %1144 = vector.broadcast %cst_471 : f32 to vector<8x1xf32>
    %1145 = arith.divf %1143, %1144 : vector<8x1xf32>
    %1146 = vector.broadcast %1145 : vector<8x1xf32> to vector<8x32xf32>
    %1147 = arith.subf %1141, %1146 : vector<8x32xf32>
    %1148 = arith.mulf %1147, %1147 : vector<8x32xf32>
    %cst_472 = arith.constant dense<0.000000e+00> : vector<8xf32>
    %1149 = vector.multi_reduction <add>, %1148, %cst_472 [1] : vector<8x32xf32> to vector<8xf32>
    %1150 = vector.shape_cast %1149 : vector<8xf32> to vector<8x1xf32>
    %cst_473 = arith.constant 3.200000e+01 : f32
    %1151 = vector.broadcast %cst_473 : f32 to vector<8x1xf32>
    %1152 = arith.divf %1150, %1151 : vector<8x1xf32>
    %cst_474 = arith.constant 9.99999974E-6 : f32
    %1153 = vector.broadcast %cst_474 : f32 to vector<8x1xf32>
    %1154 = arith.addf %1152, %1153 : vector<8x1xf32>
    %1155 = math.rsqrt %1154 : vector<8x1xf32>
    %1156 = vector.broadcast %1155 : vector<8x1xf32> to vector<8x32xf32>
    %1157 = arith.mulf %1147, %1156 : vector<8x32xf32>
    %1158 = vector.broadcast %1139 : vector<1x32xf32> to vector<8x32xf32>
    %1159 = arith.mulf %1157, %1158 : vector<8x32xf32>
    %1160 = vector.broadcast %1140 : vector<1x32xf32> to vector<8x32xf32>
    %1161 = arith.addf %1159, %1160 : vector<8x32xf32>
    %c0_475 = arith.constant 0 : index
    %c0_476 = arith.constant 0 : index
    %c0_477 = arith.constant 0 : index
    %1162 = vector.load %arg12[%c0_475, %c0_476, %c0_477] : memref<2x32x32xf32, #tpu.memory_space<vmem>>, vector<1x32x32xf32>
    %1163 = vector.shape_cast %1162 : vector<1x32x32xf32> to vector<32x32xf32>
    %c0_478 = arith.constant 0 : index
    %c0_479 = arith.constant 0 : index
    %c0_480 = arith.constant 0 : index
    %1164 = vector.load %arg13[%c0_478, %c0_479, %c0_480] : memref<2x32x64xf32, #tpu.memory_space<vmem>>, vector<1x32x64xf32>
    %1165 = vector.shape_cast %1164 : vector<1x32x64xf32> to vector<32x64xf32>
    %c0_481 = arith.constant 0 : index
    %c0_482 = arith.constant 0 : index
    %c0_483 = arith.constant 0 : index
    %1166 = vector.load %arg14[%c0_481, %c0_482, %c0_483] : memref<2x32x32xf32, #tpu.memory_space<vmem>>, vector<1x32x32xf32>
    %1167 = vector.shape_cast %1166 : vector<1x32x32xf32> to vector<32x32xf32>
    %cst_484 = arith.constant dense<0.000000e+00> : vector<8x32xf32>
    %1168 = tpu.matmul %1161, %1163, %cst_484 {dimension_numbers = #tpu.dot_dimension_numbers<[1], [0], [0], [1], [0, 0, 1, 1], [], []>} : vector<8x32xf32>, vector<32x32xf32>, vector<8x32xf32> -> vector<8x32xf32>
    %cst_485 = arith.constant dense<0.000000e+00> : vector<8x64xf32>
    %1169 = tpu.matmul %1055, %1165, %cst_485 {dimension_numbers = #tpu.dot_dimension_numbers<[1], [0], [0], [1], [0, 0, 1, 1], [], []>} : vector<8x32xf32>, vector<32x64xf32>, vector<8x64xf32> -> vector<8x64xf32>
    %1170 = vector.extract_strided_slice %1169 {offsets = [0, 0], sizes = [8, 32], strides = [1, 1]} : vector<8x64xf32> to vector<8x32xf32>
    %1171 = vector.extract_strided_slice %1169 {offsets = [0, 32], sizes = [8, 32], strides = [1, 1]} : vector<8x64xf32> to vector<8x32xf32>
    %1172 = vector.extract_strided_slice %1168 {offsets = [0, 0], sizes = [8, 8], strides = [1, 1]} : vector<8x32xf32> to vector<8x8xf32>
    %1173 = vector.extract_strided_slice %1170 {offsets = [0, 0], sizes = [8, 8], strides = [1, 1]} : vector<8x32xf32> to vector<8x8xf32>
    %cst_486 = arith.constant dense<0.000000e+00> : vector<8x8xf32>
    %1174 = tpu.matmul %1172, %1173, %cst_486 {dimension_numbers = #tpu.dot_dimension_numbers<[1], [1], [0], [0], [0, 0, 1, 0], [], []>} : vector<8x8xf32>, vector<8x8xf32>, vector<8x8xf32> -> vector<8x8xf32>
    %cst_487 = arith.constant dense<0xFF800000> : vector<8xf32>
    %1175 = vector.multi_reduction <maximumf>, %1174, %cst_487 [1] : vector<8x8xf32> to vector<8xf32>
    %1176 = vector.shape_cast %1175 : vector<8xf32> to vector<8x1xf32>
    %1177 = vector.broadcast %1176 : vector<8x1xf32> to vector<8x8xf32>
    %1178 = arith.subf %1174, %1177 : vector<8x8xf32>
    %1179 = math.exp %1178 : vector<8x8xf32>
    %cst_488 = arith.constant dense<0.000000e+00> : vector<8xf32>
    %1180 = vector.multi_reduction <add>, %1179, %cst_488 [1] : vector<8x8xf32> to vector<8xf32>
    %1181 = vector.shape_cast %1180 : vector<8xf32> to vector<8x1xf32>
    %cst_489 = arith.constant 1.000000e+00 : f32
    %1182 = vector.broadcast %cst_489 : f32 to vector<8x1xf32>
    %1183 = arith.divf %1182, %1181 : vector<8x1xf32>
    %1184 = vector.broadcast %1183 : vector<8x1xf32> to vector<8x8xf32>
    %1185 = arith.mulf %1179, %1184 : vector<8x8xf32>
    %1186 = vector.extract_strided_slice %1171 {offsets = [0, 0], sizes = [8, 8], strides = [1, 1]} : vector<8x32xf32> to vector<8x8xf32>
    %cst_490 = arith.constant dense<0.000000e+00> : vector<8x8xf32>
    %1187 = tpu.matmul %1185, %1186, %cst_490 {dimension_numbers = #tpu.dot_dimension_numbers<[1], [0], [0], [1], [0, 0, 1, 1], [], []>} : vector<8x8xf32>, vector<8x8xf32>, vector<8x8xf32> -> vector<8x8xf32>
    %1188 = vector.extract_strided_slice %1168 {offsets = [0, 8], sizes = [8, 8], strides = [1, 1]} : vector<8x32xf32> to vector<8x8xf32>
    %1189 = vector.extract_strided_slice %1170 {offsets = [0, 8], sizes = [8, 8], strides = [1, 1]} : vector<8x32xf32> to vector<8x8xf32>
    %cst_491 = arith.constant dense<0.000000e+00> : vector<8x8xf32>
    %1190 = tpu.matmul %1188, %1189, %cst_491 {dimension_numbers = #tpu.dot_dimension_numbers<[1], [1], [0], [0], [0, 0, 1, 0], [], []>} : vector<8x8xf32>, vector<8x8xf32>, vector<8x8xf32> -> vector<8x8xf32>
    %cst_492 = arith.constant dense<0xFF800000> : vector<8xf32>
    %1191 = vector.multi_reduction <maximumf>, %1190, %cst_492 [1] : vector<8x8xf32> to vector<8xf32>
    %1192 = vector.shape_cast %1191 : vector<8xf32> to vector<8x1xf32>
    %1193 = vector.broadcast %1192 : vector<8x1xf32> to vector<8x8xf32>
    %1194 = arith.subf %1190, %1193 : vector<8x8xf32>
    %1195 = math.exp %1194 : vector<8x8xf32>
    %cst_493 = arith.constant dense<0.000000e+00> : vector<8xf32>
    %1196 = vector.multi_reduction <add>, %1195, %cst_493 [1] : vector<8x8xf32> to vector<8xf32>
    %1197 = vector.shape_cast %1196 : vector<8xf32> to vector<8x1xf32>
    %cst_494 = arith.constant 1.000000e+00 : f32
    %1198 = vector.broadcast %cst_494 : f32 to vector<8x1xf32>
    %1199 = arith.divf %1198, %1197 : vector<8x1xf32>
    %1200 = vector.broadcast %1199 : vector<8x1xf32> to vector<8x8xf32>
    %1201 = arith.mulf %1195, %1200 : vector<8x8xf32>
    %1202 = vector.extract_strided_slice %1171 {offsets = [0, 8], sizes = [8, 8], strides = [1, 1]} : vector<8x32xf32> to vector<8x8xf32>
    %cst_495 = arith.constant dense<0.000000e+00> : vector<8x8xf32>
    %1203 = tpu.matmul %1201, %1202, %cst_495 {dimension_numbers = #tpu.dot_dimension_numbers<[1], [0], [0], [1], [0, 0, 1, 1], [], []>} : vector<8x8xf32>, vector<8x8xf32>, vector<8x8xf32> -> vector<8x8xf32>
    %1204 = vector.extract_strided_slice %1168 {offsets = [0, 16], sizes = [8, 8], strides = [1, 1]} : vector<8x32xf32> to vector<8x8xf32>
    %1205 = vector.extract_strided_slice %1170 {offsets = [0, 16], sizes = [8, 8], strides = [1, 1]} : vector<8x32xf32> to vector<8x8xf32>
    %cst_496 = arith.constant dense<0.000000e+00> : vector<8x8xf32>
    %1206 = tpu.matmul %1204, %1205, %cst_496 {dimension_numbers = #tpu.dot_dimension_numbers<[1], [1], [0], [0], [0, 0, 1, 0], [], []>} : vector<8x8xf32>, vector<8x8xf32>, vector<8x8xf32> -> vector<8x8xf32>
    %cst_497 = arith.constant dense<0xFF800000> : vector<8xf32>
    %1207 = vector.multi_reduction <maximumf>, %1206, %cst_497 [1] : vector<8x8xf32> to vector<8xf32>
    %1208 = vector.shape_cast %1207 : vector<8xf32> to vector<8x1xf32>
    %1209 = vector.broadcast %1208 : vector<8x1xf32> to vector<8x8xf32>
    %1210 = arith.subf %1206, %1209 : vector<8x8xf32>
    %1211 = math.exp %1210 : vector<8x8xf32>
    %cst_498 = arith.constant dense<0.000000e+00> : vector<8xf32>
    %1212 = vector.multi_reduction <add>, %1211, %cst_498 [1] : vector<8x8xf32> to vector<8xf32>
    %1213 = vector.shape_cast %1212 : vector<8xf32> to vector<8x1xf32>
    %cst_499 = arith.constant 1.000000e+00 : f32
    %1214 = vector.broadcast %cst_499 : f32 to vector<8x1xf32>
    %1215 = arith.divf %1214, %1213 : vector<8x1xf32>
    %1216 = vector.broadcast %1215 : vector<8x1xf32> to vector<8x8xf32>
    %1217 = arith.mulf %1211, %1216 : vector<8x8xf32>
    %1218 = vector.extract_strided_slice %1171 {offsets = [0, 16], sizes = [8, 8], strides = [1, 1]} : vector<8x32xf32> to vector<8x8xf32>
    %cst_500 = arith.constant dense<0.000000e+00> : vector<8x8xf32>
    %1219 = tpu.matmul %1217, %1218, %cst_500 {dimension_numbers = #tpu.dot_dimension_numbers<[1], [0], [0], [1], [0, 0, 1, 1], [], []>} : vector<8x8xf32>, vector<8x8xf32>, vector<8x8xf32> -> vector<8x8xf32>
    %1220 = vector.extract_strided_slice %1168 {offsets = [0, 24], sizes = [8, 8], strides = [1, 1]} : vector<8x32xf32> to vector<8x8xf32>
    %1221 = vector.extract_strided_slice %1170 {offsets = [0, 24], sizes = [8, 8], strides = [1, 1]} : vector<8x32xf32> to vector<8x8xf32>
    %cst_501 = arith.constant dense<0.000000e+00> : vector<8x8xf32>
    %1222 = tpu.matmul %1220, %1221, %cst_501 {dimension_numbers = #tpu.dot_dimension_numbers<[1], [1], [0], [0], [0, 0, 1, 0], [], []>} : vector<8x8xf32>, vector<8x8xf32>, vector<8x8xf32> -> vector<8x8xf32>
    %cst_502 = arith.constant dense<0xFF800000> : vector<8xf32>
    %1223 = vector.multi_reduction <maximumf>, %1222, %cst_502 [1] : vector<8x8xf32> to vector<8xf32>
    %1224 = vector.shape_cast %1223 : vector<8xf32> to vector<8x1xf32>
    %1225 = vector.broadcast %1224 : vector<8x1xf32> to vector<8x8xf32>
    %1226 = arith.subf %1222, %1225 : vector<8x8xf32>
    %1227 = math.exp %1226 : vector<8x8xf32>
    %cst_503 = arith.constant dense<0.000000e+00> : vector<8xf32>
    %1228 = vector.multi_reduction <add>, %1227, %cst_503 [1] : vector<8x8xf32> to vector<8xf32>
    %1229 = vector.shape_cast %1228 : vector<8xf32> to vector<8x1xf32>
    %cst_504 = arith.constant 1.000000e+00 : f32
    %1230 = vector.broadcast %cst_504 : f32 to vector<8x1xf32>
    %1231 = arith.divf %1230, %1229 : vector<8x1xf32>
    %1232 = vector.broadcast %1231 : vector<8x1xf32> to vector<8x8xf32>
    %1233 = arith.mulf %1227, %1232 : vector<8x8xf32>
    %1234 = vector.extract_strided_slice %1171 {offsets = [0, 24], sizes = [8, 8], strides = [1, 1]} : vector<8x32xf32> to vector<8x8xf32>
    %cst_505 = arith.constant dense<0.000000e+00> : vector<8x8xf32>
    %1235 = tpu.matmul %1233, %1234, %cst_505 {dimension_numbers = #tpu.dot_dimension_numbers<[1], [0], [0], [1], [0, 0, 1, 1], [], []>} : vector<8x8xf32>, vector<8x8xf32>, vector<8x8xf32> -> vector<8x8xf32>
    %1236 = tpu.concatenate %1187, %1203, %1219, %1235 in 1 : vector<8x8xf32>, vector<8x8xf32>, vector<8x8xf32>, vector<8x8xf32> -> vector<8x32xf32>
    %cst_506 = arith.constant dense<0.000000e+00> : vector<8x32xf32>
    %1237 = tpu.matmul %1236, %1167, %cst_506 {dimension_numbers = #tpu.dot_dimension_numbers<[1], [0], [0], [1], [0, 0, 1, 1], [], []>} : vector<8x32xf32>, vector<32x32xf32>, vector<8x32xf32> -> vector<8x32xf32>
    %1238 = vector.extract_strided_slice %1058 {offsets = [1, 0], sizes = [1, 32], strides = [1, 1]} : vector<3x32xf32> to vector<1x32xf32>
    %1239 = vector.extract_strided_slice %1060 {offsets = [1, 0], sizes = [1, 32], strides = [1, 1]} : vector<3x32xf32> to vector<1x32xf32>
    %1240 = arith.addf %1161, %1237 : vector<8x32xf32>
    %cst_507 = arith.constant dense<0.000000e+00> : vector<8xf32>
    %1241 = vector.multi_reduction <add>, %1240, %cst_507 [1] : vector<8x32xf32> to vector<8xf32>
    %1242 = vector.shape_cast %1241 : vector<8xf32> to vector<8x1xf32>
    %cst_508 = arith.constant 3.200000e+01 : f32
    %1243 = vector.broadcast %cst_508 : f32 to vector<8x1xf32>
    %1244 = arith.divf %1242, %1243 : vector<8x1xf32>
    %1245 = vector.broadcast %1244 : vector<8x1xf32> to vector<8x32xf32>
    %1246 = arith.subf %1240, %1245 : vector<8x32xf32>
    %1247 = arith.mulf %1246, %1246 : vector<8x32xf32>
    %cst_509 = arith.constant dense<0.000000e+00> : vector<8xf32>
    %1248 = vector.multi_reduction <add>, %1247, %cst_509 [1] : vector<8x32xf32> to vector<8xf32>
    %1249 = vector.shape_cast %1248 : vector<8xf32> to vector<8x1xf32>
    %cst_510 = arith.constant 3.200000e+01 : f32
    %1250 = vector.broadcast %cst_510 : f32 to vector<8x1xf32>
    %1251 = arith.divf %1249, %1250 : vector<8x1xf32>
    %cst_511 = arith.constant 9.99999974E-6 : f32
    %1252 = vector.broadcast %cst_511 : f32 to vector<8x1xf32>
    %1253 = arith.addf %1251, %1252 : vector<8x1xf32>
    %1254 = math.rsqrt %1253 : vector<8x1xf32>
    %1255 = vector.broadcast %1254 : vector<8x1xf32> to vector<8x32xf32>
    %1256 = arith.mulf %1246, %1255 : vector<8x32xf32>
    %1257 = vector.broadcast %1238 : vector<1x32xf32> to vector<8x32xf32>
    %1258 = arith.mulf %1256, %1257 : vector<8x32xf32>
    %1259 = vector.broadcast %1239 : vector<1x32xf32> to vector<8x32xf32>
    %1260 = arith.addf %1258, %1259 : vector<8x32xf32>
    %c0_512 = arith.constant 0 : index
    %c0_513 = arith.constant 0 : index
    %c0_514 = arith.constant 0 : index
    %1261 = vector.load %arg15[%c0_512, %c0_513, %c0_514] : memref<2x32x64xf32, #tpu.memory_space<vmem>>, vector<1x32x64xf32>
    %1262 = vector.shape_cast %1261 : vector<1x32x64xf32> to vector<32x64xf32>
    %c0_515 = arith.constant 0 : index
    %c0_516 = arith.constant 0 : index
    %c0_517 = arith.constant 0 : index
    %1263 = vector.load %arg16[%c0_515, %c0_516, %c0_517] : memref<2x1x64xf32, #tpu.memory_space<vmem>>, vector<1x1x64xf32>
    %1264 = vector.shape_cast %1263 : vector<1x1x64xf32> to vector<1x64xf32>
    %c0_518 = arith.constant 0 : index
    %c0_519 = arith.constant 0 : index
    %c0_520 = arith.constant 0 : index
    %1265 = vector.load %arg17[%c0_518, %c0_519, %c0_520] : memref<2x64x32xf32, #tpu.memory_space<vmem>>, vector<1x64x32xf32>
    %1266 = vector.shape_cast %1265 : vector<1x64x32xf32> to vector<64x32xf32>
    %c0_521 = arith.constant 0 : index
    %c0_522 = arith.constant 0 : index
    %c0_523 = arith.constant 0 : index
    %1267 = vector.load %arg18[%c0_521, %c0_522, %c0_523] : memref<2x1x32xf32, #tpu.memory_space<vmem>>, vector<1x1x32xf32>
    %1268 = vector.shape_cast %1267 : vector<1x1x32xf32> to vector<1x32xf32>
    %cst_524 = arith.constant dense<0.000000e+00> : vector<8x64xf32>
    %1269 = tpu.matmul %1260, %1262, %cst_524 {dimension_numbers = #tpu.dot_dimension_numbers<[1], [0], [0], [1], [0, 0, 1, 1], [], []>} : vector<8x32xf32>, vector<32x64xf32>, vector<8x64xf32> -> vector<8x64xf32>
    %1270 = vector.broadcast %1264 : vector<1x64xf32> to vector<8x64xf32>
    %1271 = arith.addf %1269, %1270 : vector<8x64xf32>
    %cst_525 = arith.constant 0.000000e+00 : f32
    %1272 = vector.broadcast %cst_525 : f32 to vector<8x64xf32>
    %1273 = arith.maximumf %1271, %1272 : vector<8x64xf32>
    %cst_526 = arith.constant dense<0.000000e+00> : vector<8x32xf32>
    %1274 = tpu.matmul %1273, %1266, %cst_526 {dimension_numbers = #tpu.dot_dimension_numbers<[1], [0], [0], [1], [0, 0, 1, 1], [], []>} : vector<8x64xf32>, vector<64x32xf32>, vector<8x32xf32> -> vector<8x32xf32>
    %1275 = vector.broadcast %1268 : vector<1x32xf32> to vector<8x32xf32>
    %1276 = arith.addf %1274, %1275 : vector<8x32xf32>
    %1277 = vector.extract_strided_slice %1058 {offsets = [2, 0], sizes = [1, 32], strides = [1, 1]} : vector<3x32xf32> to vector<1x32xf32>
    %1278 = vector.extract_strided_slice %1060 {offsets = [2, 0], sizes = [1, 32], strides = [1, 1]} : vector<3x32xf32> to vector<1x32xf32>
    %1279 = arith.addf %1260, %1276 : vector<8x32xf32>
    %cst_527 = arith.constant dense<0.000000e+00> : vector<8xf32>
    %1280 = vector.multi_reduction <add>, %1279, %cst_527 [1] : vector<8x32xf32> to vector<8xf32>
    %1281 = vector.shape_cast %1280 : vector<8xf32> to vector<8x1xf32>
    %cst_528 = arith.constant 3.200000e+01 : f32
    %1282 = vector.broadcast %cst_528 : f32 to vector<8x1xf32>
    %1283 = arith.divf %1281, %1282 : vector<8x1xf32>
    %1284 = vector.broadcast %1283 : vector<8x1xf32> to vector<8x32xf32>
    %1285 = arith.subf %1279, %1284 : vector<8x32xf32>
    %1286 = arith.mulf %1285, %1285 : vector<8x32xf32>
    %cst_529 = arith.constant dense<0.000000e+00> : vector<8xf32>
    %1287 = vector.multi_reduction <add>, %1286, %cst_529 [1] : vector<8x32xf32> to vector<8xf32>
    %1288 = vector.shape_cast %1287 : vector<8xf32> to vector<8x1xf32>
    %cst_530 = arith.constant 3.200000e+01 : f32
    %1289 = vector.broadcast %cst_530 : f32 to vector<8x1xf32>
    %1290 = arith.divf %1288, %1289 : vector<8x1xf32>
    %cst_531 = arith.constant 9.99999974E-6 : f32
    %1291 = vector.broadcast %cst_531 : f32 to vector<8x1xf32>
    %1292 = arith.addf %1290, %1291 : vector<8x1xf32>
    %1293 = math.rsqrt %1292 : vector<8x1xf32>
    %1294 = vector.broadcast %1293 : vector<8x1xf32> to vector<8x32xf32>
    %1295 = arith.mulf %1285, %1294 : vector<8x32xf32>
    %1296 = vector.broadcast %1277 : vector<1x32xf32> to vector<8x32xf32>
    %1297 = arith.mulf %1295, %1296 : vector<8x32xf32>
    %1298 = vector.broadcast %1278 : vector<1x32xf32> to vector<8x32xf32>
    %1299 = arith.addf %1297, %1298 : vector<8x32xf32>
    %c1_532 = arith.constant 1 : index
    %c0_533 = arith.constant 0 : index
    %c0_534 = arith.constant 0 : index
    %1300 = vector.load %arg19[%c1_532, %c0_533, %c0_534] : memref<2x3x32xf32, #tpu.memory_space<vmem>>, vector<1x3x32xf32>
    %1301 = vector.shape_cast %1300 : vector<1x3x32xf32> to vector<3x32xf32>
    %c1_535 = arith.constant 1 : index
    %c0_536 = arith.constant 0 : index
    %c0_537 = arith.constant 0 : index
    %1302 = vector.load %arg20[%c1_535, %c0_536, %c0_537] : memref<2x3x32xf32, #tpu.memory_space<vmem>>, vector<1x3x32xf32>
    %1303 = vector.shape_cast %1302 : vector<1x3x32xf32> to vector<3x32xf32>
    %c1_538 = arith.constant 1 : index
    %c0_539 = arith.constant 0 : index
    %c0_540 = arith.constant 0 : index
    %1304 = vector.load %arg10[%c1_538, %c0_539, %c0_540] : memref<2x32x96xf32, #tpu.memory_space<vmem>>, vector<1x32x96xf32>
    %1305 = vector.shape_cast %1304 : vector<1x32x96xf32> to vector<32x96xf32>
    %c1_541 = arith.constant 1 : index
    %c0_542 = arith.constant 0 : index
    %c0_543 = arith.constant 0 : index
    %1306 = vector.load %arg11[%c1_541, %c0_542, %c0_543] : memref<2x32x32xf32, #tpu.memory_space<vmem>>, vector<1x32x32xf32>
    %1307 = vector.shape_cast %1306 : vector<1x32x32xf32> to vector<32x32xf32>
    %cst_544 = arith.constant dense<0.000000e+00> : vector<8x96xf32>
    %1308 = tpu.matmul %1299, %1305, %cst_544 {dimension_numbers = #tpu.dot_dimension_numbers<[1], [0], [0], [1], [0, 0, 1, 1], [], []>} : vector<8x32xf32>, vector<32x96xf32>, vector<8x96xf32> -> vector<8x96xf32>
    %1309 = vector.extract_strided_slice %1308 {offsets = [0, 0], sizes = [8, 32], strides = [1, 1]} : vector<8x96xf32> to vector<8x32xf32>
    %1310 = vector.extract_strided_slice %1308 {offsets = [0, 32], sizes = [8, 32], strides = [1, 1]} : vector<8x96xf32> to vector<8x32xf32>
    %1311 = vector.extract_strided_slice %1308 {offsets = [0, 64], sizes = [8, 32], strides = [1, 1]} : vector<8x96xf32> to vector<8x32xf32>
    %1312 = vector.extract_strided_slice %1309 {offsets = [0, 0], sizes = [8, 8], strides = [1, 1]} : vector<8x32xf32> to vector<8x8xf32>
    %1313 = vector.extract_strided_slice %1310 {offsets = [0, 0], sizes = [8, 8], strides = [1, 1]} : vector<8x32xf32> to vector<8x8xf32>
    %cst_545 = arith.constant dense<0.000000e+00> : vector<8x8xf32>
    %1314 = tpu.matmul %1312, %1313, %cst_545 {dimension_numbers = #tpu.dot_dimension_numbers<[1], [1], [0], [0], [0, 0, 1, 0], [], []>} : vector<8x8xf32>, vector<8x8xf32>, vector<8x8xf32> -> vector<8x8xf32>
    %1315 = arith.addf %1314, %5 : vector<8x8xf32>
    %cst_546 = arith.constant dense<0xFF800000> : vector<8xf32>
    %1316 = vector.multi_reduction <maximumf>, %1315, %cst_546 [1] : vector<8x8xf32> to vector<8xf32>
    %1317 = vector.shape_cast %1316 : vector<8xf32> to vector<8x1xf32>
    %1318 = vector.broadcast %1317 : vector<8x1xf32> to vector<8x8xf32>
    %1319 = arith.subf %1315, %1318 : vector<8x8xf32>
    %1320 = math.exp %1319 : vector<8x8xf32>
    %cst_547 = arith.constant dense<0.000000e+00> : vector<8xf32>
    %1321 = vector.multi_reduction <add>, %1320, %cst_547 [1] : vector<8x8xf32> to vector<8xf32>
    %1322 = vector.shape_cast %1321 : vector<8xf32> to vector<8x1xf32>
    %cst_548 = arith.constant 1.000000e+00 : f32
    %1323 = vector.broadcast %cst_548 : f32 to vector<8x1xf32>
    %1324 = arith.divf %1323, %1322 : vector<8x1xf32>
    %1325 = vector.broadcast %1324 : vector<8x1xf32> to vector<8x8xf32>
    %1326 = arith.mulf %1320, %1325 : vector<8x8xf32>
    %1327 = vector.extract_strided_slice %1311 {offsets = [0, 0], sizes = [8, 8], strides = [1, 1]} : vector<8x32xf32> to vector<8x8xf32>
    %cst_549 = arith.constant dense<0.000000e+00> : vector<8x8xf32>
    %1328 = tpu.matmul %1326, %1327, %cst_549 {dimension_numbers = #tpu.dot_dimension_numbers<[1], [0], [0], [1], [0, 0, 1, 1], [], []>} : vector<8x8xf32>, vector<8x8xf32>, vector<8x8xf32> -> vector<8x8xf32>
    %1329 = vector.extract_strided_slice %1309 {offsets = [0, 8], sizes = [8, 8], strides = [1, 1]} : vector<8x32xf32> to vector<8x8xf32>
    %1330 = vector.extract_strided_slice %1310 {offsets = [0, 8], sizes = [8, 8], strides = [1, 1]} : vector<8x32xf32> to vector<8x8xf32>
    %cst_550 = arith.constant dense<0.000000e+00> : vector<8x8xf32>
    %1331 = tpu.matmul %1329, %1330, %cst_550 {dimension_numbers = #tpu.dot_dimension_numbers<[1], [1], [0], [0], [0, 0, 1, 0], [], []>} : vector<8x8xf32>, vector<8x8xf32>, vector<8x8xf32> -> vector<8x8xf32>
    %1332 = arith.addf %1331, %5 : vector<8x8xf32>
    %cst_551 = arith.constant dense<0xFF800000> : vector<8xf32>
    %1333 = vector.multi_reduction <maximumf>, %1332, %cst_551 [1] : vector<8x8xf32> to vector<8xf32>
    %1334 = vector.shape_cast %1333 : vector<8xf32> to vector<8x1xf32>
    %1335 = vector.broadcast %1334 : vector<8x1xf32> to vector<8x8xf32>
    %1336 = arith.subf %1332, %1335 : vector<8x8xf32>
    %1337 = math.exp %1336 : vector<8x8xf32>
    %cst_552 = arith.constant dense<0.000000e+00> : vector<8xf32>
    %1338 = vector.multi_reduction <add>, %1337, %cst_552 [1] : vector<8x8xf32> to vector<8xf32>
    %1339 = vector.shape_cast %1338 : vector<8xf32> to vector<8x1xf32>
    %cst_553 = arith.constant 1.000000e+00 : f32
    %1340 = vector.broadcast %cst_553 : f32 to vector<8x1xf32>
    %1341 = arith.divf %1340, %1339 : vector<8x1xf32>
    %1342 = vector.broadcast %1341 : vector<8x1xf32> to vector<8x8xf32>
    %1343 = arith.mulf %1337, %1342 : vector<8x8xf32>
    %1344 = vector.extract_strided_slice %1311 {offsets = [0, 8], sizes = [8, 8], strides = [1, 1]} : vector<8x32xf32> to vector<8x8xf32>
    %cst_554 = arith.constant dense<0.000000e+00> : vector<8x8xf32>
    %1345 = tpu.matmul %1343, %1344, %cst_554 {dimension_numbers = #tpu.dot_dimension_numbers<[1], [0], [0], [1], [0, 0, 1, 1], [], []>} : vector<8x8xf32>, vector<8x8xf32>, vector<8x8xf32> -> vector<8x8xf32>
    %1346 = vector.extract_strided_slice %1309 {offsets = [0, 16], sizes = [8, 8], strides = [1, 1]} : vector<8x32xf32> to vector<8x8xf32>
    %1347 = vector.extract_strided_slice %1310 {offsets = [0, 16], sizes = [8, 8], strides = [1, 1]} : vector<8x32xf32> to vector<8x8xf32>
    %cst_555 = arith.constant dense<0.000000e+00> : vector<8x8xf32>
    %1348 = tpu.matmul %1346, %1347, %cst_555 {dimension_numbers = #tpu.dot_dimension_numbers<[1], [1], [0], [0], [0, 0, 1, 0], [], []>} : vector<8x8xf32>, vector<8x8xf32>, vector<8x8xf32> -> vector<8x8xf32>
    %1349 = arith.addf %1348, %5 : vector<8x8xf32>
    %cst_556 = arith.constant dense<0xFF800000> : vector<8xf32>
    %1350 = vector.multi_reduction <maximumf>, %1349, %cst_556 [1] : vector<8x8xf32> to vector<8xf32>
    %1351 = vector.shape_cast %1350 : vector<8xf32> to vector<8x1xf32>
    %1352 = vector.broadcast %1351 : vector<8x1xf32> to vector<8x8xf32>
    %1353 = arith.subf %1349, %1352 : vector<8x8xf32>
    %1354 = math.exp %1353 : vector<8x8xf32>
    %cst_557 = arith.constant dense<0.000000e+00> : vector<8xf32>
    %1355 = vector.multi_reduction <add>, %1354, %cst_557 [1] : vector<8x8xf32> to vector<8xf32>
    %1356 = vector.shape_cast %1355 : vector<8xf32> to vector<8x1xf32>
    %cst_558 = arith.constant 1.000000e+00 : f32
    %1357 = vector.broadcast %cst_558 : f32 to vector<8x1xf32>
    %1358 = arith.divf %1357, %1356 : vector<8x1xf32>
    %1359 = vector.broadcast %1358 : vector<8x1xf32> to vector<8x8xf32>
    %1360 = arith.mulf %1354, %1359 : vector<8x8xf32>
    %1361 = vector.extract_strided_slice %1311 {offsets = [0, 16], sizes = [8, 8], strides = [1, 1]} : vector<8x32xf32> to vector<8x8xf32>
    %cst_559 = arith.constant dense<0.000000e+00> : vector<8x8xf32>
    %1362 = tpu.matmul %1360, %1361, %cst_559 {dimension_numbers = #tpu.dot_dimension_numbers<[1], [0], [0], [1], [0, 0, 1, 1], [], []>} : vector<8x8xf32>, vector<8x8xf32>, vector<8x8xf32> -> vector<8x8xf32>
    %1363 = vector.extract_strided_slice %1309 {offsets = [0, 24], sizes = [8, 8], strides = [1, 1]} : vector<8x32xf32> to vector<8x8xf32>
    %1364 = vector.extract_strided_slice %1310 {offsets = [0, 24], sizes = [8, 8], strides = [1, 1]} : vector<8x32xf32> to vector<8x8xf32>
    %cst_560 = arith.constant dense<0.000000e+00> : vector<8x8xf32>
    %1365 = tpu.matmul %1363, %1364, %cst_560 {dimension_numbers = #tpu.dot_dimension_numbers<[1], [1], [0], [0], [0, 0, 1, 0], [], []>} : vector<8x8xf32>, vector<8x8xf32>, vector<8x8xf32> -> vector<8x8xf32>
    %1366 = arith.addf %1365, %5 : vector<8x8xf32>
    %cst_561 = arith.constant dense<0xFF800000> : vector<8xf32>
    %1367 = vector.multi_reduction <maximumf>, %1366, %cst_561 [1] : vector<8x8xf32> to vector<8xf32>
    %1368 = vector.shape_cast %1367 : vector<8xf32> to vector<8x1xf32>
    %1369 = vector.broadcast %1368 : vector<8x1xf32> to vector<8x8xf32>
    %1370 = arith.subf %1366, %1369 : vector<8x8xf32>
    %1371 = math.exp %1370 : vector<8x8xf32>
    %cst_562 = arith.constant dense<0.000000e+00> : vector<8xf32>
    %1372 = vector.multi_reduction <add>, %1371, %cst_562 [1] : vector<8x8xf32> to vector<8xf32>
    %1373 = vector.shape_cast %1372 : vector<8xf32> to vector<8x1xf32>
    %cst_563 = arith.constant 1.000000e+00 : f32
    %1374 = vector.broadcast %cst_563 : f32 to vector<8x1xf32>
    %1375 = arith.divf %1374, %1373 : vector<8x1xf32>
    %1376 = vector.broadcast %1375 : vector<8x1xf32> to vector<8x8xf32>
    %1377 = arith.mulf %1371, %1376 : vector<8x8xf32>
    %1378 = vector.extract_strided_slice %1311 {offsets = [0, 24], sizes = [8, 8], strides = [1, 1]} : vector<8x32xf32> to vector<8x8xf32>
    %cst_564 = arith.constant dense<0.000000e+00> : vector<8x8xf32>
    %1379 = tpu.matmul %1377, %1378, %cst_564 {dimension_numbers = #tpu.dot_dimension_numbers<[1], [0], [0], [1], [0, 0, 1, 1], [], []>} : vector<8x8xf32>, vector<8x8xf32>, vector<8x8xf32> -> vector<8x8xf32>
    %1380 = tpu.concatenate %1328, %1345, %1362, %1379 in 1 : vector<8x8xf32>, vector<8x8xf32>, vector<8x8xf32>, vector<8x8xf32> -> vector<8x32xf32>
    %cst_565 = arith.constant dense<0.000000e+00> : vector<8x32xf32>
    %1381 = tpu.matmul %1380, %1307, %cst_565 {dimension_numbers = #tpu.dot_dimension_numbers<[1], [0], [0], [1], [0, 0, 1, 1], [], []>} : vector<8x32xf32>, vector<32x32xf32>, vector<8x32xf32> -> vector<8x32xf32>
    %1382 = vector.extract_strided_slice %1301 {offsets = [0, 0], sizes = [1, 32], strides = [1, 1]} : vector<3x32xf32> to vector<1x32xf32>
    %1383 = vector.extract_strided_slice %1303 {offsets = [0, 0], sizes = [1, 32], strides = [1, 1]} : vector<3x32xf32> to vector<1x32xf32>
    %1384 = arith.addf %1299, %1381 : vector<8x32xf32>
    %cst_566 = arith.constant dense<0.000000e+00> : vector<8xf32>
    %1385 = vector.multi_reduction <add>, %1384, %cst_566 [1] : vector<8x32xf32> to vector<8xf32>
    %1386 = vector.shape_cast %1385 : vector<8xf32> to vector<8x1xf32>
    %cst_567 = arith.constant 3.200000e+01 : f32
    %1387 = vector.broadcast %cst_567 : f32 to vector<8x1xf32>
    %1388 = arith.divf %1386, %1387 : vector<8x1xf32>
    %1389 = vector.broadcast %1388 : vector<8x1xf32> to vector<8x32xf32>
    %1390 = arith.subf %1384, %1389 : vector<8x32xf32>
    %1391 = arith.mulf %1390, %1390 : vector<8x32xf32>
    %cst_568 = arith.constant dense<0.000000e+00> : vector<8xf32>
    %1392 = vector.multi_reduction <add>, %1391, %cst_568 [1] : vector<8x32xf32> to vector<8xf32>
    %1393 = vector.shape_cast %1392 : vector<8xf32> to vector<8x1xf32>
    %cst_569 = arith.constant 3.200000e+01 : f32
    %1394 = vector.broadcast %cst_569 : f32 to vector<8x1xf32>
    %1395 = arith.divf %1393, %1394 : vector<8x1xf32>
    %cst_570 = arith.constant 9.99999974E-6 : f32
    %1396 = vector.broadcast %cst_570 : f32 to vector<8x1xf32>
    %1397 = arith.addf %1395, %1396 : vector<8x1xf32>
    %1398 = math.rsqrt %1397 : vector<8x1xf32>
    %1399 = vector.broadcast %1398 : vector<8x1xf32> to vector<8x32xf32>
    %1400 = arith.mulf %1390, %1399 : vector<8x32xf32>
    %1401 = vector.broadcast %1382 : vector<1x32xf32> to vector<8x32xf32>
    %1402 = arith.mulf %1400, %1401 : vector<8x32xf32>
    %1403 = vector.broadcast %1383 : vector<1x32xf32> to vector<8x32xf32>
    %1404 = arith.addf %1402, %1403 : vector<8x32xf32>
    %c1_571 = arith.constant 1 : index
    %c0_572 = arith.constant 0 : index
    %c0_573 = arith.constant 0 : index
    %1405 = vector.load %arg12[%c1_571, %c0_572, %c0_573] : memref<2x32x32xf32, #tpu.memory_space<vmem>>, vector<1x32x32xf32>
    %1406 = vector.shape_cast %1405 : vector<1x32x32xf32> to vector<32x32xf32>
    %c1_574 = arith.constant 1 : index
    %c0_575 = arith.constant 0 : index
    %c0_576 = arith.constant 0 : index
    %1407 = vector.load %arg13[%c1_574, %c0_575, %c0_576] : memref<2x32x64xf32, #tpu.memory_space<vmem>>, vector<1x32x64xf32>
    %1408 = vector.shape_cast %1407 : vector<1x32x64xf32> to vector<32x64xf32>
    %c1_577 = arith.constant 1 : index
    %c0_578 = arith.constant 0 : index
    %c0_579 = arith.constant 0 : index
    %1409 = vector.load %arg14[%c1_577, %c0_578, %c0_579] : memref<2x32x32xf32, #tpu.memory_space<vmem>>, vector<1x32x32xf32>
    %1410 = vector.shape_cast %1409 : vector<1x32x32xf32> to vector<32x32xf32>
    %cst_580 = arith.constant dense<0.000000e+00> : vector<8x32xf32>
    %1411 = tpu.matmul %1404, %1406, %cst_580 {dimension_numbers = #tpu.dot_dimension_numbers<[1], [0], [0], [1], [0, 0, 1, 1], [], []>} : vector<8x32xf32>, vector<32x32xf32>, vector<8x32xf32> -> vector<8x32xf32>
    %cst_581 = arith.constant dense<0.000000e+00> : vector<8x64xf32>
    %1412 = tpu.matmul %1055, %1408, %cst_581 {dimension_numbers = #tpu.dot_dimension_numbers<[1], [0], [0], [1], [0, 0, 1, 1], [], []>} : vector<8x32xf32>, vector<32x64xf32>, vector<8x64xf32> -> vector<8x64xf32>
    %1413 = vector.extract_strided_slice %1412 {offsets = [0, 0], sizes = [8, 32], strides = [1, 1]} : vector<8x64xf32> to vector<8x32xf32>
    %1414 = vector.extract_strided_slice %1412 {offsets = [0, 32], sizes = [8, 32], strides = [1, 1]} : vector<8x64xf32> to vector<8x32xf32>
    %1415 = vector.extract_strided_slice %1411 {offsets = [0, 0], sizes = [8, 8], strides = [1, 1]} : vector<8x32xf32> to vector<8x8xf32>
    %1416 = vector.extract_strided_slice %1413 {offsets = [0, 0], sizes = [8, 8], strides = [1, 1]} : vector<8x32xf32> to vector<8x8xf32>
    %cst_582 = arith.constant dense<0.000000e+00> : vector<8x8xf32>
    %1417 = tpu.matmul %1415, %1416, %cst_582 {dimension_numbers = #tpu.dot_dimension_numbers<[1], [1], [0], [0], [0, 0, 1, 0], [], []>} : vector<8x8xf32>, vector<8x8xf32>, vector<8x8xf32> -> vector<8x8xf32>
    %cst_583 = arith.constant dense<0xFF800000> : vector<8xf32>
    %1418 = vector.multi_reduction <maximumf>, %1417, %cst_583 [1] : vector<8x8xf32> to vector<8xf32>
    %1419 = vector.shape_cast %1418 : vector<8xf32> to vector<8x1xf32>
    %1420 = vector.broadcast %1419 : vector<8x1xf32> to vector<8x8xf32>
    %1421 = arith.subf %1417, %1420 : vector<8x8xf32>
    %1422 = math.exp %1421 : vector<8x8xf32>
    %cst_584 = arith.constant dense<0.000000e+00> : vector<8xf32>
    %1423 = vector.multi_reduction <add>, %1422, %cst_584 [1] : vector<8x8xf32> to vector<8xf32>
    %1424 = vector.shape_cast %1423 : vector<8xf32> to vector<8x1xf32>
    %cst_585 = arith.constant 1.000000e+00 : f32
    %1425 = vector.broadcast %cst_585 : f32 to vector<8x1xf32>
    %1426 = arith.divf %1425, %1424 : vector<8x1xf32>
    %1427 = vector.broadcast %1426 : vector<8x1xf32> to vector<8x8xf32>
    %1428 = arith.mulf %1422, %1427 : vector<8x8xf32>
    %1429 = vector.extract_strided_slice %1414 {offsets = [0, 0], sizes = [8, 8], strides = [1, 1]} : vector<8x32xf32> to vector<8x8xf32>
    %cst_586 = arith.constant dense<0.000000e+00> : vector<8x8xf32>
    %1430 = tpu.matmul %1428, %1429, %cst_586 {dimension_numbers = #tpu.dot_dimension_numbers<[1], [0], [0], [1], [0, 0, 1, 1], [], []>} : vector<8x8xf32>, vector<8x8xf32>, vector<8x8xf32> -> vector<8x8xf32>
    %1431 = vector.extract_strided_slice %1411 {offsets = [0, 8], sizes = [8, 8], strides = [1, 1]} : vector<8x32xf32> to vector<8x8xf32>
    %1432 = vector.extract_strided_slice %1413 {offsets = [0, 8], sizes = [8, 8], strides = [1, 1]} : vector<8x32xf32> to vector<8x8xf32>
    %cst_587 = arith.constant dense<0.000000e+00> : vector<8x8xf32>
    %1433 = tpu.matmul %1431, %1432, %cst_587 {dimension_numbers = #tpu.dot_dimension_numbers<[1], [1], [0], [0], [0, 0, 1, 0], [], []>} : vector<8x8xf32>, vector<8x8xf32>, vector<8x8xf32> -> vector<8x8xf32>
    %cst_588 = arith.constant dense<0xFF800000> : vector<8xf32>
    %1434 = vector.multi_reduction <maximumf>, %1433, %cst_588 [1] : vector<8x8xf32> to vector<8xf32>
    %1435 = vector.shape_cast %1434 : vector<8xf32> to vector<8x1xf32>
    %1436 = vector.broadcast %1435 : vector<8x1xf32> to vector<8x8xf32>
    %1437 = arith.subf %1433, %1436 : vector<8x8xf32>
    %1438 = math.exp %1437 : vector<8x8xf32>
    %cst_589 = arith.constant dense<0.000000e+00> : vector<8xf32>
    %1439 = vector.multi_reduction <add>, %1438, %cst_589 [1] : vector<8x8xf32> to vector<8xf32>
    %1440 = vector.shape_cast %1439 : vector<8xf32> to vector<8x1xf32>
    %cst_590 = arith.constant 1.000000e+00 : f32
    %1441 = vector.broadcast %cst_590 : f32 to vector<8x1xf32>
    %1442 = arith.divf %1441, %1440 : vector<8x1xf32>
    %1443 = vector.broadcast %1442 : vector<8x1xf32> to vector<8x8xf32>
    %1444 = arith.mulf %1438, %1443 : vector<8x8xf32>
    %1445 = vector.extract_strided_slice %1414 {offsets = [0, 8], sizes = [8, 8], strides = [1, 1]} : vector<8x32xf32> to vector<8x8xf32>
    %cst_591 = arith.constant dense<0.000000e+00> : vector<8x8xf32>
    %1446 = tpu.matmul %1444, %1445, %cst_591 {dimension_numbers = #tpu.dot_dimension_numbers<[1], [0], [0], [1], [0, 0, 1, 1], [], []>} : vector<8x8xf32>, vector<8x8xf32>, vector<8x8xf32> -> vector<8x8xf32>
    %1447 = vector.extract_strided_slice %1411 {offsets = [0, 16], sizes = [8, 8], strides = [1, 1]} : vector<8x32xf32> to vector<8x8xf32>
    %1448 = vector.extract_strided_slice %1413 {offsets = [0, 16], sizes = [8, 8], strides = [1, 1]} : vector<8x32xf32> to vector<8x8xf32>
    %cst_592 = arith.constant dense<0.000000e+00> : vector<8x8xf32>
    %1449 = tpu.matmul %1447, %1448, %cst_592 {dimension_numbers = #tpu.dot_dimension_numbers<[1], [1], [0], [0], [0, 0, 1, 0], [], []>} : vector<8x8xf32>, vector<8x8xf32>, vector<8x8xf32> -> vector<8x8xf32>
    %cst_593 = arith.constant dense<0xFF800000> : vector<8xf32>
    %1450 = vector.multi_reduction <maximumf>, %1449, %cst_593 [1] : vector<8x8xf32> to vector<8xf32>
    %1451 = vector.shape_cast %1450 : vector<8xf32> to vector<8x1xf32>
    %1452 = vector.broadcast %1451 : vector<8x1xf32> to vector<8x8xf32>
    %1453 = arith.subf %1449, %1452 : vector<8x8xf32>
    %1454 = math.exp %1453 : vector<8x8xf32>
    %cst_594 = arith.constant dense<0.000000e+00> : vector<8xf32>
    %1455 = vector.multi_reduction <add>, %1454, %cst_594 [1] : vector<8x8xf32> to vector<8xf32>
    %1456 = vector.shape_cast %1455 : vector<8xf32> to vector<8x1xf32>
    %cst_595 = arith.constant 1.000000e+00 : f32
    %1457 = vector.broadcast %cst_595 : f32 to vector<8x1xf32>
    %1458 = arith.divf %1457, %1456 : vector<8x1xf32>
    %1459 = vector.broadcast %1458 : vector<8x1xf32> to vector<8x8xf32>
    %1460 = arith.mulf %1454, %1459 : vector<8x8xf32>
    %1461 = vector.extract_strided_slice %1414 {offsets = [0, 16], sizes = [8, 8], strides = [1, 1]} : vector<8x32xf32> to vector<8x8xf32>
    %cst_596 = arith.constant dense<0.000000e+00> : vector<8x8xf32>
    %1462 = tpu.matmul %1460, %1461, %cst_596 {dimension_numbers = #tpu.dot_dimension_numbers<[1], [0], [0], [1], [0, 0, 1, 1], [], []>} : vector<8x8xf32>, vector<8x8xf32>, vector<8x8xf32> -> vector<8x8xf32>
    %1463 = vector.extract_strided_slice %1411 {offsets = [0, 24], sizes = [8, 8], strides = [1, 1]} : vector<8x32xf32> to vector<8x8xf32>
    %1464 = vector.extract_strided_slice %1413 {offsets = [0, 24], sizes = [8, 8], strides = [1, 1]} : vector<8x32xf32> to vector<8x8xf32>
    %cst_597 = arith.constant dense<0.000000e+00> : vector<8x8xf32>
    %1465 = tpu.matmul %1463, %1464, %cst_597 {dimension_numbers = #tpu.dot_dimension_numbers<[1], [1], [0], [0], [0, 0, 1, 0], [], []>} : vector<8x8xf32>, vector<8x8xf32>, vector<8x8xf32> -> vector<8x8xf32>
    %cst_598 = arith.constant dense<0xFF800000> : vector<8xf32>
    %1466 = vector.multi_reduction <maximumf>, %1465, %cst_598 [1] : vector<8x8xf32> to vector<8xf32>
    %1467 = vector.shape_cast %1466 : vector<8xf32> to vector<8x1xf32>
    %1468 = vector.broadcast %1467 : vector<8x1xf32> to vector<8x8xf32>
    %1469 = arith.subf %1465, %1468 : vector<8x8xf32>
    %1470 = math.exp %1469 : vector<8x8xf32>
    %cst_599 = arith.constant dense<0.000000e+00> : vector<8xf32>
    %1471 = vector.multi_reduction <add>, %1470, %cst_599 [1] : vector<8x8xf32> to vector<8xf32>
    %1472 = vector.shape_cast %1471 : vector<8xf32> to vector<8x1xf32>
    %cst_600 = arith.constant 1.000000e+00 : f32
    %1473 = vector.broadcast %cst_600 : f32 to vector<8x1xf32>
    %1474 = arith.divf %1473, %1472 : vector<8x1xf32>
    %1475 = vector.broadcast %1474 : vector<8x1xf32> to vector<8x8xf32>
    %1476 = arith.mulf %1470, %1475 : vector<8x8xf32>
    %1477 = vector.extract_strided_slice %1414 {offsets = [0, 24], sizes = [8, 8], strides = [1, 1]} : vector<8x32xf32> to vector<8x8xf32>
    %cst_601 = arith.constant dense<0.000000e+00> : vector<8x8xf32>
    %1478 = tpu.matmul %1476, %1477, %cst_601 {dimension_numbers = #tpu.dot_dimension_numbers<[1], [0], [0], [1], [0, 0, 1, 1], [], []>} : vector<8x8xf32>, vector<8x8xf32>, vector<8x8xf32> -> vector<8x8xf32>
    %1479 = tpu.concatenate %1430, %1446, %1462, %1478 in 1 : vector<8x8xf32>, vector<8x8xf32>, vector<8x8xf32>, vector<8x8xf32> -> vector<8x32xf32>
    %cst_602 = arith.constant dense<0.000000e+00> : vector<8x32xf32>
    %1480 = tpu.matmul %1479, %1410, %cst_602 {dimension_numbers = #tpu.dot_dimension_numbers<[1], [0], [0], [1], [0, 0, 1, 1], [], []>} : vector<8x32xf32>, vector<32x32xf32>, vector<8x32xf32> -> vector<8x32xf32>
    %1481 = vector.extract_strided_slice %1301 {offsets = [1, 0], sizes = [1, 32], strides = [1, 1]} : vector<3x32xf32> to vector<1x32xf32>
    %1482 = vector.extract_strided_slice %1303 {offsets = [1, 0], sizes = [1, 32], strides = [1, 1]} : vector<3x32xf32> to vector<1x32xf32>
    %1483 = arith.addf %1404, %1480 : vector<8x32xf32>
    %cst_603 = arith.constant dense<0.000000e+00> : vector<8xf32>
    %1484 = vector.multi_reduction <add>, %1483, %cst_603 [1] : vector<8x32xf32> to vector<8xf32>
    %1485 = vector.shape_cast %1484 : vector<8xf32> to vector<8x1xf32>
    %cst_604 = arith.constant 3.200000e+01 : f32
    %1486 = vector.broadcast %cst_604 : f32 to vector<8x1xf32>
    %1487 = arith.divf %1485, %1486 : vector<8x1xf32>
    %1488 = vector.broadcast %1487 : vector<8x1xf32> to vector<8x32xf32>
    %1489 = arith.subf %1483, %1488 : vector<8x32xf32>
    %1490 = arith.mulf %1489, %1489 : vector<8x32xf32>
    %cst_605 = arith.constant dense<0.000000e+00> : vector<8xf32>
    %1491 = vector.multi_reduction <add>, %1490, %cst_605 [1] : vector<8x32xf32> to vector<8xf32>
    %1492 = vector.shape_cast %1491 : vector<8xf32> to vector<8x1xf32>
    %cst_606 = arith.constant 3.200000e+01 : f32
    %1493 = vector.broadcast %cst_606 : f32 to vector<8x1xf32>
    %1494 = arith.divf %1492, %1493 : vector<8x1xf32>
    %cst_607 = arith.constant 9.99999974E-6 : f32
    %1495 = vector.broadcast %cst_607 : f32 to vector<8x1xf32>
    %1496 = arith.addf %1494, %1495 : vector<8x1xf32>
    %1497 = math.rsqrt %1496 : vector<8x1xf32>
    %1498 = vector.broadcast %1497 : vector<8x1xf32> to vector<8x32xf32>
    %1499 = arith.mulf %1489, %1498 : vector<8x32xf32>
    %1500 = vector.broadcast %1481 : vector<1x32xf32> to vector<8x32xf32>
    %1501 = arith.mulf %1499, %1500 : vector<8x32xf32>
    %1502 = vector.broadcast %1482 : vector<1x32xf32> to vector<8x32xf32>
    %1503 = arith.addf %1501, %1502 : vector<8x32xf32>
    %c1_608 = arith.constant 1 : index
    %c0_609 = arith.constant 0 : index
    %c0_610 = arith.constant 0 : index
    %1504 = vector.load %arg15[%c1_608, %c0_609, %c0_610] : memref<2x32x64xf32, #tpu.memory_space<vmem>>, vector<1x32x64xf32>
    %1505 = vector.shape_cast %1504 : vector<1x32x64xf32> to vector<32x64xf32>
    %c1_611 = arith.constant 1 : index
    %c0_612 = arith.constant 0 : index
    %c0_613 = arith.constant 0 : index
    %1506 = vector.load %arg16[%c1_611, %c0_612, %c0_613] : memref<2x1x64xf32, #tpu.memory_space<vmem>>, vector<1x1x64xf32>
    %1507 = vector.shape_cast %1506 : vector<1x1x64xf32> to vector<1x64xf32>
    %c1_614 = arith.constant 1 : index
    %c0_615 = arith.constant 0 : index
    %c0_616 = arith.constant 0 : index
    %1508 = vector.load %arg17[%c1_614, %c0_615, %c0_616] : memref<2x64x32xf32, #tpu.memory_space<vmem>>, vector<1x64x32xf32>
    %1509 = vector.shape_cast %1508 : vector<1x64x32xf32> to vector<64x32xf32>
    %c1_617 = arith.constant 1 : index
    %c0_618 = arith.constant 0 : index
    %c0_619 = arith.constant 0 : index
    %1510 = vector.load %arg18[%c1_617, %c0_618, %c0_619] : memref<2x1x32xf32, #tpu.memory_space<vmem>>, vector<1x1x32xf32>
    %1511 = vector.shape_cast %1510 : vector<1x1x32xf32> to vector<1x32xf32>
    %cst_620 = arith.constant dense<0.000000e+00> : vector<8x64xf32>
    %1512 = tpu.matmul %1503, %1505, %cst_620 {dimension_numbers = #tpu.dot_dimension_numbers<[1], [0], [0], [1], [0, 0, 1, 1], [], []>} : vector<8x32xf32>, vector<32x64xf32>, vector<8x64xf32> -> vector<8x64xf32>
    %1513 = vector.broadcast %1507 : vector<1x64xf32> to vector<8x64xf32>
    %1514 = arith.addf %1512, %1513 : vector<8x64xf32>
    %cst_621 = arith.constant 0.000000e+00 : f32
    %1515 = vector.broadcast %cst_621 : f32 to vector<8x64xf32>
    %1516 = arith.maximumf %1514, %1515 : vector<8x64xf32>
    %cst_622 = arith.constant dense<0.000000e+00> : vector<8x32xf32>
    %1517 = tpu.matmul %1516, %1509, %cst_622 {dimension_numbers = #tpu.dot_dimension_numbers<[1], [0], [0], [1], [0, 0, 1, 1], [], []>} : vector<8x64xf32>, vector<64x32xf32>, vector<8x32xf32> -> vector<8x32xf32>
    %1518 = vector.broadcast %1511 : vector<1x32xf32> to vector<8x32xf32>
    %1519 = arith.addf %1517, %1518 : vector<8x32xf32>
    %1520 = vector.extract_strided_slice %1301 {offsets = [2, 0], sizes = [1, 32], strides = [1, 1]} : vector<3x32xf32> to vector<1x32xf32>
    %1521 = vector.extract_strided_slice %1303 {offsets = [2, 0], sizes = [1, 32], strides = [1, 1]} : vector<3x32xf32> to vector<1x32xf32>
    %1522 = arith.addf %1503, %1519 : vector<8x32xf32>
    %cst_623 = arith.constant dense<0.000000e+00> : vector<8xf32>
    %1523 = vector.multi_reduction <add>, %1522, %cst_623 [1] : vector<8x32xf32> to vector<8xf32>
    %1524 = vector.shape_cast %1523 : vector<8xf32> to vector<8x1xf32>
    %cst_624 = arith.constant 3.200000e+01 : f32
    %1525 = vector.broadcast %cst_624 : f32 to vector<8x1xf32>
    %1526 = arith.divf %1524, %1525 : vector<8x1xf32>
    %1527 = vector.broadcast %1526 : vector<8x1xf32> to vector<8x32xf32>
    %1528 = arith.subf %1522, %1527 : vector<8x32xf32>
    %1529 = arith.mulf %1528, %1528 : vector<8x32xf32>
    %cst_625 = arith.constant dense<0.000000e+00> : vector<8xf32>
    %1530 = vector.multi_reduction <add>, %1529, %cst_625 [1] : vector<8x32xf32> to vector<8xf32>
    %1531 = vector.shape_cast %1530 : vector<8xf32> to vector<8x1xf32>
    %cst_626 = arith.constant 3.200000e+01 : f32
    %1532 = vector.broadcast %cst_626 : f32 to vector<8x1xf32>
    %1533 = arith.divf %1531, %1532 : vector<8x1xf32>
    %cst_627 = arith.constant 9.99999974E-6 : f32
    %1534 = vector.broadcast %cst_627 : f32 to vector<8x1xf32>
    %1535 = arith.addf %1533, %1534 : vector<8x1xf32>
    %1536 = math.rsqrt %1535 : vector<8x1xf32>
    %1537 = vector.broadcast %1536 : vector<8x1xf32> to vector<8x32xf32>
    %1538 = arith.mulf %1528, %1537 : vector<8x32xf32>
    %1539 = vector.broadcast %1520 : vector<1x32xf32> to vector<8x32xf32>
    %1540 = arith.mulf %1538, %1539 : vector<8x32xf32>
    %1541 = vector.broadcast %1521 : vector<1x32xf32> to vector<8x32xf32>
    %1542 = arith.addf %1540, %1541 : vector<8x32xf32>
    %c8_628 = arith.constant 8 : index
    %c0_629 = arith.constant 0 : index
    %1543 = vector.load %arg21[%c8_628, %c0_629] : memref<16x32xf32, #tpu.memory_space<vmem>>, vector<8x32xf32>
    tpu.vector_store %arg21[%c8_628, %c0_629], %1542 {strides = array<i32>} : memref<16x32xf32, #tpu.memory_space<vmem>>, vector<8x32xf32>,
    return
  }
}

</mosaic_0001>

<bundles_post_ra>
// kernel: transformer_forward.1
= control target key start
LH: loop header
LB: loop body
LE: loop exit
PB: predicated region body
PF: predicated region fallthrough
CT: control target
= control target key end

     0   :  { %s8385_s0 = inlined_call_operand.vmem [shape: f32[16,32], index: 0, kind: input, shape index: {}]   ;;  %s8386_s1 = inlined_call_operand.vmem [shape: f32[16,32], index: 1, kind: input, shape index: {}]   ;;  %s8387_s2 = inlined_call_operand.vmem [shape: f32[2,32,96], index: 2, kind: input, shape index: {}]   ;;  %s8388_s3 = inlined_call_operand.vmem [shape: f32[2,32,32], index: 3, kind: input, shape index: {}]   ;;  %s8389_s4 = inlined_call_operand.vmem [shape: f32[2,32,64], index: 4, kind: input, shape index: {}]   ;;  %s8390_s5 = inlined_call_operand.vmem [shape: f32[2,1,64], index: 5, kind: input, shape index: {}]   ;;  %s8391_s6 = inlined_call_operand.vmem [shape: f32[2,64,32], index: 6, kind: input, shape index: {}]   ;;  %s8392_s7 = inlined_call_operand.vmem [shape: f32[2,1,32], index: 7, kind: input, shape index: {}]   ;;  %s8393_s8 = inlined_call_operand.vmem [shape: f32[2,2,32], index: 8, kind: input, shape index: {}]   ;;  %s8394_s9 = inlined_call_operand.vmem [shape: f32[2,2,32], index: 9, kind: input, shape index: {}]   ;;  %s8395_s10 = inlined_call_operand.vmem [shape: f32[2,32,96], index: 10, kind: input, shape index: {}]   ;;  %s8396_s11 = inlined_call_operand.vmem [shape: f32[2,32,32], index: 11, kind: input, shape index: {}]   ;;  %s8397_s12 = inlined_call_operand.vmem [shape: f32[2,32,32], index: 12, kind: input, shape index: {}]   ;;  %s8398_s13 = inlined_call_operand.vmem [shape: f32[2,32,64], index: 13, kind: input, shape index: {}]   ;;  %s8399_s14 = inlined_call_operand.vmem [shape: f32[2,32,32], index: 14, kind: input, shape index: {}]   ;;  %s8400_s15 = inlined_call_operand.vmem [shape: f32[2,32,64], index: 15, kind: input, shape index: {}]   ;;  %s8401_s16 = inlined_call_operand.vmem [shape: f32[2,1,64], index: 16, kind: input, shape index: {}]   ;;  %s8402_s17 = inlined_call_operand.vmem [shape: f32[2,64,32], index: 17, kind: input, shape index: {}]   ;;  %s8403_s18 = inlined_call_operand.vmem [shape: f32[2,1,32], index: 18, kind: input, shape index: {}]   ;;  %s8404_s19 = inlined_call_operand.vmem [shape: f32[2,3,32], index: 19, kind: input, shape index: {}]   ;;  %s8405_s20 = inlined_call_operand.vmem [shape: f32[2,3,32], index: 20, kind: input, shape index: {}]   ;;  %s8406_s21 = inlined_call_operand.hbm [shape: f32[16,32], index: 21, kind: output, shape index: {}]  }
   0x1   :  { %8474 = sst [smem:[#allocation5_spill]] %s8385_s0 }
   0x2   :  { %8475 = sst [smem:[#allocation6_spill]] %s8386_s1 }
   0x3   :  { %8476 = sst [smem:[#allocation7_spill]] %s8387_s2 }
   0x4   :  { %8477 = sst [smem:[#allocation8_spill]] %s8388_s3 }
   0x5   :  { %8478 = sst [smem:[#allocation9_spill]] %s8389_s4 }
   0x6   :  { %8479 = sst [smem:[#allocation10_spill]] %s8390_s5 }
   0x7   :  { %8480 = sst [smem:[#allocation11_spill]] %s8391_s6 }
   0x8   :  { %8481 = sst [smem:[#allocation12_spill]] %s8392_s7 }
   0x9   :  { %8482 = sst [smem:[#allocation13_spill]] %s8393_s8 }
   0xa   :  { %8483 = sst [smem:[#allocation14_spill]] %s8394_s9 }
   0xb   :  { %8484 = sst [smem:[#allocation15_spill]] %s8396_s11 }
   0xc   :  { %8485 = sst [smem:[#allocation16_spill]] %s8397_s12 }
   0xd   :  { %8486 = sst [smem:[#allocation17_spill]] %s8398_s13 }
   0xe   :  { %8487 = sst [smem:[#allocation18_spill]] %s8399_s14 }
   0xf   :  { %8488 = sst [smem:[#allocation19_spill]] %s8400_s15 }
  0x10   :  { %8489 = sst [smem:[#allocation20_spill]] %s8401_s16 }
  0x11   :  { %8490 = sst [smem:[#allocation21_spill]] %s8402_s17 }
  0x12   :  { %8491 = sst [smem:[#allocation22_spill]] %s8403_s18 }
  0x13   :  { %8492 = sst [smem:[#allocation23_spill]] %s8404_s19 }
  0x14   :  { %8493 = sst [smem:[#allocation24_spill]] %s8405_s20 }
  0x15   :  { %8494 = sst [smem:[#allocation25_spill]] %s8406_s21 }
  0x16   :  { %s8495_s26 = sld [smem:[#allocation7_spill]]  ;;  %vm86_vm0 = vcmask 261120  }
  0x17   :  { %s8496_s22 = sld [smem:[#allocation5_spill]] }
  0x1c   :  { %v81_v0 = vld [vmem:[%s8495_s26 + $0x18] sm:$0xff]  ;;  %v80_v1 = vld [vmem:[%s8495_s26 + $0x10] sm:$0xff]  ;;  %v79_v2 = vld [vmem:[%s8495_s26 + $0x8] sm:$0xff] }
  0x1d   :  { %102 = vmatpush.msra.mxu0 %v81_v0  ;;  %v78_v3 = vld [vmem:[%s8495_s26] sm:$0xff] }
  0x1e   :  { %v6675_v4 = vld [vmem:[%s8496_s22] sm:$0xff] }
  0x1f   :  { %103 = vmatpush.msra.mxu0 %v80_v1 }
  0x21   :  { %104 = vmatpush.msra.mxu0 %v79_v2 }
  0x23   :  { %105 = vmatpush.msra.mxu0 %v78_v3 }
  0x24   :  { %5928 = vmatmul.msk.f32.vlgmr.msra.gmra.mxu0 %vm86_vm0, %v6675_v4 }
  0x25   :  { %26 = vsyncpa [#allocation3], 0  ;;  %s8427_s23 = smov 72   ;;  %s8435_s1 = smov 120   ;;  %vm113_vm1 = vcmask 64512  }
  0x26   :  { %s8437_s24 = smov 96   ;;  %s8419_s2 = smov 112  }
  0x27   :  { %s8423_s25 = smov 80   ;;  %s8425_s27 = smov 88  }
  0x28   :  { %s8421_s3 = smov 104   ;;  %s8417_s28 = smov 56  }
  0x29   :  { %s8415_s29 = smov 40   ;;  %s8439_s0 = smov 64  }
  0x2a   :  { %s8413_s4 = smov 48   ;;  %s8431_s30 = smov 8  }
  0x2b   :  { %s8429_s5 = smov 24   ;;  %s8510_s12 = sld [smem:[#allocation6_spill]] }
  0x2c   :  { %s8511_s14 = smov 8   ;;  %s8512_s15 = smov 24  }
  0x2d   :  { %s8514_s17 = smov 64   ;;  %s8517_s21 = sld [smem:[#allocation24_spill]] }
  0x2e   :  { %s8520_s18 = sld [smem:[#allocation18_spill]] }
  0x2f   :  { %s8521_s22 = sld [smem:[#allocation19_spill]] }
  0x30   :  { %s8524_s20 = sld [smem:[#allocation22_spill]] }
  0x31   :  { %s8526_s19 = sld [smem:[#allocation7_spill]] }
  0x32   :  { %s8533_s16 = sld [smem:[#allocation14_spill]] }
  0xa1   :  { %v6679_v5 = vpop.f32.mrf.mxu0 }
  0xa2   :  { %349 = vrot.lane.b32.xlu2 %v6679_v5, %s8427_s23  ;;  %189 = vrot.lane.b32.xlu1 %v6679_v5, %s8435_s1  ;;  %s8499_s23 = sld [smem:[#allocation10_spill]]  ;;  %s8504_s1 = smov 80  }
  0xa3   :  { %111 = vrot.lane.b32.xlu0 %v6679_v5, %s8437_s24  ;;  %s8505_s24 = smov 104  }
  0xaa   :  { %268 = vrot.lane.b32.xlu2 %v6679_v5, %s8419_s2  ;;  %270 = vrot.lane.b32.xlu1 %v6679_v5, %s8423_s25  ;;  %s8497_s2 = sld [smem:[#allocation8_spill]]  ;;  %s8508_s25 = smov 40  }
  0xab   :  { %191 = vrot.lane.b32.xlu0 %v6679_v5, %s8425_s27  ;;  %s8498_s27 = sld [smem:[#allocation9_spill]] }
  0xb3   :  { %347 = vrot.lane.b32.xlu0 %v6679_v5, %s8421_s3  ;;  %s8500_s3 = smov 96  }
  0xfc   :  { %v350_v8 = vpop.permute.xlu2 %349 }
 0x104   :  { %v269_v11 = vpop.permute.xlu2 %268 }
 0x114   :  { %v190_v6 = vpop.permute.xlu1 %189 }
 0x115   :  { %v112_v7 = vpop.permute.xlu0 %111 }
 0x116   :  { %5929 = vmatpush.xpose.msk.msra.mxu1 %vm113_vm1, %v112_v7 }
 0x119   :  { %5930 = vmatmul.msk.f32.vlgmr.msra.gmra.mxu1 %vm113_vm1, %v6679_v5 }
 0x11c   :  { %v271_v9 = vpop.permute.xlu1 %270 }
 0x11d   :  { %v192_v10 = vpop.permute.xlu0 %191  ;;  %5935 = vmatpush.xpose.msk.msrb.mxu1 %vm113_vm1, %v271_v9 }
 0x11e   :  { %5932 = vmatpush.xpose.msk.msrb.mxu0 %vm113_vm1, %v192_v10 }
 0x121   :  { %5933 = vmatmul.msk.f32.vlgmr.msrb.gmra.mxu0 %vm113_vm1, %v190_v6  ;;  %5936 = vmatmul.msk.f32.vlgmr.msrb.gmra.mxu1 %vm113_vm1, %v269_v11 }
 0x122   :  { %5938 = vmatpush.xpose.msk.msra.mxu0 %vm113_vm1, %v350_v8 }
 0x125   :  { %v348_v12 = vpop.permute.xlu0 %347 }
 0x129   :  { %5939 = vmatmul.msk.f32.vlgmr.msra.gmra.mxu0 %vm113_vm1, %v348_v12 }
 0x196   :  { %v135_v13 = vpop.f32.mrf.mxu1 }
 0x197   :  { %v138_v14 = vsel %vm113_vm1, %v135_v13, -inf }
 0x198   :  { %139 = vmax.xlane.f32.xlu1 %v138_v14 }
 0x19e   :  { %v214_v15 = vpop.f32.mrf.mxu0  ;;  %v293_v16 = vpop.f32.mrf.mxu1 }
 0x19f   :  { %v296_v17 = vsel %vm113_vm1, %v293_v16, -inf  ;;  %v217_v18 = vsel %vm113_vm1, %v214_v15, -inf }
 0x1a0   :  { %297 = vmax.xlane.f32.xlu0 %v296_v17  ;;  %218 = vmax.xlane.f32.xlu2 %v217_v18 }
 0x1a6   :  { %v372_v19 = vpop.f32.mrf.mxu0 }
 0x1a7   :  { %v375_v20 = vsel %vm113_vm1, %v372_v19, -inf }
 0x1a8   :  { %376 = vmax.xlane.f32.xlu2 %v375_v20 }
 0x1b4   :  { %242 = vrot.lane.b32.xlu0 %v6679_v5, %s8417_s28  ;;  %s8501_s28 = smov 120  }
 0x20b   :  { %v140_v21 = vpop.xlane.xlu1 %139 }
 0x20c   :  { %v141_v22 = vsub.f32 %v135_v13, %v140_v21 }
 0x20e   :  { %v142_v23 = vmul.f32 1.442695, %v141_v22 }
 0x210   :  { %6270 = vpow2.f32 %v142_v23 }
 0x213   :  { %v219_v24 = vpop.xlane.xlu2 %218  ;;  %v298_v25 = vpop.xlane.xlu0 %297 }
 0x214   :  { %v220_v26 = vsub.f32 %v214_v15, %v219_v24  ;;  %v299_v27 = vsub.f32 %v293_v16, %v298_v25 }
 0x216   :  { %v6271_v28 = vpop.eup %6270  ;;  %v221_v29 = vmul.f32 1.442695, %v220_v26  ;;  %v300_v30 = vmul.f32 1.442695, %v299_v27 }
 0x217   :  { %v144_v31 = vsel %vm113_vm1, %v6271_v28, 0.0 }
 0x218   :  { %6272 = vpow2.f32 %v221_v29  ;;  %145 = vadd.xlane.f32.xlu1 %v144_v31 }
 0x219   :  { %6274 = vpow2.f32 %v300_v30 }
 0x21b   :  { %v377_v32 = vpop.xlane.xlu2 %376 }
 0x21c   :  { %v378_v33 = vsub.f32 %v372_v19, %v377_v32 }
 0x21e   :  { %v6711_v34 = vpop.eup %6272  ;;  %v379_v35 = vmul.f32 1.442695, %v378_v33 }
 0x21f   :  { %v6713_v36 = vpop.eup %6274  ;;  %v223_v37 = vsel %vm113_vm1, %v6711_v34, 0.0 }
 0x220   :  { %6276 = vpow2.f32 %v379_v35  ;;  %224 = vadd.xlane.f32.xlu2 %v223_v37  ;;  %v302_v38 = vsel %vm113_vm1, %v6713_v36, 0.0  ;;  %v84_v35 = vld [vmem:[%s8497_s2 + $0x10] sm:$0xff]  ;;  %v82_v37 = vld [vmem:[%s8497_s2] sm:$0xff] }
 0x221   :  { %303 = vadd.xlane.f32.xlu0 %v302_v38 }
 0x226   :  { %v6719_v39 = vpop.eup %6276  ;;  %v243_v42 = vpop.permute.xlu0 %242 }
 0x227   :  { %v381_v40 = vsel %vm113_vm1, %v6719_v39, 0.0 }
 0x228   :  { %382 = vadd.xlane.f32.xlu1 %v381_v40 }
 0x235   :  { %400 = vrot.lane.b32.xlu0 %v6679_v5, %s8415_s29  ;;  %s8503_s29 = smov 88  }
 0x238   :  { %163 = vrot.lane.b32.xlu2 %v6679_v5, %s8439_s0 }
 0x241   :  { %321 = vrot.lane.b32.xlu1 %v6679_v5, %s8413_s4  ;;  %s8433_s4 = smov 16  }
 0x28b   :  { %v146_v41 = vpop.xlane.xlu1 %145 }
 0x28c   :  { %6278 = vrcp.f32 %v146_v41  ;;  %v158_v49 = vand.u32 2147483648, %v146_v41  ;;  %v156_v50 = vand.u32 2147483647, %v146_v41  ;;  %vm152_vm3 = vweird.f32 %v146_v41 }
 0x28e   :  { %v159_v58 = vor.u32 1.1754944e-38, %v158_v49  ;;  %vm157_vm5 = vcmp.eq.f32.partialorder %v156_v50, 8.507059e+37 }
 0x292   :  { %v6279_v43 = vpop.eup %6278 }
 0x293   :  { %v148_v44 = vmul.f32 %v6279_v43, %v146_v41  ;;  %v225_v45 = vpop.xlane.xlu2 %224  ;;  %vm153_vm2 = vweird.f32 %v6279_v43 }
 0x294   :  { %6280 = vrcp.f32 %v225_v45  ;;  %v6729_v46 = vpop.xlane.xlu0 %303  ;;  %vm154_vm4 = vmor %vm152_vm3, %vm153_vm2  ;;  %v237_v62 = vand.u32 2147483648, %v225_v45  ;;  %v235_v1 = vand.u32 2147483647, %v225_v45  ;;  %vm231_vm7 = vweird.f32 %v225_v45 }
 0x295   :  { %v149_v47 = vsub.f32 1.0, %v148_v44  ;;  %6282 = vrcp.f32 %v6729_v46  ;;  %v316_v20 = vand.u32 2147483648, %v6729_v46  ;;  %vm310_vm15 = vweird.f32 %v6729_v46 }
 0x296   :  { %v238_v6 = vor.u32 1.1754944e-38, %v237_v62  ;;  %vm236_vm9 = vcmp.eq.f32.partialorder %v235_v1, 8.507059e+37  ;;  %v314_v22 = vand.u32 2147483647, %v6729_v46  ;;  %v512_v62 = vld [vmem:[%s8391_s6 + $0x38] sm:$0xff] }
 0x297   :  { %v150_v48 = vmul.f32 %v6279_v43, %v149_v47  ;;  %v317_v26 = vor.u32 1.1754944e-38, %v316_v20  ;;  %v6546_v47 = vmov 32.0   ;;  %556 = vmatpush.msrb.mxu0 %v512_v62 }
 0x298   :  { %vm315_vm3 = vcmp.eq.f32.partialorder %v314_v22, 8.507059e+37  ;;  %v506_v22 = vld [vmem:[%s8391_s6 + $0x8] sm:$0xff] }
 0x299   :  { %v151_v51 = vadd.f32 %v6279_v43, %v150_v48 }
 0x29a   :  { %v6281_v52 = vpop.eup %6280 }
 0x29b   :  { %v6283_v53 = vpop.eup %6282  ;;  %v227_v54 = vmul.f32 %v6281_v52, %v225_v45  ;;  %v383_v55 = vpop.xlane.xlu1 %382  ;;  %v155_v57 = vsel %vm154_vm4, %v6279_v43, %v151_v51  ;;  %vm232_vm6 = vweird.f32 %v6281_v52  ;;  %vm439_vm4 = vcmask 130048  }
 0x29c   :  { %v164_v56 = vpop.permute.xlu2 %163  ;;  %6284 = vrcp.f32 %v383_v55  ;;  %v306_v60 = vmul.f32 %v6283_v53, %v6729_v46  ;;  %v160_v61 = vsel %vm157_vm5, %v159_v58, %v155_v57  ;;  %vm233_vm8 = vmor %vm231_vm7, %vm232_vm6  ;;  %v395_v13 = vand.u32 2147483648, %v383_v55  ;;  %v503_v58 = vld [vmem:[%s8498_s27 + $0x18] sm:$0xff] }
 0x29d   :  { %184 = vmatpush.msra.mxu2 %v164_v56  ;;  %v228_v59 = vsub.f32 1.0, %v227_v54  ;;  %v162_v63 = vmul.f32 %v6271_v28, %v160_v61  ;;  %v393_v15 = vand.u32 2147483647, %v383_v55  ;;  %vm389_vm11 = vweird.f32 %v383_v55  ;;  %v500_v61 = vld [vmem:[%s8498_s27] sm:$0xff] }
 0x29e   :  { %v307_v2 = vsub.f32 1.0, %v306_v60  ;;  %vm311_vm12 = vweird.f32 %v6283_v53  ;;  %v396_v19 = vor.u32 1.1754944e-38, %v395_v13  ;;  %vm441_vm5 = vcmask 195584   ;;  %v501_v60 = vld [vmem:[%s8498_s27 + $0x8] sm:$0xff] }
 0x29f   :  { %263 = vmatpush.msrb.mxu2 %v243_v42  ;;  %v229_v0 = vmul.f32 %v6281_v52, %v228_v59  ;;  %vm394_vm14 = vcmp.eq.f32.partialorder %v393_v15, 8.507059e+37  ;;  %vm312_vm2 = vmor %vm310_vm15, %vm311_vm12  ;;  %6286 = vrcp.f32 %v6546_v47  ;;  %v502_v59 = vld [vmem:[%s8498_s27 + $0x10] sm:$0xff] }
 0x2a0   :  { %5931 = vmatmul.msk.f32.vlgmr.msra.gmra.mxu2 %vm113_vm1, %v162_v63  ;;  %v308_v12 = vmul.f32 %v6283_v53, %v307_v2  ;;  %v511_v63 = vld [vmem:[%s8391_s6 + $0x30] sm:$0xff] }
 0x2a1   :  { %v230_v3 = vadd.f32 %v6281_v52, %v229_v0  ;;  %v510_v0 = vld [vmem:[%s8391_s6 + $0x28] sm:$0xff]  ;;  %557 = vmatpush.msrb.mxu0 %v511_v63 }
 0x2a2   :  { %v6285_v5 = vpop.eup %6284  ;;  %v309_v18 = vadd.f32 %v6283_v53, %v308_v12  ;;  %v76_v12 = vld [vmem:[%s8393_s8] sm:$0x3] }
 0x2a3   :  { %v385_v7 = vmul.f32 %v6285_v5, %v383_v55  ;;  %v234_v8 = vsel %vm233_vm8, %v6281_v52, %v230_v3  ;;  %vm390_vm10 = vweird.f32 %v6285_v5  ;;  %v509_v3 = vld [vmem:[%s8391_s6 + $0x20] sm:$0xff]  ;;  %558 = vmatpush.msrb.mxu0 %v510_v0  ;;  %v496_v15 = vperm.slane %v76_v12, 0 }
 0x2a4   :  { %v239_v9 = vsel %vm236_vm9, %v238_v6, %v234_v8  ;;  %vm391_vm13 = vmor %vm389_vm11, %vm390_vm10  ;;  %v313_v25 = vsel %vm312_vm2, %v6283_v53, %v309_v18  ;;  %v508_v6 = vld [vmem:[%s8391_s6 + $0x18] sm:$0xff]  ;;  %vm544_vm10 = vcmask 523264  }
 0x2a5   :  { %v386_v10 = vsub.f32 1.0, %v385_v7  ;;  %v241_v11 = vmul.f32 %v6711_v34, %v239_v9  ;;  %v318_v27 = vsel %vm315_vm3, %v317_v26, %v313_v25  ;;  %v85_v34 = vld [vmem:[%s8497_s2 + $0x18] sm:$0xff]  ;;  %v6287_v48 = vpop.eup %6286  ;;  %559 = vmatpush.msrb.mxu0 %v509_v3 }
 0x2a6   :  { %v320_v29 = vmul.f32 %v6713_v36, %v318_v27  ;;  %458 = vmatpush.msra.mxu1 %v85_v34  ;;  %v83_v36 = vld [vmem:[%s8497_s2 + $0x8] sm:$0xff]  ;;  %v471_v49 = vmul.f32 32.0, %v6287_v48  ;;  %vm475_vm6 = vweird.f32 %v6287_v48 }
 0x2a7   :  { %v387_v14 = vmul.f32 %v6285_v5, %v386_v10  ;;  %v401_v16 = vpop.permute.xlu0 %400  ;;  %560 = vmatpush.msrb.mxu0 %v508_v6 }
 0x2a8   :  { %5934 = vmatmul.msk.f32.vlgmr.msrb.gmra.mxu2 %vm113_vm1, %v241_v11  ;;  %459 = vmatpush.msra.mxu1 %v84_v35  ;;  %v472_v50 = vsub.f32 1.0, %v471_v49 }
 0x2a9   :  { %v388_v17 = vadd.f32 %v6285_v5, %v387_v14  ;;  %421 = vmatpush.msra.mxu2 %v401_v16  ;;  %v77_v14 = vld [vmem:[%s8394_s9] sm:$0x3] }
 0x2aa   :  { %460 = vmatpush.msra.mxu1 %v83_v36  ;;  %v473_v51 = vmul.f32 %v6287_v48, %v472_v50  ;;  %v498_v18 = vperm.slane %v77_v14, 0 }
 0x2ab   :  { %v392_v21 = vsel %vm391_vm13, %v6285_v5, %v388_v17 }
 0x2ac   :  { %v397_v23 = vsel %vm394_vm14, %v396_v19, %v392_v21  ;;  %461 = vmatpush.msra.mxu1 %v82_v37  ;;  %v474_v52 = vadd.f32 %v6287_v48, %v473_v51  ;;  %v507_v21 = vld [vmem:[%s8391_s6 + $0x10] sm:$0xff]  ;;  %v591_v51 = vperm.slane %v76_v12, 1 }
 0x2ad   :  { %v399_v24 = vmul.f32 %v6719_v39, %v397_v23  ;;  %561 = vmatpush.msrb.mxu0 %v507_v21  ;;  %v505_v23 = vld [vmem:[%s8391_s6] sm:$0xff] }
 0x2ae   :  { %v6764_v53 = vsel %vm475_vm6, %v6287_v48, %v474_v52 }
 0x2af   :  { %562 = vmatpush.msrb.mxu0 %v506_v22 }
 0x2b0   :  { %5940 = vmatmul.msk.f32.vlgmr.msra.gmra.mxu2 %vm113_vm1, %v399_v24  ;;  %v6254_v24 = vld [vmem:[%s8499_s23] ss:$0 sm:$0xff] }
 0x2b1   :  { %563 = vmatpush.msrb.mxu0 %v505_v23 }
 0x2b3   :  { %v322_v28 = vpop.permute.xlu1 %321 }
 0x2b4   :  { %342 = vmatpush.msra.mxu3 %v322_v28  ;;  %v6255_v28 = vld [vmem:[%s8392_s7] ss:$0 sm:$0xff] }
 0x2b5   :  { %5937 = vmatmul.msk.f32.vlgmr.msra.gmra.mxu3 %vm113_vm1, %v320_v29 }
 0x2b6   :  { %532 = vmatpush.msrb.mxu3 %v503_v58 }
 0x2b8   :  { %533 = vmatpush.msrb.mxu3 %v502_v59 }
 0x2ba   :  { %534 = vmatpush.msrb.mxu3 %v501_v60 }
 0x2bc   :  { %535 = vmatpush.msrb.mxu3 %v500_v61 }
 0x323   :  { %v186_v30 = vpop.f32.mrf.mxu2 }
 0x32b   :  { %v265_v31 = vpop.f32.mrf.mxu2 }
 0x32c   :  { %427 = vrot.lane.b32.xlu2 %v265_v31, %s8431_s30  ;;  %s8506_s30 = smov 112  }
 0x333   :  { %v423_v32 = vpop.f32.mrf.mxu2 }
 0x334   :  { %435 = vrot.lane.b32.xlu0 %v423_v32, %s8429_s5  ;;  %s8507_s5 = smov 56  }
 0x338   :  { %v344_v33 = vpop.f32.mrf.mxu3 }
 0x339   :  { %431 = vrot.lane.b32.xlu1 %v344_v33, %s8433_s4  ;;  %s8502_s4 = smov 72  }
 0x386   :  { %v428_v38 = vpop.permute.xlu2 %427 }
 0x387   :  { %v438_v39 = vsel %vm113_vm1, %v186_v30, %v428_v38  ;;  %v5949_v38 = vld [vmem:[%s8495_s26 + $0x38] sm:$0xff] }
 0x388   :  { %624 = vmatpush.msrb.mxu2 %v5949_v38 }
 0x3a6   :  { %v436_v41 = vpop.permute.xlu0 %435 }
 0x3ab   :  { %v432_v40 = vpop.permute.xlu1 %431 }
 0x3ac   :  { %v440_v42 = vsel %vm439_vm4, %v438_v39, %v432_v40  ;;  %v5948_v39 = vld [vmem:[%s8495_s26 + $0x30] sm:$0xff]  ;;  %v5947_v40 = vld [vmem:[%s8495_s26 + $0x28] sm:$0xff] }
 0x3ad   :  { %v442_v43 = vsel %vm441_vm5, %v440_v42, %v436_v41  ;;  %625 = vmatpush.msrb.mxu2 %v5948_v39  ;;  %v5946_v41 = vld [vmem:[%s8495_s26 + $0x20] sm:$0xff]  ;;  %s8513_s26 = smov 16  }
 0x3ae   :  { %5941 = vmatmul.msk.f32.vlgmr.msra.gmra.mxu1 %vm86_vm0, %v442_v43 }
 0x3af   :  { %626 = vmatpush.msrb.mxu2 %v5947_v40 }
 0x3b1   :  { %627 = vmatpush.msrb.mxu2 %v5946_v41 }
 0x42b   :  { %v463_v44 = vpop.f32.mrf.mxu1 }
 0x42c   :  { %v466_v45 = vadd.f32 %v463_v44, %v6675_v4 }
 0x42e   :  { %v467_v46 = vsel %vm86_vm0, %v466_v45, 0.0 }
 0x42f   :  { %468 = vadd.xlane.f32.xlu2 %v467_v46 }
 0x4a2   :  { %v469_v54 = vpop.xlane.xlu2 %468 }
 0x4a3   :  { %v477_v55 = vmul.f32 %v6764_v53, %v469_v54  ;;  %v593_v54 = vperm.slane %v77_v14, 1 }
 0x4a5   :  { %v478_v56 = vsub.f32 %v466_v45, %v477_v55 }
 0x4a7   :  { %v479_v57 = vmul.f32 %v478_v56, %v478_v56 }
 0x4a9   :  { %v480_v4 = vsel %vm86_vm0, %v479_v57, 0.0 }
 0x4aa   :  { %481 = vadd.xlane.f32.xlu1 %v480_v4 }
 0x51d   :  { %v482_v1 = vpop.xlane.xlu1 %481 }
 0x51e   :  { %v483_v2 = vmul.f32 %v482_v1, %v6764_v53 }
 0x520   :  { %v484_v5 = vadd.f32 1e-05, %v483_v2 }
 0x522   :  { %6288 = vrsqrt.f32 %v484_v5  ;;  %vm491_vm8 = vweird.f32 %v484_v5 }
 0x528   :  { %v6289_v7 = vpop.eup %6288 }
 0x529   :  { %v486_v8 = vmul.f32 %v6289_v7, %v484_v5  ;;  %vm492_vm7 = vweird.f32 %v6289_v7 }
 0x52a   :  { %vm493_vm9 = vmor %vm491_vm8, %vm492_vm7 }
 0x52b   :  { %v487_v9 = vmul.f32 %v6289_v7, %v486_v8 }
 0x52d   :  { %v488_v10 = vmul.f32 0.5, %v487_v9 }
 0x52f   :  { %v489_v11 = vsub.f32 1.5, %v488_v10 }
 0x531   :  { %v490_v13 = vmul.f32 %v6289_v7, %v489_v11 }
 0x533   :  { %v494_v16 = vsel %vm493_vm9, %v6289_v7, %v490_v13 }
 0x534   :  { %v495_v17 = vmul.f32 %v494_v16, %v478_v56 }
 0x536   :  { %v497_v19 = vmul.f32 %v496_v15, %v495_v17 }
 0x538   :  { %v499_v20 = vadd.f32 %v498_v18, %v497_v19 }
 0x53a   :  { %5942 = vmatmul.msk.f32.vlgmr.msrb.gmra.mxu3 %vm86_vm0, %v499_v20 }
 0x5bd   :  { %v537_v25 = vpop.f32.mrf.mxu3 }
 0x5be   :  { %v538_v26 = vadd.f32 %v6254_v24, %v537_v25 }
 0x5c0   :  { %v540_v27 = vmax.f32 %v538_v26, 0.0 }
 0x5c2   :  { %5943 = vmatmul.msk.f32.vlgmr.msrb.gmra.mxu0 %vm544_vm10, %v540_v27 }
 0x63f   :  { %v565_v29 = vpop.f32.mrf.mxu0 }
 0x640   :  { %v566_v30 = vadd.f32 %v6255_v28, %v565_v29 }
 0x642   :  { %v568_v31 = vadd.f32 %v566_v30, %v499_v20 }
 0x644   :  { %v569_v32 = vsel %vm86_vm0, %v568_v31, 0.0 }
 0x645   :  { %570 = vadd.xlane.f32.xlu0 %v569_v32 }
 0x6b8   :  { %v571_v33 = vpop.xlane.xlu0 %570 }
 0x6b9   :  { %v572_v34 = vmul.f32 %v571_v33, %v6764_v53 }
 0x6bb   :  { %v573_v35 = vsub.f32 %v568_v31, %v572_v34 }
 0x6bd   :  { %v574_v36 = vmul.f32 %v573_v35, %v573_v35 }
 0x6bf   :  { %v575_v37 = vsel %vm86_vm0, %v574_v36, 0.0 }
 0x6c0   :  { %576 = vadd.xlane.f32.xlu2 %v575_v37 }
 0x733   :  { %v577_v42 = vpop.xlane.xlu2 %576 }
 0x734   :  { %v578_v43 = vmul.f32 %v577_v42, %v6764_v53 }
 0x736   :  { %v579_v44 = vadd.f32 1e-05, %v578_v43 }
 0x738   :  { %6290 = vrsqrt.f32 %v579_v44  ;;  %vm586_vm12 = vweird.f32 %v579_v44 }
 0x73e   :  { %v6291_v45 = vpop.eup %6290 }
 0x73f   :  { %v581_v46 = vmul.f32 %v6291_v45, %v579_v44  ;;  %vm587_vm11 = vweird.f32 %v6291_v45 }
 0x740   :  { %vm588_vm13 = vmor %vm586_vm12, %vm587_vm11 }
 0x741   :  { %v582_v47 = vmul.f32 %v6291_v45, %v581_v46 }
 0x743   :  { %v583_v48 = vmul.f32 0.5, %v582_v47 }
 0x745   :  { %v584_v49 = vsub.f32 1.5, %v583_v48 }
 0x747   :  { %v585_v50 = vmul.f32 %v6291_v45, %v584_v49 }
 0x749   :  { %v589_v52 = vsel %vm588_vm13, %v6291_v45, %v585_v50 }
 0x74a   :  { %v590_v55 = vmul.f32 %v589_v52, %v573_v35 }
 0x74c   :  { %v592_v56 = vmul.f32 %v591_v51, %v590_v55 }
 0x74e   :  { %v6835_v57 = vadd.f32 %v593_v54, %v592_v56 }
 0x750   :  { %5954 = vmatmul.msk.f32.vlgmr.msrb.gmra.mxu2 %vm86_vm0, %v6835_v57 }
 0x7d3   :  { %v6839_v4 = vpop.f32.mrf.mxu2 }
 0x7d4   :  { %684 = vrot.lane.b32.xlu2 %v6839_v4, %s8439_s0  ;;  %633 = vrot.lane.b32.xlu1 %v6839_v4, %s8500_s3  ;;  %s8509_s0 = smov 48  }
 0x7dc   :  { %710 = vrot.lane.b32.xlu1 %v6839_v4, %s8501_s28 }
 0x7e4   :  { %870 = vrot.lane.b32.xlu1 %v6839_v4, %s8502_s4 }
 0x82e   :  { %v685_v58 = vpop.permute.xlu2 %684 }
 0x82f   :  { %705 = vmatpush.msra.mxu3 %v685_v58 }
 0x846   :  { %v634_v59 = vpop.permute.xlu1 %633 }
 0x847   :  { %5955 = vmatpush.xpose.msk.msrb.mxu1 %vm113_vm1, %v634_v59 }
 0x84a   :  { %5956 = vmatmul.msk.f32.vlgmr.msrb.gmra.mxu1 %vm113_vm1, %v6839_v4 }
 0x84e   :  { %v711_v1 = vpop.permute.xlu1 %710 }
 0x856   :  { %v871_v6 = vpop.permute.xlu1 %870 }
 0x8c7   :  { %v656_v60 = vpop.f32.mrf.mxu1 }
 0x8c8   :  { %v659_v61 = vsel %vm113_vm1, %v656_v60, -inf }
 0x8c9   :  { %660 = vmax.xlane.f32.xlu0 %v659_v61 }
 0x8dd   :  { %712 = vrot.lane.b32.xlu0 %v6839_v4, %s8503_s29 }
 0x8e5   :  { %791 = vrot.lane.b32.xlu0 %v6839_v4, %s8504_s1 }
 0x8ed   :  { %868 = vrot.lane.b32.xlu0 %v6839_v4, %s8505_s24 }
 0x93c   :  { %v661_v62 = vpop.xlane.xlu0 %660 }
 0x93d   :  { %v662_v63 = vsub.f32 %v656_v60, %v661_v62 }
 0x93f   :  { %v663_v0 = vmul.f32 1.442695, %v662_v63 }
 0x941   :  { %6292 = vpow2.f32 %v663_v0 }
 0x947   :  { %v6293_v2 = vpop.eup %6292 }
 0x948   :  { %v665_v3 = vsel %vm113_vm1, %v6293_v2, 0.0 }
 0x949   :  { %666 = vadd.xlane.f32.xlu2 %v665_v3 }
 0x94f   :  { %v713_v5 = vpop.permute.xlu0 %712 }
 0x950   :  { %5958 = vmatpush.xpose.msk.msra.mxu2 %vm113_vm1, %v713_v5 }
 0x953   :  { %5959 = vmatmul.msk.f32.vlgmr.msra.gmra.mxu2 %vm113_vm1, %v711_v1 }
 0x954   :  { %5964 = vmatpush.xpose.msk.msrb.mxu2 %vm113_vm1, %v871_v6 }
 0x957   :  { %v792_v7 = vpop.permute.xlu0 %791 }
 0x958   :  { %5961 = vmatpush.xpose.msk.msrb.mxu3 %vm113_vm1, %v792_v7 }
 0x95f   :  { %v869_v8 = vpop.permute.xlu0 %868 }
 0x960   :  { %5965 = vmatmul.msk.f32.vlgmr.msrb.gmra.mxu2 %vm113_vm1, %v869_v8 }
 0x961   :  { %789 = vrot.lane.b32.xlu2 %v6839_v4, %s8506_s30 }
 0x9bc   :  { %v667_v9 = vpop.xlane.xlu2 %666 }
 0x9bd   :  { %6294 = vrcp.f32 %v667_v9  ;;  %v679_v13 = vand.u32 2147483648, %v667_v9  ;;  %v677_v15 = vand.u32 2147483647, %v667_v9  ;;  %vm673_vm15 = vweird.f32 %v667_v9 }
 0x9bf   :  { %v680_v17 = vor.u32 1.1754944e-38, %v679_v13  ;;  %vm678_vm3 = vcmp.eq.f32.partialorder %v677_v15, 8.507059e+37 }
 0x9c3   :  { %v6295_v10 = vpop.eup %6294 }
 0x9c4   :  { %v669_v11 = vmul.f32 %v6295_v10, %v667_v9  ;;  %vm674_vm14 = vweird.f32 %v6295_v10  ;;  %v790_v22 = vpop.permute.xlu2 %789  ;;  %v1116_v9 = vld [vmem:[%s8395_s10 + $0x18] sm:$0xff] }
 0x9c5   :  { %vm675_vm2 = vmor %vm673_vm15, %vm674_vm14 }
 0x9c6   :  { %v670_v12 = vsub.f32 1.0, %v669_v11  ;;  %v1114_v11 = vld [vmem:[%s8395_s10 + $0x8] sm:$0xff] }
 0x9c8   :  { %v671_v14 = vmul.f32 %v6295_v10, %v670_v12  ;;  %v1113_v12 = vld [vmem:[%s8395_s10] sm:$0xff] }
 0x9ca   :  { %v672_v16 = vadd.f32 %v6295_v10, %v671_v14 }
 0x9cc   :  { %v676_v18 = vsel %vm675_vm2, %v6295_v10, %v672_v16  ;;  %v1115_v10 = vld [vmem:[%s8395_s10 + $0x10] sm:$0xff] }
 0x9cd   :  { %v681_v19 = vsel %vm678_vm3, %v680_v17, %v676_v18 }
 0x9ce   :  { %v683_v20 = vmul.f32 %v6293_v2, %v681_v19 }
 0x9d0   :  { %5957 = vmatmul.msk.f32.vlgmr.msra.gmra.mxu3 %vm113_vm1, %v683_v20 }
 0x9d6   :  { %v735_v21 = vpop.f32.mrf.mxu2 }
 0x9d7   :  { %v738_v23 = vsel %vm113_vm1, %v735_v21, -inf }
 0x9d8   :  { %5962 = vmatmul.msk.f32.vlgmr.msrb.gmra.mxu3 %vm113_vm1, %v790_v22  ;;  %739 = vmax.xlane.f32.xlu1 %v738_v23 }
 0x9e3   :  { %v893_v24 = vpop.f32.mrf.mxu2 }
 0x9e4   :  { %v896_v25 = vsel %vm113_vm1, %v893_v24, -inf }
 0x9e5   :  { %897 = vmax.xlane.f32.xlu0 %v896_v25 }
 0xa4b   :  { %v740_v26 = vpop.xlane.xlu1 %739 }
 0xa4c   :  { %v741_v27 = vsub.f32 %v735_v21, %v740_v26 }
 0xa4e   :  { %v742_v28 = vmul.f32 1.442695, %v741_v27 }
 0xa50   :  { %6296 = vpow2.f32 %v742_v28  ;;  %v5953_v28 = vld [vmem:[%s8497_s2 + $0x38] sm:$0xff] }
 0xa51   :  { %977 = vmatpush.msra.mxu3 %v5953_v28 }
 0xa53   :  { %v6871_v29 = vpop.f32.mrf.mxu3 }
 0xa56   :  { %v6297_v30 = vpop.eup %6296 }
 0xa57   :  { %v744_v31 = vsel %vm113_vm1, %v6297_v30, 0.0 }
 0xa58   :  { %v898_v32 = vpop.xlane.xlu0 %897  ;;  %745 = vadd.xlane.f32.xlu1 %v744_v31  ;;  %v5951_v31 = vld [vmem:[%s8497_s2 + $0x28] sm:$0xff] }
 0xa59   :  { %v899_v33 = vsub.f32 %v893_v24, %v898_v32 }
 0xa5b   :  { %v900_v34 = vmul.f32 1.442695, %v899_v33  ;;  %v814_v35 = vpop.f32.mrf.mxu3 }
 0xa5c   :  { %v817_v36 = vsel %vm113_vm1, %v814_v35, -inf }
 0xa5d   :  { %6298 = vpow2.f32 %v900_v34  ;;  %818 = vmax.xlane.f32.xlu2 %v817_v36 }
 0xa63   :  { %v6299_v37 = vpop.eup %6298 }
 0xa64   :  { %v902_v38 = vsel %vm113_vm1, %v6299_v37, 0.0 }
 0xa65   :  { %903 = vadd.xlane.f32.xlu0 %v902_v38 }
 0xa71   :  { %763 = vrot.lane.b32.xlu1 %v6839_v4, %s8507_s5 }
 0xa79   :  { %921 = vrot.lane.b32.xlu0 %v6839_v4, %s8508_s25 }
 0xacb   :  { %v746_v39 = vpop.xlane.xlu1 %745 }
 0xacc   :  { %6300 = vrcp.f32 %v746_v39  ;;  %v758_v49 = vand.u32 2147483648, %v746_v39  ;;  %vm752_vm7 = vweird.f32 %v746_v39  ;;  %v756_v51 = vand.u32 2147483647, %v746_v39 }
 0xace   :  { %v759_v55 = vor.u32 1.1754944e-38, %v758_v49  ;;  %vm757_vm9 = vcmp.eq.f32.partialorder %v756_v51, 8.507059e+37 }
 0xad0   :  { %v819_v40 = vpop.xlane.xlu2 %818 }
 0xad1   :  { %v820_v41 = vsub.f32 %v814_v35, %v819_v40  ;;  %v5950_v35 = vld [vmem:[%s8497_s2 + $0x20] sm:$0xff] }
 0xad2   :  { %v6301_v42 = vpop.eup %6300 }
 0xad3   :  { %v748_v43 = vmul.f32 %v6301_v42, %v746_v39  ;;  %v821_v44 = vmul.f32 1.442695, %v820_v41  ;;  %vm753_vm6 = vweird.f32 %v6301_v42 }
 0xad4   :  { %vm754_vm8 = vmor %vm752_vm7, %vm753_vm6 }
 0xad5   :  { %v749_v45 = vsub.f32 1.0, %v748_v43  ;;  %6302 = vpow2.f32 %v821_v44 }
 0xad7   :  { %v750_v46 = vmul.f32 %v6301_v42, %v749_v45 }
 0xad8   :  { %v904_v47 = vpop.xlane.xlu0 %903 }
 0xad9   :  { %v751_v48 = vadd.f32 %v6301_v42, %v750_v46  ;;  %6304 = vrcp.f32 %v904_v47  ;;  %v916_v61 = vand.u32 2147483648, %v904_v47  ;;  %v914_v1 = vand.u32 2147483647, %v904_v47 }
 0xada   :  { %vm910_vm12 = vweird.f32 %v904_v47 }
 0xadb   :  { %v6303_v50 = vpop.eup %6302  ;;  %v755_v54 = vsel %vm754_vm8, %v6301_v42, %v751_v48  ;;  %v917_v3 = vor.u32 1.1754944e-38, %v916_v61  ;;  %vm915_vm14 = vcmp.eq.f32.partialorder %v914_v1, 8.507059e+37  ;;  %v69_v42 = vlaneseq  ;;  %v5971_v1 = vld [vmem:[%s8498_s27 + $0x38] sm:$0xff] }
 0xadc   :  { %v823_v52 = vsel %vm113_vm1, %v6303_v50, 0.0  ;;  %v760_v59 = vsel %vm757_vm9, %v759_v55, %v755_v54 }
 0xadd   :  { %824 = vadd.xlane.f32.xlu2 %v823_v52  ;;  %v762_v63 = vmul.f32 %v6297_v30, %v760_v59  ;;  %v5952_v30 = vld [vmem:[%s8497_s2 + $0x30] sm:$0xff]  ;;  %v70_v43 = vshrl.u32 %v69_v42, 7  ;;  %v72_v44 = vand.u32 127, %v69_v42  ;;  %s8529_s2 = sld [smem:[#allocation8_spill]] }
 0xade   :  { %978 = vmatpush.msra.mxu3 %v5952_v30 }
 0xadf   :  { %v6305_v56 = vpop.eup %6304  ;;  %vm73_vm7 = vcmp.gt.s32.totalorder %v72_v44, %v70_v43 }
 0xae0   :  { %v906_v58 = vmul.f32 %v6305_v56, %v904_v47  ;;  %vm911_vm11 = vweird.f32 %v6305_v56  ;;  %979 = vmatpush.msra.mxu3 %v5951_v31 }
 0xae1   :  { %vm912_vm13 = vmor %vm910_vm12, %vm911_vm11 }
 0xae2   :  { %v907_v60 = vsub.f32 1.0, %v906_v58  ;;  %980 = vmatpush.msra.mxu3 %v5950_v35 }
 0xae3   :  { %v764_v62 = vpop.permute.xlu1 %763 }
 0xae4   :  { %v908_v0 = vmul.f32 %v6305_v56, %v907_v60  ;;  %784 = vmatpush.msra.mxu1 %v764_v62 }
 0xae5   :  { %5960 = vmatmul.msk.f32.vlgmr.msra.gmra.mxu1 %vm113_vm1, %v762_v63 }
 0xae6   :  { %v909_v2 = vadd.f32 %v6305_v56, %v908_v0 }
 0xae8   :  { %v913_v5 = vsel %vm912_vm13, %v6305_v56, %v909_v2  ;;  %v5970_v2 = vld [vmem:[%s8498_s27 + $0x30] sm:$0xff] }
 0xae9   :  { %v918_v6 = vsel %vm915_vm14, %v917_v3, %v913_v5  ;;  %v5969_v3 = vld [vmem:[%s8498_s27 + $0x28] sm:$0xff]  ;;  %v5968_v5 = vld [vmem:[%s8498_s27 + $0x20] sm:$0xff]  ;;  %s8523_s27 = sld [smem:[#allocation20_spill]] }
 0xaea   :  { %v920_v7 = vmul.f32 %v6299_v37, %v918_v6 }
 0xaeb   :  { %v922_v8 = vpop.permute.xlu0 %921 }
 0xaec   :  { %942 = vmatpush.msrb.mxu1 %v922_v8 }
 0xaed   :  { %5966 = vmatmul.msk.f32.vlgmr.msrb.gmra.mxu1 %vm113_vm1, %v920_v7 }
 0xaee   :  { %1136 = vmatpush.msra.mxu1 %v1116_v9 }
 0xaf0   :  { %1137 = vmatpush.msra.mxu1 %v1115_v10 }
 0xaf2   :  { %1138 = vmatpush.msra.mxu1 %v1114_v11 }
 0xaf4   :  { %1139 = vmatpush.msra.mxu1 %v1113_v12 }
 0xaf5   :  { %842 = vrot.lane.b32.xlu2 %v6839_v4, %s8509_s0  ;;  %v6900_v4 = vld [vmem:[%s8510_s12] sm:$0xff]  ;;  %s8515_s12 = sld [smem:[#allocation16_spill]] }
 0xaf6   :  { %5984 = vmatmul.msk.f32.vlgmr.msra.gmra.mxu1 %vm86_vm0, %v6900_v4 }
 0xb50   :  { %v825_v13 = vpop.xlane.xlu2 %824 }
 0xb51   :  { %6306 = vrcp.f32 %v825_v13  ;;  %v837_v18 = vand.u32 2147483648, %v825_v13  ;;  %v835_v20 = vand.u32 2147483647, %v825_v13  ;;  %vm831_vm2 = vweird.f32 %v825_v13 }
 0xb53   :  { %v838_v22 = vor.u32 1.1754944e-38, %v837_v18  ;;  %vm836_vm6 = vcmp.eq.f32.partialorder %v835_v20, 8.507059e+37  ;;  %v6981_v18 = vld [vmem:[%s8394_s9 + $0x2] sm:$0x3]  ;;  %s8516_s9 = sld [smem:[#allocation23_spill]] }
 0xb57   :  { %v6307_v14 = vpop.eup %6306 }
 0xb58   :  { %v827_v15 = vmul.f32 %v6307_v14, %v825_v13  ;;  %v843_v16 = vpop.permute.xlu2 %842  ;;  %vm832_vm15 = vweird.f32 %v6307_v14 }
 0xb59   :  { %863 = vmatpush.msra.mxu0 %v843_v16  ;;  %vm833_vm3 = vmor %vm831_vm2, %vm832_vm15 }
 0xb5a   :  { %v828_v17 = vsub.f32 1.0, %v827_v15 }
 0xb5b   :  { %1048 = vmatpush.msrb.mxu0 %v5971_v1 }
 0xb5c   :  { %v829_v19 = vmul.f32 %v6307_v14, %v828_v17 }
 0xb5d   :  { %1049 = vmatpush.msrb.mxu0 %v5970_v2 }
 0xb5e   :  { %v830_v21 = vadd.f32 %v6307_v14, %v829_v19 }
 0xb5f   :  { %1050 = vmatpush.msrb.mxu0 %v5969_v3 }
 0xb60   :  { %v834_v23 = vsel %vm833_vm3, %v6307_v14, %v830_v21  ;;  %v6976_v14 = vld [vmem:[%s8393_s8 + $0x2] sm:$0x3] }
 0xb61   :  { %v839_v24 = vsel %vm836_vm6, %v838_v22, %v834_v23  ;;  %1051 = vmatpush.msrb.mxu0 %v5968_v5  ;;  %v1008_v19 = vperm.slane %v6976_v14, 0 }
 0xb62   :  { %v786_v25 = vpop.f32.mrf.mxu1  ;;  %v841_v26 = vmul.f32 %v6303_v50, %v839_v24 }
 0xb63   :  { %948 = vrot.lane.b32.xlu1 %v786_v25, %s8511_s14 }
 0xb64   :  { %5963 = vmatmul.msk.f32.vlgmr.msra.gmra.mxu0 %vm113_vm1, %v841_v26  ;;  %v1010_v26 = vperm.slane %v6981_v18, 0 }
 0xb6a   :  { %v944_v27 = vpop.f32.mrf.mxu1 }
 0xb6b   :  { %956 = vrot.lane.b32.xlu2 %v944_v27, %s8512_s15 }
 0xb73   :  { %v6916_v32 = vpop.f32.mrf.mxu1 }
 0xb74   :  { %1145 = vrot.lane.b32.xlu1 %v6916_v32, %s8500_s3 }
 0xbc5   :  { %v957_v39 = vpop.permute.xlu2 %956 }
 0xbd5   :  { %v949_v34 = vpop.permute.xlu1 %948 }
 0xbd6   :  { %v959_v37 = vsel %vm113_vm1, %v6871_v29, %v949_v34  ;;  %v6547_v29 = vmov 0.0  }
 0xbd7   :  { %v6934_v48 = vsel %vm73_vm7, -1e+09, %v6547_v29  ;;  %v5977_v29 = vld [vmem:[%s8391_s6 + $0x60] sm:$0xff] }
 0xbe1   :  { %v865_v33 = vpop.f32.mrf.mxu0 }
 0xbe2   :  { %952 = vrot.lane.b32.xlu0 %v865_v33, %s8513_s26 }
 0xbe6   :  { %v1146_v36 = vpop.permute.xlu1 %1145 }
 0xbe7   :  { %5985 = vmatpush.xpose.msk.msrb.mxu3 %vm113_vm1, %v1146_v36 }
 0xc54   :  { %v953_v38 = vpop.permute.xlu0 %952 }
 0xc55   :  { %v960_v40 = vsel %vm439_vm4, %v959_v37, %v953_v38 }
 0xc56   :  { %v961_v41 = vsel %vm441_vm5, %v960_v40, %v957_v39 }
 0xc57   :  { %5967 = vmatmul.msk.f32.vlgmr.msra.gmra.mxu3 %vm86_vm0, %v961_v41 }
 0xc5f   :  { %5986 = vmatmul.msk.f32.vlgmr.msrb.gmra.mxu3 %vm113_vm1, %v6916_v32 }
 0xcda   :  { %v982_v45 = vpop.f32.mrf.mxu3 }
 0xcdb   :  { %v985_v46 = vadd.f32 %v982_v45, %v6835_v57  ;;  %v5980_v45 = vld [vmem:[%s8391_s6 + $0x78] sm:$0xff] }
 0xcdc   :  { %1071 = vmatpush.msra.mxu2 %v5980_v45 }
 0xcdd   :  { %v986_v47 = vsel %vm86_vm0, %v985_v46, 0.0 }
 0xcde   :  { %987 = vadd.xlane.f32.xlu0 %v986_v47  ;;  %v5978_v47 = vld [vmem:[%s8391_s6 + $0x68] sm:$0xff] }
 0xce2   :  { %v1168_v49 = vpop.f32.mrf.mxu3 }
 0xce3   :  { %v1169_v50 = vadd.f32 %v1168_v49, %v6934_v48  ;;  %v5976_v49 = vld [vmem:[%s8391_s6 + $0x58] sm:$0xff] }
 0xce5   :  { %v1171_v51 = vsel %vm113_vm1, %v1169_v50, -inf }
 0xce6   :  { %1172 = vmax.xlane.f32.xlu2 %v1171_v51  ;;  %v5974_v51 = vld [vmem:[%s8391_s6 + $0x48] sm:$0xff] }
 0xcf2   :  { %1222 = vrot.lane.b32.xlu0 %v6916_v32, %s8501_s28 }
 0xcfe   :  { %1224 = vrot.lane.b32.xlu2 %v6916_v32, %s8503_s29 }
 0xd06   :  { %1303 = vrot.lane.b32.xlu2 %v6916_v32, %s8504_s1 }
 0xd0e   :  { %1380 = vrot.lane.b32.xlu2 %v6916_v32, %s8505_s24 }
 0xd51   :  { %v988_v57 = vpop.xlane.xlu0 %987 }
 0xd52   :  { %v989_v52 = vmul.f32 %v988_v57, %v6764_v53  ;;  %v5973_v57 = vld [vmem:[%s8391_s6 + $0x40] sm:$0xff] }
 0xd54   :  { %v990_v54 = vsub.f32 %v985_v46, %v989_v52  ;;  %v5979_v46 = vld [vmem:[%s8391_s6 + $0x70] sm:$0xff] }
 0xd55   :  { %1072 = vmatpush.msra.mxu2 %v5979_v46 }
 0xd56   :  { %v991_v55 = vmul.f32 %v990_v54, %v990_v54 }
 0xd57   :  { %1073 = vmatpush.msra.mxu2 %v5978_v47 }
 0xd58   :  { %v992_v56 = vsel %vm86_vm0, %v991_v55, 0.0 }
 0xd59   :  { %993 = vadd.xlane.f32.xlu1 %v992_v56  ;;  %v1173_v58 = vpop.xlane.xlu2 %1172  ;;  %1074 = vmatpush.msra.mxu2 %v5977_v29  ;;  %v6256_v56 = vld [vmem:[%s8499_s23 + $0x1] ss:$0 sm:$0xff]  ;;  %s6548_s23 = smov [#allocation2]  }
 0xd5a   :  { %v1174_v59 = vsub.f32 %v1169_v50, %v1173_v58  ;;  %v5975_v50 = vld [vmem:[%s8391_s6 + $0x50] sm:$0xff]  ;;  %s8527_s6 = sld [smem:[#allocation5_spill]] }
 0xd5b   :  { %1075 = vmatpush.msra.mxu2 %v5976_v49 }
 0xd5c   :  { %v1175_v60 = vmul.f32 1.442695, %v1174_v59 }
 0xd5d   :  { %1076 = vmatpush.msra.mxu2 %v5975_v50 }
 0xd5e   :  { %6308 = vpow2.f32 %v1175_v60 }
 0xd5f   :  { %1077 = vmatpush.msra.mxu2 %v5974_v51 }
 0xd61   :  { %v1225_v61 = vpop.permute.xlu2 %1224  ;;  %1078 = vmatpush.msra.mxu2 %v5973_v57 }
 0xd62   :  { %5988 = vmatpush.xpose.msk.msrb.mxu1 %vm113_vm1, %v1225_v61 }
 0xd64   :  { %v6949_v62 = vpop.eup %6308  ;;  %v1223_v63 = vpop.permute.xlu0 %1222 }
 0xd65   :  { %5989 = vmatmul.msk.f32.vlgmr.msrb.gmra.mxu1 %vm113_vm1, %v1223_v63  ;;  %v1177_v0 = vsel %vm113_vm1, %v6949_v62, 0.0 }
 0xd66   :  { %1178 = vadd.xlane.f32.xlu0 %v1177_v0 }
 0xd69   :  { %v1304_v28 = vpop.permute.xlu2 %1303 }
 0xd71   :  { %v1381_v42 = vpop.permute.xlu2 %1380 }
 0xd72   :  { %1196 = vrot.lane.b32.xlu1 %v6916_v32, %s8514_s17 }
 0xd7a   :  { %1301 = vrot.lane.b32.xlu1 %v6916_v32, %s8506_s30  ;;  %1382 = vrot.lane.b32.xlu0 %v6916_v32, %s8502_s4 }
 0xdcc   :  { %v994_v6 = vpop.xlane.xlu1 %993 }
 0xdcd   :  { %v995_v7 = vmul.f32 %v994_v6, %v6764_v53 }
 0xdcf   :  { %v996_v8 = vadd.f32 1e-05, %v995_v7 }
 0xdd1   :  { %6310 = vrsqrt.f32 %v996_v8  ;;  %vm1003_vm9 = vweird.f32 %v996_v8 }
 0xdd7   :  { %v6311_v9 = vpop.eup %6310 }
 0xdd8   :  { %v998_v10 = vmul.f32 %v6311_v9, %v996_v8  ;;  %vm1004_vm8 = vweird.f32 %v6311_v9 }
 0xdd9   :  { %v1179_v11 = vpop.xlane.xlu0 %1178  ;;  %vm1005_vm11 = vmor %vm1003_vm9, %vm1004_vm8 }
 0xdda   :  { %v999_v12 = vmul.f32 %v6311_v9, %v998_v10  ;;  %6312 = vrcp.f32 %v1179_v11  ;;  %v1191_v34 = vand.u32 2147483648, %v1179_v11  ;;  %vm1185_vm13 = vweird.f32 %v1179_v11 }
 0xddb   :  { %v1189_v36 = vand.u32 2147483647, %v1179_v11 }
 0xddc   :  { %v1000_v13 = vmul.f32 0.5, %v999_v12  ;;  %v1192_v39 = vor.u32 1.1754944e-38, %v1191_v34 }
 0xddd   :  { %vm1190_vm15 = vcmp.eq.f32.partialorder %v1189_v36, 8.507059e+37 }
 0xdde   :  { %v1001_v15 = vsub.f32 1.5, %v1000_v13 }
 0xde0   :  { %v6313_v16 = vpop.eup %6312  ;;  %v1002_v17 = vmul.f32 %v6311_v9, %v1001_v15 }
 0xde1   :  { %v1181_v20 = vmul.f32 %v6313_v16, %v1179_v11  ;;  %vm1186_vm12 = vweird.f32 %v6313_v16 }
 0xde2   :  { %v1006_v21 = vsel %vm1005_vm11, %v6311_v9, %v1002_v17  ;;  %v1247_v22 = vpop.f32.mrf.mxu1  ;;  %vm1187_vm14 = vmor %vm1185_vm13, %vm1186_vm12 }
 0xde3   :  { %v1007_v23 = vmul.f32 %v1006_v21, %v990_v54  ;;  %v1182_v24 = vsub.f32 1.0, %v1181_v20  ;;  %v1248_v25 = vadd.f32 %v1247_v22, %v6934_v48 }
 0xde4   :  { %v1197_v27 = vpop.permute.xlu1 %1196 }
 0xde5   :  { %v1009_v30 = vmul.f32 %v1008_v19, %v1007_v23  ;;  %v1183_v31 = vmul.f32 %v6313_v16, %v1182_v24  ;;  %1217 = vmatpush.msra.mxu0 %v1197_v27  ;;  %v1250_v33 = vsel %vm113_vm1, %v1248_v25, -inf }
 0xde6   :  { %1251 = vmax.xlane.f32.xlu0 %v1250_v33 }
 0xde7   :  { %v1184_v35 = vadd.f32 %v6313_v16, %v1183_v31  ;;  %v6987_v37 = vadd.f32 %v1010_v26, %v1009_v30 }
 0xde9   :  { %v1188_v38 = vsel %vm1187_vm14, %v6313_v16, %v1184_v35  ;;  %5982 = vmatmul.msk.f32.vlgmr.msrb.gmra.mxu0 %vm86_vm0, %v6987_v37 }
 0xdea   :  { %5991 = vmatpush.xpose.msk.msrb.mxu0 %vm113_vm1, %v1304_v28  ;;  %v1193_v41 = vsel %vm1190_vm15, %v1192_v39, %v1188_v38 }
 0xdeb   :  { %v1195_v43 = vmul.f32 %v6949_v62, %v1193_v41 }
 0xdec   :  { %v1383_v40 = vpop.permute.xlu0 %1382  ;;  %v1302_v44 = vpop.permute.xlu1 %1301 }
 0xded   :  { %5994 = vmatpush.xpose.msk.msra.mxu1 %vm113_vm1, %v1383_v40 }
 0xdf0   :  { %5995 = vmatmul.msk.f32.vlgmr.msra.gmra.mxu1 %vm113_vm1, %v1381_v42 }
 0xdf1   :  { %5987 = vmatmul.msk.f32.vlgmr.msra.gmra.mxu0 %vm113_vm1, %v1195_v43 }
 0xdf9   :  { %5992 = vmatmul.msk.f32.vlgmr.msrb.gmra.mxu0 %vm113_vm1, %v1302_v44 }
 0xe59   :  { %v1252_v52 = vpop.xlane.xlu0 %1251 }
 0xe5a   :  { %v1253_v54 = vsub.f32 %v1248_v25, %v1252_v52 }
 0xe5c   :  { %v1254_v55 = vmul.f32 1.442695, %v1253_v54 }
 0xe5e   :  { %6314 = vpow2.f32 %v1254_v55 }
 0xe64   :  { %v6315_v58 = vpop.eup %6314 }
 0xe65   :  { %v1256_v59 = vsel %vm113_vm1, %v6315_v58, 0.0 }
 0xe66   :  { %v1053_v60 = vpop.f32.mrf.mxu0  ;;  %1257 = vadd.xlane.f32.xlu0 %v1256_v59 }
 0xe67   :  { %v1054_v61 = vadd.f32 %v6256_v56, %v1053_v60 }
 0xe69   :  { %v1056_v62 = vmax.f32 %v1054_v61, 0.0 }
 0xe6b   :  { %5983 = vmatmul.msk.f32.vlgmr.msra.gmra.mxu2 %vm544_vm10, %v1056_v62 }
 0xe6d   :  { %v1405_v63 = vpop.f32.mrf.mxu1 }
 0xe6e   :  { %v1406_v0 = vadd.f32 %v1405_v63, %v6934_v48  ;;  %v7027_v1 = vpop.f32.mrf.mxu0 }
 0xe70   :  { %v1408_v2 = vsel %vm113_vm1, %v1406_v0, -inf }
 0xe71   :  { %1409 = vmax.xlane.f32.xlu2 %v1408_v2  ;;  %v6257_v2 = vld [vmem:[%s8392_s7 + $0x1] ss:$0 sm:$0xff]  ;;  %s8525_s7 = sld [smem:[#allocation24_spill]] }
 0xe76   :  { %v1326_v3 = vpop.f32.mrf.mxu0 }
 0xe77   :  { %v1327_v5 = vadd.f32 %v1326_v3, %v6934_v48 }
 0xe79   :  { %v1329_v6 = vsel %vm113_vm1, %v1327_v5, -inf }
 0xe7a   :  { %1275 = vrot.lane.b32.xlu0 %v6916_v32, %s8507_s5  ;;  %1330 = vmax.xlane.f32.xlu1 %v1329_v6 }
 0xed9   :  { %v1258_v7 = vpop.xlane.xlu0 %1257 }
 0xeda   :  { %6316 = vrcp.f32 %v1258_v7  ;;  %v1270_v11 = vand.u32 2147483648, %v1258_v7  ;;  %v1268_v15 = vand.u32 2147483647, %v1258_v7  ;;  %vm1264_vm3 = vweird.f32 %v1258_v7 }
 0xedc   :  { %v1271_v20 = vor.u32 1.1754944e-38, %v1270_v11  ;;  %vm1269_vm7 = vcmp.eq.f32.partialorder %v1268_v15, 8.507059e+37 }
 0xee0   :  { %v6317_v8 = vpop.eup %6316 }
 0xee1   :  { %v1260_v9 = vmul.f32 %v6317_v8, %v1258_v7  ;;  %vm1265_vm2 = vweird.f32 %v6317_v8  ;;  %v1120_v7 = vld [vmem:[%s8396_s11 + $0x18] sm:$0xff] }
 0xee2   :  { %vm1266_vm6 = vmor %vm1264_vm3, %vm1265_vm2  ;;  %1489 = vmatpush.msra.mxu0 %v1120_v7 }
 0xee3   :  { %v1261_v10 = vsub.f32 1.0, %v1260_v9  ;;  %v1118_v9 = vld [vmem:[%s8396_s11 + $0x8] sm:$0xff] }
 0xee4   :  { %v1410_v12 = vpop.xlane.xlu2 %1409 }
 0xee5   :  { %v1262_v13 = vmul.f32 %v6317_v8, %v1261_v10  ;;  %v1411_v16 = vsub.f32 %v1406_v0, %v1410_v12 }
 0xee7   :  { %v1263_v17 = vadd.f32 %v6317_v8, %v1262_v13  ;;  %v1412_v19 = vmul.f32 1.442695, %v1411_v16 }
 0xee9   :  { %v1267_v21 = vsel %vm1266_vm6, %v6317_v8, %v1263_v17  ;;  %6318 = vpow2.f32 %v1412_v19  ;;  %v1119_v8 = vld [vmem:[%s8396_s11 + $0x10] sm:$0xff] }
 0xeea   :  { %v1272_v22 = vsel %vm1269_vm7, %v1271_v20, %v1267_v21  ;;  %1490 = vmatpush.msra.mxu0 %v1119_v8 }
 0xeeb   :  { %v1274_v23 = vmul.f32 %v6315_v58, %v1272_v22 }
 0xeec   :  { %v1276_v24 = vpop.permute.xlu0 %1275  ;;  %1491 = vmatpush.msra.mxu0 %v1118_v9 }
 0xeed   :  { %1296 = vmatpush.msra.mxu3 %v1276_v24  ;;  %v1331_v25 = vpop.xlane.xlu1 %1330 }
 0xeee   :  { %v1332_v26 = vsub.f32 %v1327_v5, %v1331_v25  ;;  %5990 = vmatmul.msk.f32.vlgmr.msra.gmra.mxu3 %vm113_vm1, %v1274_v23  ;;  %v1080_v62 = vpop.f32.mrf.mxu2  ;;  %v1531_v25 = vld [vmem:[%s8398_s13 + $0x18] sm:$0xff] }
 0xeef   :  { %v6319_v27 = vpop.eup %6318  ;;  %v1081_v3 = vadd.f32 %v6257_v2, %v1080_v62  ;;  %1574 = vmatpush.msrb.mxu1 %v1531_v25 }
 0xef0   :  { %v1333_v28 = vmul.f32 1.442695, %v1332_v26  ;;  %v1414_v30 = vsel %vm113_vm1, %v6319_v27, 0.0 }
 0xef1   :  { %1415 = vadd.xlane.f32.xlu1 %v1414_v30  ;;  %v1083_v5 = vadd.f32 %v1081_v3, %v6987_v37  ;;  %v1117_v37 = vld [vmem:[%s8396_s11] sm:$0xff] }
 0xef2   :  { %6320 = vpow2.f32 %v1333_v28  ;;  %1492 = vmatpush.msra.mxu0 %v1117_v37  ;;  %v1529_v28 = vld [vmem:[%s8398_s13 + $0x8] sm:$0xff] }
 0xef3   :  { %v1084_v6 = vsel %vm86_vm0, %v1083_v5, 0.0 }
 0xef8   :  { %v6321_v31 = vpop.eup %6320 }
 0xef9   :  { %v1335_v33 = vsel %vm113_vm1, %v6321_v31, 0.0 }
 0xefa   :  { %1336 = vadd.xlane.f32.xlu2 %v1335_v33 }
 0xf0a   :  { %1433 = vrot.lane.b32.xlu1 %v6916_v32, %s8508_s25 }
 0xf12   :  { %1354 = vrot.lane.b32.xlu2 %v6916_v32, %s8509_s0 }
 0xf64   :  { %v1416_v34 = vpop.xlane.xlu1 %1415 }
 0xf65   :  { %6322 = vrcp.f32 %v1416_v34  ;;  %v1428_v43 = vand.u32 2147483648, %v1416_v34  ;;  %vm1422_vm9 = vweird.f32 %v1416_v34  ;;  %v1426_v45 = vand.u32 2147483647, %v1416_v34 }
 0xf67   :  { %v1429_v29 = vor.u32 1.1754944e-38, %v1428_v43  ;;  %vm1427_vm12 = vcmp.eq.f32.partialorder %v1426_v45, 8.507059e+37  ;;  %v1106_v45 = vperm.slane %v6976_v14, 1  ;;  %v1526_v14 = vld [vmem:[%s8515_s12 + $0x10] sm:$0xff] }
 0xf6b   :  { %v6323_v35 = vpop.eup %6322 }
 0xf6c   :  { %v1418_v36 = vmul.f32 %v6323_v35, %v1416_v34  ;;  %vm1423_vm8 = vweird.f32 %v6323_v35 }
 0xf6d   :  { %v1337_v38 = vpop.xlane.xlu2 %1336  ;;  %vm1424_vm11 = vmor %vm1422_vm9, %vm1423_vm8 }
 0xf6e   :  { %v1419_v39 = vsub.f32 1.0, %v1418_v36  ;;  %6324 = vrcp.f32 %v1337_v38  ;;  %v1349_v50 = vand.u32 2147483648, %v1337_v38  ;;  %v1347_v57 = vand.u32 2147483647, %v1337_v38 }
 0xf6f   :  { %vm1343_vm14 = vweird.f32 %v1337_v38 }
 0xf70   :  { %v1420_v40 = vmul.f32 %v6323_v35, %v1419_v39  ;;  %v1350_v55 = vor.u32 1.1754944e-38, %v1349_v50  ;;  %vm1348_vm2 = vcmp.eq.f32.partialorder %v1347_v57, 8.507059e+37  ;;  %v1527_v50 = vld [vmem:[%s8515_s12 + $0x18] sm:$0xff] }
 0xf71   :  { %v1298_v41 = vpop.f32.mrf.mxu3 }
 0xf72   :  { %v1421_v42 = vadd.f32 %v6323_v35, %v1420_v40  ;;  %1460 = vrot.lane.b32.xlu0 %v1298_v41, %s8511_s14 }
 0xf74   :  { %v6325_v44 = vpop.eup %6324  ;;  %v1425_v47 = vsel %vm1424_vm11, %v6323_v35, %v1421_v42 }
 0xf75   :  { %v1339_v46 = vmul.f32 %v6325_v44, %v1337_v38  ;;  %v1355_v32 = vpop.permute.xlu2 %1354  ;;  %vm1344_vm13 = vweird.f32 %v6325_v44  ;;  %v1430_v52 = vsel %vm1427_vm12, %v1429_v29, %v1425_v47  ;;  %v1108_v47 = vperm.slane %v6981_v18, 1  ;;  %v1524_v18 = vld [vmem:[%s8515_s12] sm:$0xff] }
 0xf76   :  { %1375 = vmatpush.msrb.mxu2 %v1355_v32  ;;  %vm1345_vm15 = vmor %vm1343_vm14, %vm1344_vm13  ;;  %v1432_v58 = vmul.f32 %v6319_v27, %v1430_v52 }
 0xf77   :  { %v1340_v49 = vsub.f32 1.0, %v1339_v46 }
 0xf78   :  { %1551 = vmatpush.msra.mxu2 %v1527_v50 }
 0xf79   :  { %v1341_v51 = vmul.f32 %v6325_v44, %v1340_v49 }
 0xf7a   :  { %1552 = vmatpush.msra.mxu2 %v1526_v14 }
 0xf7b   :  { %v1342_v54 = vadd.f32 %v6325_v44, %v1341_v51  ;;  %v1525_v51 = vld [vmem:[%s8515_s12 + $0x8] sm:$0xff] }
 0xf7c   :  { %v1434_v56 = vpop.permute.xlu1 %1433  ;;  %1553 = vmatpush.msra.mxu2 %v1525_v51 }
 0xf7d   :  { %v1346_v59 = vsel %vm1345_vm15, %v6325_v44, %v1342_v54  ;;  %1454 = vmatpush.msrb.mxu3 %v1434_v56 }
 0xf7e   :  { %5996 = vmatmul.msk.f32.vlgmr.msrb.gmra.mxu3 %vm113_vm1, %v1432_v58  ;;  %v1351_v60 = vsel %vm1348_vm2, %v1350_v55, %v1346_v59  ;;  %1554 = vmatpush.msra.mxu2 %v1524_v18 }
 0xf7f   :  { %v1353_v61 = vmul.f32 %v6321_v31, %v1351_v60  ;;  %v1528_v31 = vld [vmem:[%s8398_s13] sm:$0xff] }
 0xf80   :  { %v7109_v60 = vld [vmem:[%s8516_s9] sm:$0x7] }
 0xf81   :  { %5993 = vmatmul.msk.f32.vlgmr.msrb.gmra.mxu2 %vm113_vm1, %v1353_v61 }
 0xfe4   :  { %v1461_v10 = vpop.permute.xlu0 %1460 }
 0xfe5   :  { %v1471_v12 = vsel %vm113_vm1, %v7027_v1, %v1461_v10 }
0x1001   :  { %v1456_v63 = vpop.f32.mrf.mxu3 }
0x1002   :  { %1468 = vrot.lane.b32.xlu0 %v1456_v63, %s8512_s15  ;;  %v7114_v63 = vld [vmem:[%s8517_s21] sm:$0x7]  ;;  %s8522_s21 = sld [smem:[#allocation21_spill]] }
0x1004   :  { %v1377_v0 = vpop.f32.mrf.mxu2 }
0x1005   :  { %1464 = vrot.lane.b32.xlu2 %v1377_v0, %s8513_s26  ;;  %v1520_v0 = vperm.slane %v7109_v60, 0 }
0x102e   :  { %1085 = vadd.xlane.f32.xlu2 %v1084_v6 }
0x105f   :  { %v1465_v11 = vpop.permute.xlu2 %1464 }
0x1060   :  { %v1472_v13 = vsel %vm439_vm4, %v1471_v12, %v1465_v11 }
0x1074   :  { %v1469_v15 = vpop.permute.xlu0 %1468 }
0x1075   :  { %v1473_v16 = vsel %vm441_vm5, %v1472_v13, %v1469_v15 }
0x1076   :  { %5997 = vmatmul.msk.f32.vlgmr.msra.gmra.mxu0 %vm86_vm0, %v1473_v16 }
0x10a1   :  { %v1086_v17 = vpop.xlane.xlu2 %1085 }
0x10a2   :  { %v1087_v19 = vmul.f32 %v1086_v17, %v6764_v53 }
0x10a4   :  { %v1088_v22 = vsub.f32 %v1083_v5, %v1087_v19  ;;  %v1522_v5 = vperm.slane %v7114_v63, 0 }
0x10a6   :  { %v1089_v24 = vmul.f32 %v1088_v22, %v1088_v22 }
0x10a8   :  { %v1090_v1 = vsel %vm86_vm0, %v1089_v24, 0.0 }
0x10f3   :  { %v1494_v20 = vpop.f32.mrf.mxu0 }
0x10f4   :  { %v1497_v21 = vadd.f32 %v1494_v20, %v6900_v4  ;;  %v1530_v4 = vld [vmem:[%s8398_s13 + $0x10] sm:$0xff] }
0x10f5   :  { %1575 = vmatpush.msrb.mxu1 %v1530_v4 }
0x10f6   :  { %v1498_v23 = vsel %vm86_vm0, %v1497_v21, 0.0 }
0x10f7   :  { %1499 = vadd.xlane.f32.xlu1 %v1498_v23  ;;  %1576 = vmatpush.msrb.mxu1 %v1529_v28 }
0x10f9   :  { %1577 = vmatpush.msrb.mxu1 %v1528_v31 }
0x10ff   :  { %1091 = vadd.xlane.f32.xlu1 %v1090_v1 }
0x116a   :  { %v1500_v26 = vpop.xlane.xlu1 %1499 }
0x116b   :  { %v1501_v27 = vmul.f32 %v1500_v26, %v6764_v53 }
0x116d   :  { %v1502_v30 = vsub.f32 %v1497_v21, %v1501_v27 }
0x116f   :  { %v1503_v33 = vmul.f32 %v1502_v30, %v1502_v30 }
0x1171   :  { %v1504_v34 = vsel %vm86_vm0, %v1503_v33, 0.0 }
0x1172   :  { %1505 = vadd.xlane.f32.xlu0 %v1504_v34  ;;  %v1092_v35 = vpop.xlane.xlu1 %1091 }
0x1173   :  { %v1093_v36 = vmul.f32 %v1092_v35, %v6764_v53 }
0x1175   :  { %v1094_v38 = vadd.f32 1e-05, %v1093_v36 }
0x1177   :  { %6326 = vrsqrt.f32 %v1094_v38  ;;  %vm1101_vm6 = vweird.f32 %v1094_v38 }
0x117d   :  { %v6327_v39 = vpop.eup %6326 }
0x117e   :  { %v1096_v40 = vmul.f32 %v6327_v39, %v1094_v38  ;;  %vm1102_vm3 = vweird.f32 %v6327_v39 }
0x117f   :  { %vm1103_vm7 = vmor %vm1101_vm6, %vm1102_vm3 }
0x1180   :  { %v1097_v41 = vmul.f32 %v6327_v39, %v1096_v40 }
0x1182   :  { %v1098_v42 = vmul.f32 0.5, %v1097_v41 }
0x1184   :  { %v1099_v43 = vsub.f32 1.5, %v1098_v42 }
0x1186   :  { %v1100_v44 = vmul.f32 %v6327_v39, %v1099_v43 }
0x1188   :  { %v1104_v46 = vsel %vm1103_vm7, %v6327_v39, %v1100_v44 }
0x1189   :  { %v1105_v32 = vmul.f32 %v1104_v46, %v1088_v22 }
0x118b   :  { %v1107_v29 = vmul.f32 %v1106_v45, %v1105_v32 }
0x118d   :  { %v7089_v49 = vadd.f32 %v1108_v47, %v1107_v29 }
0x118f   :  { %5999 = vmatmul.msk.f32.vlgmr.msrb.gmra.mxu1 %vm86_vm0, %v7089_v49 }
0x11e5   :  { %v1506_v57 = vpop.xlane.xlu0 %1505 }
0x11e6   :  { %v1507_v52 = vmul.f32 %v1506_v57, %v6764_v53 }
0x11e8   :  { %v1508_v54 = vadd.f32 1e-05, %v1507_v52 }
0x11ea   :  { %6328 = vrsqrt.f32 %v1508_v54  ;;  %vm1515_vm9 = vweird.f32 %v1508_v54 }
0x11f0   :  { %v6329_v55 = vpop.eup %6328 }
0x11f1   :  { %v1510_v56 = vmul.f32 %v6329_v55, %v1508_v54  ;;  %vm1516_vm8 = vweird.f32 %v6329_v55 }
0x11f2   :  { %vm1517_vm11 = vmor %vm1515_vm9, %vm1516_vm8 }
0x11f3   :  { %v1511_v58 = vmul.f32 %v6329_v55, %v1510_v56 }
0x11f5   :  { %v1512_v59 = vmul.f32 0.5, %v1511_v58 }
0x11f7   :  { %v1513_v61 = vsub.f32 1.5, %v1512_v59 }
0x11f9   :  { %v1514_v62 = vmul.f32 %v6329_v55, %v1513_v61 }
0x11fb   :  { %v1518_v2 = vsel %vm1517_vm11, %v6329_v55, %v1514_v62 }
0x11fc   :  { %v1519_v3 = vmul.f32 %v1518_v2, %v1502_v30 }
0x11fe   :  { %v1521_v6 = vmul.f32 %v1520_v0, %v1519_v3 }
0x1200   :  { %v7118_v7 = vadd.f32 %v1522_v5, %v1521_v6 }
0x1202   :  { %5998 = vmatmul.msk.f32.vlgmr.msra.gmra.mxu2 %vm86_vm0, %v7118_v7 }
0x120c   :  { %v7122_v8 = vpop.f32.mrf.mxu1 }
0x120d   :  { %1740 = vrot.lane.b32.xlu1 %v7122_v8, %s8506_s30  ;;  %1661 = vrot.lane.b32.xlu2 %v7122_v8, %s8501_s28 }
0x120e   :  { %6000 = vmatpush.xpose.msk.msra.mxu3 %vm113_vm1, %v7122_v8 }
0x1267   :  { %v1662_v9 = vpop.permute.xlu2 %1661 }
0x1268   :  { %6003 = vmatpush.xpose.msk.msrb.mxu2 %vm113_vm1, %v1662_v9 }
0x127f   :  { %v1741_v37 = vpop.permute.xlu1 %1740 }
0x1280   :  { %6006 = vmatpush.xpose.msk.msrb.mxu3 %vm113_vm1, %v1741_v37 }
0x1285   :  { %v1556_v10 = vpop.f32.mrf.mxu2 }
0x1286   :  { %1659 = vrot.lane.b32.xlu0 %v1556_v10, %s8501_s28  ;;  %1817 = vrot.lane.b32.xlu1 %v1556_v10, %s8505_s24 }
0x1287   :  { %1738 = vrot.lane.b32.xlu2 %v1556_v10, %s8506_s30  ;;  %6001 = vmatmul.msk.f32.vlgmr.msra.gmra.mxu3 %vm113_vm1, %v1556_v10 }
0x128e   :  { %1819 = vrot.lane.b32.xlu0 %v7122_v8, %s8505_s24 }
0x12e1   :  { %v1739_v11 = vpop.permute.xlu2 %1738 }
0x12e2   :  { %6007 = vmatmul.msk.f32.vlgmr.msrb.gmra.mxu3 %vm113_vm1, %v1739_v11 }
0x12f8   :  { %v1660_v12 = vpop.permute.xlu0 %1659  ;;  %v1818_v15 = vpop.permute.xlu1 %1817 }
0x12f9   :  { %6004 = vmatmul.msk.f32.vlgmr.msrb.gmra.mxu2 %vm113_vm1, %v1660_v12 }
0x1300   :  { %v1820_v13 = vpop.permute.xlu0 %1819 }
0x1301   :  { %6009 = vmatpush.xpose.msk.msra.mxu2 %vm113_vm1, %v1820_v13 }
0x1304   :  { %6010 = vmatmul.msk.f32.vlgmr.msra.gmra.mxu2 %vm113_vm1, %v1818_v15 }
0x130a   :  { %v1605_v16 = vpop.f32.mrf.mxu3 }
0x130b   :  { %v1608_v17 = vsel %vm113_vm1, %v1605_v16, -inf }
0x130c   :  { %1609 = vmax.xlane.f32.xlu0 %v1608_v17 }
0x1365   :  { %v1763_v19 = vpop.f32.mrf.mxu3 }
0x1366   :  { %v1766_v20 = vsel %vm113_vm1, %v1763_v19, -inf }
0x1367   :  { %1767 = vmax.xlane.f32.xlu1 %v1766_v20 }
0x137c   :  { %v1684_v21 = vpop.f32.mrf.mxu2 }
0x137d   :  { %v1687_v22 = vsel %vm113_vm1, %v1684_v21, -inf }
0x137e   :  { %1688 = vmax.xlane.f32.xlu2 %v1687_v22 }
0x137f   :  { %v1610_v23 = vpop.xlane.xlu0 %1609 }
0x1380   :  { %v1611_v24 = vsub.f32 %v1605_v16, %v1610_v23 }
0x1382   :  { %v1612_v1 = vmul.f32 1.442695, %v1611_v24 }
0x1384   :  { %6330 = vpow2.f32 %v1612_v1 }
0x1387   :  { %v1842_v25 = vpop.f32.mrf.mxu2 }
0x1388   :  { %v1845_v26 = vsel %vm113_vm1, %v1842_v25, -inf }
0x1389   :  { %1846 = vmax.xlane.f32.xlu0 %v1845_v26 }
0x138a   :  { %v7146_v27 = vpop.eup %6330 }
0x138b   :  { %v1614_v4 = vsel %vm113_vm1, %v7146_v27, 0.0 }
0x138c   :  { %1615 = vadd.xlane.f32.xlu2 %v1614_v4 }
0x139d   :  { %1712 = vrot.lane.b32.xlu0 %v7122_v8, %s8503_s29 }
0x13da   :  { %v1768_v28 = vpop.xlane.xlu1 %1767 }
0x13db   :  { %v1769_v30 = vsub.f32 %v1763_v19, %v1768_v28  ;;  %v1966_v28 = vld [vmem:[%s8522_s21] sm:$0xff] }
0x13dd   :  { %v1770_v31 = vmul.f32 1.442695, %v1769_v30 }
0x13df   :  { %6332 = vpow2.f32 %v1770_v31 }
0x13e5   :  { %v7152_v33 = vpop.eup %6332 }
0x13e6   :  { %v1772_v34 = vsel %vm113_vm1, %v7152_v33, 0.0 }
0x13e7   :  { %1773 = vadd.xlane.f32.xlu0 %v1772_v34 }
0x13f1   :  { %v1689_v35 = vpop.xlane.xlu2 %1688 }
0x13f2   :  { %v1690_v36 = vsub.f32 %v1684_v21, %v1689_v35 }
0x13f4   :  { %v1691_v38 = vmul.f32 1.442695, %v1690_v36 }
0x13f6   :  { %6334 = vpow2.f32 %v1691_v38 }
0x13fb   :  { %1870 = vrot.lane.b32.xlu0 %v7122_v8, %s8502_s4 }
0x13fc   :  { %v6335_v39 = vpop.eup %6334  ;;  %v1847_v40 = vpop.xlane.xlu0 %1846 }
0x13fd   :  { %v1848_v41 = vsub.f32 %v1842_v25, %v1847_v40  ;;  %v1693_v42 = vsel %vm113_vm1, %v6335_v39, 0.0 }
0x13fe   :  { %1694 = vadd.xlane.f32.xlu1 %v1693_v42 }
0x13ff   :  { %v1849_v43 = vmul.f32 1.442695, %v1848_v41  ;;  %v1616_v47 = vpop.xlane.xlu2 %1615 }
0x1400   :  { %v1628_v6 = vand.u32 2147483648, %v1616_v47  ;;  %vm1622_vm2 = vweird.f32 %v1616_v47  ;;  %v1626_v9 = vand.u32 2147483647, %v1616_v47 }
0x1401   :  { %6336 = vpow2.f32 %v1849_v43 }
0x1402   :  { %6338 = vrcp.f32 %v1616_v47  ;;  %v1629_v16 = vor.u32 1.1754944e-38, %v1628_v6  ;;  %vm1627_vm7 = vcmp.eq.f32.partialorder %v1626_v9, 8.507059e+37  ;;  %v1972_v6 = vld [vmem:[%s8522_s21 + $0x30] sm:$0xff] }
0x1407   :  { %v7159_v44 = vpop.eup %6336 }
0x1408   :  { %v1851_v45 = vsel %vm113_vm1, %v7159_v44, 0.0  ;;  %v6339_v50 = vpop.eup %6338 }
0x1409   :  { %1852 = vadd.xlane.f32.xlu2 %v1851_v45  ;;  %v1618_v51 = vmul.f32 %v6339_v50, %v1616_v47  ;;  %vm1623_vm13 = vweird.f32 %v6339_v50  ;;  %v1532_v47 = vld [vmem:[%s8520_s18] sm:$0xff] }
0x140a   :  { %vm1624_vm6 = vmor %vm1622_vm2, %vm1623_vm13 }
0x140b   :  { %v1619_v57 = vsub.f32 1.0, %v1618_v51 }
0x140d   :  { %v1620_v55 = vmul.f32 %v6339_v50, %v1619_v57 }
0x140f   :  { %v1713_v46 = vpop.permute.xlu0 %1712  ;;  %v1621_v2 = vadd.f32 %v6339_v50, %v1620_v55 }
0x1410   :  { %1733 = vmatpush.msra.mxu1 %v1713_v46 }
0x1411   :  { %v1625_v12 = vsel %vm1624_vm6, %v6339_v50, %v1621_v2  ;;  %v1962_v2 = vld [vmem:[%s8521_s22 + $0x8] sm:$0xff] }
0x1412   :  { %v1630_v20 = vsel %vm1627_vm7, %v1629_v16, %v1625_v12  ;;  %v1969_v12 = vld [vmem:[%s8522_s21 + $0x18] sm:$0xff] }
0x1413   :  { %v1632_v4 = vmul.f32 %v7146_v27, %v1630_v20 }
0x1417   :  { %1633 = vrot.lane.b32.xlu1 %v7122_v8, %s8500_s3 }
0x1421   :  { %1791 = vrot.lane.b32.xlu2 %v7122_v8, %s8504_s1 }
0x145a   :  { %v7167_v32 = vpop.xlane.xlu0 %1773 }
0x145b   :  { %6340 = vrcp.f32 %v7167_v32  ;;  %v1786_v23 = vand.u32 2147483648, %v7167_v32  ;;  %vm1780_vm11 = vweird.f32 %v7167_v32  ;;  %v1784_v25 = vand.u32 2147483647, %v7167_v32 }
0x145d   :  { %v1787_v36 = vor.u32 1.1754944e-38, %v1786_v23  ;;  %vm1785_vm2 = vcmp.eq.f32.partialorder %v1784_v25, 8.507059e+37 }
0x1461   :  { %v7170_v18 = vpop.eup %6340 }
0x1462   :  { %v1776_v56 = vmul.f32 %v7170_v18, %v7167_v32  ;;  %vm1781_vm8 = vweird.f32 %v7170_v18  ;;  %v1533_v32 = vld [vmem:[%s8520_s18 + $0x8] sm:$0xff] }
0x1464   :  { %v1777_v3 = vsub.f32 1.0, %v1776_v56 }
0x1466   :  { %v1778_v13 = vmul.f32 %v7170_v18, %v1777_v3  ;;  %v1961_v3 = vld [vmem:[%s8521_s22] sm:$0xff] }
0x1468   :  { %v1779_v21 = vadd.f32 %v7170_v18, %v1778_v13 }
0x146d   :  { %v1871_v29 = vpop.permute.xlu0 %1870 }
0x146e   :  { %1891 = vmatpush.msrb.mxu1 %v1871_v29 }
0x1471   :  { %v1695_v14 = vpop.xlane.xlu1 %1694 }
0x1472   :  { %6342 = vrcp.f32 %v1695_v14  ;;  %v1707_v59 = vand.u32 2147483648, %v1695_v14  ;;  %v1705_v0 = vand.u32 2147483647, %v1695_v14  ;;  %vm1701_vm14 = vweird.f32 %v1695_v14 }
0x1474   :  { %v1708_v8 = vor.u32 1.1754944e-38, %v1707_v59  ;;  %vm1706_vm3 = vcmp.eq.f32.partialorder %v1705_v0, 8.507059e+37  ;;  %v1964_v0 = vld [vmem:[%s8521_s22 + $0x18] sm:$0xff] }
0x1478   :  { %v6343_v52 = vpop.eup %6342 }
0x1479   :  { %v1697_v54 = vmul.f32 %v6343_v52, %v1695_v14  ;;  %vm1702_vm12 = vweird.f32 %v6343_v52 }
0x147a   :  { %vm1703_vm15 = vmor %vm1701_vm14, %vm1702_vm12 }
0x147b   :  { %v1698_v58 = vsub.f32 1.0, %v1697_v54  ;;  %vm7182_vm12 = vmor %vm1780_vm11, %vm1781_vm8 }
0x147c   :  { %v1853_v61 = vpop.xlane.xlu2 %1852  ;;  %v1783_v31 = vsel %vm7182_vm12, %v7170_v18, %v1779_v21  ;;  %v1957_v21 = vperm.slane %v7109_v60, 1 }
0x147d   :  { %v1699_v62 = vmul.f32 %v6343_v52, %v1698_v58  ;;  %6344 = vrcp.f32 %v1853_v61  ;;  %v1865_v22 = vand.u32 2147483648, %v1853_v61  ;;  %v1863_v1 = vand.u32 2147483647, %v1853_v61 }
0x147e   :  { %vm1859_vm13 = vweird.f32 %v1853_v61  ;;  %v1788_v40 = vsel %vm1785_vm2, %v1787_v36, %v1783_v31  ;;  %v6259_v36 = vld [vmem:[%s8524_s20] ss:$0 sm:$0xff]  ;;  %s8528_s20 = sld [smem:[#allocation18_spill]] }
0x147f   :  { %v1700_v5 = vadd.f32 %v6343_v52, %v1699_v62  ;;  %v1866_v34 = vor.u32 1.1754944e-38, %v1865_v22  ;;  %v1790_v41 = vmul.f32 %v7152_v33, %v1788_v40  ;;  %v1534_v33 = vld [vmem:[%s8520_s18 + $0x10] sm:$0xff] }
0x1481   :  { %v1704_v37 = vsel %vm1703_vm15, %v6343_v52, %v1700_v5  ;;  %vm1864_vm15 = vcmp.eq.f32.partialorder %v1863_v1, 8.507059e+37  ;;  %v1973_v5 = vld [vmem:[%s8522_s21 + $0x38] sm:$0xff] }
0x1482   :  { %v1709_v10 = vsel %vm1706_vm3, %v1708_v8, %v1704_v37  ;;  %2016 = vmatpush.msrb.mxu2 %v1973_v5  ;;  %v1971_v8 = vld [vmem:[%s8522_s21 + $0x28] sm:$0xff] }
0x1483   :  { %v6345_v11 = vpop.eup %6344  ;;  %v1711_v15 = vmul.f32 %v6335_v39, %v1709_v10  ;;  %v1970_v10 = vld [vmem:[%s8522_s21 + $0x20] sm:$0xff] }
0x1484   :  { %v1855_v17 = vmul.f32 %v6345_v11, %v1853_v61  ;;  %vm1860_vm9 = vweird.f32 %v6345_v11  ;;  %v1792_v35 = vpop.permute.xlu2 %1791  ;;  %2017 = vmatpush.msrb.mxu2 %v1972_v6 }
0x1485   :  { %6005 = vmatmul.msk.f32.vlgmr.msra.gmra.mxu1 %vm113_vm1, %v1711_v15  ;;  %vm1861_vm14 = vmor %vm1859_vm13, %vm1860_vm9 }
0x1486   :  { %v1856_v19 = vsub.f32 1.0, %v1855_v17  ;;  %2018 = vmatpush.msrb.mxu2 %v1971_v8 }
0x1488   :  { %v1857_v24 = vmul.f32 %v6345_v11, %v1856_v19  ;;  %2019 = vmatpush.msrb.mxu2 %v1970_v10 }
0x1489   :  { %v1634_v26 = vpop.permute.xlu1 %1633 }
0x148a   :  { %v1858_v30 = vadd.f32 %v6345_v11, %v1857_v24  ;;  %1654 = vmatpush.msrb.mxu0 %v1634_v26  ;;  %2020 = vmatpush.msrb.mxu2 %v1969_v12  ;;  %v1959_v24 = vperm.slane %v7114_v63, 1  ;;  %v1968_v26 = vld [vmem:[%s8522_s21 + $0x10] sm:$0xff] }
0x148b   :  { %6002 = vmatmul.msk.f32.vlgmr.msrb.gmra.mxu0 %vm113_vm1, %v1632_v4  ;;  %v1967_v4 = vld [vmem:[%s8522_s21 + $0x8] sm:$0xff] }
0x148c   :  { %v1862_v38 = vsel %vm1861_vm14, %v6345_v11, %v1858_v30  ;;  %1812 = vmatpush.msra.mxu0 %v1792_v35  ;;  %2021 = vmatpush.msrb.mxu2 %v1968_v26  ;;  %v6258_v30 = vld [vmem:[%s8523_s27] ss:$0 sm:$0xff] }
0x148d   :  { %v1867_v27 = vsel %vm1864_vm15, %v1866_v34, %v1862_v38 }
0x148e   :  { %v1869_v39 = vmul.f32 %v7159_v44, %v1867_v27  ;;  %v1535_v44 = vld [vmem:[%s8520_s18 + $0x18] sm:$0xff]  ;;  %1993 = vmatpush.msrb.mxu0 %v1964_v0  ;;  %2022 = vmatpush.msrb.mxu2 %v1967_v4  ;;  %s8530_s18 = sld [smem:[#allocation9_spill]] }
0x148f   :  { %1926 = vmatpush.msra.mxu3 %v1535_v44  ;;  %v6020_v44 = vld [vmem:[%s8395_s10 + $0x38] sm:$0xff] }
0x1490   :  { %6011 = vmatmul.msk.f32.vlgmr.msrb.gmra.mxu1 %vm113_vm1, %v1869_v39  ;;  %2023 = vmatpush.msrb.mxu2 %v1966_v28 }
0x1491   :  { %1927 = vmatpush.msra.mxu3 %v1534_v33  ;;  %2084 = vmatpush.msra.mxu1 %v6020_v44  ;;  %v6019_v33 = vld [vmem:[%s8395_s10 + $0x30] sm:$0xff] }
0x1493   :  { %6008 = vmatmul.msk.f32.vlgmr.msra.gmra.mxu0 %vm113_vm1, %v1790_v41  ;;  %1928 = vmatpush.msra.mxu3 %v1533_v32  ;;  %v6018_v32 = vld [vmem:[%s8395_s10 + $0x28] sm:$0xff] }
0x1494   :  { %2085 = vmatpush.msra.mxu1 %v6019_v33 }
0x1495   :  { %1929 = vmatpush.msra.mxu3 %v1532_v47  ;;  %v6017_v47 = vld [vmem:[%s8395_s10 + $0x20] sm:$0xff] }
0x1496   :  { %2086 = vmatpush.msra.mxu1 %v6018_v32 }
0x1498   :  { %2087 = vmatpush.msra.mxu1 %v6017_v47 }
0x1502   :  { %v1735_v42 = vpop.f32.mrf.mxu1 }
0x1503   :  { %1897 = vrot.lane.b32.xlu1 %v1735_v42, %s8511_s14 }
0x1508   :  { %v1656_v43 = vpop.f32.mrf.mxu0 }
0x150d   :  { %v1893_v45 = vpop.f32.mrf.mxu1 }
0x150e   :  { %1905 = vrot.lane.b32.xlu0 %v1893_v45, %s8512_s15 }
0x1510   :  { %v1814_v46 = vpop.f32.mrf.mxu0 }
0x1511   :  { %1901 = vrot.lane.b32.xlu2 %v1814_v46, %s8513_s26 }
0x156b   :  { %v1902_v14 = vpop.permute.xlu2 %1901 }
0x1575   :  { %v1898_v29 = vpop.permute.xlu1 %1897 }
0x1576   :  { %v1908_v50 = vsel %vm113_vm1, %v1656_v43, %v1898_v29 }
0x1577   :  { %v1909_v51 = vsel %vm439_vm4, %v1908_v50, %v1902_v14 }
0x1580   :  { %v1906_v18 = vpop.permute.xlu0 %1905 }
0x1581   :  { %v1910_v57 = vsel %vm441_vm5, %v1909_v51, %v1906_v18 }
0x1582   :  { %6012 = vmatmul.msk.f32.vlgmr.msra.gmra.mxu3 %vm86_vm0, %v1910_v57 }
0x1605   :  { %v1931_v52 = vpop.f32.mrf.mxu3 }
0x1606   :  { %v1934_v54 = vadd.f32 %v1931_v52, %v7118_v7  ;;  %v1963_v7 = vld [vmem:[%s8521_s22 + $0x10] sm:$0xff] }
0x1607   :  { %1994 = vmatpush.msrb.mxu0 %v1963_v7 }
0x1608   :  { %v1935_v55 = vsel %vm86_vm0, %v1934_v54, 0.0 }
0x1609   :  { %1936 = vadd.xlane.f32.xlu1 %v1935_v55  ;;  %1995 = vmatpush.msrb.mxu0 %v1962_v2 }
0x160b   :  { %1996 = vmatpush.msrb.mxu0 %v1961_v3 }
0x167c   :  { %v1937_v56 = vpop.xlane.xlu1 %1936 }
0x167d   :  { %v1938_v58 = vmul.f32 %v1937_v56, %v6764_v53  ;;  %v2051_v56 = vperm.slane %v7109_v60, 2 }
0x167f   :  { %v1939_v59 = vsub.f32 %v1934_v54, %v1938_v58 }
0x1681   :  { %v1940_v61 = vmul.f32 %v1939_v59, %v1939_v59 }
0x1683   :  { %v1941_v62 = vsel %vm86_vm0, %v1940_v61, 0.0  ;;  %v2053_v61 = vperm.slane %v7114_v63, 2 }
0x1684   :  { %1942 = vadd.xlane.f32.xlu2 %v1941_v62 }
0x16f7   :  { %v1943_v9 = vpop.xlane.xlu2 %1942 }
0x16f8   :  { %v1944_v37 = vmul.f32 %v1943_v9, %v6764_v53 }
0x16fa   :  { %v1945_v11 = vadd.f32 1e-05, %v1944_v37 }
0x16fc   :  { %6346 = vrsqrt.f32 %v1945_v11  ;;  %vm1952_vm6 = vweird.f32 %v1945_v11 }
0x1702   :  { %v6347_v13 = vpop.eup %6346 }
0x1703   :  { %v1947_v15 = vmul.f32 %v6347_v13, %v1945_v11  ;;  %vm1953_vm3 = vweird.f32 %v6347_v13 }
0x1704   :  { %vm1954_vm7 = vmor %vm1952_vm6, %vm1953_vm3 }
0x1705   :  { %v1948_v16 = vmul.f32 %v6347_v13, %v1947_v15 }
0x1707   :  { %v1949_v17 = vmul.f32 0.5, %v1948_v16  ;;  %v6046_v16 = vld [vmem:[%s8398_s13 + $0x38] sm:$0xff] }
0x1709   :  { %v1950_v19 = vsub.f32 1.5, %v1949_v17  ;;  %v6045_v17 = vld [vmem:[%s8398_s13 + $0x30] sm:$0xff] }
0x170b   :  { %v1951_v20 = vmul.f32 %v6347_v13, %v1950_v19  ;;  %v6044_v19 = vld [vmem:[%s8398_s13 + $0x28] sm:$0xff] }
0x170d   :  { %v1955_v22 = vsel %vm1954_vm7, %v6347_v13, %v1951_v20  ;;  %v6043_v20 = vld [vmem:[%s8398_s13 + $0x20] sm:$0xff] }
0x170e   :  { %v1956_v23 = vmul.f32 %v1955_v22, %v1939_v59 }
0x1710   :  { %v1958_v1 = vmul.f32 %v1957_v21, %v1956_v23 }
0x1712   :  { %v1960_v25 = vadd.f32 %v1959_v24, %v1958_v1 }
0x1714   :  { %6013 = vmatmul.msk.f32.vlgmr.msrb.gmra.mxu0 %vm86_vm0, %v1960_v25 }
0x1791   :  { %v1998_v31 = vpop.f32.mrf.mxu0 }
0x1792   :  { %v1999_v34 = vadd.f32 %v6258_v30, %v1998_v31 }
0x1794   :  { %v2001_v35 = vmax.f32 %v1999_v34, 0.0 }
0x1796   :  { %6014 = vmatmul.msk.f32.vlgmr.msrb.gmra.mxu2 %vm544_vm10, %v2001_v35 }
0x1819   :  { %v2025_v38 = vpop.f32.mrf.mxu2 }
0x181a   :  { %v2026_v27 = vadd.f32 %v6259_v36, %v2025_v38 }
0x181c   :  { %v2028_v39 = vadd.f32 %v2026_v27, %v1960_v25 }
0x181e   :  { %v2029_v40 = vsel %vm86_vm0, %v2028_v39, 0.0 }
0x181f   :  { %2030 = vadd.xlane.f32.xlu0 %v2029_v40 }
0x1892   :  { %v2031_v41 = vpop.xlane.xlu0 %2030 }
0x1893   :  { %v2032_v42 = vmul.f32 %v2031_v41, %v6764_v53 }
0x1895   :  { %v2033_v43 = vsub.f32 %v2028_v39, %v2032_v42 }
0x1897   :  { %v2034_v45 = vmul.f32 %v2033_v43, %v2033_v43 }
0x1899   :  { %v2035_v46 = vsel %vm86_vm0, %v2034_v45, 0.0 }
0x189a   :  { %2036 = vadd.xlane.f32.xlu1 %v2035_v46 }
0x190d   :  { %v2037_v29 = vpop.xlane.xlu1 %2036 }
0x190e   :  { %v2038_v50 = vmul.f32 %v2037_v29, %v6764_v53 }
0x1910   :  { %v2039_v14 = vadd.f32 1e-05, %v2038_v50 }
0x1912   :  { %6348 = vrsqrt.f32 %v2039_v14  ;;  %vm2046_vm9 = vweird.f32 %v2039_v14 }
0x1918   :  { %v6349_v51 = vpop.eup %6348 }
0x1919   :  { %v2041_v18 = vmul.f32 %v6349_v51, %v2039_v14  ;;  %vm2047_vm8 = vweird.f32 %v6349_v51 }
0x191a   :  { %vm2048_vm11 = vmor %vm2046_vm9, %vm2047_vm8 }
0x191b   :  { %v2042_v57 = vmul.f32 %v6349_v51, %v2041_v18 }
0x191d   :  { %v2043_v52 = vmul.f32 0.5, %v2042_v57 }
0x191f   :  { %v2044_v54 = vsub.f32 1.5, %v2043_v52 }
0x1921   :  { %v2045_v55 = vmul.f32 %v6349_v51, %v2044_v54 }
0x1923   :  { %v2049_v58 = vsel %vm2048_vm11, %v6349_v51, %v2045_v55 }
0x1924   :  { %v2050_v59 = vmul.f32 %v2049_v58, %v2033_v43 }
0x1926   :  { %v2052_v62 = vmul.f32 %v2051_v56, %v2050_v59 }
0x1928   :  { %v7282_v0 = vadd.f32 %v2053_v61, %v2052_v62 }
0x192a   :  { %6025 = vmatmul.msk.f32.vlgmr.msra.gmra.mxu1 %vm86_vm0, %v7282_v0 }
0x19a7   :  { %v7286_v7 = vpop.f32.mrf.mxu1 }
0x19a8   :  { %2144 = vrot.lane.b32.xlu1 %v7286_v7, %s8514_s17  ;;  %2093 = vrot.lane.b32.xlu2 %v7286_v7, %s8500_s3 }
0x19b0   :  { %2170 = vrot.lane.b32.xlu2 %v7286_v7, %s8501_s28 }
0x19b8   :  { %2330 = vrot.lane.b32.xlu2 %v7286_v7, %s8502_s4 }
0x1a02   :  { %v2094_v60 = vpop.permute.xlu2 %2093 }
0x1a03   :  { %6026 = vmatpush.xpose.msk.msrb.mxu3 %vm113_vm1, %v2094_v60 }
0x1a06   :  { %6027 = vmatmul.msk.f32.vlgmr.msrb.gmra.mxu3 %vm113_vm1, %v7286_v7 }
0x1a0a   :  { %v2171_v37 = vpop.permute.xlu2 %2170 }
0x1a12   :  { %v2331_v13 = vpop.permute.xlu2 %2330 }
0x1a1a   :  { %v2145_v63 = vpop.permute.xlu1 %2144 }
0x1a1b   :  { %2165 = vmatpush.msra.mxu0 %v2145_v63 }
0x1a89   :  { %v2116_v2 = vpop.f32.mrf.mxu3 }
0x1a8a   :  { %v2117_v3 = vadd.f32 %v2116_v2, %v6934_v48 }
0x1a8c   :  { %v2119_v5 = vsel %vm113_vm1, %v2117_v3, -inf }
0x1a8d   :  { %2120 = vmax.xlane.f32.xlu0 %v2119_v5 }
0x1aa1   :  { %2172 = vrot.lane.b32.xlu0 %v7286_v7, %s8503_s29 }
0x1aa9   :  { %2251 = vrot.lane.b32.xlu0 %v7286_v7, %s8504_s1 }
0x1ab1   :  { %2249 = vrot.lane.b32.xlu0 %v7286_v7, %s8506_s30 }
0x1b00   :  { %v2121_v6 = vpop.xlane.xlu0 %2120 }
0x1b01   :  { %v2122_v8 = vsub.f32 %v2117_v3, %v2121_v6 }
0x1b03   :  { %v2123_v9 = vmul.f32 1.442695, %v2122_v8 }
0x1b05   :  { %6350 = vpow2.f32 %v2123_v9 }
0x1b0b   :  { %v6351_v10 = vpop.eup %6350 }
0x1b0c   :  { %v2125_v11 = vsel %vm113_vm1, %v6351_v10, 0.0 }
0x1b0d   :  { %2126 = vadd.xlane.f32.xlu1 %v2125_v11 }
0x1b13   :  { %v2173_v12 = vpop.permute.xlu0 %2172 }
0x1b14   :  { %6029 = vmatpush.xpose.msk.msrb.mxu1 %vm113_vm1, %v2173_v12 }
0x1b17   :  { %6030 = vmatmul.msk.f32.vlgmr.msrb.gmra.mxu1 %vm113_vm1, %v2171_v37 }
0x1b18   :  { %6035 = vmatpush.xpose.msk.msra.mxu1 %vm113_vm1, %v2331_v13 }
0x1b1b   :  { %v2252_v15 = vpop.permute.xlu0 %2251 }
0x1b1c   :  { %6032 = vmatpush.xpose.msk.msrb.mxu0 %vm113_vm1, %v2252_v15  ;;  %2522 = vmatpush.msrb.mxu1 %v6046_v16 }
0x1b1e   :  { %2523 = vmatpush.msrb.mxu1 %v6045_v17 }
0x1b20   :  { %2524 = vmatpush.msrb.mxu1 %v6044_v19 }
0x1b22   :  { %2525 = vmatpush.msrb.mxu1 %v6043_v20 }
0x1b23   :  { %v2250_v39 = vpop.permute.xlu0 %2249 }
0x1b26   :  { %2328 = vrot.lane.b32.xlu1 %v7286_v7, %s8505_s24 }
0x1b80   :  { %v2127_v21 = vpop.xlane.xlu1 %2126 }
0x1b81   :  { %6352 = vrcp.f32 %v2127_v21  ;;  %v2139_v1 = vand.u32 2147483648, %v2127_v21  ;;  %v2137_v26 = vand.u32 2147483647, %v2127_v21  ;;  %vm2133_vm13 = vweird.f32 %v2127_v21 }
0x1b83   :  { %v2140_v28 = vor.u32 1.1754944e-38, %v2139_v1  ;;  %vm2138_vm15 = vcmp.eq.f32.partialorder %v2137_v26, 8.507059e+37 }
0x1b87   :  { %v6353_v22 = vpop.eup %6352 }
0x1b88   :  { %v2129_v23 = vmul.f32 %v6353_v22, %v2127_v21  ;;  %vm2134_vm12 = vweird.f32 %v6353_v22 }
0x1b89   :  { %vm2135_vm14 = vmor %vm2133_vm13, %vm2134_vm12 }
0x1b8a   :  { %v2130_v24 = vsub.f32 1.0, %v2129_v23 }
0x1b8c   :  { %v2131_v25 = vmul.f32 %v6353_v22, %v2130_v24 }
0x1b8e   :  { %v2132_v4 = vadd.f32 %v6353_v22, %v2131_v25 }
0x1b90   :  { %v2136_v30 = vsel %vm2135_vm14, %v6353_v22, %v2132_v4 }
0x1b91   :  { %v2141_v31 = vsel %vm2138_vm15, %v2140_v28, %v2136_v30 }
0x1b92   :  { %v2143_v34 = vmul.f32 %v6351_v10, %v2141_v31 }
0x1b94   :  { %6028 = vmatmul.msk.f32.vlgmr.msra.gmra.mxu0 %vm113_vm1, %v2143_v34  ;;  %v2195_v35 = vpop.f32.mrf.mxu1 }
0x1b95   :  { %v2196_v36 = vadd.f32 %v2195_v35, %v6934_v48 }
0x1b97   :  { %v2198_v38 = vsel %vm113_vm1, %v2196_v36, -inf }
0x1b98   :  { %v2329_v27 = vpop.permute.xlu1 %2328  ;;  %2199 = vmax.xlane.f32.xlu2 %v2198_v38 }
0x1b99   :  { %6036 = vmatmul.msk.f32.vlgmr.msra.gmra.mxu1 %vm113_vm1, %v2329_v27 }
0x1b9c   :  { %6033 = vmatmul.msk.f32.vlgmr.msrb.gmra.mxu0 %vm113_vm1, %v2250_v39 }
0x1ba1   :  { %6052 = vmatmul.msk.f32.vlgmr.msrb.gmra.mxu1 %vm86_vm0, %v7089_v49 }
0x1c0b   :  { %v2200_v40 = vpop.xlane.xlu2 %2199 }
0x1c0c   :  { %v2201_v41 = vsub.f32 %v2196_v36, %v2200_v40 }
0x1c0e   :  { %v2202_v42 = vmul.f32 1.442695, %v2201_v41 }
0x1c10   :  { %6354 = vpow2.f32 %v2202_v42 }
0x1c11   :  { %v7333_v43 = vpop.f32.mrf.mxu0 }
0x1c16   :  { %v6355_v45 = vpop.eup %6354  ;;  %v2353_v46 = vpop.f32.mrf.mxu1 }
0x1c17   :  { %v2354_v44 = vadd.f32 %v2353_v46, %v6934_v48  ;;  %v2204_v33 = vsel %vm113_vm1, %v6355_v45, 0.0  ;;  %v6042_v46 = vld [vmem:[%s8515_s12 + $0x38] sm:$0xff] }
0x1c18   :  { %2205 = vadd.xlane.f32.xlu2 %v2204_v33  ;;  %v6040_v33 = vld [vmem:[%s8515_s12 + $0x28] sm:$0xff] }
0x1c19   :  { %v2274_v32 = vpop.f32.mrf.mxu0  ;;  %v2356_v47 = vsel %vm113_vm1, %v2354_v44, -inf }
0x1c1a   :  { %v2275_v29 = vadd.f32 %v2274_v32, %v6934_v48  ;;  %2357 = vmax.xlane.f32.xlu1 %v2356_v47  ;;  %v6039_v32 = vld [vmem:[%s8515_s12 + $0x20] sm:$0xff]  ;;  %v6024_v47 = vld [vmem:[%s8396_s11 + $0x38] sm:$0xff] }
0x1c1b   :  { %2437 = vmatpush.msra.mxu0 %v6024_v47 }
0x1c1c   :  { %v2277_v49 = vsel %vm113_vm1, %v2275_v29, -inf }
0x1c1d   :  { %2278 = vmax.xlane.f32.xlu0 %v2277_v49  ;;  %v6022_v49 = vld [vmem:[%s8396_s11 + $0x28] sm:$0xff] }
0x1c1e   :  { %v7349_v39 = vpop.f32.mrf.mxu1 }
0x1c33   :  { %2223 = vrot.lane.b32.xlu1 %v7286_v7, %s8507_s5 }
0x1c8b   :  { %v2206_v50 = vpop.xlane.xlu2 %2205 }
0x1c8c   :  { %6356 = vrcp.f32 %v2206_v50  ;;  %v2218_v2 = vand.u32 2147483648, %v2206_v50  ;;  %vm2212_vm3 = vweird.f32 %v2206_v50  ;;  %v2216_v5 = vand.u32 2147483647, %v2206_v50 }
0x1c8d   :  { %v2358_v14 = vpop.xlane.xlu1 %2357 }
0x1c8e   :  { %v2359_v51 = vsub.f32 %v2354_v44, %v2358_v14  ;;  %v2219_v8 = vor.u32 1.1754944e-38, %v2218_v2  ;;  %vm2217_vm7 = vcmp.eq.f32.partialorder %v2216_v5, 8.507059e+37  ;;  %v6041_v44 = vld [vmem:[%s8515_s12 + $0x30] sm:$0xff]  ;;  %s8534_s12 = sld [smem:[#allocation10_spill]] }
0x1c90   :  { %v2360_v18 = vmul.f32 1.442695, %v2359_v51  ;;  %v2279_v57 = vpop.xlane.xlu0 %2278 }
0x1c91   :  { %v2280_v52 = vsub.f32 %v2275_v29, %v2279_v57  ;;  %v6023_v29 = vld [vmem:[%s8396_s11 + $0x30] sm:$0xff] }
0x1c92   :  { %v6357_v54 = vpop.eup %6356  ;;  %6358 = vpow2.f32 %v2360_v18  ;;  %2438 = vmatpush.msra.mxu0 %v6023_v29 }
0x1c93   :  { %v2208_v55 = vmul.f32 %v6357_v54, %v2206_v50  ;;  %v2281_v56 = vmul.f32 1.442695, %v2280_v52  ;;  %vm2213_vm2 = vweird.f32 %v6357_v54  ;;  %v6021_v50 = vld [vmem:[%s8396_s11 + $0x20] sm:$0xff]  ;;  %s8535_s11 = sld [smem:[#allocation12_spill]] }
0x1c94   :  { %vm2214_vm6 = vmor %vm2212_vm3, %vm2213_vm2  ;;  %2439 = vmatpush.msra.mxu0 %v6022_v49 }
0x1c95   :  { %v2209_v58 = vsub.f32 1.0, %v2208_v55  ;;  %6360 = vpow2.f32 %v2281_v56 }
0x1c96   :  { %2440 = vmatpush.msra.mxu0 %v6021_v50 }
0x1c97   :  { %v2210_v59 = vmul.f32 %v6357_v54, %v2209_v58 }
0x1c98   :  { %v6359_v61 = vpop.eup %6358 }
0x1c99   :  { %v2362_v62 = vsel %vm113_vm1, %v6359_v61, 0.0  ;;  %v2211_v63 = vadd.f32 %v6357_v54, %v2210_v59 }
0x1c9a   :  { %2363 = vadd.xlane.f32.xlu0 %v2362_v62 }
0x1c9b   :  { %v6361_v60 = vpop.eup %6360  ;;  %v2215_v6 = vsel %vm2214_vm6, %v6357_v54, %v2211_v63 }
0x1c9c   :  { %v2283_v3 = vsel %vm113_vm1, %v6361_v60, 0.0  ;;  %v2220_v9 = vsel %vm2217_vm7, %v2219_v8, %v2215_v6 }
0x1c9d   :  { %2284 = vadd.xlane.f32.xlu2 %v2283_v3  ;;  %v2222_v10 = vmul.f32 %v6355_v45, %v2220_v9 }
0x1ca5   :  { %v2224_v37 = vpop.permute.xlu1 %2223 }
0x1ca6   :  { %2244 = vmatpush.msra.mxu3 %v2224_v37 }
0x1ca7   :  { %6031 = vmatmul.msk.f32.vlgmr.msra.gmra.mxu3 %vm113_vm1, %v2222_v10  ;;  %v7403_v10 = vld [vmem:[%s8516_s9 + $0x4] sm:$0x7]  ;;  %s8531_s9 = sld [smem:[#allocation11_spill]] }
0x1cae   :  { %2381 = vrot.lane.b32.xlu0 %v7286_v7, %s8508_s25 }
0x1cb5   :  { %2302 = vrot.lane.b32.xlu2 %v7286_v7, %s8509_s0 }
0x1d0d   :  { %v2364_v11 = vpop.xlane.xlu0 %2363 }
0x1d0e   :  { %6362 = vrcp.f32 %v2364_v11  ;;  %v2376_v19 = vand.u32 2147483648, %v2364_v11  ;;  %v2374_v23 = vand.u32 2147483647, %v2364_v11  ;;  %vm2370_vm9 = vweird.f32 %v2364_v11 }
0x1d10   :  { %v2285_v12 = vpop.xlane.xlu2 %2284  ;;  %v2377_v7 = vor.u32 1.1754944e-38, %v2376_v19  ;;  %vm2375_vm13 = vcmp.eq.f32.partialorder %v2374_v23, 8.507059e+37 }
0x1d11   :  { %6364 = vrcp.f32 %v2285_v12  ;;  %v2297_v25 = vand.u32 2147483648, %v2285_v12  ;;  %v2295_v4 = vand.u32 2147483647, %v2285_v12  ;;  %vm2291_vm14 = vweird.f32 %v2285_v12 }
0x1d13   :  { %v2298_v34 = vor.u32 1.1754944e-38, %v2297_v25  ;;  %vm2296_vm2 = vcmp.eq.f32.partialorder %v2295_v4, 8.507059e+37 }
0x1d14   :  { %v6363_v13 = vpop.eup %6362 }
0x1d15   :  { %v2366_v15 = vmul.f32 %v6363_v13, %v2364_v11  ;;  %vm2371_vm8 = vweird.f32 %v6363_v13 }
0x1d16   :  { %vm2372_vm11 = vmor %vm2370_vm9, %vm2371_vm8 }
0x1d17   :  { %v6365_v16 = vpop.eup %6364  ;;  %v2367_v17 = vsub.f32 1.0, %v2366_v15  ;;  %v2468_v15 = vperm.slane %v7403_v10, 0 }
0x1d18   :  { %v2287_v20 = vmul.f32 %v6365_v16, %v2285_v12  ;;  %v2303_v21 = vpop.permute.xlu2 %2302  ;;  %vm2292_vm12 = vweird.f32 %v6365_v16 }
0x1d19   :  { %v2368_v22 = vmul.f32 %v6363_v13, %v2367_v17  ;;  %2323 = vmatpush.msra.mxu2 %v2303_v21  ;;  %vm2293_vm15 = vmor %vm2291_vm14, %vm2292_vm12 }
0x1d1a   :  { %v2288_v24 = vsub.f32 1.0, %v2287_v20 }
0x1d1b   :  { %v2369_v1 = vadd.f32 %v6363_v13, %v2368_v22  ;;  %2502 = vmatpush.msrb.mxu2 %v6042_v46 }
0x1d1c   :  { %v2289_v26 = vmul.f32 %v6365_v16, %v2288_v24 }
0x1d1d   :  { %v2373_v28 = vsel %vm2372_vm11, %v6363_v13, %v2369_v1  ;;  %2503 = vmatpush.msrb.mxu2 %v6041_v44  ;;  %v7408_v13 = vld [vmem:[%s8525_s7 + $0x4] sm:$0x7]  ;;  %s8544_s7 = sld [smem:[#allocation18_spill]] }
0x1d1e   :  { %v2290_v30 = vadd.f32 %v6365_v16, %v2289_v26  ;;  %v2378_v31 = vsel %vm2375_vm13, %v2377_v7, %v2373_v28  ;;  %v2470_v19 = vperm.slane %v7408_v13, 0 }
0x1d1f   :  { %v2380_v35 = vmul.f32 %v6359_v61, %v2378_v31  ;;  %2504 = vmatpush.msrb.mxu2 %v6040_v33 }
0x1d20   :  { %v2294_v36 = vsel %vm2293_vm15, %v6365_v16, %v2290_v30  ;;  %v2382_v38 = vpop.permute.xlu0 %2381 }
0x1d21   :  { %2402 = vmatpush.msrb.mxu3 %v2382_v38  ;;  %v2299_v27 = vsel %vm2296_vm2, %v2298_v34, %v2294_v36  ;;  %2505 = vmatpush.msrb.mxu2 %v6039_v32 }
0x1d22   :  { %6037 = vmatmul.msk.f32.vlgmr.msrb.gmra.mxu3 %vm113_vm1, %v2380_v35  ;;  %v2301_v40 = vmul.f32 %v6361_v60, %v2299_v27 }
0x1d23   :  { %6053 = vmatpush.xpose.msk.msra.mxu3 %vm113_vm1, %v7349_v39 }
0x1d24   :  { %6034 = vmatmul.msk.f32.vlgmr.msra.gmra.mxu2 %vm113_vm1, %v2301_v40 }
0x1d2a   :  { %v2246_v41 = vpop.f32.mrf.mxu3 }
0x1d2b   :  { %2408 = vrot.lane.b32.xlu1 %v2246_v41, %s8511_s14 }
0x1d9d   :  { %v2409_v57 = vpop.permute.xlu1 %2408 }
0x1d9e   :  { %v2419_v52 = vsel %vm113_vm1, %v7333_v43, %v2409_v57 }
0x1da5   :  { %v2404_v42 = vpop.f32.mrf.mxu3 }
0x1da6   :  { %2416 = vrot.lane.b32.xlu2 %v2404_v42, %s8512_s15 }
0x1da7   :  { %v2325_v45 = vpop.f32.mrf.mxu2 }
0x1da8   :  { %2412 = vrot.lane.b32.xlu0 %v2325_v45, %s8513_s26 }
0x1dae   :  { %2609 = vrot.lane.b32.xlu2 %v7349_v39, %s8501_s28 }
0x1db6   :  { %2688 = vrot.lane.b32.xlu2 %v7349_v39, %s8506_s30 }
0x1dbe   :  { %2767 = vrot.lane.b32.xlu2 %v7349_v39, %s8505_s24 }
0x1e00   :  { %v2417_v14 = vpop.permute.xlu2 %2416 }
0x1e08   :  { %v2610_v51 = vpop.permute.xlu2 %2609 }
0x1e09   :  { %6056 = vmatpush.xpose.msk.msra.mxu2 %vm113_vm1, %v2610_v51 }
0x1e10   :  { %v2689_v18 = vpop.permute.xlu2 %2688 }
0x1e11   :  { %6059 = vmatpush.xpose.msk.msrb.mxu3 %vm113_vm1, %v2689_v18 }
0x1e18   :  { %v2768_v22 = vpop.permute.xlu2 %2767 }
0x1e1a   :  { %v2413_v54 = vpop.permute.xlu0 %2412 }
0x1e1b   :  { %v2420_v55 = vsel %vm439_vm4, %v2419_v52, %v2413_v54 }
0x1e1c   :  { %v2421_v56 = vsel %vm441_vm5, %v2420_v55, %v2417_v14 }
0x1e1d   :  { %6038 = vmatmul.msk.f32.vlgmr.msra.gmra.mxu0 %vm86_vm0, %v2421_v56 }
0x1e9a   :  { %v2442_v58 = vpop.f32.mrf.mxu0 }
0x1e9b   :  { %v2445_v59 = vadd.f32 %v2442_v58, %v7282_v0 }
0x1e9d   :  { %v2446_v61 = vsel %vm86_vm0, %v2445_v59, 0.0 }
0x1e9e   :  { %2447 = vadd.xlane.f32.xlu1 %v2446_v61 }
0x1f11   :  { %v2448_v62 = vpop.xlane.xlu1 %2447 }
0x1f12   :  { %v2449_v60 = vmul.f32 %v2448_v62, %v6764_v53 }
0x1f14   :  { %v2450_v63 = vsub.f32 %v2445_v59, %v2449_v60 }
0x1f16   :  { %v2451_v2 = vmul.f32 %v2450_v63, %v2450_v63 }
0x1f18   :  { %v2452_v43 = vsel %vm86_vm0, %v2451_v2, 0.0 }
0x1f19   :  { %2453 = vadd.xlane.f32.xlu0 %v2452_v43 }
0x1f8c   :  { %v2454_v3 = vpop.xlane.xlu0 %2453 }
0x1f8d   :  { %v2455_v5 = vmul.f32 %v2454_v3, %v6764_v53 }
0x1f8f   :  { %v2456_v6 = vadd.f32 1e-05, %v2455_v5 }
0x1f91   :  { %6366 = vrsqrt.f32 %v2456_v6  ;;  %vm2463_vm6 = vweird.f32 %v2456_v6 }
0x1f97   :  { %v6367_v8 = vpop.eup %6366 }
0x1f98   :  { %v2458_v9 = vmul.f32 %v6367_v8, %v2456_v6  ;;  %vm2464_vm3 = vweird.f32 %v6367_v8 }
0x1f99   :  { %vm2465_vm7 = vmor %vm2463_vm6, %vm2464_vm3 }
0x1f9a   :  { %v2459_v37 = vmul.f32 %v6367_v8, %v2458_v9 }
0x1f9c   :  { %v2460_v0 = vmul.f32 0.5, %v2459_v37 }
0x1f9e   :  { %v2461_v11 = vsub.f32 1.5, %v2460_v0 }
0x1fa0   :  { %v2462_v12 = vmul.f32 %v6367_v8, %v2461_v11 }
0x1fa2   :  { %v2466_v16 = vsel %vm2465_vm7, %v6367_v8, %v2462_v12 }
0x1fa3   :  { %v2467_v17 = vmul.f32 %v2466_v16, %v2450_v63 }
0x1fa5   :  { %v2469_v20 = vmul.f32 %v2468_v15, %v2467_v17 }
0x1fa7   :  { %v7412_v21 = vadd.f32 %v2470_v19, %v2469_v20 }
0x1fa9   :  { %6051 = vmatmul.msk.f32.vlgmr.msrb.gmra.mxu2 %vm86_vm0, %v7412_v21 }
0x1faa   :  { %6062 = vmatpush.xpose.msk.msrb.mxu2 %vm113_vm1, %v2768_v22 }
0x202c   :  { %v2507_v23 = vpop.f32.mrf.mxu2 }
0x202d   :  { %2765 = vrot.lane.b32.xlu1 %v2507_v23, %s8505_s24  ;;  %2607 = vrot.lane.b32.xlu2 %v2507_v23, %s8501_s28 }
0x202e   :  { %6054 = vmatmul.msk.f32.vlgmr.msra.gmra.mxu3 %vm113_vm1, %v2507_v23 }
0x2035   :  { %2686 = vrot.lane.b32.xlu2 %v2507_v23, %s8506_s30 }
0x2087   :  { %v2608_v24 = vpop.permute.xlu2 %2607 }
0x2088   :  { %6057 = vmatmul.msk.f32.vlgmr.msra.gmra.mxu2 %vm113_vm1, %v2608_v24 }
0x208f   :  { %v2687_v1 = vpop.permute.xlu2 %2686 }
0x2090   :  { %6060 = vmatmul.msk.f32.vlgmr.msrb.gmra.mxu3 %vm113_vm1, %v2687_v1 }
0x209f   :  { %v2766_v25 = vpop.permute.xlu1 %2765 }
0x20a0   :  { %6063 = vmatmul.msk.f32.vlgmr.msrb.gmra.mxu2 %vm113_vm1, %v2766_v25 }
0x20b1   :  { %v2553_v7 = vpop.f32.mrf.mxu3 }
0x20b2   :  { %v2556_v26 = vsel %vm113_vm1, %v2553_v7, -inf }
0x20b3   :  { %2557 = vmax.xlane.f32.xlu0 %v2556_v26 }
0x210b   :  { %v2632_v4 = vpop.f32.mrf.mxu2 }
0x210c   :  { %v2635_v28 = vsel %vm113_vm1, %v2632_v4, -inf }
0x210d   :  { %2636 = vmax.xlane.f32.xlu2 %v2635_v28 }
0x2113   :  { %v2711_v30 = vpop.f32.mrf.mxu3 }
0x2114   :  { %v2714_v31 = vsel %vm113_vm1, %v2711_v30, -inf }
0x2115   :  { %2715 = vmax.xlane.f32.xlu0 %v2714_v31 }
0x2123   :  { %v2790_v34 = vpop.f32.mrf.mxu2 }
0x2124   :  { %v2793_v35 = vsel %vm113_vm1, %v2790_v34, -inf }
0x2125   :  { %2581 = vrot.lane.b32.xlu2 %v7349_v39, %s8500_s3  ;;  %2794 = vmax.xlane.f32.xlu0 %v2793_v35 }
0x2126   :  { %v2558_v36 = vpop.xlane.xlu0 %2557 }
0x2127   :  { %v2559_v38 = vsub.f32 %v2553_v7, %v2558_v36 }
0x2129   :  { %v2560_v27 = vmul.f32 1.442695, %v2559_v38 }
0x212b   :  { %6368 = vpow2.f32 %v2560_v27 }
0x212d   :  { %2818 = vrot.lane.b32.xlu2 %v7349_v39, %s8502_s4 }
0x2131   :  { %v6369_v40 = vpop.eup %6368 }
0x2132   :  { %v2562_v41 = vsel %vm113_vm1, %v6369_v40, 0.0 }
0x2133   :  { %2563 = vadd.xlane.f32.xlu1 %v2562_v41 }
0x214c   :  { %2739 = vrot.lane.b32.xlu1 %v7349_v39, %s8504_s1 }
0x2180   :  { %v2637_v42 = vpop.xlane.xlu2 %2636 }
0x2181   :  { %v2638_v45 = vsub.f32 %v2632_v4, %v2637_v42 }
0x2183   :  { %v2639_v46 = vmul.f32 1.442695, %v2638_v45 }
0x2185   :  { %6370 = vpow2.f32 %v2639_v46 }
0x2188   :  { %v2716_v44 = vpop.xlane.xlu0 %2715  ;;  %v2582_v33 = vpop.permute.xlu2 %2581 }
0x2189   :  { %v2717_v32 = vsub.f32 %v2711_v30, %v2716_v44  ;;  %2602 = vmatpush.msrb.mxu0 %v2582_v33  ;;  %v3014_v44 = vld [vmem:[%s8526_s19 + $0x18] sm:$0xff] }
0x218b   :  { %v7435_v47 = vpop.eup %6370  ;;  %v2718_v29 = vmul.f32 1.442695, %v2717_v32 }
0x218c   :  { %v2641_v49 = vsel %vm113_vm1, %v7435_v47, 0.0 }
0x218d   :  { %6372 = vpow2.f32 %v2718_v29  ;;  %2642 = vadd.xlane.f32.xlu0 %v2641_v49  ;;  %v3013_v49 = vld [vmem:[%s8526_s19 + $0x10] sm:$0xff] }
0x2190   :  { %v2819_v33 = vpop.permute.xlu2 %2818 }
0x2193   :  { %v6373_v50 = vpop.eup %6372 }
0x2194   :  { %v2720_v14 = vsel %vm113_vm1, %v6373_v50, 0.0 }
0x2195   :  { %2721 = vadd.xlane.f32.xlu0 %v2720_v14 }
0x2198   :  { %v2795_v51 = vpop.xlane.xlu0 %2794 }
0x2199   :  { %v2796_v18 = vsub.f32 %v2790_v34, %v2795_v51  ;;  %v3011_v51 = vld [vmem:[%s8526_s19] sm:$0xff] }
0x219b   :  { %v2797_v57 = vmul.f32 1.442695, %v2796_v18  ;;  %v7467_v18 = vld [vmem:[%s8527_s6 + $0x8] sm:$0xff] }
0x219d   :  { %6374 = vpow2.f32 %v2797_v57 }
0x21a3   :  { %v7440_v52 = vpop.eup %6374 }
0x21a4   :  { %v2799_v54 = vsel %vm113_vm1, %v7440_v52, 0.0 }
0x21a5   :  { %2800 = vadd.xlane.f32.xlu0 %v2799_v54 }
0x21a6   :  { %v2564_v55 = vpop.xlane.xlu1 %2563 }
0x21a7   :  { %6376 = vrcp.f32 %v2564_v55  ;;  %v2576_v61 = vand.u32 2147483648, %v2564_v55  ;;  %v2574_v60 = vand.u32 2147483647, %v2564_v55  ;;  %vm2570_vm9 = vweird.f32 %v2564_v55 }
0x21a9   :  { %v2577_v2 = vor.u32 1.1754944e-38, %v2576_v61  ;;  %vm2575_vm12 = vcmp.eq.f32.partialorder %v2574_v60, 8.507059e+37  ;;  %v6048_v61 = vld [vmem:[%s8528_s20 + $0x28] sm:$0xff] }
0x21ad   :  { %v6377_v56 = vpop.eup %6376 }
0x21ae   :  { %v2566_v58 = vmul.f32 %v6377_v56, %v2564_v55  ;;  %vm2571_vm8 = vweird.f32 %v6377_v56 }
0x21af   :  { %vm2572_vm11 = vmor %vm2570_vm9, %vm2571_vm8 }
0x21b0   :  { %v2567_v59 = vsub.f32 1.0, %v2566_v58  ;;  %v6050_v58 = vld [vmem:[%s8528_s20 + $0x38] sm:$0xff] }
0x21b1   :  { %2874 = vmatpush.msra.mxu3 %v6050_v58 }
0x21b2   :  { %v2568_v62 = vmul.f32 %v6377_v56, %v2567_v59  ;;  %v6049_v59 = vld [vmem:[%s8528_s20 + $0x30] sm:$0xff] }
0x21b3   :  { %2875 = vmatpush.msra.mxu3 %v6049_v59 }
0x21b4   :  { %v2569_v63 = vadd.f32 %v6377_v56, %v2568_v62  ;;  %v6047_v62 = vld [vmem:[%s8528_s20 + $0x20] sm:$0xff] }
0x21b5   :  { %2876 = vmatpush.msra.mxu3 %v6048_v61 }
0x21b6   :  { %v2573_v43 = vsel %vm2572_vm11, %v6377_v56, %v2569_v63 }
0x21b7   :  { %v2578_v3 = vsel %vm2575_vm12, %v2577_v2, %v2573_v43  ;;  %2877 = vmatpush.msra.mxu3 %v6047_v62 }
0x21b8   :  { %v2580_v5 = vmul.f32 %v6369_v40, %v2578_v3 }
0x21b9   :  { %2660 = vrot.lane.b32.xlu0 %v7349_v39, %s8503_s29 }
0x21ba   :  { %6055 = vmatmul.msk.f32.vlgmr.msrb.gmra.mxu0 %vm113_vm1, %v2580_v5 }
0x21be   :  { %v2740_v6 = vpop.permute.xlu1 %2739 }
0x21bf   :  { %2760 = vmatpush.msra.mxu0 %v2740_v6 }
0x2200   :  { %v2643_v8 = vpop.xlane.xlu0 %2642 }
0x2201   :  { %v2655_v30 = vand.u32 2147483648, %v2643_v8  ;;  %vm2649_vm6 = vweird.f32 %v2643_v8  ;;  %v2653_v34 = vand.u32 2147483647, %v2643_v8 }
0x2203   :  { %v2656_v38 = vor.u32 1.1754944e-38, %v2655_v30  ;;  %vm2654_vm8 = vcmp.eq.f32.partialorder %v2653_v34, 8.507059e+37 }
0x2208   :  { %v2722_v9 = vpop.xlane.xlu0 %2721 }
0x2209   :  { %6378 = vrcp.f32 %v2722_v9  ;;  %v2734_v16 = vand.u32 2147483648, %v2722_v9  ;;  %v2732_v19 = vand.u32 2147483647, %v2722_v9  ;;  %vm2728_vm14 = vweird.f32 %v2722_v9 }
0x220a   :  { %6380 = vrcp.f32 %v2643_v8 }
0x220b   :  { %v2735_v22 = vor.u32 1.1754944e-38, %v2734_v16  ;;  %vm2733_vm2 = vcmp.eq.f32.partialorder %v2732_v19, 8.507059e+37 }
0x220f   :  { %v6379_v37 = vpop.eup %6378 }
0x2210   :  { %v2724_v0 = vmul.f32 %v6379_v37, %v2722_v9  ;;  %v6381_v11 = vpop.eup %6380  ;;  %vm2729_vm13 = vweird.f32 %v6379_v37 }
0x2211   :  { %v2645_v17 = vmul.f32 %v6381_v11, %v2643_v8  ;;  %vm2730_vm15 = vmor %vm2728_vm14, %vm2729_vm13  ;;  %vm2650_vm3 = vweird.f32 %v6381_v11 }
0x2212   :  { %v2725_v12 = vsub.f32 1.0, %v2724_v0  ;;  %vm2651_vm7 = vmor %vm2649_vm6, %vm2650_vm3 }
0x2213   :  { %v2646_v24 = vsub.f32 1.0, %v2645_v17 }
0x2214   :  { %v2726_v15 = vmul.f32 %v6379_v37, %v2725_v12 }
0x2215   :  { %v2647_v7 = vmul.f32 %v6381_v11, %v2646_v24 }
0x2216   :  { %v2727_v20 = vadd.f32 %v6379_v37, %v2726_v15 }
0x2217   :  { %v2648_v28 = vadd.f32 %v6381_v11, %v2647_v7  ;;  %v6068_v7 = vld [vmem:[%s8521_s22 + $0x30] sm:$0xff] }
0x2218   :  { %v2731_v39 = vsel %vm2730_vm15, %v6379_v37, %v2727_v20  ;;  %v2801_v23 = vpop.xlane.xlu0 %2800 }
0x2219   :  { %6382 = vrcp.f32 %v2801_v23  ;;  %v2736_v1 = vsel %vm2733_vm2, %v2735_v22, %v2731_v39  ;;  %v2652_v35 = vsel %vm2651_vm7, %v6381_v11, %v2648_v28  ;;  %v2813_v41 = vand.u32 2147483648, %v2801_v23 }
0x221a   :  { %v2738_v25 = vmul.f32 %v6373_v50, %v2736_v1  ;;  %v2657_v27 = vsel %vm2654_vm8, %v2656_v38, %v2652_v35  ;;  %vm2807_vm11 = vweird.f32 %v2801_v23  ;;  %v2811_v42 = vand.u32 2147483647, %v2801_v23 }
0x221b   :  { %v2659_v46 = vmul.f32 %v7435_v47, %v2657_v27  ;;  %v2814_v29 = vor.u32 1.1754944e-38, %v2813_v41  ;;  %v3012_v47 = vld [vmem:[%s8526_s19 + $0x8] sm:$0xff]  ;;  %v6077_v41 = vld [vmem:[%s8522_s21 + $0x70] sm:$0xff] }
0x221c   :  { %6061 = vmatmul.msk.f32.vlgmr.msra.gmra.mxu0 %vm113_vm1, %v2738_v25  ;;  %vm2812_vm13 = vcmp.eq.f32.partialorder %v2811_v42, 8.507059e+37  ;;  %v6069_v25 = vld [vmem:[%s8521_s22 + $0x38] sm:$0xff] }
0x221d   :  { %2945 = vmatpush.msrb.mxu0 %v6069_v25 }
0x221f   :  { %v6383_v26 = vpop.eup %6382  ;;  %2946 = vmatpush.msrb.mxu0 %v6068_v7 }
0x2220   :  { %v2803_v4 = vmul.f32 %v6383_v26, %v2801_v23  ;;  %vm2808_vm9 = vweird.f32 %v6383_v26 }
0x2221   :  { %vm2809_vm12 = vmor %vm2807_vm11, %vm2808_vm9 }
0x2222   :  { %v2804_v31 = vsub.f32 1.0, %v2803_v4  ;;  %v6066_v4 = vld [vmem:[%s8521_s22 + $0x20] sm:$0xff] }
0x2224   :  { %v2805_v36 = vmul.f32 %v6383_v26, %v2804_v31 }
0x2226   :  { %v2806_v40 = vadd.f32 %v6383_v26, %v2805_v36 }
0x2228   :  { %v2810_v32 = vsel %vm2809_vm12, %v6383_v26, %v2806_v40  ;;  %v6067_v26 = vld [vmem:[%s8521_s22 + $0x28] sm:$0xff]  ;;  %v6078_v40 = vld [vmem:[%s8522_s21 + $0x78] sm:$0xff]  ;;  %s8541_s22 = sld [smem:[#allocation16_spill]] }
0x2229   :  { %v2815_v50 = vsel %vm2812_vm13, %v2814_v29, %v2810_v32  ;;  %2947 = vmatpush.msrb.mxu0 %v6067_v26  ;;  %2968 = vmatpush.msra.mxu2 %v6078_v40 }
0x222a   :  { %v2817_v14 = vmul.f32 %v7440_v52, %v2815_v50  ;;  %v6074_v50 = vld [vmem:[%s8522_s21 + $0x58] sm:$0xff] }
0x222b   :  { %v2661_v45 = vpop.permute.xlu0 %2660  ;;  %2948 = vmatpush.msrb.mxu0 %v6066_v4  ;;  %2969 = vmatpush.msra.mxu2 %v6077_v41 }
0x222c   :  { %2681 = vmatpush.msra.mxu1 %v2661_v45  ;;  %v6076_v45 = vld [vmem:[%s8522_s21 + $0x68] sm:$0xff] }
0x222d   :  { %6058 = vmatmul.msk.f32.vlgmr.msra.gmra.mxu1 %vm113_vm1, %v2659_v46  ;;  %2970 = vmatpush.msra.mxu2 %v6076_v45 }
0x222e   :  { %2839 = vmatpush.msrb.mxu1 %v2819_v33  ;;  %v6075_v33 = vld [vmem:[%s8522_s21 + $0x60] sm:$0xff] }
0x222f   :  { %2971 = vmatpush.msra.mxu2 %v6075_v33 }
0x2230   :  { %3034 = vmatpush.msra.mxu1 %v3014_v44 }
0x2231   :  { %2972 = vmatpush.msra.mxu2 %v6074_v50 }
0x2232   :  { %3035 = vmatpush.msra.mxu1 %v3013_v49 }
0x2234   :  { %3036 = vmatpush.msra.mxu1 %v3012_v47 }
0x2235   :  { %6064 = vmatmul.msk.f32.vlgmr.msrb.gmra.mxu1 %vm113_vm1, %v2817_v14  ;;  %v2905_v14 = vperm.slane %v7403_v10, 1 }
0x2236   :  { %3037 = vmatpush.msra.mxu1 %v3011_v51 }
0x2237   :  { %v2604_v57 = vpop.f32.mrf.mxu0 }
0x223d   :  { %6082 = vmatmul.msk.f32.vlgmr.msra.gmra.mxu1 %vm86_vm0, %v7467_v18 }
0x2299   :  { %v2762_v54 = vpop.f32.mrf.mxu0 }
0x229a   :  { %2849 = vrot.lane.b32.xlu2 %v2762_v54, %s8513_s26 }
0x22aa   :  { %v2683_v52 = vpop.f32.mrf.mxu1 }
0x22ab   :  { %2845 = vrot.lane.b32.xlu0 %v2683_v52, %s8511_s14 }
0x22b2   :  { %v2841_v55 = vpop.f32.mrf.mxu1 }
0x22b3   :  { %2853 = vrot.lane.b32.xlu0 %v2841_v55, %s8512_s15  ;;  %v2907_v55 = vperm.slane %v7408_v13, 1 }
0x22ba   :  { %v7474_v56 = vpop.f32.mrf.mxu1 }
0x22bb   :  { %3043 = vrot.lane.b32.xlu2 %v7474_v56, %s8500_s3 }
0x22f4   :  { %v2850_v60 = vpop.permute.xlu2 %2849 }
0x2315   :  { %v3044_v63 = vpop.permute.xlu2 %3043 }
0x2316   :  { %6083 = vmatpush.xpose.msk.msrb.mxu3 %vm113_vm1, %v3044_v63 }
0x231d   :  { %v2846_v2 = vpop.permute.xlu0 %2845 }
0x231e   :  { %v2856_v43 = vsel %vm113_vm1, %v2604_v57, %v2846_v2 }
0x231f   :  { %v2857_v5 = vsel %vm439_vm4, %v2856_v43, %v2850_v60 }
0x2325   :  { %v2854_v3 = vpop.permute.xlu0 %2853 }
0x2326   :  { %v2858_v6 = vsel %vm441_vm5, %v2857_v5, %v2854_v3 }
0x2327   :  { %6065 = vmatmul.msk.f32.vlgmr.msra.gmra.mxu3 %vm86_vm0, %v2858_v6 }
0x232f   :  { %6084 = vmatmul.msk.f32.vlgmr.msrb.gmra.mxu3 %vm113_vm1, %v7474_v56 }
0x23aa   :  { %v2879_v8 = vpop.f32.mrf.mxu3 }
0x23ab   :  { %v2882_v9 = vadd.f32 %v2879_v8, %v7412_v21  ;;  %v6073_v8 = vld [vmem:[%s8522_s21 + $0x50] sm:$0xff] }
0x23ac   :  { %2973 = vmatpush.msra.mxu2 %v6073_v8 }
0x23ad   :  { %v2883_v37 = vsel %vm86_vm0, %v2882_v9, 0.0 }
0x23ae   :  { %2884 = vadd.xlane.f32.xlu0 %v2883_v37  ;;  %v6071_v37 = vld [vmem:[%s8522_s21 + $0x40] sm:$0xff] }
0x23b2   :  { %v3066_v0 = vpop.f32.mrf.mxu3 }
0x23b3   :  { %v3069_v11 = vsel %vm113_vm1, %v3066_v0, -inf }
0x23b4   :  { %3070 = vmax.xlane.f32.xlu1 %v3069_v11 }
0x23c2   :  { %3120 = vrot.lane.b32.xlu0 %v7474_v56, %s8501_s28 }
0x23ca   :  { %3201 = vrot.lane.b32.xlu0 %v7474_v56, %s8504_s1 }
0x23cd   :  { %3122 = vrot.lane.b32.xlu1 %v7474_v56, %s8503_s29 }
0x23d5   :  { %3199 = vrot.lane.b32.xlu1 %v7474_v56, %s8506_s30 }
0x2421   :  { %v2885_v21 = vpop.xlane.xlu0 %2884 }
0x2422   :  { %v2886_v12 = vmul.f32 %v2885_v21, %v6764_v53 }
0x2424   :  { %v2887_v15 = vsub.f32 %v2882_v9, %v2886_v12  ;;  %v6072_v9 = vld [vmem:[%s8522_s21 + $0x48] sm:$0xff]  ;;  %s8548_s21 = sld [smem:[#allocation22_spill]] }
0x2425   :  { %2974 = vmatpush.msra.mxu2 %v6072_v9 }
0x2426   :  { %v2888_v16 = vmul.f32 %v2887_v15, %v2887_v15 }
0x2427   :  { %v3071_v17 = vpop.xlane.xlu1 %3070  ;;  %2975 = vmatpush.msra.mxu2 %v6071_v37 }
0x2428   :  { %v3072_v19 = vsub.f32 %v3066_v0, %v3071_v17  ;;  %v2889_v20 = vsel %vm86_vm0, %v2888_v16, 0.0  ;;  %v6260_v0 = vld [vmem:[%s8523_s27 + $0x1] ss:$0 sm:$0xff]  ;;  %s8532_s27 = sld [smem:[#allocation13_spill]] }
0x2429   :  { %2890 = vadd.xlane.f32.xlu2 %v2889_v20 }
0x242a   :  { %v3073_v39 = vmul.f32 1.442695, %v3072_v19 }
0x242c   :  { %6384 = vpow2.f32 %v3073_v39 }
0x2432   :  { %v7510_v22 = vpop.eup %6384 }
0x2433   :  { %v3075_v23 = vsel %vm113_vm1, %v7510_v22, 0.0 }
0x2434   :  { %3076 = vadd.xlane.f32.xlu0 %v3075_v23  ;;  %v3121_v1 = vpop.permute.xlu0 %3120 }
0x243c   :  { %v3202_v31 = vpop.permute.xlu0 %3201 }
0x243f   :  { %v3123_v24 = vpop.permute.xlu1 %3122 }
0x2440   :  { %6086 = vmatpush.xpose.msk.msrb.mxu1 %vm113_vm1, %v3123_v24 }
0x2441   :  { %3094 = vrot.lane.b32.xlu2 %v7474_v56, %s8514_s17 }
0x2443   :  { %6087 = vmatmul.msk.f32.vlgmr.msrb.gmra.mxu1 %vm113_vm1, %v3121_v1 }
0x2447   :  { %v3200_v6 = vpop.permute.xlu1 %3199 }
0x2448   :  { %3278 = vrot.lane.b32.xlu0 %v7474_v56, %s8505_s24 }
0x2449   :  { %3280 = vrot.lane.b32.xlu2 %v7474_v56, %s8502_s4 }
0x249c   :  { %v2891_v28 = vpop.xlane.xlu2 %2890 }
0x249d   :  { %v2892_v30 = vmul.f32 %v2891_v28, %v6764_v53 }
0x249f   :  { %v2893_v34 = vadd.f32 1e-05, %v2892_v30 }
0x24a1   :  { %6386 = vrsqrt.f32 %v2893_v34  ;;  %vm2900_vm15 = vweird.f32 %v2893_v34 }
0x24a4   :  { %v3095_v35 = vpop.permute.xlu2 %3094 }
0x24a5   :  { %3115 = vmatpush.msra.mxu0 %v3095_v35 }
0x24a7   :  { %v6387_v36 = vpop.eup %6386  ;;  %v3077_v38 = vpop.xlane.xlu0 %3076 }
0x24a8   :  { %v2895_v27 = vmul.f32 %v6387_v36, %v2893_v34  ;;  %6388 = vrcp.f32 %v3077_v38  ;;  %vm2901_vm14 = vweird.f32 %v6387_v36  ;;  %v3089_v61 = vand.u32 2147483648, %v3077_v38 }
0x24a9   :  { %vm2902_vm2 = vmor %vm2900_vm15, %vm2901_vm14  ;;  %vm3083_vm6 = vweird.f32 %v3077_v38  ;;  %v3087_v62 = vand.u32 2147483647, %v3077_v38 }
0x24aa   :  { %v2896_v42 = vmul.f32 %v6387_v36, %v2895_v27  ;;  %v3090_v10 = vor.u32 1.1754944e-38, %v3089_v61 }
0x24ab   :  { %vm3088_vm8 = vcmp.eq.f32.partialorder %v3087_v62, 8.507059e+37 }
0x24ac   :  { %v2897_v46 = vmul.f32 0.5, %v2896_v42  ;;  %v3281_v44 = vpop.permute.xlu2 %3280 }
0x24ad   :  { %6092 = vmatpush.xpose.msk.msra.mxu1 %vm113_vm1, %v3281_v44 }
0x24ae   :  { %v6389_v32 = vpop.eup %6388  ;;  %v2898_v29 = vsub.f32 1.5, %v2897_v46 }
0x24af   :  { %v3079_v49 = vmul.f32 %v6389_v32, %v3077_v38  ;;  %vm3084_vm3 = vweird.f32 %v6389_v32 }
0x24b0   :  { %v2899_v47 = vmul.f32 %v6387_v36, %v2898_v29  ;;  %vm3085_vm7 = vmor %vm3083_vm6, %vm3084_vm3 }
0x24b1   :  { %v3080_v51 = vsub.f32 1.0, %v3079_v49 }
0x24b2   :  { %v2903_v57 = vsel %vm2902_vm2, %v6387_v36, %v2899_v47 }
0x24b3   :  { %v2904_v54 = vmul.f32 %v2903_v57, %v2887_v15  ;;  %v3081_v52 = vmul.f32 %v6389_v32, %v3080_v51 }
0x24b5   :  { %v2906_v58 = vmul.f32 %v2905_v14, %v2904_v54  ;;  %v3082_v59 = vadd.f32 %v6389_v32, %v3081_v52 }
0x24b7   :  { %v7553_v60 = vadd.f32 %v2907_v55, %v2906_v58  ;;  %v3086_v63 = vsel %vm3085_vm7, %v6389_v32, %v3082_v59 }
0x24b8   :  { %v3091_v13 = vsel %vm3088_vm8, %v3090_v10, %v3086_v63 }
0x24b9   :  { %6080 = vmatmul.msk.f32.vlgmr.msrb.gmra.mxu0 %vm86_vm0, %v7553_v60  ;;  %v3093_v43 = vmul.f32 %v7510_v22, %v3091_v13 }
0x24ba   :  { %6089 = vmatpush.xpose.msk.msrb.mxu0 %vm113_vm1, %v3202_v31  ;;  %v3279_v2 = vpop.permute.xlu0 %3278 }
0x24bb   :  { %6093 = vmatmul.msk.f32.vlgmr.msra.gmra.mxu1 %vm113_vm1, %v3279_v2 }
0x24c0   :  { %v3145_v3 = vpop.f32.mrf.mxu1 }
0x24c1   :  { %6085 = vmatmul.msk.f32.vlgmr.msra.gmra.mxu0 %vm113_vm1, %v3093_v43  ;;  %v3148_v5 = vsel %vm113_vm1, %v3145_v3, -inf }
0x24c2   :  { %3149 = vmax.xlane.f32.xlu2 %v3148_v5 }
0x24c9   :  { %6090 = vmatmul.msk.f32.vlgmr.msrb.gmra.mxu0 %vm113_vm1, %v3200_v6 }
0x2535   :  { %v3150_v11 = vpop.xlane.xlu2 %3149 }
0x2536   :  { %v3151_v21 = vsub.f32 %v3145_v3, %v3150_v11  ;;  %v2950_v12 = vpop.f32.mrf.mxu0 }
0x2537   :  { %v2951_v15 = vadd.f32 %v6260_v0, %v2950_v12 }
0x2538   :  { %v3152_v16 = vmul.f32 1.442695, %v3151_v21  ;;  %v3303_v17 = vpop.f32.mrf.mxu1 }
0x2539   :  { %v2953_v19 = vmax.f32 %v2951_v15, 0.0  ;;  %v3306_v20 = vsel %vm113_vm1, %v3303_v17, -inf }
0x253a   :  { %6390 = vpow2.f32 %v3152_v16  ;;  %3307 = vmax.xlane.f32.xlu0 %v3306_v20  ;;  %v3017_v20 = vld [vmem:[%s8529_s2 + $0x10] sm:$0xff] }
0x253b   :  { %6081 = vmatmul.msk.f32.vlgmr.msra.gmra.mxu2 %vm544_vm10, %v2953_v19  ;;  %v3018_v19 = vld [vmem:[%s8529_s2 + $0x18] sm:$0xff] }
0x253c   :  { %3387 = vmatpush.msra.mxu0 %v3018_v19 }
0x253e   :  { %v7577_v39 = vpop.f32.mrf.mxu0  ;;  %3388 = vmatpush.msra.mxu0 %v3017_v20  ;;  %v6103_v20 = vld [vmem:[%s8526_s19 + $0x38] sm:$0xff] }
0x2540   :  { %v6391_v22 = vpop.eup %6390 }
0x2541   :  { %v3154_v23 = vsel %vm113_vm1, %v6391_v22, 0.0 }
0x2542   :  { %3155 = vadd.xlane.f32.xlu2 %v3154_v23  ;;  %v3015_v23 = vld [vmem:[%s8529_s2] sm:$0xff] }
0x2546   :  { %v3224_v24 = vpop.f32.mrf.mxu0 }
0x2547   :  { %v3227_v1 = vsel %vm113_vm1, %v3224_v24, -inf }
0x2548   :  { %3228 = vmax.xlane.f32.xlu1 %v3227_v1 }
0x255a   :  { %3173 = vrot.lane.b32.xlu2 %v7474_v56, %s8507_s5 }
0x25ad   :  { %v3308_v25 = vpop.xlane.xlu0 %3307 }
0x25ae   :  { %v3309_v7 = vsub.f32 %v3303_v17, %v3308_v25 }
0x25b0   :  { %v3310_v26 = vmul.f32 1.442695, %v3309_v7 }
0x25b2   :  { %6392 = vpow2.f32 %v3310_v26 }
0x25b5   :  { %v3156_v4 = vpop.xlane.xlu2 %3155 }
0x25b6   :  { %6394 = vrcp.f32 %v3156_v4  ;;  %v3168_v41 = vand.u32 2147483648, %v3156_v4  ;;  %v3166_v45 = vand.u32 2147483647, %v3156_v4  ;;  %vm3162_vm11 = vweird.f32 %v3156_v4 }
0x25b8   :  { %v6393_v28 = vpop.eup %6392  ;;  %v3169_v44 = vor.u32 1.1754944e-38, %v3168_v41  ;;  %vm3167_vm13 = vcmp.eq.f32.partialorder %v3166_v45, 8.507059e+37  ;;  %v3422_v41 = vld [vmem:[%s8530_s18] sm:$0xff]  ;;  %v3433_v45 = vld [vmem:[%s8531_s9 + $0x30] sm:$0xff] }
0x25b9   :  { %v3312_v30 = vsel %vm113_vm1, %v6393_v28, 0.0 }
0x25ba   :  { %3313 = vadd.xlane.f32.xlu0 %v3312_v30 }
0x25bb   :  { %v3229_v31 = vpop.xlane.xlu1 %3228 }
0x25bc   :  { %v6395_v34 = vpop.eup %6394  ;;  %v3230_v35 = vsub.f32 %v3224_v24, %v3229_v31 }
0x25bd   :  { %v3158_v36 = vmul.f32 %v6395_v34, %v3156_v4  ;;  %v3174_v38 = vpop.permute.xlu2 %3173  ;;  %vm3163_vm9 = vweird.f32 %v6395_v34 }
0x25be   :  { %v3231_v27 = vmul.f32 1.442695, %v3230_v35  ;;  %3194 = vmatpush.msra.mxu3 %v3174_v38  ;;  %vm3164_vm12 = vmor %vm3162_vm11, %vm3163_vm9  ;;  %v7594_v16 = vpop.f32.mrf.mxu2 }
0x25bf   :  { %v3159_v40 = vsub.f32 1.0, %v3158_v36 }
0x25c0   :  { %6396 = vpow2.f32 %v3231_v27  ;;  %v3425_v27 = vld [vmem:[%s8530_s18 + $0x18] sm:$0xff] }
0x25c1   :  { %v3160_v42 = vmul.f32 %v6395_v34, %v3159_v40  ;;  %v3423_v40 = vld [vmem:[%s8530_s18 + $0x8] sm:$0xff] }
0x25c3   :  { %v3161_v46 = vadd.f32 %v6395_v34, %v3160_v42  ;;  %v3434_v42 = vld [vmem:[%s8531_s9 + $0x38] sm:$0xff] }
0x25c4   :  { %3477 = vmatpush.msrb.mxu1 %v3434_v42 }
0x25c5   :  { %v3165_v33 = vsel %vm3164_vm12, %v6395_v34, %v3161_v46  ;;  %v3432_v46 = vld [vmem:[%s8531_s9 + $0x28] sm:$0xff] }
0x25c6   :  { %v6397_v32 = vpop.eup %6396  ;;  %v3170_v29 = vsel %vm3167_vm13, %v3169_v44, %v3165_v33  ;;  %3478 = vmatpush.msrb.mxu1 %v3433_v45 }
0x25c7   :  { %v3233_v49 = vsel %vm113_vm1, %v6397_v32, 0.0  ;;  %v3172_v50 = vmul.f32 %v6391_v22, %v3170_v29  ;;  %v3016_v22 = vld [vmem:[%s8529_s2 + $0x8] sm:$0xff] }
0x25c8   :  { %3234 = vadd.xlane.f32.xlu1 %v3233_v49  ;;  %3389 = vmatpush.msra.mxu0 %v3016_v22  ;;  %v3430_v49 = vld [vmem:[%s8531_s9 + $0x18] sm:$0xff]  ;;  %v6102_v22 = vld [vmem:[%s8526_s19 + $0x30] sm:$0xff] }
0x25c9   :  { %6088 = vmatmul.msk.f32.vlgmr.msra.gmra.mxu3 %vm113_vm1, %v3172_v50  ;;  %3479 = vmatpush.msrb.mxu1 %v3432_v46 }
0x25ca   :  { %3390 = vmatpush.msra.mxu0 %v3015_v23  ;;  %v6101_v23 = vld [vmem:[%s8526_s19 + $0x28] sm:$0xff] }
0x25ce   :  { %3331 = vrot.lane.b32.xlu0 %v7474_v56, %s8508_s25 }
0x25e1   :  { %3252 = vrot.lane.b32.xlu1 %v7474_v56, %s8509_s0 }
0x262d   :  { %v3314_v47 = vpop.xlane.xlu0 %3313 }
0x262e   :  { %6398 = vrcp.f32 %v3314_v47  ;;  %v3326_v54 = vand.u32 2147483648, %v3314_v47  ;;  %v3324_v55 = vand.u32 2147483647, %v3314_v47  ;;  %vm3320_vm15 = vweird.f32 %v3314_v47 }
0x2630   :  { %v3327_v61 = vor.u32 1.1754944e-38, %v3326_v54  ;;  %vm3325_vm3 = vcmp.eq.f32.partialorder %v3324_v55, 8.507059e+37  ;;  %v3010_v55 = vld [vmem:[%s8533_s16] sm:$0x3] }
0x2634   :  { %v6399_v14 = vpop.eup %6398 }
0x2635   :  { %v3316_v51 = vmul.f32 %v6399_v14, %v3314_v47  ;;  %vm3321_vm14 = vweird.f32 %v6399_v14 }
0x2636   :  { %vm3322_vm2 = vmor %vm3320_vm15, %vm3321_vm14 }
0x2637   :  { %v3317_v57 = vsub.f32 1.0, %v3316_v51 }
0x2639   :  { %v3318_v52 = vmul.f32 %v6399_v14, %v3317_v57  ;;  %v7649_v57 = vld [vmem:[%s8532_s27] sm:$0x3] }
0x263b   :  { %v3319_v58 = vadd.f32 %v6399_v14, %v3318_v52  ;;  %v3235_v59 = vpop.xlane.xlu1 %3234 }
0x263c   :  { %6400 = vrcp.f32 %v3235_v59  ;;  %v3247_v6 = vand.u32 2147483648, %v3235_v59  ;;  %vm3241_vm7 = vweird.f32 %v3235_v59  ;;  %v3245_v8 = vand.u32 2147483647, %v3235_v59 }
0x263d   :  { %v3323_v62 = vsel %vm3322_vm2, %v6399_v14, %v3319_v58  ;;  %v3418_v58 = vperm.slane %v7649_v57, 0 }
0x263e   :  { %v3328_v63 = vsel %vm3325_vm3, %v3327_v61, %v3323_v62  ;;  %v3248_v0 = vor.u32 1.1754944e-38, %v3247_v6  ;;  %vm3246_vm9 = vcmp.eq.f32.partialorder %v3245_v8, 8.507059e+37  ;;  %v3420_v62 = vperm.slane %v3010_v55, 0  ;;  %v6263_v8 = vld [vmem:[%s8535_s11] ss:$0 sm:$0xff]  ;;  %s8539_s11 = sld [smem:[#allocation15_spill]] }
0x263f   :  { %v3330_v10 = vmul.f32 %v6393_v28, %v3328_v63 }
0x2640   :  { %v3332_v56 = vpop.permute.xlu0 %3331 }
0x2641   :  { %3352 = vmatpush.msrb.mxu3 %v3332_v56  ;;  %v3429_v56 = vld [vmem:[%s8531_s9 + $0x10] sm:$0xff] }
0x2642   :  { %v6401_v2 = vpop.eup %6400  ;;  %6094 = vmatmul.msk.f32.vlgmr.msrb.gmra.mxu3 %vm113_vm1, %v3330_v10 }
0x2643   :  { %v3237_v13 = vmul.f32 %v6401_v2, %v3235_v59  ;;  %vm3242_vm6 = vweird.f32 %v6401_v2  ;;  %3541 = vmatpush.msra.mxu3 %v6103_v20 }
0x2644   :  { %vm3243_vm8 = vmor %vm3241_vm7, %vm3242_vm6 }
0x2645   :  { %v3238_v43 = vsub.f32 1.0, %v3237_v13  ;;  %v3427_v13 = vld [vmem:[%s8531_s9] sm:$0xff]  ;;  %3542 = vmatpush.msra.mxu3 %v6102_v22 }
0x2647   :  { %v3239_v3 = vmul.f32 %v6401_v2, %v3238_v43  ;;  %v6262_v43 = vld [vmem:[%s8534_s12] ss:$0 sm:$0xff]  ;;  %3543 = vmatpush.msra.mxu3 %v6101_v23 }
0x2649   :  { %v3240_v5 = vadd.f32 %v6401_v2, %v3239_v3 }
0x264b   :  { %v3244_v37 = vsel %vm3243_vm8, %v6401_v2, %v3240_v5  ;;  %v3428_v2 = vld [vmem:[%s8531_s9 + $0x8] sm:$0xff] }
0x264c   :  { %v3196_v9 = vpop.f32.mrf.mxu3  ;;  %v3249_v11 = vsel %vm3246_vm9, %v3248_v0, %v3244_v37 }
0x264d   :  { %3358 = vrot.lane.b32.xlu2 %v3196_v9, %s8511_s14  ;;  %v3251_v12 = vmul.f32 %v6397_v32, %v3249_v11  ;;  %v3431_v32 = vld [vmem:[%s8531_s9 + $0x20] sm:$0xff] }
0x264e   :  { %3480 = vmatpush.msrb.mxu1 %v3431_v32 }
0x2650   :  { %3481 = vmatpush.msrb.mxu1 %v3430_v49 }
0x2652   :  { %3482 = vmatpush.msrb.mxu1 %v3429_v56 }
0x2653   :  { %v3253_v21 = vpop.permute.xlu1 %3252 }
0x2654   :  { %3273 = vmatpush.msrb.mxu2 %v3253_v21  ;;  %3483 = vmatpush.msrb.mxu1 %v3428_v2 }
0x2655   :  { %6091 = vmatmul.msk.f32.vlgmr.msrb.gmra.mxu2 %vm113_vm1, %v3251_v12 }
0x2656   :  { %3454 = vmatpush.msra.mxu2 %v3425_v27  ;;  %3484 = vmatpush.msrb.mxu1 %v3427_v13 }
0x26a7   :  { %v3359_v24 = vpop.permute.xlu2 %3358 }
0x26a8   :  { %v3369_v1 = vsel %vm113_vm1, %v7577_v39, %v3359_v24  ;;  %v6100_v24 = vld [vmem:[%s8526_s19 + $0x20] sm:$0xff]  ;;  %s8545_s19 = sld [smem:[#allocation19_spill]] }
0x26a9   :  { %3544 = vmatpush.msra.mxu3 %v6100_v24 }
0x26c5   :  { %v3354_v15 = vpop.f32.mrf.mxu3 }
0x26c6   :  { %3366 = vrot.lane.b32.xlu0 %v3354_v15, %s8512_s15 }
0x26d8   :  { %v3275_v17 = vpop.f32.mrf.mxu2 }
0x26d9   :  { %3362 = vrot.lane.b32.xlu1 %v3275_v17, %s8513_s26 }
0x2738   :  { %v3367_v7 = vpop.permute.xlu0 %3366 }
0x274b   :  { %v3363_v25 = vpop.permute.xlu1 %3362 }
0x274c   :  { %v3370_v26 = vsel %vm439_vm4, %v3369_v1, %v3363_v25 }
0x274d   :  { %v3371_v4 = vsel %vm441_vm5, %v3370_v26, %v3367_v7 }
0x274e   :  { %6095 = vmatmul.msk.f32.vlgmr.msra.gmra.mxu0 %vm86_vm0, %v3371_v4 }
0x27cb   :  { %v3392_v28 = vpop.f32.mrf.mxu0 }
0x27cc   :  { %v3395_v30 = vadd.f32 %v3392_v28, %v7467_v18  ;;  %v3424_v18 = vld [vmem:[%s8530_s18 + $0x10] sm:$0xff] }
0x27cd   :  { %3455 = vmatpush.msra.mxu2 %v3424_v18 }
0x27ce   :  { %v3396_v31 = vsel %vm86_vm0, %v3395_v30, 0.0 }
0x27cf   :  { %3397 = vadd.xlane.f32.xlu2 %v3396_v31  ;;  %3456 = vmatpush.msra.mxu2 %v3423_v40 }
0x27d1   :  { %3457 = vmatpush.msra.mxu2 %v3422_v41 }
0x2842   :  { %v3398_v34 = vpop.xlane.xlu2 %3397 }
0x2843   :  { %v3399_v35 = vmul.f32 %v3398_v34, %v6764_v53 }
0x2845   :  { %v3400_v36 = vsub.f32 %v3395_v30, %v3399_v35  ;;  %v3512_v35 = vperm.slane %v7649_v57, 1 }
0x2847   :  { %v3401_v38 = vmul.f32 %v3400_v36, %v3400_v36 }
0x2849   :  { %v3402_v39 = vsel %vm86_vm0, %v3401_v38, 0.0 }
0x284a   :  { %3403 = vadd.xlane.f32.xlu1 %v3402_v39  ;;  %v3514_v39 = vperm.slane %v3010_v55, 1 }
0x28bd   :  { %v3404_v44 = vpop.xlane.xlu1 %3403 }
0x28be   :  { %v3405_v33 = vmul.f32 %v3404_v44, %v6764_v53 }
0x28c0   :  { %v3406_v29 = vadd.f32 1e-05, %v3405_v33 }
0x28c2   :  { %6402 = vrsqrt.f32 %v3406_v29  ;;  %vm3413_vm12 = vweird.f32 %v3406_v29 }
0x28c8   :  { %v6403_v50 = vpop.eup %6402 }
0x28c9   :  { %v3408_v47 = vmul.f32 %v6403_v50, %v3406_v29  ;;  %vm3414_vm11 = vweird.f32 %v6403_v50 }
0x28ca   :  { %vm3415_vm13 = vmor %vm3413_vm12, %vm3414_vm11 }
0x28cb   :  { %v3409_v14 = vmul.f32 %v6403_v50, %v3408_v47 }
0x28cd   :  { %v3410_v51 = vmul.f32 0.5, %v3409_v14 }
0x28cf   :  { %v3411_v54 = vsub.f32 1.5, %v3410_v51 }
0x28d1   :  { %v3412_v52 = vmul.f32 %v6403_v50, %v3411_v54 }
0x28d3   :  { %v3416_v59 = vsel %vm3415_vm13, %v6403_v50, %v3412_v52 }
0x28d4   :  { %v3417_v61 = vmul.f32 %v3416_v59, %v3400_v36 }
0x28d6   :  { %v3419_v63 = vmul.f32 %v3418_v58, %v3417_v61 }
0x28d8   :  { %v3421_v10 = vadd.f32 %v3420_v62, %v3419_v63 }
0x28da   :  { %6096 = vmatmul.msk.f32.vlgmr.msra.gmra.mxu2 %vm86_vm0, %v3421_v10 }
0x295d   :  { %v3459_v3 = vpop.f32.mrf.mxu2 }
0x295e   :  { %v3460_v5 = vadd.f32 %v6262_v43, %v3459_v3 }
0x2960   :  { %v3462_v6 = vmax.f32 %v3460_v5, 0.0 }
0x2962   :  { %6097 = vmatmul.msk.f32.vlgmr.msrb.gmra.mxu1 %vm544_vm10, %v3462_v6 }
0x29df   :  { %v3486_v9 = vpop.f32.mrf.mxu1 }
0x29e0   :  { %v3487_v37 = vadd.f32 %v6263_v8, %v3486_v9 }
0x29e2   :  { %v3489_v0 = vadd.f32 %v3487_v37, %v3421_v10 }
0x29e4   :  { %v3490_v11 = vsel %vm86_vm0, %v3489_v0, 0.0 }
0x29e5   :  { %3491 = vadd.xlane.f32.xlu0 %v3490_v11 }
0x2a58   :  { %v3492_v21 = vpop.xlane.xlu0 %3491 }
0x2a59   :  { %v3493_v12 = vmul.f32 %v3492_v21, %v6764_v53 }
0x2a5b   :  { %v3494_v15 = vsub.f32 %v3489_v0, %v3493_v12 }
0x2a5d   :  { %v3495_v17 = vmul.f32 %v3494_v15, %v3494_v15 }
0x2a5f   :  { %v3496_v19 = vsel %vm86_vm0, %v3495_v17, 0.0 }
0x2a60   :  { %3497 = vadd.xlane.f32.xlu2 %v3496_v19 }
0x2ad3   :  { %v3498_v1 = vpop.xlane.xlu2 %3497 }
0x2ad4   :  { %v3499_v25 = vmul.f32 %v3498_v1, %v6764_v53 }
0x2ad6   :  { %v3500_v7 = vadd.f32 1e-05, %v3499_v25 }
0x2ad8   :  { %6404 = vrsqrt.f32 %v3500_v7  ;;  %vm3507_vm15 = vweird.f32 %v3500_v7 }
0x2ade   :  { %v6405_v26 = vpop.eup %6404 }
0x2adf   :  { %v3502_v4 = vmul.f32 %v6405_v26, %v3500_v7  ;;  %vm3508_vm14 = vweird.f32 %v6405_v26 }
0x2ae0   :  { %vm3509_vm2 = vmor %vm3507_vm15, %vm3508_vm14 }
0x2ae1   :  { %v3503_v28 = vmul.f32 %v6405_v26, %v3502_v4 }
0x2ae3   :  { %v3504_v30 = vmul.f32 0.5, %v3503_v28 }
0x2ae5   :  { %v3505_v31 = vsub.f32 1.5, %v3504_v30 }
0x2ae7   :  { %v3506_v34 = vmul.f32 %v6405_v26, %v3505_v31 }
0x2ae9   :  { %v3510_v36 = vsel %vm3509_vm2, %v6405_v26, %v3506_v34 }
0x2aea   :  { %v3511_v38 = vmul.f32 %v3510_v36, %v3494_v15 }
0x2aec   :  { %v3513_v27 = vmul.f32 %v3512_v35, %v3511_v38 }
0x2aee   :  { %v7689_v18 = vadd.f32 %v3514_v39, %v3513_v27 }
0x2af0   :  { %6108 = vmatmul.msk.f32.vlgmr.msra.gmra.mxu3 %vm86_vm0, %v7689_v18 }
0x2b73   :  { %v7693_v40 = vpop.f32.mrf.mxu3 }
0x2b74   :  { %3601 = vrot.lane.b32.xlu2 %v7693_v40, %s8514_s17  ;;  %3550 = vrot.lane.b32.xlu1 %v7693_v40, %s8500_s3 }
0x2b7c   :  { %3627 = vrot.lane.b32.xlu1 %v7693_v40, %s8501_s28 }
0x2b84   :  { %3787 = vrot.lane.b32.xlu1 %v7693_v40, %s8502_s4 }
0x2bce   :  { %v3602_v41 = vpop.permute.xlu2 %3601 }
0x2bcf   :  { %3622 = vmatpush.msrb.mxu2 %v3602_v41 }
0x2be6   :  { %v3551_v42 = vpop.permute.xlu1 %3550 }
0x2be7   :  { %6109 = vmatpush.xpose.msk.msrb.mxu0 %vm113_vm1, %v3551_v42 }
0x2bea   :  { %6110 = vmatmul.msk.f32.vlgmr.msrb.gmra.mxu0 %vm113_vm1, %v7693_v40 }
0x2bee   :  { %v3628_v29 = vpop.permute.xlu1 %3627 }
0x2bf6   :  { %v3788_v14 = vpop.permute.xlu1 %3787 }
0x2c67   :  { %v3573_v45 = vpop.f32.mrf.mxu0 }
0x2c68   :  { %v3576_v46 = vsel %vm113_vm1, %v3573_v45, -inf }
0x2c69   :  { %3577 = vmax.xlane.f32.xlu0 %v3576_v46 }
0x2c7d   :  { %3629 = vrot.lane.b32.xlu0 %v7693_v40, %s8503_s29 }
0x2c85   :  { %3708 = vrot.lane.b32.xlu0 %v7693_v40, %s8504_s1 }
0x2c8d   :  { %3785 = vrot.lane.b32.xlu0 %v7693_v40, %s8505_s24 }
0x2cdc   :  { %v3578_v44 = vpop.xlane.xlu0 %3577 }
0x2cdd   :  { %v3579_v33 = vsub.f32 %v3573_v45, %v3578_v44 }
0x2cdf   :  { %v3580_v32 = vmul.f32 1.442695, %v3579_v33 }
0x2ce1   :  { %6406 = vpow2.f32 %v3580_v32 }
0x2ce7   :  { %v6407_v49 = vpop.eup %6406 }
0x2ce8   :  { %v3582_v50 = vsel %vm113_vm1, %v6407_v49, 0.0 }
0x2ce9   :  { %3583 = vadd.xlane.f32.xlu2 %v3582_v50 }
0x2cef   :  { %v3630_v47 = vpop.permute.xlu0 %3629 }
0x2cf0   :  { %6112 = vmatpush.xpose.msk.msrb.mxu3 %vm113_vm1, %v3630_v47 }
0x2cf3   :  { %6113 = vmatmul.msk.f32.vlgmr.msrb.gmra.mxu3 %vm113_vm1, %v3628_v29 }
0x2cf4   :  { %6118 = vmatpush.xpose.msk.msra.mxu3 %vm113_vm1, %v3788_v14 }
0x2cf7   :  { %v3709_v51 = vpop.permute.xlu0 %3708 }
0x2cf8   :  { %6115 = vmatpush.xpose.msk.msra.mxu2 %vm113_vm1, %v3709_v51 }
0x2cff   :  { %v3786_v57 = vpop.permute.xlu0 %3785 }
0x2d00   :  { %6119 = vmatmul.msk.f32.vlgmr.msra.gmra.mxu3 %vm113_vm1, %v3786_v57 }
0x2d01   :  { %3706 = vrot.lane.b32.xlu2 %v7693_v40, %s8506_s30 }
0x2d5c   :  { %v3584_v54 = vpop.xlane.xlu2 %3583 }
0x2d5d   :  { %6408 = vrcp.f32 %v3584_v54  ;;  %v3596_v59 = vand.u32 2147483648, %v3584_v54  ;;  %v3594_v62 = vand.u32 2147483647, %v3584_v54  ;;  %vm3590_vm6 = vweird.f32 %v3584_v54 }
0x2d5f   :  { %v3597_v10 = vor.u32 1.1754944e-38, %v3596_v59  ;;  %vm3595_vm8 = vcmp.eq.f32.partialorder %v3594_v62, 8.507059e+37  ;;  %v4028_v59 = vld [vmem:[%s8395_s10 + $0x10] sm:$0xff]  ;;  %v4026_v62 = vld [vmem:[%s8395_s10] sm:$0xff] }
0x2d63   :  { %v6409_v52 = vpop.eup %6408 }
0x2d64   :  { %v3586_v55 = vmul.f32 %v6409_v52, %v3584_v54  ;;  %vm3591_vm3 = vweird.f32 %v6409_v52  ;;  %v3707_v3 = vpop.permute.xlu2 %3706 }
0x2d65   :  { %vm3592_vm7 = vmor %vm3590_vm6, %vm3591_vm3 }
0x2d66   :  { %v3587_v58 = vsub.f32 1.0, %v3586_v55 }
0x2d68   :  { %v3588_v61 = vmul.f32 %v6409_v52, %v3587_v58  ;;  %v4029_v58 = vld [vmem:[%s8395_s10 + $0x18] sm:$0xff] }
0x2d6a   :  { %v3589_v63 = vadd.f32 %v6409_v52, %v3588_v61  ;;  %v4027_v61 = vld [vmem:[%s8395_s10 + $0x8] sm:$0xff] }
0x2d6c   :  { %v3593_v56 = vsel %vm3592_vm7, %v6409_v52, %v3589_v63 }
0x2d6d   :  { %v3598_v2 = vsel %vm3595_vm8, %v3597_v10, %v3593_v56 }
0x2d6e   :  { %v3600_v13 = vmul.f32 %v6407_v49, %v3598_v2 }
0x2d70   :  { %6111 = vmatmul.msk.f32.vlgmr.msrb.gmra.mxu2 %vm113_vm1, %v3600_v13 }
0x2d76   :  { %v3652_v43 = vpop.f32.mrf.mxu3 }
0x2d77   :  { %v3655_v5 = vsel %vm113_vm1, %v3652_v43, -inf }
0x2d78   :  { %6116 = vmatmul.msk.f32.vlgmr.msra.gmra.mxu2 %vm113_vm1, %v3707_v3  ;;  %3656 = vmax.xlane.f32.xlu1 %v3655_v5 }
0x2d83   :  { %v3810_v6 = vpop.f32.mrf.mxu3 }
0x2d84   :  { %v3813_v8 = vsel %vm113_vm1, %v3810_v6, -inf }
0x2d85   :  { %3814 = vmax.xlane.f32.xlu0 %v3813_v8 }
0x2deb   :  { %v3657_v9 = vpop.xlane.xlu1 %3656 }
0x2dec   :  { %v3658_v37 = vsub.f32 %v3652_v43, %v3657_v9 }
0x2dee   :  { %v3659_v0 = vmul.f32 1.442695, %v3658_v37 }
0x2df0   :  { %6410 = vpow2.f32 %v3659_v0 }
0x2df3   :  { %v7725_v11 = vpop.f32.mrf.mxu2 }
0x2df6   :  { %v6411_v21 = vpop.eup %6410 }
0x2df7   :  { %v3661_v12 = vsel %vm113_vm1, %v6411_v21, 0.0 }
0x2df8   :  { %v3815_v15 = vpop.xlane.xlu0 %3814  ;;  %3662 = vadd.xlane.f32.xlu1 %v3661_v12 }
0x2df9   :  { %v3816_v17 = vsub.f32 %v3810_v6, %v3815_v15  ;;  %v6107_v15 = vld [vmem:[%s8529_s2 + $0x38] sm:$0xff] }
0x2dfa   :  { %3894 = vmatpush.msrb.mxu2 %v6107_v15 }
0x2dfb   :  { %v3817_v19 = vmul.f32 1.442695, %v3816_v17  ;;  %v3731_v20 = vpop.f32.mrf.mxu2  ;;  %v6106_v17 = vld [vmem:[%s8529_s2 + $0x30] sm:$0xff] }
0x2dfc   :  { %v3734_v22 = vsel %vm113_vm1, %v3731_v20, -inf  ;;  %3895 = vmatpush.msrb.mxu2 %v6106_v17 }
0x2dfd   :  { %6412 = vpow2.f32 %v3817_v19  ;;  %3735 = vmax.xlane.f32.xlu2 %v3734_v22  ;;  %v6105_v19 = vld [vmem:[%s8529_s2 + $0x28] sm:$0xff] }
0x2dfe   :  { %3896 = vmatpush.msrb.mxu2 %v6105_v19 }
0x2e03   :  { %v6413_v23 = vpop.eup %6412 }
0x2e04   :  { %v3819_v24 = vsel %vm113_vm1, %v6413_v23, 0.0 }
0x2e05   :  { %3820 = vadd.xlane.f32.xlu0 %v3819_v24  ;;  %v6104_v24 = vld [vmem:[%s8529_s2 + $0x20] sm:$0xff]  ;;  %s8540_s2 = sld [smem:[#allocation17_spill]] }
0x2e06   :  { %3897 = vmatpush.msrb.mxu2 %v6104_v24 }
0x2e11   :  { %3680 = vrot.lane.b32.xlu1 %v7693_v40, %s8507_s5 }
0x2e19   :  { %3838 = vrot.lane.b32.xlu0 %v7693_v40, %s8508_s25 }
0x2e6b   :  { %v3663_v1 = vpop.xlane.xlu1 %3662 }
0x2e6c   :  { %6414 = vrcp.f32 %v3663_v1  ;;  %v3675_v36 = vand.u32 2147483648, %v3663_v1  ;;  %vm3669_vm11 = vweird.f32 %v3663_v1  ;;  %v3673_v39 = vand.u32 2147483647, %v3663_v1 }
0x2e6e   :  { %v3676_v42 = vor.u32 1.1754944e-38, %v3675_v36  ;;  %vm3674_vm13 = vcmp.eq.f32.partialorder %v3673_v39, 8.507059e+37 }
0x2e70   :  { %v3736_v25 = vpop.xlane.xlu2 %3735 }
0x2e71   :  { %v3737_v7 = vsub.f32 %v3731_v20, %v3736_v25 }
0x2e72   :  { %v6415_v26 = vpop.eup %6414 }
0x2e73   :  { %v3665_v4 = vmul.f32 %v6415_v26, %v3663_v1  ;;  %v3738_v28 = vmul.f32 1.442695, %v3737_v7  ;;  %vm3670_vm9 = vweird.f32 %v6415_v26 }
0x2e74   :  { %vm3671_vm12 = vmor %vm3669_vm11, %vm3670_vm9 }
0x2e75   :  { %v3666_v30 = vsub.f32 1.0, %v3665_v4  ;;  %6416 = vpow2.f32 %v3738_v28 }
0x2e77   :  { %v3667_v31 = vmul.f32 %v6415_v26, %v3666_v30 }
0x2e78   :  { %v3821_v34 = vpop.xlane.xlu0 %3820 }
0x2e79   :  { %v3668_v35 = vadd.f32 %v6415_v26, %v3667_v31  ;;  %6418 = vrcp.f32 %v3821_v34  ;;  %v3833_v32 = vand.u32 2147483648, %v3821_v34  ;;  %v3831_v47 = vand.u32 2147483647, %v3821_v34 }
0x2e7a   :  { %vm3827_vm15 = vweird.f32 %v3821_v34 }
0x2e7b   :  { %v6417_v38 = vpop.eup %6416  ;;  %v3672_v41 = vsel %vm3671_vm12, %v6415_v26, %v3668_v35  ;;  %v3834_v51 = vor.u32 1.1754944e-38, %v3833_v32  ;;  %vm3832_vm3 = vcmp.eq.f32.partialorder %v3831_v47, 8.507059e+37  ;;  %v6123_v47 = vld [vmem:[%s8530_s18 + $0x28] sm:$0xff] }
0x2e7c   :  { %v3740_v27 = vsel %vm113_vm1, %v6417_v38, 0.0  ;;  %v3677_v46 = vsel %vm3674_vm13, %v3676_v42, %v3672_v41 }
0x2e7d   :  { %3741 = vadd.xlane.f32.xlu2 %v3740_v27  ;;  %v3679_v49 = vmul.f32 %v6411_v21, %v3677_v46 }
0x2e7f   :  { %v6419_v45 = vpop.eup %6418 }
0x2e80   :  { %v3823_v44 = vmul.f32 %v6419_v45, %v3821_v34  ;;  %vm3828_vm14 = vweird.f32 %v6419_v45 }
0x2e81   :  { %vm3829_vm2 = vmor %vm3827_vm15, %vm3828_vm14 }
0x2e82   :  { %v3824_v33 = vsub.f32 1.0, %v3823_v44 }
0x2e83   :  { %v3681_v29 = vpop.permute.xlu1 %3680 }
0x2e84   :  { %v3825_v50 = vmul.f32 %v6419_v45, %v3824_v33  ;;  %3701 = vmatpush.msra.mxu0 %v3681_v29 }
0x2e85   :  { %6114 = vmatmul.msk.f32.vlgmr.msra.gmra.mxu0 %vm113_vm1, %v3679_v49  ;;  %v6125_v49 = vld [vmem:[%s8530_s18 + $0x38] sm:$0xff] }
0x2e86   :  { %v3826_v14 = vadd.f32 %v6419_v45, %v3825_v50  ;;  %v6124_v50 = vld [vmem:[%s8530_s18 + $0x30] sm:$0xff] }
0x2e88   :  { %v3830_v57 = vsel %vm3829_vm2, %v6419_v45, %v3826_v14  ;;  %v6122_v14 = vld [vmem:[%s8530_s18 + $0x20] sm:$0xff] }
0x2e89   :  { %v3835_v54 = vsel %vm3832_vm3, %v3834_v51, %v3830_v57 }
0x2e8a   :  { %v3837_v52 = vmul.f32 %v6413_v23, %v3835_v54 }
0x2e8b   :  { %v3839_v55 = vpop.permute.xlu0 %3838 }
0x2e8c   :  { %3859 = vmatpush.msrb.mxu0 %v3839_v55 }
0x2e8d   :  { %6120 = vmatmul.msk.f32.vlgmr.msrb.gmra.mxu0 %vm113_vm1, %v3837_v52 }
0x2e8e   :  { %4049 = vmatpush.msra.mxu0 %v4029_v58 }
0x2e90   :  { %4050 = vmatpush.msra.mxu0 %v4028_v59  ;;  %v6134_v59 = vld [vmem:[%s8531_s9 + $0x78] sm:$0xff] }
0x2e91   :  { %3984 = vmatpush.msrb.mxu3 %v6134_v59 }
0x2e92   :  { %4051 = vmatpush.msra.mxu0 %v4027_v61  ;;  %v6133_v61 = vld [vmem:[%s8531_s9 + $0x70] sm:$0xff] }
0x2e93   :  { %3985 = vmatpush.msrb.mxu3 %v6133_v61 }
0x2e94   :  { %4052 = vmatpush.msra.mxu0 %v4026_v62 }
0x2e95   :  { %3759 = vrot.lane.b32.xlu2 %v7693_v40, %s8509_s0  ;;  %s8536_s0 = sld [smem:[#allocation6_spill]] }
0x2e9b   :  { %v7754_v40 = vld [vmem:[%s8536_s0 + $0x8] sm:$0xff]  ;;  %s8543_s0 = sld [smem:[#allocation24_spill]] }
0x2e9c   :  { %6138 = vmatmul.msk.f32.vlgmr.msra.gmra.mxu0 %vm86_vm0, %v7754_v40 }
0x2ef0   :  { %v3742_v63 = vpop.xlane.xlu2 %3741 }
0x2ef1   :  { %6420 = vrcp.f32 %v3742_v63  ;;  %v3754_v43 = vand.u32 2147483648, %v3742_v63  ;;  %v3752_v5 = vand.u32 2147483647, %v3742_v63  ;;  %vm3748_vm7 = vweird.f32 %v3742_v63 }
0x2ef3   :  { %v3755_v8 = vor.u32 1.1754944e-38, %v3754_v43  ;;  %vm3753_vm9 = vcmp.eq.f32.partialorder %v3752_v5, 8.507059e+37 }
0x2ef7   :  { %v6421_v10 = vpop.eup %6420 }
0x2ef8   :  { %v3744_v56 = vmul.f32 %v6421_v10, %v3742_v63  ;;  %v3760_v2 = vpop.permute.xlu2 %3759  ;;  %vm3749_vm6 = vweird.f32 %v6421_v10 }
0x2ef9   :  { %3780 = vmatpush.msra.mxu1 %v3760_v2  ;;  %vm3750_vm8 = vmor %vm3748_vm7, %vm3749_vm6 }
0x2efa   :  { %v3745_v13 = vsub.f32 1.0, %v3744_v56 }
0x2efb   :  { %3961 = vmatpush.msrb.mxu1 %v6125_v49 }
0x2efc   :  { %v3746_v3 = vmul.f32 %v6421_v10, %v3745_v13 }
0x2efd   :  { %3962 = vmatpush.msrb.mxu1 %v6124_v50 }
0x2efe   :  { %v3747_v6 = vadd.f32 %v6421_v10, %v3746_v3  ;;  %v7839_v3 = vld [vmem:[%s8533_s16 + $0x2] sm:$0x3] }
0x2eff   :  { %3963 = vmatpush.msrb.mxu1 %v6123_v47 }
0x2f00   :  { %v3751_v9 = vsel %vm3750_vm8, %v6421_v10, %v3747_v6  ;;  %v7834_v10 = vld [vmem:[%s8532_s27 + $0x2] sm:$0x3]  ;;  %s8538_s27 = sld [smem:[#allocation12_spill]] }
0x2f01   :  { %v3756_v37 = vsel %vm3753_vm9, %v3755_v8, %v3751_v9  ;;  %3964 = vmatpush.msrb.mxu1 %v6122_v14  ;;  %v3925_v5 = vperm.slane %v7834_v10, 0 }
0x2f02   :  { %v3703_v0 = vpop.f32.mrf.mxu0  ;;  %v3758_v21 = vmul.f32 %v6417_v38, %v3756_v37 }
0x2f03   :  { %3865 = vrot.lane.b32.xlu0 %v3703_v0, %s8511_s14  ;;  %v3927_v0 = vperm.slane %v7839_v3, 0 }
0x2f04   :  { %6117 = vmatmul.msk.f32.vlgmr.msra.gmra.mxu1 %vm113_vm1, %v3758_v21 }
0x2f0a   :  { %v3861_v12 = vpop.f32.mrf.mxu0 }
0x2f0b   :  { %3873 = vrot.lane.b32.xlu2 %v3861_v12, %s8512_s15 }
0x2f19   :  { %v7770_v20 = vpop.f32.mrf.mxu0 }
0x2f1a   :  { %4058 = vrot.lane.b32.xlu0 %v7770_v20, %s8500_s3 }
0x2f65   :  { %v3874_v26 = vpop.permute.xlu2 %3873 }
0x2f75   :  { %v3866_v23 = vpop.permute.xlu0 %3865 }
0x2f76   :  { %v3876_v25 = vsel %vm113_vm1, %v7725_v11, %v3866_v23 }
0x2f81   :  { %v3782_v22 = vpop.f32.mrf.mxu1 }
0x2f82   :  { %3869 = vrot.lane.b32.xlu1 %v3782_v22, %s8513_s26 }
0x2f8c   :  { %v4059_v1 = vpop.permute.xlu0 %4058 }
0x2f8d   :  { %6139 = vmatpush.xpose.msk.msra.mxu2 %vm113_vm1, %v4059_v1 }
0x2ff4   :  { %v3870_v7 = vpop.permute.xlu1 %3869 }
0x2ff5   :  { %v3877_v4 = vsel %vm439_vm4, %v3876_v25, %v3870_v7 }
0x2ff6   :  { %v3878_v28 = vsel %vm441_vm5, %v3877_v4, %v3874_v26 }
0x2ff7   :  { %6121 = vmatmul.msk.f32.vlgmr.msrb.gmra.mxu2 %vm86_vm0, %v3878_v28 }
0x2fff   :  { %6140 = vmatmul.msk.f32.vlgmr.msra.gmra.mxu2 %vm113_vm1, %v7770_v20 }
0x307a   :  { %v3899_v30 = vpop.f32.mrf.mxu2 }
0x307b   :  { %v3902_v31 = vadd.f32 %v3899_v30, %v7689_v18 }
0x307d   :  { %v3903_v34 = vsel %vm86_vm0, %v3902_v31, 0.0 }
0x307e   :  { %3904 = vadd.xlane.f32.xlu1 %v3903_v34 }
0x3082   :  { %v4081_v35 = vpop.f32.mrf.mxu2 }
0x3083   :  { %v4082_v11 = vadd.f32 %v4081_v35, %v6934_v48  ;;  %v6132_v35 = vld [vmem:[%s8531_s9 + $0x68] sm:$0xff] }
0x3084   :  { %3986 = vmatpush.msrb.mxu3 %v6132_v35 }
0x3085   :  { %v4084_v36 = vsel %vm113_vm1, %v4082_v11, -inf }
0x3086   :  { %4085 = vmax.xlane.f32.xlu2 %v4084_v36  ;;  %v6130_v36 = vld [vmem:[%s8531_s9 + $0x58] sm:$0xff] }
0x3097   :  { %4135 = vrot.lane.b32.xlu1 %v7770_v20, %s8501_s28 }
0x309e   :  { %4137 = vrot.lane.b32.xlu2 %v7770_v20, %s8503_s29 }
0x30a6   :  { %4216 = vrot.lane.b32.xlu2 %v7770_v20, %s8504_s1 }
0x30ae   :  { %4214 = vrot.lane.b32.xlu2 %v7770_v20, %s8506_s30 }
0x30f1   :  { %v3905_v18 = vpop.xlane.xlu1 %3904 }
0x30f2   :  { %v3906_v38 = vmul.f32 %v3905_v18, %v6764_v53  ;;  %v6129_v18 = vld [vmem:[%s8531_s9 + $0x50] sm:$0xff] }
0x30f4   :  { %v3907_v39 = vsub.f32 %v3902_v31, %v3906_v38  ;;  %v6128_v38 = vld [vmem:[%s8531_s9 + $0x48] sm:$0xff] }
0x30f6   :  { %v3908_v27 = vmul.f32 %v3907_v39, %v3907_v39 }
0x30f8   :  { %v3909_v41 = vsel %vm86_vm0, %v3908_v27, 0.0 }
0x30f9   :  { %v4086_v42 = vpop.xlane.xlu2 %4085  ;;  %3910 = vadd.xlane.f32.xlu0 %v3909_v41 }
0x30fa   :  { %v4087_v45 = vsub.f32 %v4082_v11, %v4086_v42  ;;  %v6131_v11 = vld [vmem:[%s8531_s9 + $0x60] sm:$0xff] }
0x30fb   :  { %3987 = vmatpush.msrb.mxu3 %v6131_v11 }
0x30fc   :  { %v4088_v46 = vmul.f32 1.442695, %v4087_v45  ;;  %v6264_v45 = vld [vmem:[%s8534_s12 + $0x1] ss:$0 sm:$0xff]  ;;  %s8537_s12 = smov 48  }
0x30fd   :  { %3988 = vmatpush.msrb.mxu3 %v6130_v36 }
0x30fe   :  { %6422 = vpow2.f32 %v4088_v46 }
0x30ff   :  { %3989 = vmatpush.msrb.mxu3 %v6129_v18 }
0x3101   :  { %v4138_v44 = vpop.permute.xlu2 %4137  ;;  %3990 = vmatpush.msrb.mxu3 %v6128_v38 }
0x3102   :  { %6142 = vmatpush.xpose.msk.msrb.mxu0 %vm113_vm1, %v4138_v44 }
0x3104   :  { %v7801_v33 = vpop.eup %6422 }
0x3105   :  { %v4090_v32 = vsel %vm113_vm1, %v7801_v33, 0.0 }
0x3106   :  { %4091 = vadd.xlane.f32.xlu1 %v4090_v32 }
0x3109   :  { %v4136_v29 = vpop.permute.xlu1 %4135  ;;  %v4217_v25 = vpop.permute.xlu2 %4216 }
0x310a   :  { %6143 = vmatmul.msk.f32.vlgmr.msrb.gmra.mxu0 %vm113_vm1, %v4136_v29 }
0x310d   :  { %4109 = vrot.lane.b32.xlu0 %v7770_v20, %s8514_s17 }
0x3111   :  { %v4215_v34 = vpop.permute.xlu2 %4214 }
0x3115   :  { %4295 = vrot.lane.b32.xlu0 %v7770_v20, %s8502_s4 }
0x311f   :  { %4293 = vrot.lane.b32.xlu1 %v7770_v20, %s8505_s24 }
0x316c   :  { %v3911_v51 = vpop.xlane.xlu0 %3910 }
0x316d   :  { %v3912_v57 = vmul.f32 %v3911_v51, %v6764_v53 }
0x316f   :  { %v3913_v54 = vadd.f32 1e-05, %v3912_v57 }
0x3171   :  { %6424 = vrsqrt.f32 %v3913_v54  ;;  %vm3920_vm12 = vweird.f32 %v3913_v54 }
0x3177   :  { %v6425_v52 = vpop.eup %6424 }
0x3178   :  { %v3915_v55 = vmul.f32 %v6425_v52, %v3913_v54  ;;  %vm3921_vm11 = vweird.f32 %v6425_v52 }
0x3179   :  { %v4092_v58 = vpop.xlane.xlu1 %4091  ;;  %vm3922_vm13 = vmor %vm3920_vm12, %vm3921_vm11 }
0x317a   :  { %v3916_v62 = vmul.f32 %v6425_v52, %v3915_v55  ;;  %6426 = vrcp.f32 %v4092_v58  ;;  %v4104_v15 = vand.u32 2147483648, %v4092_v58  ;;  %vm4098_vm15 = vweird.f32 %v4092_v58 }
0x317b   :  { %v4102_v19 = vand.u32 2147483647, %v4092_v58 }
0x317c   :  { %v3917_v63 = vmul.f32 0.5, %v3916_v62  ;;  %v4105_v26 = vor.u32 1.1754944e-38, %v4104_v15 }
0x317d   :  { %vm4103_vm3 = vcmp.eq.f32.partialorder %v4102_v19, 8.507059e+37 }
0x317e   :  { %v3918_v56 = vsub.f32 1.5, %v3917_v63 }
0x317f   :  { %v4110_v2 = vpop.permute.xlu0 %4109 }
0x3180   :  { %v6427_v13 = vpop.eup %6426  ;;  %v3919_v43 = vmul.f32 %v6425_v52, %v3918_v56  ;;  %4130 = vmatpush.msra.mxu1 %v4110_v2 }
0x3181   :  { %v4094_v6 = vmul.f32 %v6427_v13, %v4092_v58  ;;  %vm4099_vm14 = vweird.f32 %v6427_v13 }
0x3182   :  { %v3923_v8 = vsel %vm3922_vm13, %v6425_v52, %v3919_v43  ;;  %vm4100_vm2 = vmor %vm4098_vm15, %vm4099_vm14 }
0x3183   :  { %v3924_v9 = vmul.f32 %v3923_v8, %v3907_v39  ;;  %v4095_v37 = vsub.f32 1.0, %v4094_v6  ;;  %v6127_v39 = vld [vmem:[%s8531_s9 + $0x40] sm:$0xff] }
0x3184   :  { %3991 = vmatpush.msrb.mxu3 %v6127_v39 }
0x3185   :  { %v3926_v21 = vmul.f32 %v3925_v5, %v3924_v9  ;;  %v4096_v12 = vmul.f32 %v6427_v13, %v4095_v37 }
0x3187   :  { %v4097_v17 = vadd.f32 %v6427_v13, %v4096_v12  ;;  %v4296_v22 = vpop.permute.xlu0 %4295  ;;  %v4160_v23 = vpop.f32.mrf.mxu0  ;;  %v7843_v24 = vadd.f32 %v3927_v0, %v3926_v21 }
0x3188   :  { %v4161_v1 = vadd.f32 %v4160_v23, %v6934_v48  ;;  %6148 = vmatpush.xpose.msk.msra.mxu0 %vm113_vm1, %v4296_v22 }
0x3189   :  { %v4101_v7 = vsel %vm4100_vm2, %v6427_v13, %v4097_v17  ;;  %6136 = vmatmul.msk.f32.vlgmr.msrb.gmra.mxu1 %vm86_vm0, %v7843_v24 }
0x318a   :  { %6145 = vmatpush.xpose.msk.msrb.mxu1 %vm113_vm1, %v4217_v25  ;;  %v4163_v4 = vsel %vm113_vm1, %v4161_v1, -inf  ;;  %v4106_v28 = vsel %vm4103_vm3, %v4105_v26, %v4101_v7 }
0x318b   :  { %4164 = vmax.xlane.f32.xlu0 %v4163_v4  ;;  %v4108_v30 = vmul.f32 %v7801_v33, %v4106_v28 }
0x3191   :  { %6141 = vmatmul.msk.f32.vlgmr.msra.gmra.mxu1 %vm113_vm1, %v4108_v30  ;;  %v4294_v31 = vpop.permute.xlu1 %4293 }
0x3192   :  { %6149 = vmatmul.msk.f32.vlgmr.msra.gmra.mxu0 %vm113_vm1, %v4294_v31 }
0x3199   :  { %6146 = vmatmul.msk.f32.vlgmr.msrb.gmra.mxu1 %vm113_vm1, %v4215_v34 }
0x31fe   :  { %v4165_v27 = vpop.xlane.xlu0 %4164 }
0x31ff   :  { %v4166_v41 = vsub.f32 %v4161_v1, %v4165_v27 }
0x3201   :  { %v4167_v42 = vmul.f32 1.442695, %v4166_v41 }
0x3203   :  { %6428 = vpow2.f32 %v4167_v42 }
0x3206   :  { %v3966_v46 = vpop.f32.mrf.mxu1 }
0x3207   :  { %v3967_v44 = vadd.f32 %v6264_v45, %v3966_v46 }
0x3209   :  { %v6429_v33 = vpop.eup %6428  ;;  %v3969_v32 = vmax.f32 %v3967_v44, 0.0 }
0x320a   :  { %v4169_v29 = vsel %vm113_vm1, %v6429_v33, 0.0 }
0x320b   :  { %6137 = vmatmul.msk.f32.vlgmr.msrb.gmra.mxu3 %vm544_vm10, %v3969_v32  ;;  %4170 = vadd.xlane.f32.xlu0 %v4169_v29 }
0x320e   :  { %v7878_v49 = vpop.f32.mrf.mxu1 }
0x320f   :  { %v4318_v50 = vpop.f32.mrf.mxu0 }
0x3210   :  { %v4319_v47 = vadd.f32 %v4318_v50, %v6934_v48 }
0x3212   :  { %v4321_v14 = vsel %vm113_vm1, %v4319_v47, -inf }
0x3213   :  { %4322 = vmax.xlane.f32.xlu1 %v4321_v14 }
0x3216   :  { %v4239_v51 = vpop.f32.mrf.mxu1 }
0x3217   :  { %v4240_v57 = vadd.f32 %v4239_v51, %v6934_v48 }
0x3219   :  { %v4242_v54 = vsel %vm113_vm1, %v4240_v57, -inf }
0x321a   :  { %4243 = vmax.xlane.f32.xlu2 %v4242_v54 }
0x321f   :  { %4188 = vrot.lane.b32.xlu0 %v7770_v20, %s8507_s5 }
0x327e   :  { %v4171_v52 = vpop.xlane.xlu0 %4170 }
0x327f   :  { %6430 = vrcp.f32 %v4171_v52  ;;  %v4183_v63 = vand.u32 2147483648, %v4171_v52  ;;  %v4181_v13 = vand.u32 2147483647, %v4171_v52  ;;  %vm4177_vm7 = vweird.f32 %v4171_v52 }
0x3281   :  { %v4184_v5 = vor.u32 1.1754944e-38, %v4183_v63  ;;  %vm4182_vm9 = vcmp.eq.f32.partialorder %v4181_v13, 8.507059e+37 }
0x3285   :  { %v6431_v55 = vpop.eup %6430 }
0x3286   :  { %v4173_v58 = vmul.f32 %v6431_v55, %v4171_v52  ;;  %v4323_v59 = vpop.xlane.xlu1 %4322  ;;  %vm4178_vm6 = vweird.f32 %v6431_v55 }
0x3287   :  { %v4324_v61 = vsub.f32 %v4319_v47, %v4323_v59  ;;  %vm4179_vm8 = vmor %vm4177_vm7, %vm4178_vm6  ;;  %v4032_v59 = vld [vmem:[%s8539_s11 + $0x10] sm:$0xff] }
0x3288   :  { %v4174_v62 = vsub.f32 1.0, %v4173_v58  ;;  %v4033_v58 = vld [vmem:[%s8539_s11 + $0x18] sm:$0xff] }
0x3289   :  { %v4325_v56 = vmul.f32 1.442695, %v4324_v61  ;;  %4402 = vmatpush.msra.mxu1 %v4033_v58  ;;  %v4031_v61 = vld [vmem:[%s8539_s11 + $0x8] sm:$0xff] }
0x328a   :  { %v4175_v2 = vmul.f32 %v6431_v55, %v4174_v62 }
0x328b   :  { %6432 = vpow2.f32 %v4325_v56  ;;  %4403 = vmatpush.msra.mxu1 %v4032_v59 }
0x328c   :  { %v4176_v43 = vadd.f32 %v6431_v55, %v4175_v2 }
0x328d   :  { %v4244_v6 = vpop.xlane.xlu2 %4243  ;;  %4404 = vmatpush.msra.mxu1 %v4031_v61 }
0x328e   :  { %v4180_v8 = vsel %vm4179_vm8, %v6431_v55, %v4176_v43  ;;  %v4245_v9 = vsub.f32 %v4240_v57, %v4244_v6  ;;  %v3993_v47 = vpop.f32.mrf.mxu3  ;;  %v6265_v57 = vld [vmem:[%s8538_s27 + $0x1] ss:$0 sm:$0xff]  ;;  %s8542_s27 = sld [smem:[#allocation23_spill]] }
0x328f   :  { %v4185_v37 = vsel %vm4182_vm9, %v4184_v5, %v4180_v8  ;;  %v3994_v54 = vadd.f32 %v6265_v57, %v3993_v47 }
0x3290   :  { %v4246_v0 = vmul.f32 1.442695, %v4245_v9  ;;  %v4187_v21 = vmul.f32 %v6429_v33, %v4185_v37 }
0x3291   :  { %v6433_v12 = vpop.eup %6432  ;;  %v4189_v15 = vpop.permute.xlu0 %4188  ;;  %v3996_v52 = vadd.f32 %v3994_v54, %v7843_v24  ;;  %v4030_v24 = vld [vmem:[%s8539_s11] sm:$0xff] }
0x3292   :  { %6434 = vpow2.f32 %v4246_v0  ;;  %4209 = vmatpush.msrb.mxu2 %v4189_v15  ;;  %v4327_v17 = vsel %vm113_vm1, %v6433_v12, 0.0  ;;  %4405 = vmatpush.msra.mxu1 %v4030_v24 }
0x3293   :  { %6144 = vmatmul.msk.f32.vlgmr.msrb.gmra.mxu2 %vm113_vm1, %v4187_v21  ;;  %4328 = vadd.xlane.f32.xlu1 %v4327_v17  ;;  %v3997_v55 = vsel %vm86_vm0, %v3996_v52, 0.0 }
0x3294   :  { %v7961_v47 = vld [vmem:[%s8542_s27] sm:$0x7] }
0x3295   :  { %v4433_v54 = vperm.slane %v7961_v47, 0 }
0x3298   :  { %v6435_v19 = vpop.eup %6434 }
0x3299   :  { %v4248_v22 = vsel %vm113_vm1, %v6435_v19, 0.0 }
0x329a   :  { %4249 = vadd.xlane.f32.xlu2 %v4248_v22  ;;  %v4442_v22 = vld [vmem:[%s8540_s2 + $0x8] sm:$0xff] }
0x32ac   :  { %4346 = vrot.lane.b32.xlu1 %v7770_v20, %s8508_s25 }
0x32b2   :  { %4267 = vrot.lane.b32.xlu2 %v7770_v20, %s8537_s12 }
0x3306   :  { %v4329_v23 = vpop.xlane.xlu1 %4328 }
0x3307   :  { %6436 = vrcp.f32 %v4329_v23  ;;  %v4341_v31 = vand.u32 2147483648, %v4329_v23  ;;  %vm4335_vm12 = vweird.f32 %v4329_v23  ;;  %v4339_v11 = vand.u32 2147483647, %v4329_v23 }
0x3309   :  { %v4342_v39 = vor.u32 1.1754944e-38, %v4341_v31  ;;  %vm4340_vm15 = vcmp.eq.f32.partialorder %v4339_v11, 8.507059e+37 }
0x330d   :  { %v6437_v1 = vpop.eup %6436  ;;  %v4250_v25 = vpop.xlane.xlu2 %4249 }
0x330e   :  { %v4331_v7 = vmul.f32 %v6437_v1, %v4329_v23  ;;  %6438 = vrcp.f32 %v4250_v25  ;;  %vm4336_vm11 = vweird.f32 %v6437_v1  ;;  %v4262_v38 = vand.u32 2147483648, %v4250_v25  ;;  %v4441_v23 = vld [vmem:[%s8540_s2] sm:$0xff] }
0x330f   :  { %vm4337_vm13 = vmor %vm4335_vm12, %vm4336_vm11  ;;  %v4260_v41 = vand.u32 2147483647, %v4250_v25  ;;  %vm4256_vm2 = vweird.f32 %v4250_v25 }
0x3310   :  { %v4332_v26 = vsub.f32 1.0, %v4331_v7  ;;  %v4263_v46 = vor.u32 1.1754944e-38, %v4262_v38 }
0x3311   :  { %vm4261_vm6 = vcmp.eq.f32.partialorder %v4260_v41, 8.507059e+37  ;;  %v4440_v41 = vld [vmem:[%s8541_s22 + $0x18] sm:$0xff] }
0x3312   :  { %v4333_v4 = vmul.f32 %v6437_v1, %v4332_v26 }
0x3314   :  { %v6439_v28 = vpop.eup %6438  ;;  %v4334_v30 = vadd.f32 %v6437_v1, %v4333_v4 }
0x3315   :  { %v4252_v34 = vmul.f32 %v6439_v28, %v4250_v25  ;;  %v4268_v35 = vpop.permute.xlu2 %4267  ;;  %vm4257_vm14 = vweird.f32 %v6439_v28 }
0x3316   :  { %v4211_v36 = vpop.f32.mrf.mxu2  ;;  %4288 = vmatpush.msra.mxu3 %v4268_v35  ;;  %v4338_v18 = vsel %vm4337_vm13, %v6437_v1, %v4334_v30  ;;  %vm4258_vm3 = vmor %vm4256_vm2, %vm4257_vm14 }
0x3317   :  { %v4253_v20 = vsub.f32 1.0, %v4252_v34  ;;  %4373 = vrot.lane.b32.xlu0 %v4211_v36, %s8511_s14  ;;  %v4343_v42 = vsel %vm4340_vm15, %v4342_v39, %v4338_v18  ;;  %v4019_v36 = vperm.slane %v7834_v10, 1  ;;  %v4021_v18 = vperm.slane %v7839_v3, 1  ;;  %v4439_v10 = vld [vmem:[%s8541_s22 + $0x10] sm:$0xff]  ;;  %v4438_v3 = vld [vmem:[%s8541_s22 + $0x8] sm:$0xff] }
0x3318   :  { %v4345_v33 = vmul.f32 %v6433_v12, %v4343_v42  ;;  %v4444_v12 = vld [vmem:[%s8540_s2 + $0x18] sm:$0xff]  ;;  %4464 = vmatpush.msrb.mxu3 %v4440_v41  ;;  %v4437_v42 = vld [vmem:[%s8541_s22] sm:$0xff] }
0x3319   :  { %v4254_v27 = vmul.f32 %v6439_v28, %v4253_v20  ;;  %4487 = vmatpush.msrb.mxu0 %v4444_v12 }
0x331a   :  { %4465 = vmatpush.msrb.mxu3 %v4439_v10 }
0x331b   :  { %v4255_v45 = vadd.f32 %v6439_v28, %v4254_v27 }
0x331c   :  { %4466 = vmatpush.msrb.mxu3 %v4438_v3 }
0x331d   :  { %v4259_v44 = vsel %vm4258_vm3, %v6439_v28, %v4255_v45 }
0x331e   :  { %v4264_v32 = vsel %vm4261_vm6, %v4263_v46, %v4259_v44  ;;  %v4347_v29 = vpop.permute.xlu1 %4346  ;;  %4467 = vmatpush.msrb.mxu3 %v4437_v42 }
0x331f   :  { %v4266_v50 = vmul.f32 %v6435_v19, %v4264_v32  ;;  %4367 = vmatpush.msra.mxu2 %v4347_v29 }
0x3320   :  { %6150 = vmatmul.msk.f32.vlgmr.msra.gmra.mxu2 %vm113_vm1, %v4345_v33 }
0x3321   :  { %6147 = vmatmul.msk.f32.vlgmr.msra.gmra.mxu3 %vm113_vm1, %v4266_v50 }
0x3389   :  { %v4374_v62 = vpop.permute.xlu0 %4373 }
0x338a   :  { %v4384_v63 = vsel %vm113_vm1, %v7878_v49, %v4374_v62 }
0x33a3   :  { %v4369_v14 = vpop.f32.mrf.mxu2 }
0x33a4   :  { %v4290_v51 = vpop.f32.mrf.mxu3  ;;  %4381 = vrot.lane.b32.xlu2 %v4369_v14, %s8512_s15 }
0x33a5   :  { %4377 = vrot.lane.b32.xlu0 %v4290_v51, %s8513_s26  ;;  %v7966_v51 = vld [vmem:[%s8543_s0] sm:$0x7]  ;;  %s8546_s0 = sld [smem:[#allocation21_spill]] }
0x33cf   :  { %3998 = vadd.xlane.f32.xlu0 %v3997_v55  ;;  %v4435_v55 = vperm.slane %v7966_v51, 0 }
0x33fe   :  { %v4382_v2 = vpop.permute.xlu2 %4381 }
0x3417   :  { %v4378_v56 = vpop.permute.xlu0 %4377 }
0x3418   :  { %v4385_v13 = vsel %vm439_vm4, %v4384_v63, %v4378_v56 }
0x3419   :  { %v4386_v43 = vsel %vm441_vm5, %v4385_v13, %v4382_v2 }
0x341a   :  { %6151 = vmatmul.msk.f32.vlgmr.msra.gmra.mxu1 %vm86_vm0, %v4386_v43 }
0x3442   :  { %v3999_v5 = vpop.xlane.xlu0 %3998 }
0x3443   :  { %v4000_v6 = vmul.f32 %v3999_v5, %v6764_v53 }
0x3445   :  { %v4001_v37 = vsub.f32 %v3996_v52, %v4000_v6 }
0x3447   :  { %v4002_v21 = vmul.f32 %v4001_v37, %v4001_v37 }
0x3449   :  { %v4003_v49 = vsel %vm86_vm0, %v4002_v21, 0.0 }
0x3497   :  { %v4407_v8 = vpop.f32.mrf.mxu1 }
0x3498   :  { %v4410_v9 = vadd.f32 %v4407_v8, %v7754_v40  ;;  %v4443_v40 = vld [vmem:[%s8540_s2 + $0x10] sm:$0xff] }
0x3499   :  { %4488 = vmatpush.msrb.mxu0 %v4443_v40 }
0x349a   :  { %v4411_v0 = vsel %vm86_vm0, %v4410_v9, 0.0 }
0x349b   :  { %4412 = vadd.xlane.f32.xlu1 %v4411_v0  ;;  %4489 = vmatpush.msrb.mxu0 %v4442_v22 }
0x349d   :  { %4490 = vmatpush.msrb.mxu0 %v4441_v23 }
0x34a3   :  { %4004 = vadd.xlane.f32.xlu1 %v4003_v49 }
0x350e   :  { %v4413_v15 = vpop.xlane.xlu1 %4412 }
0x350f   :  { %v4414_v17 = vmul.f32 %v4413_v15, %v6764_v53 }
0x3511   :  { %v4415_v19 = vsub.f32 %v4410_v9, %v4414_v17 }
0x3513   :  { %v4416_v1 = vmul.f32 %v4415_v19, %v4415_v19 }
0x3515   :  { %v4417_v25 = vsel %vm86_vm0, %v4416_v1, 0.0 }
0x3516   :  { %4418 = vadd.xlane.f32.xlu2 %v4417_v25  ;;  %v4005_v7 = vpop.xlane.xlu1 %4004 }
0x3517   :  { %v4006_v26 = vmul.f32 %v4005_v7, %v6764_v53 }
0x3519   :  { %v4007_v4 = vadd.f32 1e-05, %v4006_v26 }
0x351b   :  { %6440 = vrsqrt.f32 %v4007_v4  ;;  %vm4014_vm8 = vweird.f32 %v4007_v4 }
0x3521   :  { %v6441_v28 = vpop.eup %6440 }
0x3522   :  { %v4009_v30 = vmul.f32 %v6441_v28, %v4007_v4  ;;  %vm4015_vm7 = vweird.f32 %v6441_v28 }
0x3523   :  { %vm4016_vm9 = vmor %vm4014_vm8, %vm4015_vm7 }
0x3524   :  { %v4010_v31 = vmul.f32 %v6441_v28, %v4009_v30 }
0x3526   :  { %v4011_v34 = vmul.f32 0.5, %v4010_v31 }
0x3528   :  { %v4012_v35 = vsub.f32 1.5, %v4011_v34 }
0x352a   :  { %v4013_v11 = vmul.f32 %v6441_v28, %v4012_v35 }
0x352c   :  { %v4017_v20 = vsel %vm4016_vm9, %v6441_v28, %v4013_v11 }
0x352d   :  { %v4018_v38 = vmul.f32 %v4017_v20, %v4001_v37 }
0x352f   :  { %v4020_v39 = vmul.f32 %v4019_v36, %v4018_v38 }
0x3531   :  { %v7941_v27 = vadd.f32 %v4021_v18, %v4020_v39 }
0x3533   :  { %6153 = vmatmul.msk.f32.vlgmr.msrb.gmra.mxu0 %vm86_vm0, %v7941_v27 }
0x3589   :  { %v4419_v45 = vpop.xlane.xlu2 %4418 }
0x358a   :  { %v4420_v46 = vmul.f32 %v4419_v45, %v6764_v53 }
0x358c   :  { %v4421_v44 = vadd.f32 1e-05, %v4420_v46 }
0x358e   :  { %6442 = vrsqrt.f32 %v4421_v44  ;;  %vm4428_vm12 = vweird.f32 %v4421_v44 }
0x3594   :  { %v6443_v33 = vpop.eup %6442 }
0x3595   :  { %v4423_v32 = vmul.f32 %v6443_v33, %v4421_v44  ;;  %vm4429_vm11 = vweird.f32 %v6443_v33 }
0x3596   :  { %vm4430_vm13 = vmor %vm4428_vm12, %vm4429_vm11 }
0x3597   :  { %v4424_v29 = vmul.f32 %v6443_v33, %v4423_v32 }
0x3599   :  { %v4425_v50 = vmul.f32 0.5, %v4424_v29 }
0x359b   :  { %v4426_v14 = vsub.f32 1.5, %v4425_v50 }
0x359d   :  { %v4427_v57 = vmul.f32 %v6443_v33, %v4426_v14 }
0x359f   :  { %v4431_v52 = vsel %vm4430_vm13, %v6443_v33, %v4427_v57 }
0x35a0   :  { %v4432_v58 = vmul.f32 %v4431_v52, %v4415_v19 }
0x35a2   :  { %v4434_v59 = vmul.f32 %v4433_v54, %v4432_v58 }
0x35a4   :  { %v7970_v61 = vadd.f32 %v4435_v55, %v4434_v59 }
0x35a6   :  { %6152 = vmatmul.msk.f32.vlgmr.msrb.gmra.mxu3 %vm86_vm0, %v7970_v61 }
0x35b0   :  { %v7974_v24 = vpop.f32.mrf.mxu0 }
0x35b1   :  { %4732 = vrot.lane.b32.xlu0 %v7974_v24, %s8505_s24  ;;  %4653 = vrot.lane.b32.xlu1 %v7974_v24, %s8506_s30 }
0x35b2   :  { %4574 = vrot.lane.b32.xlu2 %v7974_v24, %s8501_s28  ;;  %6154 = vmatpush.xpose.msk.msrb.mxu2 %vm113_vm1, %v7974_v24 }
0x360c   :  { %v4575_v62 = vpop.permute.xlu2 %4574 }
0x360d   :  { %6157 = vmatpush.xpose.msk.msra.mxu3 %vm113_vm1, %v4575_v62 }
0x3623   :  { %v4733_v63 = vpop.permute.xlu0 %4732  ;;  %v4654_v56 = vpop.permute.xlu1 %4653 }
0x3624   :  { %6160 = vmatpush.xpose.msk.msra.mxu2 %vm113_vm1, %v4654_v56  ;;  %6163 = vmatpush.xpose.msk.msrb.mxu3 %vm113_vm1, %v4733_v63 }
0x3629   :  { %v4469_v2 = vpop.f32.mrf.mxu3 }
0x362a   :  { %4572 = vrot.lane.b32.xlu0 %v4469_v2, %s8501_s28  ;;  %4651 = vrot.lane.b32.xlu2 %v4469_v2, %s8506_s30 }
0x362b   :  { %6155 = vmatmul.msk.f32.vlgmr.msrb.gmra.mxu2 %vm113_vm1, %v4469_v2 }
0x3632   :  { %4730 = vrot.lane.b32.xlu0 %v4469_v2, %s8505_s24 }
0x3684   :  { %v4652_v13 = vpop.permute.xlu2 %4651 }
0x3685   :  { %6161 = vmatmul.msk.f32.vlgmr.msra.gmra.mxu2 %vm113_vm1, %v4652_v13 }
0x369c   :  { %v4573_v43 = vpop.permute.xlu0 %4572 }
0x369d   :  { %6158 = vmatmul.msk.f32.vlgmr.msra.gmra.mxu3 %vm113_vm1, %v4573_v43 }
0x36a4   :  { %v4731_v5 = vpop.permute.xlu0 %4730 }
0x36a5   :  { %6164 = vmatmul.msk.f32.vlgmr.msrb.gmra.mxu3 %vm113_vm1, %v4731_v5 }
0x36ae   :  { %v4518_v6 = vpop.f32.mrf.mxu2 }
0x36af   :  { %v4521_v8 = vsel %vm113_vm1, %v4518_v6, -inf }
0x36b0   :  { %4522 = vmax.xlane.f32.xlu1 %v4521_v8 }
0x3708   :  { %v4676_v9 = vpop.f32.mrf.mxu2 }
0x3709   :  { %v4679_v37 = vsel %vm113_vm1, %v4676_v9, -inf }
0x370a   :  { %4680 = vmax.xlane.f32.xlu0 %v4679_v37 }
0x371e   :  { %4546 = vrot.lane.b32.xlu0 %v7974_v24, %s8500_s3 }
0x3720   :  { %v4597_v0 = vpop.f32.mrf.mxu3 }
0x3721   :  { %v4600_v21 = vsel %vm113_vm1, %v4597_v0, -inf }
0x3722   :  { %4601 = vmax.xlane.f32.xlu2 %v4600_v21 }
0x3723   :  { %v4523_v49 = vpop.xlane.xlu1 %4522 }
0x3724   :  { %v4524_v12 = vsub.f32 %v4518_v6, %v4523_v49 }
0x3726   :  { %v4525_v15 = vmul.f32 1.442695, %v4524_v12 }
0x3728   :  { %6444 = vpow2.f32 %v4525_v15  ;;  %v4755_v17 = vpop.f32.mrf.mxu3 }
0x3729   :  { %v4758_v40 = vsel %vm113_vm1, %v4755_v17, -inf }
0x372a   :  { %4759 = vmax.xlane.f32.xlu1 %v4758_v40 }
0x372e   :  { %v6445_v19 = vpop.eup %6444 }
0x372f   :  { %v4527_v22 = vsel %vm113_vm1, %v6445_v19, 0.0 }
0x3730   :  { %4528 = vadd.xlane.f32.xlu2 %v4527_v22 }
0x377d   :  { %v4681_v23 = vpop.xlane.xlu0 %4680 }
0x377e   :  { %v4682_v1 = vsub.f32 %v4676_v9, %v4681_v23 }
0x3780   :  { %v4683_v25 = vmul.f32 1.442695, %v4682_v1 }
0x3782   :  { %6446 = vpow2.f32 %v4683_v25 }
0x3788   :  { %v8001_v7 = vpop.eup %6446 }
0x3789   :  { %v4685_v26 = vsel %vm113_vm1, %v8001_v7, 0.0 }
0x378a   :  { %4686 = vadd.xlane.f32.xlu1 %v4685_v26 }
0x3790   :  { %v4547_v4 = vpop.permute.xlu0 %4546 }
0x3791   :  { %4567 = vmatpush.msrb.mxu1 %v4547_v4 }
0x3795   :  { %v4602_v28 = vpop.xlane.xlu2 %4601 }
0x3796   :  { %v4603_v30 = vsub.f32 %v4597_v0, %v4602_v28 }
0x3798   :  { %v4604_v31 = vmul.f32 1.442695, %v4603_v30 }
0x379a   :  { %6448 = vpow2.f32 %v4604_v31 }
0x379d   :  { %v4760_v34 = vpop.xlane.xlu1 %4759 }
0x379e   :  { %v4761_v35 = vsub.f32 %v4755_v17, %v4760_v34 }
0x37a0   :  { %v8005_v11 = vpop.eup %6448  ;;  %v4762_v36 = vmul.f32 1.442695, %v4761_v35 }
0x37a1   :  { %v4606_v20 = vsel %vm113_vm1, %v8005_v11, 0.0 }
0x37a2   :  { %6450 = vpow2.f32 %v4762_v36  ;;  %4607 = vadd.xlane.f32.xlu0 %v4606_v20 }
0x37a3   :  { %v4529_v18 = vpop.xlane.xlu2 %4528  ;;  %4625 = vrot.lane.b32.xlu1 %v7974_v24, %s8503_s29 }
0x37a4   :  { %6452 = vrcp.f32 %v4529_v18  ;;  %v4541_v42 = vand.u32 2147483648, %v4529_v18  ;;  %v4539_v46 = vand.u32 2147483647, %v4529_v18  ;;  %vm4535_vm15 = vweird.f32 %v4529_v18 }
0x37a6   :  { %v4542_v33 = vor.u32 1.1754944e-38, %v4541_v42  ;;  %vm4540_vm3 = vcmp.eq.f32.partialorder %v4539_v46, 8.507059e+37 }
0x37a8   :  { %v8011_v38 = vpop.eup %6450 }
0x37a9   :  { %v4764_v39 = vsel %vm113_vm1, %v8011_v38, 0.0 }
0x37aa   :  { %v6453_v41 = vpop.eup %6452  ;;  %4765 = vadd.xlane.f32.xlu2 %v4764_v39  ;;  %v4448_v39 = vld [vmem:[%s8544_s7 + $0x18] sm:$0xff] }
0x37ab   :  { %v4531_v10 = vmul.f32 %v6453_v41, %v4529_v18  ;;  %vm4536_vm14 = vweird.f32 %v6453_v41  ;;  %4839 = vmatpush.msrb.mxu2 %v4448_v39 }
0x37ac   :  { %vm4537_vm2 = vmor %vm4535_vm15, %vm4536_vm14 }
0x37ad   :  { %v4532_v3 = vsub.f32 1.0, %v4531_v10  ;;  %v4445_v10 = vld [vmem:[%s8544_s7] sm:$0xff] }
0x37af   :  { %v4533_v45 = vmul.f32 %v6453_v41, %v4532_v3 }
0x37b1   :  { %v4534_v44 = vadd.f32 %v6453_v41, %v4533_v45 }
0x37b3   :  { %v4538_v32 = vsel %vm4537_vm2, %v6453_v41, %v4534_v44  ;;  %v4446_v41 = vld [vmem:[%s8544_s7 + $0x8] sm:$0xff] }
0x37b4   :  { %v4543_v29 = vsel %vm4540_vm3, %v4542_v33, %v4538_v32 }
0x37b5   :  { %v4545_v50 = vmul.f32 %v6445_v19, %v4543_v29 }
0x37b6   :  { %4783 = vrot.lane.b32.xlu0 %v7974_v24, %s8502_s4 }
0x37b7   :  { %6156 = vmatmul.msk.f32.vlgmr.msrb.gmra.mxu1 %vm113_vm1, %v4545_v50 }
0x37c2   :  { %4704 = vrot.lane.b32.xlu2 %v7974_v24, %s8504_s1 }
0x37fd   :  { %v4687_v14 = vpop.xlane.xlu1 %4686 }
0x37fe   :  { %6454 = vrcp.f32 %v4687_v14  ;;  %v4699_v56 = vand.u32 2147483648, %v4687_v14  ;;  %vm4693_vm7 = vweird.f32 %v4687_v14  ;;  %v4697_v2 = vand.u32 2147483647, %v4687_v14 }
0x3800   :  { %v4700_v6 = vor.u32 1.1754944e-38, %v4699_v56  ;;  %vm4698_vm9 = vcmp.eq.f32.partialorder %v4697_v2, 8.507059e+37  ;;  %v4885_v56 = vld [vmem:[%s8546_s0 + $0x30] sm:$0xff]  ;;  %v4884_v2 = vld [vmem:[%s8546_s0 + $0x28] sm:$0xff] }
0x3804   :  { %v6455_v57 = vpop.eup %6454 }
0x3805   :  { %v4689_v54 = vmul.f32 %v6455_v57, %v4687_v14  ;;  %vm4694_vm6 = vweird.f32 %v6455_v57 }
0x3806   :  { %vm4695_vm8 = vmor %vm4693_vm7, %vm4694_vm6 }
0x3807   :  { %v4690_v52 = vsub.f32 1.0, %v4689_v54 }
0x3809   :  { %v4691_v59 = vmul.f32 %v6455_v57, %v4690_v52 }
0x380b   :  { %v4692_v62 = vadd.f32 %v6455_v57, %v4691_v59  ;;  %v4875_v59 = vld [vmem:[%s8545_s19 + $0x8] sm:$0xff] }
0x380d   :  { %v4696_v24 = vsel %vm4695_vm8, %v6455_v57, %v4692_v62  ;;  %v4874_v62 = vld [vmem:[%s8545_s19] sm:$0xff] }
0x380e   :  { %v4701_v0 = vsel %vm4698_vm9, %v4700_v6, %v4696_v24  ;;  %v4883_v24 = vld [vmem:[%s8546_s0 + $0x20] sm:$0xff]  ;;  %v4882_v6 = vld [vmem:[%s8546_s0 + $0x18] sm:$0xff] }
0x380f   :  { %v4703_v15 = vmul.f32 %v8001_v7, %v4701_v0 }
0x3815   :  { %v4608_v55 = vpop.xlane.xlu0 %4607  ;;  %v4626_v58 = vpop.permute.xlu1 %4625 }
0x3816   :  { %6456 = vrcp.f32 %v4608_v55  ;;  %4646 = vmatpush.msra.mxu0 %v4626_v58  ;;  %v4620_v8 = vand.u32 2147483648, %v4608_v55  ;;  %v4618_v37 = vand.u32 2147483647, %v4608_v55  ;;  %vm4614_vm12 = vweird.f32 %v4608_v55  ;;  %v4877_v58 = vld [vmem:[%s8545_s19 + $0x18] sm:$0xff] }
0x3818   :  { %v4621_v12 = vor.u32 1.1754944e-38, %v4620_v8  ;;  %vm4619_vm14 = vcmp.eq.f32.partialorder %v4618_v37, 8.507059e+37 }
0x381c   :  { %v6457_v63 = vpop.eup %6456 }
0x381d   :  { %v4610_v13 = vmul.f32 %v6457_v63, %v4608_v55  ;;  %v4766_v43 = vpop.xlane.xlu2 %4765  ;;  %vm4615_vm11 = vweird.f32 %v6457_v63 }
0x381e   :  { %6458 = vrcp.f32 %v4766_v43  ;;  %vm4616_vm13 = vmor %vm4614_vm12, %vm4615_vm11  ;;  %v4778_v25 = vand.u32 2147483648, %v4766_v43  ;;  %v4776_v28 = vand.u32 2147483647, %v4766_v43  ;;  %vm4772_vm2 = vweird.f32 %v4766_v43 }
0x381f   :  { %v4611_v5 = vsub.f32 1.0, %v4610_v13 }
0x3820   :  { %v4779_v30 = vor.u32 1.1754944e-38, %v4778_v25  ;;  %vm4777_vm6 = vcmp.eq.f32.partialorder %v4776_v28, 8.507059e+37  ;;  %v4879_v25 = vld [vmem:[%s8546_s0] sm:$0xff] }
0x3821   :  { %v4612_v9 = vmul.f32 %v6457_v63, %v4611_v5 }
0x3823   :  { %v4613_v21 = vadd.f32 %v6457_v63, %v4612_v9 }
0x3824   :  { %v6459_v49 = vpop.eup %6458 }
0x3825   :  { %v4617_v17 = vsel %vm4616_vm13, %v6457_v63, %v4613_v21  ;;  %v4768_v40 = vmul.f32 %v6459_v49, %v4766_v43  ;;  %v4705_v19 = vpop.permute.xlu2 %4704  ;;  %vm4773_vm15 = vweird.f32 %v6459_v49  ;;  %v4886_v63 = vld [vmem:[%s8546_s0 + $0x38] sm:$0xff] }
0x3826   :  { %v4622_v22 = vsel %vm4619_vm14, %v4621_v12, %v4617_v17  ;;  %4725 = vmatpush.msra.mxu1 %v4705_v19  ;;  %vm4774_vm3 = vmor %vm4772_vm2, %vm4773_vm15  ;;  %4929 = vmatpush.msra.mxu3 %v4886_v63  ;;  %v4870_v12 = vperm.slane %v7961_v47, 1  ;;  %v4872_v17 = vperm.slane %v7966_v51, 1 }
0x3827   :  { %v4624_v23 = vmul.f32 %v8005_v11, %v4622_v22  ;;  %v4769_v1 = vsub.f32 1.0, %v4768_v40  ;;  %6162 = vmatmul.msk.f32.vlgmr.msra.gmra.mxu1 %vm113_vm1, %v4703_v15 }
0x3828   :  { %v4784_v26 = vpop.permute.xlu0 %4783  ;;  %4906 = vmatpush.msrb.mxu1 %v4877_v58  ;;  %4930 = vmatpush.msra.mxu3 %v4885_v56 }
0x3829   :  { %v4770_v4 = vmul.f32 %v6459_v49, %v4769_v1  ;;  %6159 = vmatmul.msk.f32.vlgmr.msra.gmra.mxu0 %vm113_vm1, %v4624_v23  ;;  %v4881_v23 = vld [vmem:[%s8546_s0 + $0x10] sm:$0xff]  ;;  %v4880_v1 = vld [vmem:[%s8546_s0 + $0x8] sm:$0xff] }
0x382a   :  { %4804 = vmatpush.msrb.mxu0 %v4784_v26  ;;  %4931 = vmatpush.msra.mxu3 %v4884_v2 }
0x382b   :  { %v4771_v7 = vadd.f32 %v6459_v49, %v4770_v4 }
0x382c   :  { %4932 = vmatpush.msra.mxu3 %v4883_v24 }
0x382d   :  { %v4775_v31 = vsel %vm4774_vm3, %v6459_v49, %v4771_v7 }
0x382e   :  { %v4780_v34 = vsel %vm4777_vm6, %v4779_v30, %v4775_v31  ;;  %4933 = vmatpush.msra.mxu3 %v4882_v6  ;;  %v6267_v30 = vld [vmem:[%s8548_s21] ss:$0 sm:$0xff] }
0x382f   :  { %v4782_v35 = vmul.f32 %v8011_v38, %v4780_v34  ;;  %v4447_v38 = vld [vmem:[%s8544_s7 + $0x10] sm:$0xff]  ;;  %s8547_s7 = sld [smem:[#allocation20_spill]] }
0x3830   :  { %4840 = vmatpush.msrb.mxu2 %v4447_v38  ;;  %4934 = vmatpush.msra.mxu3 %v4881_v23 }
0x3831   :  { %6165 = vmatmul.msk.f32.vlgmr.msrb.gmra.mxu0 %vm113_vm1, %v4782_v35 }
0x3832   :  { %4841 = vmatpush.msrb.mxu2 %v4446_v41  ;;  %4935 = vmatpush.msra.mxu3 %v4880_v1  ;;  %v6174_v41 = vld [vmem:[%s8395_s10 + $0x38] sm:$0xff] }
0x3833   :  { %4993 = vmatpush.msra.mxu0 %v6174_v41 }
0x3834   :  { %v4569_v11 = vpop.f32.mrf.mxu1  ;;  %4842 = vmatpush.msrb.mxu2 %v4445_v10  ;;  %4936 = vmatpush.msra.mxu3 %v4879_v25  ;;  %v6173_v10 = vld [vmem:[%s8395_s10 + $0x30] sm:$0xff] }
0x3835   :  { %v6266_v26 = vld [vmem:[%s8547_s7] ss:$0 sm:$0xff]  ;;  %4994 = vmatpush.msra.mxu0 %v6173_v10 }
0x38a4   :  { %v4727_v36 = vpop.f32.mrf.mxu1 }
0x38a5   :  { %4814 = vrot.lane.b32.xlu2 %v4727_v36, %s8513_s26 }
0x38a6   :  { %v4648_v20 = vpop.f32.mrf.mxu0 }
0x38a7   :  { %4810 = vrot.lane.b32.xlu1 %v4648_v20, %s8511_s14 }
0x38ae   :  { %v4806_v18 = vpop.f32.mrf.mxu0 }
0x38af   :  { %4818 = vrot.lane.b32.xlu0 %v4806_v18, %s8512_s15 }
0x38ff   :  { %v4815_v45 = vpop.permute.xlu2 %4814 }
0x3919   :  { %v4811_v3 = vpop.permute.xlu1 %4810 }
0x391a   :  { %v4821_v42 = vsel %vm113_vm1, %v4569_v11, %v4811_v3  ;;  %v6172_v3 = vld [vmem:[%s8395_s10 + $0x28] sm:$0xff] }
0x391b   :  { %v4822_v46 = vsel %vm439_vm4, %v4821_v42, %v4815_v45  ;;  %v6171_v42 = vld [vmem:[%s8395_s10 + $0x20] sm:$0xff]  ;;  %4995 = vmatpush.msra.mxu0 %v6172_v3 }
0x391d   :  { %4996 = vmatpush.msra.mxu0 %v6171_v42 }
0x3921   :  { %v4819_v44 = vpop.permute.xlu0 %4818 }
0x3922   :  { %v4823_v33 = vsel %vm441_vm5, %v4822_v46, %v4819_v44 }
0x3923   :  { %6166 = vmatmul.msk.f32.vlgmr.msrb.gmra.mxu2 %vm86_vm0, %v4823_v33 }
0x39a6   :  { %v4844_v32 = vpop.f32.mrf.mxu2 }
0x39a7   :  { %v4847_v29 = vadd.f32 %v4844_v32, %v7970_v61  ;;  %v4876_v61 = vld [vmem:[%s8545_s19 + $0x10] sm:$0xff] }
0x39a8   :  { %4907 = vmatpush.msrb.mxu1 %v4876_v61 }
0x39a9   :  { %v4848_v50 = vsel %vm86_vm0, %v4847_v29, 0.0 }
0x39aa   :  { %4849 = vadd.xlane.f32.xlu1 %v4848_v50  ;;  %4908 = vmatpush.msrb.mxu1 %v4875_v59 }
0x39ac   :  { %4909 = vmatpush.msrb.mxu1 %v4874_v62 }
0x3a1d   :  { %v4850_v14 = vpop.xlane.xlu1 %4849 }
0x3a1e   :  { %v4851_v57 = vmul.f32 %v4850_v14, %v6764_v53 }
0x3a20   :  { %v4852_v54 = vsub.f32 %v4847_v29, %v4851_v57 }
0x3a22   :  { %v4853_v52 = vmul.f32 %v4852_v54, %v4852_v54 }
0x3a24   :  { %v4854_v55 = vsel %vm86_vm0, %v4853_v52, 0.0 }
0x3a25   :  { %4855 = vadd.xlane.f32.xlu2 %v4854_v55  ;;  %v4966_v55 = vperm.slane %v7966_v51, 2 }
0x3a98   :  { %v4856_v13 = vpop.xlane.xlu2 %4855 }
0x3a99   :  { %v4857_v43 = vmul.f32 %v4856_v13, %v6764_v53 }
0x3a9b   :  { %v4858_v5 = vadd.f32 1e-05, %v4857_v43 }
0x3a9d   :  { %6460 = vrsqrt.f32 %v4858_v5  ;;  %vm4865_vm8 = vweird.f32 %v4858_v5 }
0x3aa3   :  { %v6461_v8 = vpop.eup %6460 }
0x3aa4   :  { %v4860_v9 = vmul.f32 %v6461_v8, %v4858_v5  ;;  %vm4866_vm7 = vweird.f32 %v6461_v8 }
0x3aa5   :  { %vm4867_vm9 = vmor %vm4865_vm8, %vm4866_vm7 }
0x3aa6   :  { %v4861_v37 = vmul.f32 %v6461_v8, %v4860_v9 }
0x3aa8   :  { %v4862_v0 = vmul.f32 0.5, %v4861_v37  ;;  %v6200_v37 = vld [vmem:[%s8540_s2 + $0x38] sm:$0xff] }
0x3aaa   :  { %v4863_v21 = vsub.f32 1.5, %v4862_v0  ;;  %v6199_v0 = vld [vmem:[%s8540_s2 + $0x30] sm:$0xff] }
0x3aac   :  { %v4864_v49 = vmul.f32 %v6461_v8, %v4863_v21  ;;  %v6198_v21 = vld [vmem:[%s8540_s2 + $0x28] sm:$0xff] }
0x3aae   :  { %v4868_v15 = vsel %vm4867_vm9, %v6461_v8, %v4864_v49  ;;  %v6197_v49 = vld [vmem:[%s8540_s2 + $0x20] sm:$0xff]  ;;  %s8549_s2 = sld [smem:[#allocation24_spill]] }
0x3aaf   :  { %v4869_v40 = vmul.f32 %v4868_v15, %v4852_v54  ;;  %v4964_v54 = vperm.slane %v7961_v47, 2 }
0x3ab1   :  { %v4871_v19 = vmul.f32 %v4870_v12, %v4869_v40 }
0x3ab3   :  { %v4873_v22 = vadd.f32 %v4872_v17, %v4871_v19 }
0x3ab5   :  { %6167 = vmatmul.msk.f32.vlgmr.msrb.gmra.mxu1 %vm86_vm0, %v4873_v22 }
0x3b32   :  { %v4911_v4 = vpop.f32.mrf.mxu1 }
0x3b33   :  { %v4912_v28 = vadd.f32 %v6266_v26, %v4911_v4 }
0x3b35   :  { %v4914_v7 = vmax.f32 %v4912_v28, 0.0 }
0x3b37   :  { %6168 = vmatmul.msk.f32.vlgmr.msra.gmra.mxu3 %vm544_vm10, %v4914_v7 }
0x3bba   :  { %v4938_v31 = vpop.f32.mrf.mxu3 }
0x3bbb   :  { %v4939_v34 = vadd.f32 %v6267_v30, %v4938_v31 }
0x3bbd   :  { %v4941_v35 = vadd.f32 %v4939_v34, %v4873_v22 }
0x3bbf   :  { %v4942_v11 = vsel %vm86_vm0, %v4941_v35, 0.0 }
0x3bc0   :  { %4943 = vadd.xlane.f32.xlu0 %v4942_v11 }
0x3c33   :  { %v4944_v36 = vpop.xlane.xlu0 %4943 }
0x3c34   :  { %v4945_v20 = vmul.f32 %v4944_v36, %v6764_v53 }
0x3c36   :  { %v4946_v18 = vsub.f32 %v4941_v35, %v4945_v20 }
0x3c38   :  { %v4947_v39 = vmul.f32 %v4946_v18, %v4946_v18 }
0x3c3a   :  { %v4948_v38 = vsel %vm86_vm0, %v4947_v39, 0.0 }
0x3c3b   :  { %4949 = vadd.xlane.f32.xlu1 %v4948_v38 }
0x3cae   :  { %v4950_v45 = vpop.xlane.xlu1 %4949 }
0x3caf   :  { %v4951_v46 = vmul.f32 %v4950_v45, %v6764_v53 }
0x3cb1   :  { %v4952_v44 = vadd.f32 1e-05, %v4951_v46 }
0x3cb3   :  { %6462 = vrsqrt.f32 %v4952_v44  ;;  %vm4959_vm12 = vweird.f32 %v4952_v44 }
0x3cb9   :  { %v6463_v33 = vpop.eup %6462 }
0x3cba   :  { %v4954_v32 = vmul.f32 %v6463_v33, %v4952_v44  ;;  %vm4960_vm11 = vweird.f32 %v6463_v33 }
0x3cbb   :  { %vm4961_vm13 = vmor %vm4959_vm12, %vm4960_vm11 }
0x3cbc   :  { %v4955_v29 = vmul.f32 %v6463_v33, %v4954_v32 }
0x3cbe   :  { %v4956_v50 = vmul.f32 0.5, %v4955_v29 }
0x3cc0   :  { %v4957_v14 = vsub.f32 1.5, %v4956_v50 }
0x3cc2   :  { %v4958_v57 = vmul.f32 %v6463_v33, %v4957_v14 }
0x3cc4   :  { %v4962_v52 = vsel %vm4961_vm13, %v6463_v33, %v4958_v57 }
0x3cc5   :  { %v4963_v58 = vmul.f32 %v4962_v52, %v4946_v18 }
0x3cc7   :  { %v4965_v61 = vmul.f32 %v4964_v54, %v4963_v58 }
0x3cc9   :  { %v8114_v59 = vadd.f32 %v4966_v55, %v4965_v61 }
0x3ccb   :  { %6179 = vmatmul.msk.f32.vlgmr.msra.gmra.mxu0 %vm86_vm0, %v8114_v59 }
0x3d48   :  { %v8118_v62 = vpop.f32.mrf.mxu0 }
0x3d49   :  { %5002 = vrot.lane.b32.xlu2 %v8118_v62, %s8500_s3 }
0x3d51   :  { %5079 = vrot.lane.b32.xlu2 %v8118_v62, %s8501_s28 }
0x3d59   :  { %5239 = vrot.lane.b32.xlu2 %v8118_v62, %s8502_s4 }
0x3d61   :  { %5237 = vrot.lane.b32.xlu2 %v8118_v62, %s8505_s24 }
0x3da3   :  { %v5003_v47 = vpop.permute.xlu2 %5002 }
0x3da4   :  { %6180 = vmatpush.xpose.msk.msra.mxu2 %vm113_vm1, %v5003_v47 }
0x3da7   :  { %6181 = vmatmul.msk.f32.vlgmr.msra.gmra.mxu2 %vm113_vm1, %v8118_v62 }
0x3dab   :  { %v5080_v24 = vpop.permute.xlu2 %5079 }
0x3db3   :  { %v5240_v9 = vpop.permute.xlu2 %5239 }
0x3dbb   :  { %v5238_v12 = vpop.permute.xlu2 %5237 }
0x3e2a   :  { %v5025_v51 = vpop.f32.mrf.mxu2 }
0x3e2b   :  { %v5026_v63 = vadd.f32 %v5025_v51, %v6934_v48 }
0x3e2d   :  { %v5028_v56 = vsel %vm113_vm1, %v5026_v63, -inf }
0x3e2e   :  { %5029 = vmax.xlane.f32.xlu0 %v5028_v56 }
0x3e42   :  { %5081 = vrot.lane.b32.xlu0 %v8118_v62, %s8503_s29 }
0x3e4a   :  { %5160 = vrot.lane.b32.xlu0 %v8118_v62, %s8504_s1 }
0x3e52   :  { %5158 = vrot.lane.b32.xlu0 %v8118_v62, %s8506_s30 }
0x3ea1   :  { %v5030_v2 = vpop.xlane.xlu0 %5029 }
0x3ea2   :  { %v5031_v13 = vsub.f32 %v5026_v63, %v5030_v2 }
0x3ea4   :  { %v5032_v43 = vmul.f32 1.442695, %v5031_v13 }
0x3ea6   :  { %6464 = vpow2.f32 %v5032_v43 }
0x3eac   :  { %v6465_v5 = vpop.eup %6464 }
0x3ead   :  { %v5034_v6 = vsel %vm113_vm1, %v6465_v5, 0.0 }
0x3eae   :  { %5035 = vadd.xlane.f32.xlu1 %v5034_v6 }
0x3eb4   :  { %v5082_v8 = vpop.permute.xlu0 %5081 }
0x3eb5   :  { %6183 = vmatpush.xpose.msk.msrb.mxu0 %vm113_vm1, %v5082_v8 }
0x3eb8   :  { %6184 = vmatmul.msk.f32.vlgmr.msrb.gmra.mxu0 %vm113_vm1, %v5080_v24 }
0x3eb9   :  { %6189 = vmatpush.xpose.msk.msra.mxu0 %vm113_vm1, %v5240_v9 }
0x3ebd   :  { %5428 = vmatpush.msrb.mxu0 %v6200_v37 }
0x3ebf   :  { %5429 = vmatpush.msrb.mxu0 %v6199_v0 }
0x3ec0   :  { %6190 = vmatmul.msk.f32.vlgmr.msra.gmra.mxu0 %vm113_vm1, %v5238_v12 }
0x3ec1   :  { %5430 = vmatpush.msrb.mxu0 %v6198_v21 }
0x3ec3   :  { %5431 = vmatpush.msrb.mxu0 %v6197_v49 }
0x3ec7   :  { %5053 = vrot.lane.b32.xlu1 %v8118_v62, %s8514_s17 }
0x3ec8   :  { %6206 = vmatmul.msk.f32.vlgmr.msrb.gmra.mxu0 %vm86_vm0, %v7941_v27  ;;  %v5161_v27 = vpop.permute.xlu0 %5160 }
0x3ed0   :  { %v5159_v18 = vpop.permute.xlu0 %5158 }
0x3f21   :  { %v5036_v15 = vpop.xlane.xlu1 %5035 }
0x3f22   :  { %6466 = vrcp.f32 %v5036_v15  ;;  %v5048_v1 = vand.u32 2147483648, %v5036_v15  ;;  %vm5042_vm15 = vweird.f32 %v5036_v15  ;;  %v5046_v25 = vand.u32 2147483647, %v5036_v15 }
0x3f24   :  { %v5049_v4 = vor.u32 1.1754944e-38, %v5048_v1  ;;  %vm5047_vm3 = vcmp.eq.f32.partialorder %v5046_v25, 8.507059e+37 }
0x3f28   :  { %v6467_v17 = vpop.eup %6466 }
0x3f29   :  { %v5038_v40 = vmul.f32 %v6467_v17, %v5036_v15  ;;  %vm5043_vm14 = vweird.f32 %v6467_v17 }
0x3f2a   :  { %vm5044_vm2 = vmor %vm5042_vm15, %vm5043_vm14 }
0x3f2b   :  { %v5039_v19 = vsub.f32 1.0, %v5038_v40 }
0x3f2d   :  { %v5040_v22 = vmul.f32 %v6467_v17, %v5039_v19 }
0x3f2f   :  { %v5041_v23 = vadd.f32 %v6467_v17, %v5040_v22 }
0x3f31   :  { %v5045_v26 = vsel %vm5044_vm2, %v6467_v17, %v5041_v23 }
0x3f32   :  { %v5050_v7 = vsel %vm5047_vm3, %v5049_v4, %v5045_v26 }
0x3f33   :  { %v5052_v34 = vmul.f32 %v6465_v5, %v5050_v7 }
0x3f35   :  { %v5104_v28 = vpop.f32.mrf.mxu0 }
0x3f36   :  { %v5105_v30 = vadd.f32 %v5104_v28, %v6934_v48 }
0x3f38   :  { %v5107_v31 = vsel %vm113_vm1, %v5105_v30, -inf }
0x3f39   :  { %v5054_v35 = vpop.permute.xlu1 %5053  ;;  %5108 = vmax.xlane.f32.xlu1 %v5107_v31 }
0x3f3a   :  { %5074 = vmatpush.msra.mxu1 %v5054_v35 }
0x3f3b   :  { %6182 = vmatmul.msk.f32.vlgmr.msra.gmra.mxu1 %vm113_vm1, %v5052_v34 }
0x3f3c   :  { %6186 = vmatpush.xpose.msk.msrb.mxu1 %vm113_vm1, %v5161_v27 }
0x3f3d   :  { %v5262_v11 = vpop.f32.mrf.mxu0 }
0x3f3e   :  { %v5263_v36 = vadd.f32 %v5262_v11, %v6934_v48 }
0x3f40   :  { %v5265_v20 = vsel %vm113_vm1, %v5263_v36, -inf }
0x3f41   :  { %5266 = vmax.xlane.f32.xlu2 %v5265_v20 }
0x3f43   :  { %6187 = vmatmul.msk.f32.vlgmr.msrb.gmra.mxu1 %vm113_vm1, %v5159_v18 }
0x3f45   :  { %v8179_v22 = vpop.f32.mrf.mxu0 }
0x3fac   :  { %v5109_v39 = vpop.xlane.xlu1 %5108 }
0x3fad   :  { %v5110_v38 = vsub.f32 %v5105_v30, %v5109_v39 }
0x3faf   :  { %v5111_v41 = vmul.f32 1.442695, %v5110_v38  ;;  %v6196_v38 = vld [vmem:[%s8541_s22 + $0x38] sm:$0xff] }
0x3fb1   :  { %6468 = vpow2.f32 %v5111_v41  ;;  %v6195_v41 = vld [vmem:[%s8541_s22 + $0x30] sm:$0xff] }
0x3fb4   :  { %v5267_v10 = vpop.xlane.xlu2 %5266 }
0x3fb5   :  { %v5268_v3 = vsub.f32 %v5263_v36, %v5267_v10  ;;  %v6194_v10 = vld [vmem:[%s8541_s22 + $0x28] sm:$0xff] }
0x3fb7   :  { %v6469_v42 = vpop.eup %6468  ;;  %v5269_v45 = vmul.f32 1.442695, %v5268_v3  ;;  %v6193_v3 = vld [vmem:[%s8541_s22 + $0x20] sm:$0xff]  ;;  %s6549_s22 = smov 128  }
0x3fb8   :  { %v8167_v46 = vpop.f32.mrf.mxu1  ;;  %v5113_v44 = vsel %vm113_vm1, %v6469_v42, 0.0 }
0x3fb9   :  { %6470 = vpow2.f32 %v5269_v45  ;;  %5114 = vadd.xlane.f32.xlu1 %v5113_v44  ;;  %v6178_v45 = vld [vmem:[%s8539_s11 + $0x38] sm:$0xff]  ;;  %v6177_v44 = vld [vmem:[%s8539_s11 + $0x30] sm:$0xff] }
0x3fba   :  { %5346 = vmatpush.msra.mxu1 %v6178_v45 }
0x3fbc   :  { %5347 = vmatpush.msra.mxu1 %v6177_v44 }
0x3fbf   :  { %v6471_v33 = vpop.eup %6470 }
0x3fc0   :  { %v5183_v32 = vpop.f32.mrf.mxu1  ;;  %v5271_v29 = vsel %vm113_vm1, %v6471_v33, 0.0 }
0x3fc1   :  { %v5184_v50 = vadd.f32 %v5183_v32, %v6934_v48  ;;  %5272 = vadd.xlane.f32.xlu2 %v5271_v29 }
0x3fc3   :  { %v5186_v14 = vsel %vm113_vm1, %v5184_v50, -inf }
0x3fc4   :  { %5187 = vmax.xlane.f32.xlu0 %v5186_v14  ;;  %v6175_v14 = vld [vmem:[%s8539_s11 + $0x20] sm:$0xff] }
0x3fd2   :  { %5132 = vrot.lane.b32.xlu1 %v8118_v62, %s8507_s5 }
0x3fd9   :  { %5290 = vrot.lane.b32.xlu2 %v8118_v62, %s8508_s25 }
0x402c   :  { %v5115_v57 = vpop.xlane.xlu1 %5114 }
0x402d   :  { %6472 = vrcp.f32 %v5115_v57  ;;  %v5127_v2 = vand.u32 2147483648, %v5115_v57  ;;  %vm5121_vm7 = vweird.f32 %v5115_v57  ;;  %v5125_v13 = vand.u32 2147483647, %v5115_v57 }
0x402f   :  { %v5128_v6 = vor.u32 1.1754944e-38, %v5127_v2  ;;  %vm5126_vm9 = vcmp.eq.f32.partialorder %v5125_v13, 8.507059e+37 }
0x4033   :  { %v6473_v54 = vpop.eup %6472 }
0x4034   :  { %v5117_v52 = vmul.f32 %v6473_v54, %v5115_v57  ;;  %v5273_v55 = vpop.xlane.xlu2 %5272  ;;  %vm5122_vm6 = vweird.f32 %v6473_v54 }
0x4035   :  { %6474 = vrcp.f32 %v5273_v55  ;;  %vm5123_vm8 = vmor %vm5121_vm7, %vm5122_vm6  ;;  %v5285_v21 = vand.u32 2147483648, %v5273_v55  ;;  %vm5279_vm12 = vweird.f32 %v5273_v55  ;;  %v5283_v15 = vand.u32 2147483647, %v5273_v55 }
0x4036   :  { %v5118_v58 = vsub.f32 1.0, %v5117_v52 }
0x4037   :  { %v5188_v61 = vpop.xlane.xlu0 %5187  ;;  %v5286_v23 = vor.u32 1.1754944e-38, %v5285_v21  ;;  %vm5284_vm14 = vcmp.eq.f32.partialorder %v5283_v15, 8.507059e+37 }
0x4038   :  { %v5119_v47 = vmul.f32 %v6473_v54, %v5118_v58  ;;  %v5189_v48 = vsub.f32 %v5184_v50, %v5188_v61 }
0x403a   :  { %v5120_v51 = vadd.f32 %v6473_v54, %v5119_v47  ;;  %v5190_v63 = vmul.f32 1.442695, %v5189_v48 }
0x403b   :  { %v6475_v56 = vpop.eup %6474 }
0x403c   :  { %v5275_v43 = vmul.f32 %v6475_v56, %v5273_v55  ;;  %6476 = vpow2.f32 %v5190_v63  ;;  %v5124_v24 = vsel %vm5123_vm8, %v6473_v54, %v5120_v51  ;;  %vm5280_vm11 = vweird.f32 %v6475_v56  ;;  %v5291_v19 = vpop.permute.xlu2 %5290 }
0x403d   :  { %v5129_v9 = vsel %vm5126_vm9, %v5128_v6, %v5124_v24  ;;  %vm5281_vm13 = vmor %vm5279_vm12, %vm5280_vm11 }
0x403e   :  { %v5276_v5 = vsub.f32 1.0, %v5275_v43  ;;  %v5131_v12 = vmul.f32 %v6469_v42, %v5129_v9  ;;  %v8235_v9 = vld [vmem:[%s8542_s27 + $0x4] sm:$0x7] }
0x4040   :  { %v5277_v8 = vmul.f32 %v6475_v56, %v5276_v5 }
0x4042   :  { %v6477_v37 = vpop.eup %6476  ;;  %v5278_v0 = vadd.f32 %v6475_v56, %v5277_v8 }
0x4043   :  { %v5192_v49 = vsel %vm113_vm1, %v6477_v37, 0.0 }
0x4044   :  { %5193 = vadd.xlane.f32.xlu0 %v5192_v49  ;;  %v5133_v17 = vpop.permute.xlu1 %5132  ;;  %v5282_v40 = vsel %vm5281_vm13, %v6475_v56, %v5278_v0  ;;  %v8240_v0 = vld [vmem:[%s8549_s2 + $0x4] sm:$0x7]  ;;  %v5377_v49 = vperm.slane %v8235_v9, 0 }
0x4045   :  { %5153 = vmatpush.msrb.mxu2 %v5133_v17  ;;  %v5287_v1 = vsel %vm5284_vm14, %v5286_v23, %v5282_v40  ;;  %v5379_v15 = vperm.slane %v8240_v0, 0 }
0x4046   :  { %6185 = vmatmul.msk.f32.vlgmr.msrb.gmra.mxu2 %vm113_vm1, %v5131_v12  ;;  %v5289_v25 = vmul.f32 %v6471_v33, %v5287_v1  ;;  %v6176_v33 = vld [vmem:[%s8539_s11 + $0x28] sm:$0xff] }
0x4047   :  { %5311 = vmatpush.msra.mxu2 %v5291_v19  ;;  %5348 = vmatpush.msra.mxu1 %v6176_v33 }
0x4049   :  { %6207 = vmatpush.xpose.msk.msrb.mxu2 %vm113_vm1, %v8179_v22  ;;  %5349 = vmatpush.msra.mxu1 %v6175_v14 }
0x404e   :  { %6191 = vmatmul.msk.f32.vlgmr.msra.gmra.mxu2 %vm113_vm1, %v5289_v25 }
0x4058   :  { %5211 = vrot.lane.b32.xlu0 %v8118_v62, %s8537_s12 }
0x40b7   :  { %v5194_v26 = vpop.xlane.xlu0 %5193 }
0x40b8   :  { %6478 = vrcp.f32 %v5194_v26  ;;  %v5206_v30 = vand.u32 2147483648, %v5194_v26  ;;  %v5204_v31 = vand.u32 2147483647, %v5194_v26  ;;  %vm5200_vm2 = vweird.f32 %v5194_v26 }
0x40ba   :  { %v5207_v35 = vor.u32 1.1754944e-38, %v5206_v30  ;;  %vm5205_vm6 = vcmp.eq.f32.partialorder %v5204_v31, 8.507059e+37 }
0x40be   :  { %v6479_v4 = vpop.eup %6478 }
0x40bf   :  { %v5196_v28 = vmul.f32 %v6479_v4, %v5194_v26  ;;  %vm5201_vm15 = vweird.f32 %v6479_v4 }
0x40c0   :  { %vm5202_vm3 = vmor %vm5200_vm2, %vm5201_vm15 }
0x40c1   :  { %v5197_v7 = vsub.f32 1.0, %v5196_v28 }
0x40c3   :  { %v5198_v27 = vmul.f32 %v6479_v4, %v5197_v7 }
0x40c5   :  { %v5199_v34 = vadd.f32 %v6479_v4, %v5198_v27 }
0x40c7   :  { %v5203_v11 = vsel %vm5202_vm3, %v6479_v4, %v5199_v34 }
0x40c8   :  { %v5208_v36 = vsel %vm5205_vm6, %v5207_v35, %v5203_v11 }
0x40c9   :  { %v5210_v20 = vmul.f32 %v6477_v37, %v5208_v36  ;;  %v5155_v18 = vpop.f32.mrf.mxu2 }
0x40ca   :  { %v5212_v39 = vpop.permute.xlu0 %5211  ;;  %5317 = vrot.lane.b32.xlu1 %v5155_v18, %s8511_s14 }
0x40cb   :  { %5232 = vmatpush.msrb.mxu3 %v5212_v39 }
0x40cc   :  { %6188 = vmatmul.msk.f32.vlgmr.msrb.gmra.mxu3 %vm113_vm1, %v5210_v20 }
0x40cd   :  { %5408 = vmatpush.msra.mxu3 %v6196_v38 }
0x40cf   :  { %5409 = vmatpush.msra.mxu3 %v6195_v41 }
0x40d1   :  { %v5313_v62 = vpop.f32.mrf.mxu2  ;;  %5410 = vmatpush.msra.mxu3 %v6194_v10 }
0x40d2   :  { %5325 = vrot.lane.b32.xlu2 %v5313_v62, %s8512_s15 }
0x40d3   :  { %5411 = vmatpush.msra.mxu3 %v6193_v3 }
0x40da   :  { %5515 = vrot.lane.b32.xlu2 %v8179_v22, %s8501_s28 }
0x40e2   :  { %5594 = vrot.lane.b32.xlu2 %v8179_v22, %s8506_s30 }
0x40ea   :  { %5673 = vrot.lane.b32.xlu2 %v8179_v22, %s8505_s24 }
0x412c   :  { %v5326_v42 = vpop.permute.xlu2 %5325 }
0x4134   :  { %v5516_v32 = vpop.permute.xlu2 %5515 }
0x4135   :  { %6210 = vmatpush.xpose.msk.msrb.mxu3 %vm113_vm1, %v5516_v32 }
0x413c   :  { %v5595_v29 = vpop.permute.xlu2 %5594  ;;  %v5318_v57 = vpop.permute.xlu1 %5317 }
0x413d   :  { %6213 = vmatpush.xpose.msk.msra.mxu2 %vm113_vm1, %v5595_v29  ;;  %v5328_v54 = vsel %vm113_vm1, %v8167_v46, %v5318_v57 }
0x4144   :  { %v5674_v23 = vpop.permute.xlu2 %5673 }
0x414f   :  { %v5234_v50 = vpop.f32.mrf.mxu3 }
0x4150   :  { %5321 = vrot.lane.b32.xlu0 %v5234_v50, %s8513_s26 }
0x41c2   :  { %v5322_v52 = vpop.permute.xlu0 %5321 }
0x41c3   :  { %v5329_v55 = vsel %vm439_vm4, %v5328_v54, %v5322_v52 }
0x41c4   :  { %v5330_v58 = vsel %vm441_vm5, %v5329_v55, %v5326_v42 }
0x41c5   :  { %6192 = vmatmul.msk.f32.vlgmr.msra.gmra.mxu1 %vm86_vm0, %v5330_v58 }
0x4242   :  { %v5351_v61 = vpop.f32.mrf.mxu1 }
0x4243   :  { %v5354_v47 = vadd.f32 %v5351_v61, %v8114_v59 }
0x4245   :  { %v5355_v48 = vsel %vm86_vm0, %v5354_v47, 0.0 }
0x4246   :  { %5356 = vadd.xlane.f32.xlu1 %v5355_v48 }
0x42b9   :  { %v5357_v51 = vpop.xlane.xlu1 %5356 }
0x42ba   :  { %v5358_v63 = vmul.f32 %v5357_v51, %v6764_v53 }
0x42bc   :  { %v5359_v56 = vsub.f32 %v5354_v47, %v5358_v63 }
0x42be   :  { %v5360_v2 = vmul.f32 %v5359_v56, %v5359_v56 }
0x42c0   :  { %v5361_v46 = vsel %vm86_vm0, %v5360_v2, 0.0 }
0x42c1   :  { %5362 = vadd.xlane.f32.xlu0 %v5361_v46 }
0x4334   :  { %v5363_v13 = vpop.xlane.xlu0 %5362 }
0x4335   :  { %v5364_v43 = vmul.f32 %v5363_v13, %v6764_v53 }
0x4337   :  { %v5365_v24 = vadd.f32 1e-05, %v5364_v43 }
0x4339   :  { %6480 = vrsqrt.f32 %v5365_v24  ;;  %vm5372_vm8 = vweird.f32 %v5365_v24 }
0x433f   :  { %v6481_v5 = vpop.eup %6480 }
0x4340   :  { %v5367_v6 = vmul.f32 %v6481_v5, %v5365_v24  ;;  %vm5373_vm7 = vweird.f32 %v6481_v5 }
0x4341   :  { %vm5374_vm9 = vmor %vm5372_vm8, %vm5373_vm7 }
0x4342   :  { %v5368_v8 = vmul.f32 %v6481_v5, %v5367_v6 }
0x4344   :  { %v5369_v59 = vmul.f32 0.5, %v5368_v8 }
0x4346   :  { %v5370_v37 = vsub.f32 1.5, %v5369_v59 }
0x4348   :  { %v5371_v21 = vmul.f32 %v6481_v5, %v5370_v37 }
0x434a   :  { %v5375_v12 = vsel %vm5374_vm9, %v6481_v5, %v5371_v21  ;;  %v6261_v5 = vld [vmem:[%s8548_s21 + $0x1] ss:$0 sm:$0xff] }
0x434b   :  { %v5376_v17 = vmul.f32 %v5375_v12, %v5359_v56  ;;  %v2978_v6 = vadd.f32 %v6261_v5, %v7594_v16 }
0x434d   :  { %v5378_v40 = vmul.f32 %v5377_v49, %v5376_v17  ;;  %v8284_v8 = vadd.f32 %v2978_v6, %v7553_v60 }
0x434f   :  { %v8244_v19 = vadd.f32 %v5379_v15, %v5378_v40  ;;  %v2981_v59 = vsel %vm86_vm0, %v8284_v8, 0.0 }
0x4351   :  { %6205 = vmatmul.msk.f32.vlgmr.msra.gmra.mxu3 %vm86_vm0, %v8244_v19 }
0x4352   :  { %6216 = vmatpush.xpose.msk.msra.mxu3 %vm113_vm1, %v5674_v23 }
0x43d4   :  { %v5413_v1 = vpop.f32.mrf.mxu3 }
0x43d5   :  { %5671 = vrot.lane.b32.xlu1 %v5413_v1, %s8505_s24  ;;  %5513 = vrot.lane.b32.xlu2 %v5413_v1, %s8501_s28 }
0x43d6   :  { %6208 = vmatmul.msk.f32.vlgmr.msrb.gmra.mxu2 %vm113_vm1, %v5413_v1 }
0x43dd   :  { %5592 = vrot.lane.b32.xlu2 %v5413_v1, %s8506_s30 }
0x442f   :  { %v5514_v25 = vpop.permute.xlu2 %5513 }
0x4430   :  { %6211 = vmatmul.msk.f32.vlgmr.msrb.gmra.mxu3 %vm113_vm1, %v5514_v25 }
0x4437   :  { %v5593_v26 = vpop.permute.xlu2 %5592 }
0x4438   :  { %6214 = vmatmul.msk.f32.vlgmr.msra.gmra.mxu2 %vm113_vm1, %v5593_v26 }
0x4447   :  { %v5672_v4 = vpop.permute.xlu1 %5671 }
0x4448   :  { %6217 = vmatmul.msk.f32.vlgmr.msra.gmra.mxu3 %vm113_vm1, %v5672_v4 }
0x4459   :  { %v5459_v28 = vpop.f32.mrf.mxu2 }
0x445a   :  { %v5462_v7 = vsel %vm113_vm1, %v5459_v28, -inf }
0x445b   :  { %5463 = vmax.xlane.f32.xlu0 %v5462_v7 }
0x44b3   :  { %v5538_v30 = vpop.f32.mrf.mxu3 }
0x44b4   :  { %v5541_v27 = vsel %vm113_vm1, %v5538_v30, -inf }
0x44b5   :  { %5542 = vmax.xlane.f32.xlu2 %v5541_v27 }
0x44bb   :  { %v5617_v31 = vpop.f32.mrf.mxu2 }
0x44bc   :  { %v5620_v34 = vsel %vm113_vm1, %v5617_v31, -inf }
0x44bd   :  { %5621 = vmax.xlane.f32.xlu0 %v5620_v34 }
0x44cb   :  { %v5696_v35 = vpop.f32.mrf.mxu3 }
0x44cc   :  { %v5699_v11 = vsel %vm113_vm1, %v5696_v35, -inf }
0x44cd   :  { %5487 = vrot.lane.b32.xlu2 %v8179_v22, %s8500_s3  ;;  %5700 = vmax.xlane.f32.xlu0 %v5699_v11 }
0x44ce   :  { %v5464_v36 = vpop.xlane.xlu0 %5463 }
0x44cf   :  { %v5465_v20 = vsub.f32 %v5459_v28, %v5464_v36 }
0x44d1   :  { %v5466_v18 = vmul.f32 1.442695, %v5465_v20 }
0x44d3   :  { %6482 = vpow2.f32 %v5466_v18 }
0x44d5   :  { %5724 = vrot.lane.b32.xlu2 %v8179_v22, %s8502_s4 }
0x44d9   :  { %v6483_v39 = vpop.eup %6482 }
0x44da   :  { %v5468_v62 = vsel %vm113_vm1, %v6483_v39, 0.0 }
0x44db   :  { %5469 = vadd.xlane.f32.xlu0 %v5468_v62 }
0x4528   :  { %v5543_v38 = vpop.xlane.xlu2 %5542 }
0x4529   :  { %v5544_v41 = vsub.f32 %v5538_v30, %v5543_v38 }
0x452b   :  { %v5545_v10 = vmul.f32 1.442695, %v5544_v41 }
0x452d   :  { %6484 = vpow2.f32 %v5545_v10 }
0x4530   :  { %v5622_v3 = vpop.xlane.xlu0 %5621  ;;  %v5488_v42 = vpop.permute.xlu2 %5487 }
0x4531   :  { %v5623_v45 = vsub.f32 %v5617_v31, %v5622_v3  ;;  %5508 = vmatpush.msrb.mxu1 %v5488_v42 }
0x4533   :  { %v8265_v44 = vpop.eup %6484  ;;  %v5624_v33 = vmul.f32 1.442695, %v5623_v45 }
0x4534   :  { %v5547_v32 = vsel %vm113_vm1, %v8265_v44, 0.0 }
0x4535   :  { %6486 = vpow2.f32 %v5624_v33  ;;  %5548 = vadd.xlane.f32.xlu1 %v5547_v32 }
0x4538   :  { %v5725_v33 = vpop.permute.xlu2 %5724 }
0x453b   :  { %v6487_v29 = vpop.eup %6486 }
0x453c   :  { %v5626_v50 = vsel %vm113_vm1, %v6487_v29, 0.0 }
0x453d   :  { %5627 = vadd.xlane.f32.xlu0 %v5626_v50 }
0x4540   :  { %v5701_v14 = vpop.xlane.xlu0 %5700 }
0x4541   :  { %v5702_v57 = vsub.f32 %v5696_v35, %v5701_v14 }
0x4543   :  { %v5703_v54 = vmul.f32 1.442695, %v5702_v57 }
0x4545   :  { %6488 = vpow2.f32 %v5703_v54 }
0x454b   :  { %v8270_v52 = vpop.eup %6488 }
0x454c   :  { %v5705_v55 = vsel %vm113_vm1, %v8270_v52, 0.0 }
0x454d   :  { %5706 = vadd.xlane.f32.xlu0 %v5705_v55 }
0x454e   :  { %v5470_v58 = vpop.xlane.xlu0 %5469  ;;  %5645 = vrot.lane.b32.xlu1 %v8179_v22, %s8504_s1  ;;  %s8550_s1 = sld [smem:[#allocation18_spill]] }
0x454f   :  { %6490 = vrcp.f32 %v5470_v58  ;;  %v5482_v51 = vand.u32 2147483648, %v5470_v58  ;;  %v5480_v56 = vand.u32 2147483647, %v5470_v58  ;;  %vm5476_vm12 = vweird.f32 %v5470_v58 }
0x4551   :  { %v5483_v46 = vor.u32 1.1754944e-38, %v5482_v51  ;;  %vm5481_vm14 = vcmp.eq.f32.partialorder %v5480_v56, 8.507059e+37 }
0x4555   :  { %v6491_v61 = vpop.eup %6490 }
0x4556   :  { %v5472_v47 = vmul.f32 %v6491_v61, %v5470_v58  ;;  %vm5477_vm11 = vweird.f32 %v6491_v61  ;;  %v6204_v58 = vld [vmem:[%s8550_s1 + $0x38] sm:$0xff] }
0x4557   :  { %vm5478_vm13 = vmor %vm5476_vm12, %vm5477_vm11  ;;  %5780 = vmatpush.msrb.mxu2 %v6204_v58 }
0x4558   :  { %v5473_v48 = vsub.f32 1.0, %v5472_v47  ;;  %v6201_v47 = vld [vmem:[%s8550_s1 + $0x20] sm:$0xff] }
0x455a   :  { %v5474_v63 = vmul.f32 %v6491_v61, %v5473_v48 }
0x455c   :  { %v5475_v2 = vadd.f32 %v6491_v61, %v5474_v63 }
0x455e   :  { %v5479_v13 = vsel %vm5478_vm13, %v6491_v61, %v5475_v2  ;;  %v6202_v61 = vld [vmem:[%s8550_s1 + $0x28] sm:$0xff] }
0x455f   :  { %v5484_v43 = vsel %vm5481_vm14, %v5483_v46, %v5479_v13 }
0x4560   :  { %v5486_v24 = vmul.f32 %v6483_v39, %v5484_v43 }
0x4561   :  { %5566 = vrot.lane.b32.xlu0 %v8179_v22, %s8503_s29 }
0x4562   :  { %6209 = vmatmul.msk.f32.vlgmr.msrb.gmra.mxu1 %vm113_vm1, %v5486_v24 }
0x4578   :  { %2982 = vadd.xlane.f32.xlu1 %v2981_v59 }
0x45a8   :  { %v5549_v21 = vpop.xlane.xlu1 %5548 }
0x45a9   :  { %v5561_v11 = vand.u32 2147483648, %v5549_v21  ;;  %vm5555_vm8 = vweird.f32 %v5549_v21  ;;  %v5559_v20 = vand.u32 2147483647, %v5549_v21 }
0x45ab   :  { %v5562_v62 = vor.u32 1.1754944e-38, %v5561_v11  ;;  %vm5560_vm11 = vcmp.eq.f32.partialorder %v5559_v20, 8.507059e+37  ;;  %v6223_v11 = vld [vmem:[%s8545_s19 + $0x38] sm:$0xff]  ;;  %v6221_v20 = vld [vmem:[%s8545_s19 + $0x28] sm:$0xff] }
0x45b0   :  { %v5628_v37 = vpop.xlane.xlu0 %5627 }
0x45b1   :  { %6492 = vrcp.f32 %v5628_v37  ;;  %v5640_v17 = vand.u32 2147483648, %v5628_v37  ;;  %v5638_v23 = vand.u32 2147483647, %v5628_v37  ;;  %vm5634_vm2 = vweird.f32 %v5628_v37 }
0x45b2   :  { %6494 = vrcp.f32 %v5549_v21 }
0x45b3   :  { %v5641_v60 = vor.u32 1.1754944e-38, %v5640_v17  ;;  %vm5639_vm6 = vcmp.eq.f32.partialorder %v5638_v23, 8.507059e+37 }
0x45b7   :  { %v6493_v22 = vpop.eup %6492 }
0x45b8   :  { %v5630_v49 = vmul.f32 %v6493_v22, %v5628_v37  ;;  %v6495_v12 = vpop.eup %6494  ;;  %vm5635_vm15 = vweird.f32 %v6493_v22 }
0x45b9   :  { %v5551_v16 = vmul.f32 %v6495_v12, %v5549_v21  ;;  %vm5636_vm3 = vmor %vm5634_vm2, %vm5635_vm15  ;;  %vm5556_vm7 = vweird.f32 %v6495_v12 }
0x45ba   :  { %v5631_v15 = vsub.f32 1.0, %v5630_v49  ;;  %vm5557_vm9 = vmor %vm5555_vm8, %vm5556_vm7 }
0x45bb   :  { %v5552_v28 = vsub.f32 1.0, %v5551_v16 }
0x45bc   :  { %v5632_v40 = vmul.f32 %v6493_v22, %v5631_v15 }
0x45bd   :  { %v5553_v27 = vmul.f32 %v6495_v12, %v5552_v28 }
0x45be   :  { %v5633_v1 = vadd.f32 %v6493_v22, %v5632_v40 }
0x45bf   :  { %v5554_v35 = vadd.f32 %v6495_v12, %v5553_v27  ;;  %v6505_v27 = vld [vmem:[%s8549_s2 + $0x4] sm:$0x7] }
0x45c0   :  { %v5637_v25 = vsel %vm5636_vm3, %v6493_v22, %v5633_v1  ;;  %v5707_v26 = vpop.xlane.xlu0 %5706  ;;  %v5646_v4 = vpop.permute.xlu1 %5645 }
0x45c1   :  { %v5642_v7 = vsel %vm5639_vm6, %v5641_v60, %v5637_v25  ;;  %6496 = vrcp.f32 %v5707_v26  ;;  %5666 = vmatpush.msra.mxu1 %v5646_v4  ;;  %v5558_v18 = vsel %vm5557_vm9, %v6495_v12, %v5554_v35  ;;  %v5719_v10 = vand.u32 2147483648, %v5707_v26  ;;  %v6504_v4 = vld [vmem:[%s8542_s27 + $0x4] sm:$0x7]  ;;  %s5914_s27 = sshll.u32 %s6548_s23, 4  ;;  %s5915_s27 = int_to_ptr.vmem [resolvable:$true] %s5914_s27 }
0x45c2   :  { %v5644_v30 = vmul.f32 %v6487_v29, %v5642_v7  ;;  %v5563_v38 = vsel %vm5560_vm11, %v5562_v62, %v5558_v18  ;;  %vm5713_vm13 = vweird.f32 %v5707_v26  ;;  %v5717_v42 = vand.u32 2147483647, %v5707_v26  ;;  %v6220_v18 = vld [vmem:[%s8545_s19 + $0x20] sm:$0xff]  ;;  %v6231_v62 = vld [vmem:[%s8546_s0 + $0x70] sm:$0xff] }
0x45c3   :  { %v5565_v3 = vmul.f32 %v8265_v44, %v5563_v38  ;;  %v5720_v29 = vor.u32 1.1754944e-38, %v5719_v10  ;;  %v3003_v28 = vperm.slane %v6504_v4, 2  ;;  %5847 = vmatpush.msrb.mxu1 %v6223_v11  ;;  %v6230_v38 = vld [vmem:[%s8546_s0 + $0x68] sm:$0xff]  ;;  %v5907_v4 = vperm.slane %v8240_v0, 2 }
0x45c4   :  { %6215 = vmatmul.msk.f32.vlgmr.msra.gmra.mxu1 %vm113_vm1, %v5644_v30  ;;  %vm5718_vm15 = vcmp.eq.f32.partialorder %v5717_v42, 8.507059e+37 }
0x45c7   :  { %v6497_v31 = vpop.eup %6496 }
0x45c8   :  { %v5709_v34 = vmul.f32 %v6497_v31, %v5707_v26  ;;  %vm5714_vm12 = vweird.f32 %v6497_v31 }
0x45c9   :  { %vm5715_vm14 = vmor %vm5713_vm13, %vm5714_vm12 }
0x45ca   :  { %v5710_v36 = vsub.f32 1.0, %v5709_v34 }
0x45cc   :  { %v5711_v39 = vmul.f32 %v6497_v31, %v5710_v36  ;;  %v6222_v36 = vld [vmem:[%s8545_s19 + $0x30] sm:$0xff] }
0x45cd   :  { %5848 = vmatpush.msrb.mxu1 %v6222_v36 }
0x45ce   :  { %v5712_v41 = vadd.f32 %v6497_v31, %v5711_v39  ;;  %v6232_v39 = vld [vmem:[%s8546_s0 + $0x78] sm:$0xff] }
0x45cf   :  { %5849 = vmatpush.msrb.mxu1 %v6221_v20  ;;  %5870 = vmatpush.msrb.mxu3 %v6232_v39 }
0x45d0   :  { %v5716_v32 = vsel %vm5715_vm14, %v6497_v31, %v5712_v41  ;;  %v3005_v31 = vperm.slane %v6505_v27, 2 }
0x45d1   :  { %v5721_v50 = vsel %vm5718_vm15, %v5720_v29, %v5716_v32  ;;  %5850 = vmatpush.msrb.mxu1 %v6220_v18  ;;  %5871 = vmatpush.msrb.mxu3 %v6231_v62 }
0x45d2   :  { %v5723_v14 = vmul.f32 %v8270_v52, %v5721_v50  ;;  %v6203_v52 = vld [vmem:[%s8550_s1 + $0x30] sm:$0xff] }
0x45d3   :  { %v5567_v45 = vpop.permute.xlu0 %5566  ;;  %5781 = vmatpush.msrb.mxu2 %v6203_v52  ;;  %5872 = vmatpush.msrb.mxu3 %v6230_v38 }
0x45d4   :  { %5587 = vmatpush.msra.mxu0 %v5567_v45  ;;  %v6228_v45 = vld [vmem:[%s8546_s0 + $0x58] sm:$0xff] }
0x45d5   :  { %6212 = vmatmul.msk.f32.vlgmr.msra.gmra.mxu0 %vm113_vm1, %v5565_v3  ;;  %5782 = vmatpush.msrb.mxu2 %v6202_v61  ;;  %v6229_v3 = vld [vmem:[%s8546_s0 + $0x60] sm:$0xff] }
0x45d6   :  { %5745 = vmatpush.msrb.mxu0 %v5725_v33  ;;  %5873 = vmatpush.msrb.mxu3 %v6229_v3 }
0x45d7   :  { %5783 = vmatpush.msrb.mxu2 %v6201_v47  ;;  %v6227_v47 = vld [vmem:[%s8546_s0 + $0x50] sm:$0xff] }
0x45d8   :  { %5874 = vmatpush.msrb.mxu3 %v6228_v45 }
0x45da   :  { %5875 = vmatpush.msrb.mxu3 %v6227_v47 }
0x45dd   :  { %6218 = vmatmul.msk.f32.vlgmr.msrb.gmra.mxu0 %vm113_vm1, %v5723_v14 }
0x45df   :  { %v5510_v57 = vpop.f32.mrf.mxu1 }
0x45eb   :  { %v2983_v13 = vpop.xlane.xlu1 %2982 }
0x45ec   :  { %v2984_v43 = vmul.f32 %v2983_v13, %v6764_v53  ;;  %v6269_v13 = vld [vmem:[%s8548_s21 + $0x1] ss:$0 sm:$0xff]  ;;  %s8551_s21 = sld [smem:[#allocation25_spill]] }
0x45ee   :  { %v2985_v6 = vsub.f32 %v8284_v8, %v2984_v43 }
0x45f0   :  { %v2986_v37 = vmul.f32 %v2985_v6, %v2985_v6 }
0x45f2   :  { %v2987_v21 = vsel %vm86_vm0, %v2986_v37, 0.0  ;;  %s5916_s18 = sshll.u32 %s8551_s21, 4  ;;  %s5917_s18 = int_to_ptr.hbm [resolvable:$true] %s5916_s18 }
0x4641   :  { %v5668_v54 = vpop.f32.mrf.mxu1 }
0x4642   :  { %5755 = vrot.lane.b32.xlu2 %v5668_v54, %s8513_s26  ;;  %v5811_v54 = vperm.slane %v8235_v9, 1 }
0x4652   :  { %v5589_v44 = vpop.f32.mrf.mxu0 }
0x4653   :  { %5751 = vrot.lane.b32.xlu0 %v5589_v44, %s8511_s14 }
0x465a   :  { %v5747_v55 = vpop.f32.mrf.mxu0 }
0x465b   :  { %5759 = vrot.lane.b32.xlu0 %v5747_v55, %s8512_s15  ;;  %v5813_v55 = vperm.slane %v8240_v0, 1 }
0x469c   :  { %v5756_v63 = vpop.permute.xlu2 %5755 }
0x46c5   :  { %v5752_v48 = vpop.permute.xlu0 %5751 }
0x46c6   :  { %v5762_v51 = vsel %vm113_vm1, %v5510_v57, %v5752_v48  ;;  %v6226_v48 = vld [vmem:[%s8546_s0 + $0x48] sm:$0xff] }
0x46c7   :  { %v5763_v2 = vsel %vm439_vm4, %v5762_v51, %v5756_v63  ;;  %v6225_v51 = vld [vmem:[%s8546_s0 + $0x40] sm:$0xff]  ;;  %5876 = vmatpush.msrb.mxu3 %v6226_v48 }
0x46c8   :  { %v6268_v63 = vld [vmem:[%s8547_s7 + $0x1] ss:$0 sm:$0xff] }
0x46c9   :  { %5877 = vmatpush.msrb.mxu3 %v6225_v51 }
0x46cd   :  { %v5760_v56 = vpop.permute.xlu0 %5759 }
0x46ce   :  { %v5764_v46 = vsel %vm441_vm5, %v5763_v2, %v5760_v56 }
0x46cf   :  { %6219 = vmatmul.msk.f32.vlgmr.msrb.gmra.mxu2 %vm86_vm0, %v5764_v46 }
0x4752   :  { %v5785_v24 = vpop.f32.mrf.mxu2 }
0x4753   :  { %v5788_v5 = vadd.f32 %v5785_v24, %v8244_v19 }
0x4755   :  { %v5789_v59 = vsel %vm86_vm0, %v5788_v5, 0.0 }
0x4756   :  { %5790 = vadd.xlane.f32.xlu2 %v5789_v59 }
0x475e   :  { %2988 = vadd.xlane.f32.xlu2 %v2987_v21 }
0x47c9   :  { %v5791_v22 = vpop.xlane.xlu2 %5790 }
0x47ca   :  { %v5792_v49 = vmul.f32 %v5791_v22, %v6764_v53 }
0x47cc   :  { %v5793_v12 = vsub.f32 %v5788_v5, %v5792_v49 }
0x47ce   :  { %v5794_v15 = vmul.f32 %v5793_v12, %v5793_v12 }
0x47d0   :  { %v5795_v17 = vsel %vm86_vm0, %v5794_v15, 0.0 }
0x47d1   :  { %5796 = vadd.xlane.f32.xlu0 %v5795_v17  ;;  %v2989_v40 = vpop.xlane.xlu2 %2988 }
0x47d2   :  { %v2990_v19 = vmul.f32 %v2989_v40, %v6764_v53 }
0x47d4   :  { %v2991_v23 = vadd.f32 1e-05, %v2990_v19 }
0x47d6   :  { %6498 = vrsqrt.f32 %v2991_v23  ;;  %vm2998_vm4 = vweird.f32 %v2991_v23 }
0x47dc   :  { %v6499_v8 = vpop.eup %6498 }
0x47dd   :  { %v2993_v16 = vmul.f32 %v6499_v8, %v2991_v23  ;;  %vm2999_vm1 = vweird.f32 %v6499_v8 }
0x47de   :  { %vm3000_vm5 = vmor %vm2998_vm4, %vm2999_vm1 }
0x47df   :  { %v2994_v1 = vmul.f32 %v6499_v8, %v2993_v16 }
0x47e1   :  { %v2995_v60 = vmul.f32 0.5, %v2994_v1 }
0x47e3   :  { %v2996_v25 = vsub.f32 1.5, %v2995_v60  ;;  %v5905_v60 = vperm.slane %v8235_v9, 2 }
0x47e5   :  { %v2997_v26 = vmul.f32 %v6499_v8, %v2996_v25 }
0x47e7   :  { %v3001_v7 = vsel %vm3000_vm5, %v6499_v8, %v2997_v26 }
0x47e8   :  { %v3002_v30 = vmul.f32 %v3001_v7, %v2985_v6 }
0x47ea   :  { %v3004_v34 = vmul.f32 %v3003_v28, %v3002_v30 }
0x47ec   :  { %v3006_v35 = vadd.f32 %v3005_v31, %v3004_v34 }
0x47ee   :  { %3007 = vst.msk [vmem:[#allocation2] sm:$0xff] %vm86_vm0, %v3006_v35 }
0x4844   :  { %v5797_v41 = vpop.xlane.xlu0 %5796 }
0x4845   :  { %v5798_v10 = vmul.f32 %v5797_v41, %v6764_v53 }
0x4847   :  { %v5799_v42 = vadd.f32 1e-05, %v5798_v10 }
0x4849   :  { %6500 = vrsqrt.f32 %v5799_v42  ;;  %vm5806_vm3 = vweird.f32 %v5799_v42 }
0x484f   :  { %v6501_v33 = vpop.eup %6500 }
0x4850   :  { %v5801_v32 = vmul.f32 %v6501_v33, %v5799_v42  ;;  %vm5807_vm2 = vweird.f32 %v6501_v33 }
0x4851   :  { %vm5808_vm6 = vmor %vm5806_vm3, %vm5807_vm2 }
0x4852   :  { %v5802_v29 = vmul.f32 %v6501_v33, %v5801_v32 }
0x4854   :  { %v5803_v50 = vmul.f32 0.5, %v5802_v29 }
0x4856   :  { %v5804_v14 = vsub.f32 1.5, %v5803_v50 }
0x4858   :  { %v5805_v57 = vmul.f32 %v6501_v33, %v5804_v14 }
0x485a   :  { %v5809_v44 = vsel %vm5808_vm6, %v6501_v33, %v5805_v57 }
0x485b   :  { %v5810_v58 = vmul.f32 %v5809_v44, %v5793_v12 }
0x485d   :  { %v5812_v52 = vmul.f32 %v5811_v54, %v5810_v58 }
0x485f   :  { %v5814_v61 = vadd.f32 %v5813_v55, %v5812_v52 }
0x4861   :  { %6234 = vmatmul.msk.f32.vlgmr.msrb.gmra.mxu1 %vm86_vm0, %v5814_v61 }
0x48de   :  { %v5852_v56 = vpop.f32.mrf.mxu1 }
0x48df   :  { %v5853_v2 = vadd.f32 %v6268_v63, %v5852_v56 }
0x48e1   :  { %v5855_v46 = vmax.f32 %v5853_v2, 0.0 }
0x48e3   :  { %6235 = vmatmul.msk.f32.vlgmr.msrb.gmra.mxu3 %vm544_vm10, %v5855_v46 }
0x4966   :  { %v5879_v43 = vpop.f32.mrf.mxu3 }
0x4967   :  { %v5880_v24 = vadd.f32 %v6269_v13, %v5879_v43 }
0x4969   :  { %v5882_v5 = vadd.f32 %v5880_v24, %v5814_v61 }
0x496b   :  { %v5883_v6 = vsel %vm86_vm0, %v5882_v5, 0.0 }
0x496c   :  { %5884 = vadd.xlane.f32.xlu0 %v5883_v6 }
0x49df   :  { %v5885_v59 = vpop.xlane.xlu0 %5884 }
0x49e0   :  { %v5886_v37 = vmul.f32 %v5885_v59, %v6764_v53 }
0x49e2   :  { %v5887_v21 = vsub.f32 %v5882_v5, %v5886_v37 }
0x49e4   :  { %v5888_v22 = vmul.f32 %v5887_v21, %v5887_v21 }
0x49e6   :  { %v5889_v49 = vsel %vm86_vm0, %v5888_v22, 0.0 }
0x49e7   :  { %5890 = vadd.xlane.f32.xlu2 %v5889_v49 }
0x4a5a   :  { %v5891_v12 = vpop.xlane.xlu2 %5890 }
0x4a5b   :  { %v5892_v15 = vmul.f32 %v5891_v12, %v6764_v53 }
0x4a5d   :  { %v5893_v17 = vadd.f32 1e-05, %v5892_v15 }
0x4a5f   :  { %6502 = vrsqrt.f32 %v5893_v17  ;;  %vm5900_vm7 = vweird.f32 %v5893_v17 }
0x4a65   :  { %v6503_v40 = vpop.eup %6502 }
0x4a66   :  { %v5895_v19 = vmul.f32 %v6503_v40, %v5893_v17  ;;  %vm5901_vm10 = vweird.f32 %v6503_v40 }
0x4a67   :  { %vm5902_vm8 = vmor %vm5900_vm7, %vm5901_vm10 }
0x4a68   :  { %v5896_v23 = vmul.f32 %v6503_v40, %v5895_v19 }
0x4a6a   :  { %v5897_v8 = vmul.f32 0.5, %v5896_v23 }
0x4a6c   :  { %v5898_v16 = vsub.f32 1.5, %v5897_v8 }
0x4a6e   :  { %v5899_v1 = vmul.f32 %v6503_v40, %v5898_v16 }
0x4a70   :  { %v5903_v25 = vsel %vm5902_vm8, %v6503_v40, %v5899_v1 }
0x4a71   :  { %v5904_v26 = vmul.f32 %v5903_v25, %v5887_v21 }
0x4a73   :  { %v5906_v53 = vmul.f32 %v5905_v60, %v5904_v26 }
0x4a75   :  { %v5908_v28 = vadd.f32 %v5907_v4, %v5906_v53 }
0x4a77   :  { %5909 = vst.msk [vmem:[#allocation2 + $0x8] sm:$0xff] %vm86_vm0, %v5908_v28 }
0x4a78   :  { %5922 = dma.vmem_to_hbm [thread:$0]  %s5915_s27, 256, %s5917_s18, [#allocation3], %s6549_s22, %s6549_s22, %s8511_s14  }
0x4a79   :  { %6530 = dma.done.wait [#allocation3], 256  }
0x4a7a   :  { %6531 = vsyncadd [#allocation3], 4294967040 }
0x4a7b   :  { %5927 = vsyncpa [#allocation3], 1 }

</bundles_post_ra>
